<compile_context>
chip_gen: v6e
topology: v6e:2x2x1
jax: 0.10.0
libtpu: 0.0.40
codegen_flags: <defaults>
</compile_context>

<pallas_src>
import math

import jax
import jax.numpy as jnp
from jax import lax
from jax.experimental import pallas as pl
from jax.experimental.pallas import tpu as pltpu


# ----------------------------------------------------------------------------
# Geometry constants (the module hard-codes 28x28 inputs via flatten_dim).
# ----------------------------------------------------------------------------
K = 5                       # conv kernel size (5x5, padding 2 -> 'same')

H1 = 28                     # conv1 spatial size
WP1 = H1 + 4                # padded row stride, stage 1 (32)
XLEN1 = WP1 * WP1 + 8       # flattened padded stage-1 input length (1032);
                            # tail pad keeps every in-kernel tap window in bounds.
PO1 = H1 // 2               # pool1 output spatial size (14)
C1 = 16                     # conv1_width

H2 = 14                     # conv2 spatial size
WP2 = H2 + 4                # 18
XLEN2 = WP2 * WP2 + 4       # 328 (= stage-1 output length, already conv2-padded)
PO2 = H2 // 2               # 7
C2 = 32                     # conv2_width

FLAT = C2 * PO2 * PO2       # 1568
FC1 = 512
NCLS = 10

_VMEM_LIMIT = 32 * 1024 * 1024


# ----------------------------------------------------------------------------
# Kernels
# ----------------------------------------------------------------------------
def _conv1_pool_kernel(x_ref, w_ref, b_ref, o_ref):
    """conv1 (5x5, pad 2, Cin=1) + bias + 2x2/2 maxpool + ReLU for ONE image.

    x_ref: (1, XLEN1, 1)   zero-padded 32x32 image, row-flattened (row stride 32)
    w_ref: (25, 1, 16)     conv1 taps, tap-major (kh*5+kw)
    b_ref: (1, 16)
    o_ref: (1, XLEN2, 16)  pooled output, already laid out as conv2's zero-padded
                           18x18x16 input (row stride 18)
    """
    o_ref[...] = jnp.zeros_like(o_ref)          # zero border = conv2's padding
    w = w_ref[...]                              # (25, 1, 16)
    b = b_ref[...]                              # (1, 16)

    # 0/1 selectors compacting even / odd columns of a 32-wide conv row down to the
    # 14 pooled columns (tiny MXU matmuls; avoids strided lane gathers / reshapes).
    p_idx = lax.broadcasted_iota(jnp.int32, (PO1, WP1), 0)
    c_idx = lax.broadcasted_iota(jnp.int32, (PO1, WP1), 1)
    sel_e = (c_idx == 2 * p_idx).astype(jnp.float32)          # (14, 32)
    sel_o = (c_idx == 2 * p_idx + 1).astype(jnp.float32)      # (14, 32)

    def pool_row(pr, carry):
        base = pr * (2 * WP1)                   # flat offset of conv row 2*pr
        acc = jnp.zeros((2 * WP1, C1), jnp.float32)           # two conv rows (64, 16)
        # Fused im2col: 25 shifted VPU multiply-accumulates (Cin == 1, K-dim tiny so
        # the MXU would be idle anyway).  The 4 extra "wrap" columns per row are
        # garbage and never selected by sel_e / sel_o.
        for kh in range(K):
            for kw in range(K):
                xs = x_ref[0, pl.ds(base + kh * WP1 + kw, 2 * WP1), :]   # (64, 1)
                acc = acc + xs * w[kh * K + kw]                          # * (1, 16)
        # 2x2 max pool: row-pair max, then even/odd column compaction.
        m = jnp.maximum(acc[:WP1, :], acc[WP1:, :])                      # (32, 16)
        pooled = jnp.maximum(
            jnp.dot(sel_e, m, preferred_element_type=jnp.float32),
            jnp.dot(sel_o, m, preferred_element_type=jnp.float32))       # (14, 16)
        pooled = jnp.maximum(pooled + b, 0.0)                            # bias + ReLU
        # Place at rows (pr+2, cols 2..15) of conv2's padded 18x18 input.
        o_ref[0, pl.ds(pr * WP2 + 2 * WP2 + 2, PO1), :] = pooled
        return carry

    lax.fori_loop(0, PO1, pool_row, None)


def _conv2_pool_kernel(x_ref, w_ref, b_ref, o_ref):
    """conv2 (5x5, pad 2) + bias + 2x2/2 maxpool + ReLU for ONE image.

    x_ref: (1, XLEN2, 16)  zero-padded 18x18x16 input, row-flattened (stride 18)
    w_ref: (25, 16, 32)    conv2 taps, tap-major
    b_ref: (1, 32)
    o_ref: (1, 49, 32)     pooled 7x7x32, spatial-flattened (row = ph*7 + pw)
    """
    w = w_ref[...]
    b = b_ref[...]
    p_idx = lax.broadcasted_iota(jnp.int32, (PO2, WP2), 0)
    c_idx = lax.broadcasted_iota(jnp.int32, (PO2, WP2), 1)
    sel_e = (c_idx == 2 * p_idx).astype(jnp.float32)          # (7, 18)
    sel_o = (c_idx == 2 * p_idx + 1).astype(jnp.float32)      # (7, 18)

    def pool_row(pr, carry):
        base = pr * (2 * WP2)
        acc = jnp.zeros((2 * WP2, C2), jnp.float32)           # (36, 32)
        # Fused im2col: 25 shifted (36,16)@(16,32) MXU matmuls, f32 accumulation.
        for kh in range(K):
            for kw in range(K):
                xs = x_ref[0, pl.ds(base + kh * WP2 + kw, 2 * WP2), :]   # (36, 16)
                acc = acc + jnp.dot(xs, w[kh * K + kw],
                                    preferred_element_type=jnp.float32)
        m = jnp.maximum(acc[:WP2, :], acc[WP2:, :])                      # (18, 32)
        pooled = jnp.maximum(
            jnp.dot(sel_e, m, preferred_element_type=jnp.float32),
            jnp.dot(sel_o, m, preferred_element_type=jnp.float32))       # (7, 32)
        pooled = jnp.maximum(pooled + b, 0.0)                            # bias + ReLU
        o_ref[0, pl.ds(pr * PO2, PO2), :] = pooled
        return carry

    lax.fori_loop(0, PO2, pool_row, None)


def _fc_kernel(x_ref, w1_ref, b1_ref, w2_ref, b2_ref, o_ref):
    """fc1 + ReLU + fc_logits, fused.  bf16 MXU operands, f32 accumulation."""
    x = x_ref[...].astype(jnp.bfloat16)                                  # (TB, 1568)
    h = jnp.dot(x, w1_ref[...], preferred_element_type=jnp.float32)     # (TB, 512)
    h = jnp.maximum(h + b1_ref[...], 0.0)
    logits = jnp.dot(h.astype(jnp.bfloat16), w2_ref[...],
                     preferred_element_type=jnp.float32)                 # (TB, 10)
    o_ref[...] = logits + b2_ref[...]


# ----------------------------------------------------------------------------
# pallas_call wrappers
# ----------------------------------------------------------------------------
def _conv1_pool(xf, w1, b1):
    B = xf.shape[0]
    flops = int(B * (2 * K * K * H1 * H1 * C1 + 4 * PO1 * PO1 * C1))
    bytes_acc = int(B * (XLEN1 + XLEN2 * C1) * 4 + w1.size * 4)
    return pl.pallas_call(
        _conv1_pool_kernel,
        out_shape=jax.ShapeDtypeStruct((B, XLEN2, C1), jnp.float32),
        grid_spec=pltpu.PrefetchScalarGridSpec(
            num_scalar_prefetch=0,
            grid=(B,),
            in_specs=[
                pl.BlockSpec((1, XLEN1, 1), lambda b: (b, 0, 0)),
                pl.BlockSpec((K * K, 1, C1), lambda b: (0, 0, 0)),
                pl.BlockSpec((1, C1), lambda b: (0, 0)),
            ],
            out_specs=pl.BlockSpec((1, XLEN2, C1), lambda b: (b, 0, 0)),
        ),
        compiler_params=pltpu.CompilerParams(
            dimension_semantics=("parallel",),
            vmem_limit_bytes=_VMEM_LIMIT,
        ),
        cost_estimate=pl.CostEstimate(
            flops=flops, transcendentals=0, bytes_accessed=bytes_acc),
    )(xf, w1, b1)


def _conv2_pool(h1, w2, b2):
    B = h1.shape[0]
    flops = int(B * (2 * K * K * H2 * H2 * C1 * C2 + 4 * PO2 * PO2 * C2))
    bytes_acc = int(B * (XLEN2 * C1 + PO2 * PO2 * C2) * 4 + w2.size * 4)
    return pl.pallas_call(
        _conv2_pool_kernel,
        out_shape=jax.ShapeDtypeStruct((B, PO2 * PO2, C2), jnp.float32),
        grid_spec=pltpu.PrefetchScalarGridSpec(
            num_scalar_prefetch=0,
            grid=(B,),
            in_specs=[
                pl.BlockSpec((1, XLEN2, C1), lambda b: (b, 0, 0)),
                pl.BlockSpec((K * K, C1, C2), lambda b: (0, 0, 0)),
                pl.BlockSpec((1, C2), lambda b: (0, 0)),
            ],
            out_specs=pl.BlockSpec((1, PO2 * PO2, C2), lambda b: (b, 0, 0)),
        ),
        compiler_params=pltpu.CompilerParams(
            dimension_semantics=("parallel",),
            vmem_limit_bytes=_VMEM_LIMIT,
        ),
        cost_estimate=pl.CostEstimate(
            flops=flops, transcendentals=0, bytes_accessed=bytes_acc),
    )(h1, w2, b2)


def _fc_fused(x, w1, b1, w2, b2):
    B, Kdim = x.shape
    N1 = w1.shape[1]
    N2 = w2.shape[1]
    TB = 256 if B % 256 == 0 else B          # batch tile; demo batch -> single tile
    flops = int(B * 2 * (Kdim * N1 + N1 * N2))
    bytes_acc = int(B * (Kdim + N2) * 4 + (w1.size + w2.size) * 2)
    return pl.pallas_call(
        _fc_kernel,
        out_shape=jax.ShapeDtypeStruct((B, N2), jnp.float32),
        grid_spec=pltpu.PrefetchScalarGridSpec(
            num_scalar_prefetch=0,
            grid=(B // TB,),
            in_specs=[
                pl.BlockSpec((TB, Kdim), lambda i: (i, 0)),
                pl.BlockSpec((Kdim, N1), lambda i: (0, 0)),
                pl.BlockSpec((1, N1), lambda i: (0, 0)),
                pl.BlockSpec((N1, N2), lambda i: (0, 0)),
                pl.BlockSpec((1, N2), lambda i: (0, 0)),
            ],
            out_specs=pl.BlockSpec((TB, N2), lambda i: (i, 0)),
        ),
        compiler_params=pltpu.CompilerParams(
            dimension_semantics=("parallel",),
            vmem_limit_bytes=_VMEM_LIMIT,
        ),
        cost_estimate=pl.CostEstimate(
            flops=flops, transcendentals=0, bytes_accessed=bytes_acc),
    )(x, w1, b1, w2, b2)


# ----------------------------------------------------------------------------
# Parameters + forward
# ----------------------------------------------------------------------------
def init_params(key, in_channels=1, conv1_width=C1, conv2_width=C2,
                fc1_width=FC1, class_count=NCLS):
    """PyTorch-equivalent init, then one-time layout transforms for the kernels."""
    assert in_channels == 1 and conv1_width == C1 and conv2_width == C2
    k1, k2, k3, k4, k5 = jax.random.split(key, 5)
    flatten_dim = conv2_width * PO2 * PO2

    # nn.Conv2d / fc1: kaiming_normal_(fan_in, relu), zero bias.
    w_conv1 = jax.random.normal(k1, (conv1_width, in_channels, K, K), jnp.float32) \
        * math.sqrt(2.0 / (in_channels * K * K))
    w_conv2 = jax.random.normal(k2, (conv2_width, conv1_width, K, K), jnp.float32) \
        * math.sqrt(2.0 / (conv1_width * K * K))
    w_fc1 = jax.random.normal(k3, (fc1_width, flatten_dim), jnp.float32) \
        * math.sqrt(2.0 / flatten_dim)
    # fc_logits: nn.Linear default reset -> U(-1/sqrt(fan_in), 1/sqrt(fan_in)).
    bound = 1.0 / math.sqrt(fc1_width)
    w_log = jax.random.uniform(k4, (class_count, fc1_width), jnp.float32, -bound, bound)
    b_log = jax.random.uniform(k5, (class_count,), jnp.float32, -bound, bound)

    # --- one-time layout transforms (init-time, off the forward hot path) -------
    # conv taps: (Cout, Cin, KH, KW) -> tap-major (KH*KW, Cin, Cout).
    w1_taps = jnp.transpose(w_conv1, (2, 3, 1, 0)).reshape(K * K, in_channels, conv1_width)
    w2_taps = jnp.transpose(w_conv2, (2, 3, 1, 0)).reshape(K * K, conv1_width, conv2_width)
    # fc1: PyTorch flattens NCHW (idx = c*49 + s); the kernel flattens (s*32 + c).
    # Permute rows accordingly and pre-transpose to (in, out); store bf16 for the MXU
    # (accumulation stays f32 in-kernel), so forward is numerically the same model.
    w_fc1_k = jnp.transpose(w_fc1.reshape(fc1_width, conv2_width, PO2 * PO2),
                            (2, 1, 0)).reshape(flatten_dim, fc1_width).astype(jnp.bfloat16)
    w_log_k = jnp.transpose(w_log, (1, 0)).astype(jnp.bfloat16)

    return dict(
        w1_taps=w1_taps, b1=jnp.zeros((1, conv1_width), jnp.float32),
        w2_taps=w2_taps, b2=jnp.zeros((1, conv2_width), jnp.float32),
        w_fc1=w_fc1_k, b_fc1=jnp.zeros((1, fc1_width), jnp.float32),
        w_log=w_log_k, b_log=b_log.reshape(1, class_count),
    )


def forward(x_nchw, params):
    """ConvolutionalModel.forward: (B, 1, 28, 28) float32 NCHW -> (B, 10) logits."""
    B, Cin, H, W = x_nchw.shape
    assert (Cin, H, W) == (1, H1, H1), "module hard-codes 28x28 / Cin=1 via flatten_dim"

    # Remaining XLA glue is tiny: 'same' zero-pad of the raw input, row-flatten, and a
    # small tail pad so every in-kernel tap window stays in bounds.  (Both reshapes
    # below are free row-major reshapes.)
    xp = jnp.pad(x_nchw[:, 0].astype(jnp.float32), ((0, 0), (2, 2), (2, 2)))  # (B,32,32)
    xf = jnp.pad(xp.reshape(B, WP1 * WP1, 1),
                 ((0, 0), (0, XLEN1 - WP1 * WP1), (0, 0)))                    # (B,1032,1)

    h1 = _conv1_pool(xf, params["w1_taps"], params["b1"])      # (B, 328, 16)
    h2 = _conv2_pool(h1, params["w2_taps"], params["b2"])      # (B, 49, 32)
    h2 = h2.reshape(B, FLAT)                                   # free reshape to (B,1568)
    return _fc_fused(h2, params["w_fc1"], params["b_fc1"],
                     params["w_log"], params["b_log"])


if __name__ == "__main__":
    key = jax.random.PRNGKey(0)
    pkey, xkey = jax.random.split(key)

    params = init_params(pkey)
    # MNIST-shaped input (the module's flatten_dim hard-codes 28x28 -> 7x7).
    x = jax.random.normal(xkey, (2, 1, 28, 28), jnp.float32)

    logits = jax.jit(forward)(x, params)
    logits = jax.block_until_ready(logits)
    assert logits.shape == (2, 10) and logits.dtype == jnp.float32
    assert bool(jnp.all(jnp.isfinite(logits)))
    print("KERNEL_OK")
</pallas_src>

<mosaic_0001>
module attributes {stable_mosaic.version = 11 : i64} {
  func.func @_conv1_pool_kernel(%arg0: i32, %arg1: memref<1x1032x1xf32, #tpu.memory_space<vmem>>, %arg2: memref<25x1x16xf32, #tpu.memory_space<vmem>>, %arg3: memref<1x16xf32, #tpu.memory_space<vmem>>, %arg4: memref<1x328x16xf32, #tpu.memory_space<vmem>>) attributes {dimension_semantics = [#tpu.dimension_semantics<parallel>], iteration_bounds = array<i64: 2>, scalar_prefetch = 0 : i64, scratch_operands = 0 : i64, tpu.core_type = #tpu.core_type<tc>, window_params = [{transform_indices = @transform_0, window_bounds = array<i64: 1, 1032, 1>}, {pipeline_mode = #tpu.pipeline_mode<synchronous>, transform_indices = @transform_1, window_bounds = array<i64: 25, 1, 16>}, {pipeline_mode = #tpu.pipeline_mode<synchronous>, transform_indices = @transform_2, window_bounds = array<i64: 1, 16>}, {transform_indices = @transform_3, window_bounds = array<i64: 1, 328, 16>}]} {
    %cst = arith.constant 0.000000e+00 : f32
    %0 = vector.broadcast %cst : f32 to vector<1x328x16xf32>
    %c0 = arith.constant 0 : index
    %c0_0 = arith.constant 0 : index
    %c0_1 = arith.constant 0 : index
    %1 = vector.load %arg4[%c0, %c0_0, %c0_1] : memref<1x328x16xf32, #tpu.memory_space<vmem>>, vector<1x328x16xf32>
    tpu.vector_store %arg4[%c0, %c0_0, %c0_1], %0 {strides = array<i32>} : memref<1x328x16xf32, #tpu.memory_space<vmem>>, vector<1x328x16xf32>,
    %c0_2 = arith.constant 0 : index
    %c0_3 = arith.constant 0 : index
    %c0_4 = arith.constant 0 : index
    %2 = vector.load %arg2[%c0_2, %c0_3, %c0_4] : memref<25x1x16xf32, #tpu.memory_space<vmem>>, vector<25x1x16xf32>
    %c0_5 = arith.constant 0 : index
    %c0_6 = arith.constant 0 : index
    %3 = vector.load %arg3[%c0_5, %c0_6] : memref<1x16xf32, #tpu.memory_space<vmem>>, vector<1x16xf32>
    %4 = tpu.iota {dimensions = array<i32: 0>} : vector<14x32xi32>
    %5 = tpu.iota {dimensions = array<i32: 1>} : vector<14x32xi32>
    %c2_i32 = arith.constant 2 : i32
    %6 = vector.broadcast %c2_i32 : i32 to vector<14x32xi32>
    %7 = arith.muli %6, %4 : vector<14x32xi32>
    %8 = arith.cmpi eq, %5, %7 : vector<14x32xi32>
    %9 = arith.extui %8 : vector<14x32xi1> to vector<14x32xi32>
    %10 = arith.sitofp %9 : vector<14x32xi32> to vector<14x32xf32>
    %c2_i32_7 = arith.constant 2 : i32
    %11 = vector.broadcast %c2_i32_7 : i32 to vector<14x32xi32>
    %12 = arith.muli %11, %4 : vector<14x32xi32>
    %c1_i32 = arith.constant 1 : i32
    %13 = vector.broadcast %c1_i32 : i32 to vector<14x32xi32>
    %14 = arith.addi %12, %13 : vector<14x32xi32>
    %15 = arith.cmpi eq, %5, %14 : vector<14x32xi32>
    %16 = arith.extui %15 : vector<14x32xi1> to vector<14x32xi32>
    %17 = arith.sitofp %16 : vector<14x32xi32> to vector<14x32xf32>
    %c0_i32 = arith.constant 0 : i32
    %c14_i32 = arith.constant 14 : i32
    %18 = arith.addi %c0_i32, %c14_i32 : i32
    %c1_i32_8 = arith.constant 1 : i32
    scf.for %arg5 = %c0_i32 to %18 step %c1_i32_8  : i32 {
      %c64_i32 = arith.constant 64 : i32
      %19 = arith.muli %arg5, %c64_i32 : i32
      %cst_10 = arith.constant 0.000000e+00 : f32
      %20 = vector.broadcast %cst_10 : f32 to vector<64x16xf32>
      %c0_i32_11 = arith.constant 0 : i32
      %21 = arith.addi %19, %c0_i32_11 : i32
      %c0_i32_12 = arith.constant 0 : i32
      %22 = arith.addi %21, %c0_i32_12 : i32
      %c0_13 = arith.constant 0 : index
      %23 = arith.index_cast %22 : i32 to index
      %c0_14 = arith.constant 0 : index
      %24 = vector.load %arg1[%c0_13, %23, %c0_14] : memref<1x1032x1xf32, #tpu.memory_space<vmem>>, vector<1x64x1xf32>
      %25 = vector.shape_cast %24 : vector<1x64x1xf32> to vector<64x1xf32>
      %26 = vector.extract_strided_slice %2 {offsets = [0, 0, 0], sizes = [1, 1, 16], strides = [1, 1, 1]} : vector<25x1x16xf32> to vector<1x1x16xf32>
      %27 = vector.shape_cast %26 : vector<1x1x16xf32> to vector<1x16xf32>
      %28 = vector.broadcast %25 : vector<64x1xf32> to vector<64x16xf32>
      %29 = vector.broadcast %27 : vector<1x16xf32> to vector<64x16xf32>
      %30 = arith.mulf %28, %29 : vector<64x16xf32>
      %31 = arith.addf %20, %30 : vector<64x16xf32>
      %c0_i32_15 = arith.constant 0 : i32
      %32 = arith.addi %19, %c0_i32_15 : i32
      %c1_i32_16 = arith.constant 1 : i32
      %33 = arith.addi %32, %c1_i32_16 : i32
      %c0_17 = arith.constant 0 : index
      %34 = arith.index_cast %33 : i32 to index
      %c0_18 = arith.constant 0 : index
      %35 = vector.load %arg1[%c0_17, %34, %c0_18] : memref<1x1032x1xf32, #tpu.memory_space<vmem>>, vector<1x64x1xf32>
      %36 = vector.shape_cast %35 : vector<1x64x1xf32> to vector<64x1xf32>
      %37 = vector.extract_strided_slice %2 {offsets = [1, 0, 0], sizes = [1, 1, 16], strides = [1, 1, 1]} : vector<25x1x16xf32> to vector<1x1x16xf32>
      %38 = vector.shape_cast %37 : vector<1x1x16xf32> to vector<1x16xf32>
      %39 = vector.broadcast %36 : vector<64x1xf32> to vector<64x16xf32>
      %40 = vector.broadcast %38 : vector<1x16xf32> to vector<64x16xf32>
      %41 = arith.mulf %39, %40 : vector<64x16xf32>
      %42 = arith.addf %31, %41 : vector<64x16xf32>
      %c0_i32_19 = arith.constant 0 : i32
      %43 = arith.addi %19, %c0_i32_19 : i32
      %c2_i32_20 = arith.constant 2 : i32
      %44 = arith.addi %43, %c2_i32_20 : i32
      %c0_21 = arith.constant 0 : index
      %45 = arith.index_cast %44 : i32 to index
      %c0_22 = arith.constant 0 : index
      %46 = vector.load %arg1[%c0_21, %45, %c0_22] : memref<1x1032x1xf32, #tpu.memory_space<vmem>>, vector<1x64x1xf32>
      %47 = vector.shape_cast %46 : vector<1x64x1xf32> to vector<64x1xf32>
      %48 = vector.extract_strided_slice %2 {offsets = [2, 0, 0], sizes = [1, 1, 16], strides = [1, 1, 1]} : vector<25x1x16xf32> to vector<1x1x16xf32>
      %49 = vector.shape_cast %48 : vector<1x1x16xf32> to vector<1x16xf32>
      %50 = vector.broadcast %47 : vector<64x1xf32> to vector<64x16xf32>
      %51 = vector.broadcast %49 : vector<1x16xf32> to vector<64x16xf32>
      %52 = arith.mulf %50, %51 : vector<64x16xf32>
      %53 = arith.addf %42, %52 : vector<64x16xf32>
      %c0_i32_23 = arith.constant 0 : i32
      %54 = arith.addi %19, %c0_i32_23 : i32
      %c3_i32 = arith.constant 3 : i32
      %55 = arith.addi %54, %c3_i32 : i32
      %c0_24 = arith.constant 0 : index
      %56 = arith.index_cast %55 : i32 to index
      %c0_25 = arith.constant 0 : index
      %57 = vector.load %arg1[%c0_24, %56, %c0_25] : memref<1x1032x1xf32, #tpu.memory_space<vmem>>, vector<1x64x1xf32>
      %58 = vector.shape_cast %57 : vector<1x64x1xf32> to vector<64x1xf32>
      %59 = vector.extract_strided_slice %2 {offsets = [3, 0, 0], sizes = [1, 1, 16], strides = [1, 1, 1]} : vector<25x1x16xf32> to vector<1x1x16xf32>
      %60 = vector.shape_cast %59 : vector<1x1x16xf32> to vector<1x16xf32>
      %61 = vector.broadcast %58 : vector<64x1xf32> to vector<64x16xf32>
      %62 = vector.broadcast %60 : vector<1x16xf32> to vector<64x16xf32>
      %63 = arith.mulf %61, %62 : vector<64x16xf32>
      %64 = arith.addf %53, %63 : vector<64x16xf32>
      %c0_i32_26 = arith.constant 0 : i32
      %65 = arith.addi %19, %c0_i32_26 : i32
      %c4_i32 = arith.constant 4 : i32
      %66 = arith.addi %65, %c4_i32 : i32
      %c0_27 = arith.constant 0 : index
      %67 = arith.index_cast %66 : i32 to index
      %c0_28 = arith.constant 0 : index
      %68 = vector.load %arg1[%c0_27, %67, %c0_28] : memref<1x1032x1xf32, #tpu.memory_space<vmem>>, vector<1x64x1xf32>
      %69 = vector.shape_cast %68 : vector<1x64x1xf32> to vector<64x1xf32>
      %70 = vector.extract_strided_slice %2 {offsets = [4, 0, 0], sizes = [1, 1, 16], strides = [1, 1, 1]} : vector<25x1x16xf32> to vector<1x1x16xf32>
      %71 = vector.shape_cast %70 : vector<1x1x16xf32> to vector<1x16xf32>
      %72 = vector.broadcast %69 : vector<64x1xf32> to vector<64x16xf32>
      %73 = vector.broadcast %71 : vector<1x16xf32> to vector<64x16xf32>
      %74 = arith.mulf %72, %73 : vector<64x16xf32>
      %75 = arith.addf %64, %74 : vector<64x16xf32>
      %c32_i32 = arith.constant 32 : i32
      %76 = arith.addi %19, %c32_i32 : i32
      %c0_i32_29 = arith.constant 0 : i32
      %77 = arith.addi %76, %c0_i32_29 : i32
      %c0_30 = arith.constant 0 : index
      %78 = arith.index_cast %77 : i32 to index
      %c0_31 = arith.constant 0 : index
      %79 = vector.load %arg1[%c0_30, %78, %c0_31] : memref<1x1032x1xf32, #tpu.memory_space<vmem>>, vector<1x64x1xf32>
      %80 = vector.shape_cast %79 : vector<1x64x1xf32> to vector<64x1xf32>
      %81 = vector.extract_strided_slice %2 {offsets = [5, 0, 0], sizes = [1, 1, 16], strides = [1, 1, 1]} : vector<25x1x16xf32> to vector<1x1x16xf32>
      %82 = vector.shape_cast %81 : vector<1x1x16xf32> to vector<1x16xf32>
      %83 = vector.broadcast %80 : vector<64x1xf32> to vector<64x16xf32>
      %84 = vector.broadcast %82 : vector<1x16xf32> to vector<64x16xf32>
      %85 = arith.mulf %83, %84 : vector<64x16xf32>
      %86 = arith.addf %75, %85 : vector<64x16xf32>
      %c32_i32_32 = arith.constant 32 : i32
      %87 = arith.addi %19, %c32_i32_32 : i32
      %c1_i32_33 = arith.constant 1 : i32
      %88 = arith.addi %87, %c1_i32_33 : i32
      %c0_34 = arith.constant 0 : index
      %89 = arith.index_cast %88 : i32 to index
      %c0_35 = arith.constant 0 : index
      %90 = vector.load %arg1[%c0_34, %89, %c0_35] : memref<1x1032x1xf32, #tpu.memory_space<vmem>>, vector<1x64x1xf32>
      %91 = vector.shape_cast %90 : vector<1x64x1xf32> to vector<64x1xf32>
      %92 = vector.extract_strided_slice %2 {offsets = [6, 0, 0], sizes = [1, 1, 16], strides = [1, 1, 1]} : vector<25x1x16xf32> to vector<1x1x16xf32>
      %93 = vector.shape_cast %92 : vector<1x1x16xf32> to vector<1x16xf32>
      %94 = vector.broadcast %91 : vector<64x1xf32> to vector<64x16xf32>
      %95 = vector.broadcast %93 : vector<1x16xf32> to vector<64x16xf32>
      %96 = arith.mulf %94, %95 : vector<64x16xf32>
      %97 = arith.addf %86, %96 : vector<64x16xf32>
      %c32_i32_36 = arith.constant 32 : i32
      %98 = arith.addi %19, %c32_i32_36 : i32
      %c2_i32_37 = arith.constant 2 : i32
      %99 = arith.addi %98, %c2_i32_37 : i32
      %c0_38 = arith.constant 0 : index
      %100 = arith.index_cast %99 : i32 to index
      %c0_39 = arith.constant 0 : index
      %101 = vector.load %arg1[%c0_38, %100, %c0_39] : memref<1x1032x1xf32, #tpu.memory_space<vmem>>, vector<1x64x1xf32>
      %102 = vector.shape_cast %101 : vector<1x64x1xf32> to vector<64x1xf32>
      %103 = vector.extract_strided_slice %2 {offsets = [7, 0, 0], sizes = [1, 1, 16], strides = [1, 1, 1]} : vector<25x1x16xf32> to vector<1x1x16xf32>
      %104 = vector.shape_cast %103 : vector<1x1x16xf32> to vector<1x16xf32>
      %105 = vector.broadcast %102 : vector<64x1xf32> to vector<64x16xf32>
      %106 = vector.broadcast %104 : vector<1x16xf32> to vector<64x16xf32>
      %107 = arith.mulf %105, %106 : vector<64x16xf32>
      %108 = arith.addf %97, %107 : vector<64x16xf32>
      %c32_i32_40 = arith.constant 32 : i32
      %109 = arith.addi %19, %c32_i32_40 : i32
      %c3_i32_41 = arith.constant 3 : i32
      %110 = arith.addi %109, %c3_i32_41 : i32
      %c0_42 = arith.constant 0 : index
      %111 = arith.index_cast %110 : i32 to index
      %c0_43 = arith.constant 0 : index
      %112 = vector.load %arg1[%c0_42, %111, %c0_43] : memref<1x1032x1xf32, #tpu.memory_space<vmem>>, vector<1x64x1xf32>
      %113 = vector.shape_cast %112 : vector<1x64x1xf32> to vector<64x1xf32>
      %114 = vector.extract_strided_slice %2 {offsets = [8, 0, 0], sizes = [1, 1, 16], strides = [1, 1, 1]} : vector<25x1x16xf32> to vector<1x1x16xf32>
      %115 = vector.shape_cast %114 : vector<1x1x16xf32> to vector<1x16xf32>
      %116 = vector.broadcast %113 : vector<64x1xf32> to vector<64x16xf32>
      %117 = vector.broadcast %115 : vector<1x16xf32> to vector<64x16xf32>
      %118 = arith.mulf %116, %117 : vector<64x16xf32>
      %119 = arith.addf %108, %118 : vector<64x16xf32>
      %c32_i32_44 = arith.constant 32 : i32
      %120 = arith.addi %19, %c32_i32_44 : i32
      %c4_i32_45 = arith.constant 4 : i32
      %121 = arith.addi %120, %c4_i32_45 : i32
      %c0_46 = arith.constant 0 : index
      %122 = arith.index_cast %121 : i32 to index
      %c0_47 = arith.constant 0 : index
      %123 = vector.load %arg1[%c0_46, %122, %c0_47] : memref<1x1032x1xf32, #tpu.memory_space<vmem>>, vector<1x64x1xf32>
      %124 = vector.shape_cast %123 : vector<1x64x1xf32> to vector<64x1xf32>
      %125 = vector.extract_strided_slice %2 {offsets = [9, 0, 0], sizes = [1, 1, 16], strides = [1, 1, 1]} : vector<25x1x16xf32> to vector<1x1x16xf32>
      %126 = vector.shape_cast %125 : vector<1x1x16xf32> to vector<1x16xf32>
      %127 = vector.broadcast %124 : vector<64x1xf32> to vector<64x16xf32>
      %128 = vector.broadcast %126 : vector<1x16xf32> to vector<64x16xf32>
      %129 = arith.mulf %127, %128 : vector<64x16xf32>
      %130 = arith.addf %119, %129 : vector<64x16xf32>
      %c64_i32_48 = arith.constant 64 : i32
      %131 = arith.addi %19, %c64_i32_48 : i32
      %c0_i32_49 = arith.constant 0 : i32
      %132 = arith.addi %131, %c0_i32_49 : i32
      %c0_50 = arith.constant 0 : index
      %133 = arith.index_cast %132 : i32 to index
      %c0_51 = arith.constant 0 : index
      %134 = vector.load %arg1[%c0_50, %133, %c0_51] : memref<1x1032x1xf32, #tpu.memory_space<vmem>>, vector<1x64x1xf32>
      %135 = vector.shape_cast %134 : vector<1x64x1xf32> to vector<64x1xf32>
      %136 = vector.extract_strided_slice %2 {offsets = [10, 0, 0], sizes = [1, 1, 16], strides = [1, 1, 1]} : vector<25x1x16xf32> to vector<1x1x16xf32>
      %137 = vector.shape_cast %136 : vector<1x1x16xf32> to vector<1x16xf32>
      %138 = vector.broadcast %135 : vector<64x1xf32> to vector<64x16xf32>
      %139 = vector.broadcast %137 : vector<1x16xf32> to vector<64x16xf32>
      %140 = arith.mulf %138, %139 : vector<64x16xf32>
      %141 = arith.addf %130, %140 : vector<64x16xf32>
      %c64_i32_52 = arith.constant 64 : i32
      %142 = arith.addi %19, %c64_i32_52 : i32
      %c1_i32_53 = arith.constant 1 : i32
      %143 = arith.addi %142, %c1_i32_53 : i32
      %c0_54 = arith.constant 0 : index
      %144 = arith.index_cast %143 : i32 to index
      %c0_55 = arith.constant 0 : index
      %145 = vector.load %arg1[%c0_54, %144, %c0_55] : memref<1x1032x1xf32, #tpu.memory_space<vmem>>, vector<1x64x1xf32>
      %146 = vector.shape_cast %145 : vector<1x64x1xf32> to vector<64x1xf32>
      %147 = vector.extract_strided_slice %2 {offsets = [11, 0, 0], sizes = [1, 1, 16], strides = [1, 1, 1]} : vector<25x1x16xf32> to vector<1x1x16xf32>
      %148 = vector.shape_cast %147 : vector<1x1x16xf32> to vector<1x16xf32>
      %149 = vector.broadcast %146 : vector<64x1xf32> to vector<64x16xf32>
      %150 = vector.broadcast %148 : vector<1x16xf32> to vector<64x16xf32>
      %151 = arith.mulf %149, %150 : vector<64x16xf32>
      %152 = arith.addf %141, %151 : vector<64x16xf32>
      %c64_i32_56 = arith.constant 64 : i32
      %153 = arith.addi %19, %c64_i32_56 : i32
      %c2_i32_57 = arith.constant 2 : i32
      %154 = arith.addi %153, %c2_i32_57 : i32
      %c0_58 = arith.constant 0 : index
      %155 = arith.index_cast %154 : i32 to index
      %c0_59 = arith.constant 0 : index
      %156 = vector.load %arg1[%c0_58, %155, %c0_59] : memref<1x1032x1xf32, #tpu.memory_space<vmem>>, vector<1x64x1xf32>
      %157 = vector.shape_cast %156 : vector<1x64x1xf32> to vector<64x1xf32>
      %158 = vector.extract_strided_slice %2 {offsets = [12, 0, 0], sizes = [1, 1, 16], strides = [1, 1, 1]} : vector<25x1x16xf32> to vector<1x1x16xf32>
      %159 = vector.shape_cast %158 : vector<1x1x16xf32> to vector<1x16xf32>
      %160 = vector.broadcast %157 : vector<64x1xf32> to vector<64x16xf32>
      %161 = vector.broadcast %159 : vector<1x16xf32> to vector<64x16xf32>
      %162 = arith.mulf %160, %161 : vector<64x16xf32>
      %163 = arith.addf %152, %162 : vector<64x16xf32>
      %c64_i32_60 = arith.constant 64 : i32
      %164 = arith.addi %19, %c64_i32_60 : i32
      %c3_i32_61 = arith.constant 3 : i32
      %165 = arith.addi %164, %c3_i32_61 : i32
      %c0_62 = arith.constant 0 : index
      %166 = arith.index_cast %165 : i32 to index
      %c0_63 = arith.constant 0 : index
      %167 = vector.load %arg1[%c0_62, %166, %c0_63] : memref<1x1032x1xf32, #tpu.memory_space<vmem>>, vector<1x64x1xf32>
      %168 = vector.shape_cast %167 : vector<1x64x1xf32> to vector<64x1xf32>
      %169 = vector.extract_strided_slice %2 {offsets = [13, 0, 0], sizes = [1, 1, 16], strides = [1, 1, 1]} : vector<25x1x16xf32> to vector<1x1x16xf32>
      %170 = vector.shape_cast %169 : vector<1x1x16xf32> to vector<1x16xf32>
      %171 = vector.broadcast %168 : vector<64x1xf32> to vector<64x16xf32>
      %172 = vector.broadcast %170 : vector<1x16xf32> to vector<64x16xf32>
      %173 = arith.mulf %171, %172 : vector<64x16xf32>
      %174 = arith.addf %163, %173 : vector<64x16xf32>
      %c64_i32_64 = arith.constant 64 : i32
      %175 = arith.addi %19, %c64_i32_64 : i32
      %c4_i32_65 = arith.constant 4 : i32
      %176 = arith.addi %175, %c4_i32_65 : i32
      %c0_66 = arith.constant 0 : index
      %177 = arith.index_cast %176 : i32 to index
      %c0_67 = arith.constant 0 : index
      %178 = vector.load %arg1[%c0_66, %177, %c0_67] : memref<1x1032x1xf32, #tpu.memory_space<vmem>>, vector<1x64x1xf32>
      %179 = vector.shape_cast %178 : vector<1x64x1xf32> to vector<64x1xf32>
      %180 = vector.extract_strided_slice %2 {offsets = [14, 0, 0], sizes = [1, 1, 16], strides = [1, 1, 1]} : vector<25x1x16xf32> to vector<1x1x16xf32>
      %181 = vector.shape_cast %180 : vector<1x1x16xf32> to vector<1x16xf32>
      %182 = vector.broadcast %179 : vector<64x1xf32> to vector<64x16xf32>
      %183 = vector.broadcast %181 : vector<1x16xf32> to vector<64x16xf32>
      %184 = arith.mulf %182, %183 : vector<64x16xf32>
      %185 = arith.addf %174, %184 : vector<64x16xf32>
      %c96_i32 = arith.constant 96 : i32
      %186 = arith.addi %19, %c96_i32 : i32
      %c0_i32_68 = arith.constant 0 : i32
      %187 = arith.addi %186, %c0_i32_68 : i32
      %c0_69 = arith.constant 0 : index
      %188 = arith.index_cast %187 : i32 to index
      %c0_70 = arith.constant 0 : index
      %189 = vector.load %arg1[%c0_69, %188, %c0_70] : memref<1x1032x1xf32, #tpu.memory_space<vmem>>, vector<1x64x1xf32>
      %190 = vector.shape_cast %189 : vector<1x64x1xf32> to vector<64x1xf32>
      %191 = vector.extract_strided_slice %2 {offsets = [15, 0, 0], sizes = [1, 1, 16], strides = [1, 1, 1]} : vector<25x1x16xf32> to vector<1x1x16xf32>
      %192 = vector.shape_cast %191 : vector<1x1x16xf32> to vector<1x16xf32>
      %193 = vector.broadcast %190 : vector<64x1xf32> to vector<64x16xf32>
      %194 = vector.broadcast %192 : vector<1x16xf32> to vector<64x16xf32>
      %195 = arith.mulf %193, %194 : vector<64x16xf32>
      %196 = arith.addf %185, %195 : vector<64x16xf32>
      %c96_i32_71 = arith.constant 96 : i32
      %197 = arith.addi %19, %c96_i32_71 : i32
      %c1_i32_72 = arith.constant 1 : i32
      %198 = arith.addi %197, %c1_i32_72 : i32
      %c0_73 = arith.constant 0 : index
      %199 = arith.index_cast %198 : i32 to index
      %c0_74 = arith.constant 0 : index
      %200 = vector.load %arg1[%c0_73, %199, %c0_74] : memref<1x1032x1xf32, #tpu.memory_space<vmem>>, vector<1x64x1xf32>
      %201 = vector.shape_cast %200 : vector<1x64x1xf32> to vector<64x1xf32>
      %202 = vector.extract_strided_slice %2 {offsets = [16, 0, 0], sizes = [1, 1, 16], strides = [1, 1, 1]} : vector<25x1x16xf32> to vector<1x1x16xf32>
      %203 = vector.shape_cast %202 : vector<1x1x16xf32> to vector<1x16xf32>
      %204 = vector.broadcast %201 : vector<64x1xf32> to vector<64x16xf32>
      %205 = vector.broadcast %203 : vector<1x16xf32> to vector<64x16xf32>
      %206 = arith.mulf %204, %205 : vector<64x16xf32>
      %207 = arith.addf %196, %206 : vector<64x16xf32>
      %c96_i32_75 = arith.constant 96 : i32
      %208 = arith.addi %19, %c96_i32_75 : i32
      %c2_i32_76 = arith.constant 2 : i32
      %209 = arith.addi %208, %c2_i32_76 : i32
      %c0_77 = arith.constant 0 : index
      %210 = arith.index_cast %209 : i32 to index
      %c0_78 = arith.constant 0 : index
      %211 = vector.load %arg1[%c0_77, %210, %c0_78] : memref<1x1032x1xf32, #tpu.memory_space<vmem>>, vector<1x64x1xf32>
      %212 = vector.shape_cast %211 : vector<1x64x1xf32> to vector<64x1xf32>
      %213 = vector.extract_strided_slice %2 {offsets = [17, 0, 0], sizes = [1, 1, 16], strides = [1, 1, 1]} : vector<25x1x16xf32> to vector<1x1x16xf32>
      %214 = vector.shape_cast %213 : vector<1x1x16xf32> to vector<1x16xf32>
      %215 = vector.broadcast %212 : vector<64x1xf32> to vector<64x16xf32>
      %216 = vector.broadcast %214 : vector<1x16xf32> to vector<64x16xf32>
      %217 = arith.mulf %215, %216 : vector<64x16xf32>
      %218 = arith.addf %207, %217 : vector<64x16xf32>
      %c96_i32_79 = arith.constant 96 : i32
      %219 = arith.addi %19, %c96_i32_79 : i32
      %c3_i32_80 = arith.constant 3 : i32
      %220 = arith.addi %219, %c3_i32_80 : i32
      %c0_81 = arith.constant 0 : index
      %221 = arith.index_cast %220 : i32 to index
      %c0_82 = arith.constant 0 : index
      %222 = vector.load %arg1[%c0_81, %221, %c0_82] : memref<1x1032x1xf32, #tpu.memory_space<vmem>>, vector<1x64x1xf32>
      %223 = vector.shape_cast %222 : vector<1x64x1xf32> to vector<64x1xf32>
      %224 = vector.extract_strided_slice %2 {offsets = [18, 0, 0], sizes = [1, 1, 16], strides = [1, 1, 1]} : vector<25x1x16xf32> to vector<1x1x16xf32>
      %225 = vector.shape_cast %224 : vector<1x1x16xf32> to vector<1x16xf32>
      %226 = vector.broadcast %223 : vector<64x1xf32> to vector<64x16xf32>
      %227 = vector.broadcast %225 : vector<1x16xf32> to vector<64x16xf32>
      %228 = arith.mulf %226, %227 : vector<64x16xf32>
      %229 = arith.addf %218, %228 : vector<64x16xf32>
      %c96_i32_83 = arith.constant 96 : i32
      %230 = arith.addi %19, %c96_i32_83 : i32
      %c4_i32_84 = arith.constant 4 : i32
      %231 = arith.addi %230, %c4_i32_84 : i32
      %c0_85 = arith.constant 0 : index
      %232 = arith.index_cast %231 : i32 to index
      %c0_86 = arith.constant 0 : index
      %233 = vector.load %arg1[%c0_85, %232, %c0_86] : memref<1x1032x1xf32, #tpu.memory_space<vmem>>, vector<1x64x1xf32>
      %234 = vector.shape_cast %233 : vector<1x64x1xf32> to vector<64x1xf32>
      %235 = vector.extract_strided_slice %2 {offsets = [19, 0, 0], sizes = [1, 1, 16], strides = [1, 1, 1]} : vector<25x1x16xf32> to vector<1x1x16xf32>
      %236 = vector.shape_cast %235 : vector<1x1x16xf32> to vector<1x16xf32>
      %237 = vector.broadcast %234 : vector<64x1xf32> to vector<64x16xf32>
      %238 = vector.broadcast %236 : vector<1x16xf32> to vector<64x16xf32>
      %239 = arith.mulf %237, %238 : vector<64x16xf32>
      %240 = arith.addf %229, %239 : vector<64x16xf32>
      %c128_i32 = arith.constant 128 : i32
      %241 = arith.addi %19, %c128_i32 : i32
      %c0_i32_87 = arith.constant 0 : i32
      %242 = arith.addi %241, %c0_i32_87 : i32
      %c0_88 = arith.constant 0 : index
      %243 = arith.index_cast %242 : i32 to index
      %c0_89 = arith.constant 0 : index
      %244 = vector.load %arg1[%c0_88, %243, %c0_89] : memref<1x1032x1xf32, #tpu.memory_space<vmem>>, vector<1x64x1xf32>
      %245 = vector.shape_cast %244 : vector<1x64x1xf32> to vector<64x1xf32>
      %246 = vector.extract_strided_slice %2 {offsets = [20, 0, 0], sizes = [1, 1, 16], strides = [1, 1, 1]} : vector<25x1x16xf32> to vector<1x1x16xf32>
      %247 = vector.shape_cast %246 : vector<1x1x16xf32> to vector<1x16xf32>
      %248 = vector.broadcast %245 : vector<64x1xf32> to vector<64x16xf32>
      %249 = vector.broadcast %247 : vector<1x16xf32> to vector<64x16xf32>
      %250 = arith.mulf %248, %249 : vector<64x16xf32>
      %251 = arith.addf %240, %250 : vector<64x16xf32>
      %c128_i32_90 = arith.constant 128 : i32
      %252 = arith.addi %19, %c128_i32_90 : i32
      %c1_i32_91 = arith.constant 1 : i32
      %253 = arith.addi %252, %c1_i32_91 : i32
      %c0_92 = arith.constant 0 : index
      %254 = arith.index_cast %253 : i32 to index
      %c0_93 = arith.constant 0 : index
      %255 = vector.load %arg1[%c0_92, %254, %c0_93] : memref<1x1032x1xf32, #tpu.memory_space<vmem>>, vector<1x64x1xf32>
      %256 = vector.shape_cast %255 : vector<1x64x1xf32> to vector<64x1xf32>
      %257 = vector.extract_strided_slice %2 {offsets = [21, 0, 0], sizes = [1, 1, 16], strides = [1, 1, 1]} : vector<25x1x16xf32> to vector<1x1x16xf32>
      %258 = vector.shape_cast %257 : vector<1x1x16xf32> to vector<1x16xf32>
      %259 = vector.broadcast %256 : vector<64x1xf32> to vector<64x16xf32>
      %260 = vector.broadcast %258 : vector<1x16xf32> to vector<64x16xf32>
      %261 = arith.mulf %259, %260 : vector<64x16xf32>
      %262 = arith.addf %251, %261 : vector<64x16xf32>
      %c128_i32_94 = arith.constant 128 : i32
      %263 = arith.addi %19, %c128_i32_94 : i32
      %c2_i32_95 = arith.constant 2 : i32
      %264 = arith.addi %263, %c2_i32_95 : i32
      %c0_96 = arith.constant 0 : index
      %265 = arith.index_cast %264 : i32 to index
      %c0_97 = arith.constant 0 : index
      %266 = vector.load %arg1[%c0_96, %265, %c0_97] : memref<1x1032x1xf32, #tpu.memory_space<vmem>>, vector<1x64x1xf32>
      %267 = vector.shape_cast %266 : vector<1x64x1xf32> to vector<64x1xf32>
      %268 = vector.extract_strided_slice %2 {offsets = [22, 0, 0], sizes = [1, 1, 16], strides = [1, 1, 1]} : vector<25x1x16xf32> to vector<1x1x16xf32>
      %269 = vector.shape_cast %268 : vector<1x1x16xf32> to vector<1x16xf32>
      %270 = vector.broadcast %267 : vector<64x1xf32> to vector<64x16xf32>
      %271 = vector.broadcast %269 : vector<1x16xf32> to vector<64x16xf32>
      %272 = arith.mulf %270, %271 : vector<64x16xf32>
      %273 = arith.addf %262, %272 : vector<64x16xf32>
      %c128_i32_98 = arith.constant 128 : i32
      %274 = arith.addi %19, %c128_i32_98 : i32
      %c3_i32_99 = arith.constant 3 : i32
      %275 = arith.addi %274, %c3_i32_99 : i32
      %c0_100 = arith.constant 0 : index
      %276 = arith.index_cast %275 : i32 to index
      %c0_101 = arith.constant 0 : index
      %277 = vector.load %arg1[%c0_100, %276, %c0_101] : memref<1x1032x1xf32, #tpu.memory_space<vmem>>, vector<1x64x1xf32>
      %278 = vector.shape_cast %277 : vector<1x64x1xf32> to vector<64x1xf32>
      %279 = vector.extract_strided_slice %2 {offsets = [23, 0, 0], sizes = [1, 1, 16], strides = [1, 1, 1]} : vector<25x1x16xf32> to vector<1x1x16xf32>
      %280 = vector.shape_cast %279 : vector<1x1x16xf32> to vector<1x16xf32>
      %281 = vector.broadcast %278 : vector<64x1xf32> to vector<64x16xf32>
      %282 = vector.broadcast %280 : vector<1x16xf32> to vector<64x16xf32>
      %283 = arith.mulf %281, %282 : vector<64x16xf32>
      %284 = arith.addf %273, %283 : vector<64x16xf32>
      %c128_i32_102 = arith.constant 128 : i32
      %285 = arith.addi %19, %c128_i32_102 : i32
      %c4_i32_103 = arith.constant 4 : i32
      %286 = arith.addi %285, %c4_i32_103 : i32
      %c0_104 = arith.constant 0 : index
      %287 = arith.index_cast %286 : i32 to index
      %c0_105 = arith.constant 0 : index
      %288 = vector.load %arg1[%c0_104, %287, %c0_105] : memref<1x1032x1xf32, #tpu.memory_space<vmem>>, vector<1x64x1xf32>
      %289 = vector.shape_cast %288 : vector<1x64x1xf32> to vector<64x1xf32>
      %290 = vector.extract_strided_slice %2 {offsets = [24, 0, 0], sizes = [1, 1, 16], strides = [1, 1, 1]} : vector<25x1x16xf32> to vector<1x1x16xf32>
      %291 = vector.shape_cast %290 : vector<1x1x16xf32> to vector<1x16xf32>
      %292 = vector.broadcast %289 : vector<64x1xf32> to vector<64x16xf32>
      %293 = vector.broadcast %291 : vector<1x16xf32> to vector<64x16xf32>
      %294 = arith.mulf %292, %293 : vector<64x16xf32>
      %295 = arith.addf %284, %294 : vector<64x16xf32>
      %296 = vector.extract_strided_slice %295 {offsets = [0, 0], sizes = [32, 16], strides = [1, 1]} : vector<64x16xf32> to vector<32x16xf32>
      %297 = vector.extract_strided_slice %295 {offsets = [32, 0], sizes = [32, 16], strides = [1, 1]} : vector<64x16xf32> to vector<32x16xf32>
      %298 = arith.maximumf %296, %297 : vector<32x16xf32>
      %cst_106 = arith.constant dense<0.000000e+00> : vector<14x16xf32>
      %299 = tpu.matmul %10, %298, %cst_106 {dimension_numbers = #tpu.dot_dimension_numbers<[1], [0], [0], [1], [0, 0, 1, 1], [], []>} : vector<14x32xf32>, vector<32x16xf32>, vector<14x16xf32> -> vector<14x16xf32>
      %cst_107 = arith.constant dense<0.000000e+00> : vector<14x16xf32>
      %300 = tpu.matmul %17, %298, %cst_107 {dimension_numbers = #tpu.dot_dimension_numbers<[1], [0], [0], [1], [0, 0, 1, 1], [], []>} : vector<14x32xf32>, vector<32x16xf32>, vector<14x16xf32> -> vector<14x16xf32>
      %301 = arith.maximumf %299, %300 : vector<14x16xf32>
      %302 = vector.broadcast %3 : vector<1x16xf32> to vector<14x16xf32>
      %303 = arith.addf %301, %302 : vector<14x16xf32>
      %cst_108 = arith.constant 0.000000e+00 : f32
      %304 = vector.broadcast %cst_108 : f32 to vector<14x16xf32>
      %305 = arith.maximumf %303, %304 : vector<14x16xf32>
      %c18_i32 = arith.constant 18 : i32
      %306 = arith.muli %arg5, %c18_i32 : i32
      %c36_i32 = arith.constant 36 : i32
      %307 = arith.addi %306, %c36_i32 : i32
      %c2_i32_109 = arith.constant 2 : i32
      %308 = arith.addi %307, %c2_i32_109 : i32
      %c0_110 = arith.constant 0 : index
      %309 = arith.index_cast %308 : i32 to index
      %c0_111 = arith.constant 0 : index
      %310 = vector.load %arg4[%c0_110, %309, %c0_111] : memref<1x328x16xf32, #tpu.memory_space<vmem>>, vector<1x14x16xf32>
      %311 = vector.shape_cast %310 : vector<1x14x16xf32> to vector<14x16xf32>
      %312 = vector.shape_cast %305 : vector<14x16xf32> to vector<1x14x16xf32>
      tpu.vector_store %arg4[%c0_110, %309, %c0_111], %312 {strides = array<i32>} : memref<1x328x16xf32, #tpu.memory_space<vmem>>, vector<1x14x16xf32>,
    }
    %c14_i32_9 = arith.constant 14 : i32
    return
  }
  func.func @transform_0(%arg0: i32) -> (i32, i32, i32) {
    %c0_i32 = arith.constant 0 : i32
    %c0_i32_0 = arith.constant 0 : i32
    %c0_i32_1 = arith.constant 0 : i32
    return %arg0, %c0_i32, %c0_i32_0 : i32, i32, i32
  }
  func.func @transform_1(%arg0: i32) -> (i32, i32, i32) {
    %c0_i32 = arith.constant 0 : i32
    %c0_i32_0 = arith.constant 0 : i32
    %c0_i32_1 = arith.constant 0 : i32
    %c0_i32_2 = arith.constant 0 : i32
    return %c0_i32, %c0_i32_0, %c0_i32_1 : i32, i32, i32
  }
  func.func @transform_2(%arg0: i32) -> (i32, i32) {
    %c0_i32 = arith.constant 0 : i32
    %c0_i32_0 = arith.constant 0 : i32
    %c0_i32_1 = arith.constant 0 : i32
    return %c0_i32, %c0_i32_0 : i32, i32
  }
  func.func @transform_3(%arg0: i32) -> (i32, i32, i32) {
    %c0_i32 = arith.constant 0 : i32
    %c0_i32_0 = arith.constant 0 : i32
    %c0_i32_1 = arith.constant 0 : i32
    return %arg0, %c0_i32, %c0_i32_0 : i32, i32, i32
  }
}

module attributes {stable_mosaic.version = 11 : i64} {
  func.func @_conv2_pool_kernel(%arg0: i32, %arg1: memref<1x328x16xf32, #tpu.memory_space<vmem>>, %arg2: memref<25x16x32xf32, #tpu.memory_space<vmem>>, %arg3: memref<1x32xf32, #tpu.memory_space<vmem>>, %arg4: memref<1x49x32xf32, #tpu.memory_space<vmem>>) attributes {dimension_semantics = [#tpu.dimension_semantics<parallel>], iteration_bounds = array<i64: 2>, scalar_prefetch = 0 : i64, scratch_operands = 0 : i64, tpu.core_type = #tpu.core_type<tc>, window_params = [{transform_indices = @transform_0, window_bounds = array<i64: 1, 328, 16>}, {pipeline_mode = #tpu.pipeline_mode<synchronous>, transform_indices = @transform_1, window_bounds = array<i64: 25, 16, 32>}, {pipeline_mode = #tpu.pipeline_mode<synchronous>, transform_indices = @transform_2, window_bounds = array<i64: 1, 32>}, {transform_indices = @transform_3, window_bounds = array<i64: 1, 49, 32>}]} {
    %c0 = arith.constant 0 : index
    %c0_0 = arith.constant 0 : index
    %c0_1 = arith.constant 0 : index
    %0 = vector.load %arg2[%c0, %c0_0, %c0_1] : memref<25x16x32xf32, #tpu.memory_space<vmem>>, vector<25x16x32xf32>
    %c0_2 = arith.constant 0 : index
    %c0_3 = arith.constant 0 : index
    %1 = vector.load %arg3[%c0_2, %c0_3] : memref<1x32xf32, #tpu.memory_space<vmem>>, vector<1x32xf32>
    %2 = tpu.iota {dimensions = array<i32: 0>} : vector<7x18xi32>
    %3 = tpu.iota {dimensions = array<i32: 1>} : vector<7x18xi32>
    %c2_i32 = arith.constant 2 : i32
    %4 = vector.broadcast %c2_i32 : i32 to vector<7x18xi32>
    %5 = arith.muli %4, %2 : vector<7x18xi32>
    %6 = arith.cmpi eq, %3, %5 : vector<7x18xi32>
    %7 = arith.extui %6 : vector<7x18xi1> to vector<7x18xi32>
    %8 = arith.sitofp %7 : vector<7x18xi32> to vector<7x18xf32>
    %c2_i32_4 = arith.constant 2 : i32
    %9 = vector.broadcast %c2_i32_4 : i32 to vector<7x18xi32>
    %10 = arith.muli %9, %2 : vector<7x18xi32>
    %c1_i32 = arith.constant 1 : i32
    %11 = vector.broadcast %c1_i32 : i32 to vector<7x18xi32>
    %12 = arith.addi %10, %11 : vector<7x18xi32>
    %13 = arith.cmpi eq, %3, %12 : vector<7x18xi32>
    %14 = arith.extui %13 : vector<7x18xi1> to vector<7x18xi32>
    %15 = arith.sitofp %14 : vector<7x18xi32> to vector<7x18xf32>
    %c0_i32 = arith.constant 0 : i32
    %c7_i32 = arith.constant 7 : i32
    %16 = arith.addi %c0_i32, %c7_i32 : i32
    %c1_i32_5 = arith.constant 1 : i32
    scf.for %arg5 = %c0_i32 to %16 step %c1_i32_5  : i32 {
      %c36_i32 = arith.constant 36 : i32
      %17 = arith.muli %arg5, %c36_i32 : i32
      %cst = arith.constant 0.000000e+00 : f32
      %18 = vector.broadcast %cst : f32 to vector<36x32xf32>
      %c0_i32_7 = arith.constant 0 : i32
      %19 = arith.addi %17, %c0_i32_7 : i32
      %c0_i32_8 = arith.constant 0 : i32
      %20 = arith.addi %19, %c0_i32_8 : i32
      %c0_9 = arith.constant 0 : index
      %21 = arith.index_cast %20 : i32 to index
      %c0_10 = arith.constant 0 : index
      %22 = vector.load %arg1[%c0_9, %21, %c0_10] : memref<1x328x16xf32, #tpu.memory_space<vmem>>, vector<1x36x16xf32>
      %23 = vector.shape_cast %22 : vector<1x36x16xf32> to vector<36x16xf32>
      %24 = vector.extract_strided_slice %0 {offsets = [0, 0, 0], sizes = [1, 16, 32], strides = [1, 1, 1]} : vector<25x16x32xf32> to vector<1x16x32xf32>
      %25 = vector.shape_cast %24 : vector<1x16x32xf32> to vector<16x32xf32>
      %cst_11 = arith.constant dense<0.000000e+00> : vector<36x32xf32>
      %26 = tpu.matmul %23, %25, %cst_11 {dimension_numbers = #tpu.dot_dimension_numbers<[1], [0], [0], [1], [0, 0, 1, 1], [], []>} : vector<36x16xf32>, vector<16x32xf32>, vector<36x32xf32> -> vector<36x32xf32>
      %27 = arith.addf %18, %26 : vector<36x32xf32>
      %c0_i32_12 = arith.constant 0 : i32
      %28 = arith.addi %17, %c0_i32_12 : i32
      %c1_i32_13 = arith.constant 1 : i32
      %29 = arith.addi %28, %c1_i32_13 : i32
      %c0_14 = arith.constant 0 : index
      %30 = arith.index_cast %29 : i32 to index
      %c0_15 = arith.constant 0 : index
      %31 = vector.load %arg1[%c0_14, %30, %c0_15] : memref<1x328x16xf32, #tpu.memory_space<vmem>>, vector<1x36x16xf32>
      %32 = vector.shape_cast %31 : vector<1x36x16xf32> to vector<36x16xf32>
      %33 = vector.extract_strided_slice %0 {offsets = [1, 0, 0], sizes = [1, 16, 32], strides = [1, 1, 1]} : vector<25x16x32xf32> to vector<1x16x32xf32>
      %34 = vector.shape_cast %33 : vector<1x16x32xf32> to vector<16x32xf32>
      %cst_16 = arith.constant dense<0.000000e+00> : vector<36x32xf32>
      %35 = tpu.matmul %32, %34, %cst_16 {dimension_numbers = #tpu.dot_dimension_numbers<[1], [0], [0], [1], [0, 0, 1, 1], [], []>} : vector<36x16xf32>, vector<16x32xf32>, vector<36x32xf32> -> vector<36x32xf32>
      %36 = arith.addf %27, %35 : vector<36x32xf32>
      %c0_i32_17 = arith.constant 0 : i32
      %37 = arith.addi %17, %c0_i32_17 : i32
      %c2_i32_18 = arith.constant 2 : i32
      %38 = arith.addi %37, %c2_i32_18 : i32
      %c0_19 = arith.constant 0 : index
      %39 = arith.index_cast %38 : i32 to index
      %c0_20 = arith.constant 0 : index
      %40 = vector.load %arg1[%c0_19, %39, %c0_20] : memref<1x328x16xf32, #tpu.memory_space<vmem>>, vector<1x36x16xf32>
      %41 = vector.shape_cast %40 : vector<1x36x16xf32> to vector<36x16xf32>
      %42 = vector.extract_strided_slice %0 {offsets = [2, 0, 0], sizes = [1, 16, 32], strides = [1, 1, 1]} : vector<25x16x32xf32> to vector<1x16x32xf32>
      %43 = vector.shape_cast %42 : vector<1x16x32xf32> to vector<16x32xf32>
      %cst_21 = arith.constant dense<0.000000e+00> : vector<36x32xf32>
      %44 = tpu.matmul %41, %43, %cst_21 {dimension_numbers = #tpu.dot_dimension_numbers<[1], [0], [0], [1], [0, 0, 1, 1], [], []>} : vector<36x16xf32>, vector<16x32xf32>, vector<36x32xf32> -> vector<36x32xf32>
      %45 = arith.addf %36, %44 : vector<36x32xf32>
      %c0_i32_22 = arith.constant 0 : i32
      %46 = arith.addi %17, %c0_i32_22 : i32
      %c3_i32 = arith.constant 3 : i32
      %47 = arith.addi %46, %c3_i32 : i32
      %c0_23 = arith.constant 0 : index
      %48 = arith.index_cast %47 : i32 to index
      %c0_24 = arith.constant 0 : index
      %49 = vector.load %arg1[%c0_23, %48, %c0_24] : memref<1x328x16xf32, #tpu.memory_space<vmem>>, vector<1x36x16xf32>
      %50 = vector.shape_cast %49 : vector<1x36x16xf32> to vector<36x16xf32>
      %51 = vector.extract_strided_slice %0 {offsets = [3, 0, 0], sizes = [1, 16, 32], strides = [1, 1, 1]} : vector<25x16x32xf32> to vector<1x16x32xf32>
      %52 = vector.shape_cast %51 : vector<1x16x32xf32> to vector<16x32xf32>
      %cst_25 = arith.constant dense<0.000000e+00> : vector<36x32xf32>
      %53 = tpu.matmul %50, %52, %cst_25 {dimension_numbers = #tpu.dot_dimension_numbers<[1], [0], [0], [1], [0, 0, 1, 1], [], []>} : vector<36x16xf32>, vector<16x32xf32>, vector<36x32xf32> -> vector<36x32xf32>
      %54 = arith.addf %45, %53 : vector<36x32xf32>
      %c0_i32_26 = arith.constant 0 : i32
      %55 = arith.addi %17, %c0_i32_26 : i32
      %c4_i32 = arith.constant 4 : i32
      %56 = arith.addi %55, %c4_i32 : i32
      %c0_27 = arith.constant 0 : index
      %57 = arith.index_cast %56 : i32 to index
      %c0_28 = arith.constant 0 : index
      %58 = vector.load %arg1[%c0_27, %57, %c0_28] : memref<1x328x16xf32, #tpu.memory_space<vmem>>, vector<1x36x16xf32>
      %59 = vector.shape_cast %58 : vector<1x36x16xf32> to vector<36x16xf32>
      %60 = vector.extract_strided_slice %0 {offsets = [4, 0, 0], sizes = [1, 16, 32], strides = [1, 1, 1]} : vector<25x16x32xf32> to vector<1x16x32xf32>
      %61 = vector.shape_cast %60 : vector<1x16x32xf32> to vector<16x32xf32>
      %cst_29 = arith.constant dense<0.000000e+00> : vector<36x32xf32>
      %62 = tpu.matmul %59, %61, %cst_29 {dimension_numbers = #tpu.dot_dimension_numbers<[1], [0], [0], [1], [0, 0, 1, 1], [], []>} : vector<36x16xf32>, vector<16x32xf32>, vector<36x32xf32> -> vector<36x32xf32>
      %63 = arith.addf %54, %62 : vector<36x32xf32>
      %c18_i32 = arith.constant 18 : i32
      %64 = arith.addi %17, %c18_i32 : i32
      %c0_i32_30 = arith.constant 0 : i32
      %65 = arith.addi %64, %c0_i32_30 : i32
      %c0_31 = arith.constant 0 : index
      %66 = arith.index_cast %65 : i32 to index
      %c0_32 = arith.constant 0 : index
      %67 = vector.load %arg1[%c0_31, %66, %c0_32] : memref<1x328x16xf32, #tpu.memory_space<vmem>>, vector<1x36x16xf32>
      %68 = vector.shape_cast %67 : vector<1x36x16xf32> to vector<36x16xf32>
      %69 = vector.extract_strided_slice %0 {offsets = [5, 0, 0], sizes = [1, 16, 32], strides = [1, 1, 1]} : vector<25x16x32xf32> to vector<1x16x32xf32>
      %70 = vector.shape_cast %69 : vector<1x16x32xf32> to vector<16x32xf32>
      %cst_33 = arith.constant dense<0.000000e+00> : vector<36x32xf32>
      %71 = tpu.matmul %68, %70, %cst_33 {dimension_numbers = #tpu.dot_dimension_numbers<[1], [0], [0], [1], [0, 0, 1, 1], [], []>} : vector<36x16xf32>, vector<16x32xf32>, vector<36x32xf32> -> vector<36x32xf32>
      %72 = arith.addf %63, %71 : vector<36x32xf32>
      %c18_i32_34 = arith.constant 18 : i32
      %73 = arith.addi %17, %c18_i32_34 : i32
      %c1_i32_35 = arith.constant 1 : i32
      %74 = arith.addi %73, %c1_i32_35 : i32
      %c0_36 = arith.constant 0 : index
      %75 = arith.index_cast %74 : i32 to index
      %c0_37 = arith.constant 0 : index
      %76 = vector.load %arg1[%c0_36, %75, %c0_37] : memref<1x328x16xf32, #tpu.memory_space<vmem>>, vector<1x36x16xf32>
      %77 = vector.shape_cast %76 : vector<1x36x16xf32> to vector<36x16xf32>
      %78 = vector.extract_strided_slice %0 {offsets = [6, 0, 0], sizes = [1, 16, 32], strides = [1, 1, 1]} : vector<25x16x32xf32> to vector<1x16x32xf32>
      %79 = vector.shape_cast %78 : vector<1x16x32xf32> to vector<16x32xf32>
      %cst_38 = arith.constant dense<0.000000e+00> : vector<36x32xf32>
      %80 = tpu.matmul %77, %79, %cst_38 {dimension_numbers = #tpu.dot_dimension_numbers<[1], [0], [0], [1], [0, 0, 1, 1], [], []>} : vector<36x16xf32>, vector<16x32xf32>, vector<36x32xf32> -> vector<36x32xf32>
      %81 = arith.addf %72, %80 : vector<36x32xf32>
      %c18_i32_39 = arith.constant 18 : i32
      %82 = arith.addi %17, %c18_i32_39 : i32
      %c2_i32_40 = arith.constant 2 : i32
      %83 = arith.addi %82, %c2_i32_40 : i32
      %c0_41 = arith.constant 0 : index
      %84 = arith.index_cast %83 : i32 to index
      %c0_42 = arith.constant 0 : index
      %85 = vector.load %arg1[%c0_41, %84, %c0_42] : memref<1x328x16xf32, #tpu.memory_space<vmem>>, vector<1x36x16xf32>
      %86 = vector.shape_cast %85 : vector<1x36x16xf32> to vector<36x16xf32>
      %87 = vector.extract_strided_slice %0 {offsets = [7, 0, 0], sizes = [1, 16, 32], strides = [1, 1, 1]} : vector<25x16x32xf32> to vector<1x16x32xf32>
      %88 = vector.shape_cast %87 : vector<1x16x32xf32> to vector<16x32xf32>
      %cst_43 = arith.constant dense<0.000000e+00> : vector<36x32xf32>
      %89 = tpu.matmul %86, %88, %cst_43 {dimension_numbers = #tpu.dot_dimension_numbers<[1], [0], [0], [1], [0, 0, 1, 1], [], []>} : vector<36x16xf32>, vector<16x32xf32>, vector<36x32xf32> -> vector<36x32xf32>
      %90 = arith.addf %81, %89 : vector<36x32xf32>
      %c18_i32_44 = arith.constant 18 : i32
      %91 = arith.addi %17, %c18_i32_44 : i32
      %c3_i32_45 = arith.constant 3 : i32
      %92 = arith.addi %91, %c3_i32_45 : i32
      %c0_46 = arith.constant 0 : index
      %93 = arith.index_cast %92 : i32 to index
      %c0_47 = arith.constant 0 : index
      %94 = vector.load %arg1[%c0_46, %93, %c0_47] : memref<1x328x16xf32, #tpu.memory_space<vmem>>, vector<1x36x16xf32>
      %95 = vector.shape_cast %94 : vector<1x36x16xf32> to vector<36x16xf32>
      %96 = vector.extract_strided_slice %0 {offsets = [8, 0, 0], sizes = [1, 16, 32], strides = [1, 1, 1]} : vector<25x16x32xf32> to vector<1x16x32xf32>
      %97 = vector.shape_cast %96 : vector<1x16x32xf32> to vector<16x32xf32>
      %cst_48 = arith.constant dense<0.000000e+00> : vector<36x32xf32>
      %98 = tpu.matmul %95, %97, %cst_48 {dimension_numbers = #tpu.dot_dimension_numbers<[1], [0], [0], [1], [0, 0, 1, 1], [], []>} : vector<36x16xf32>, vector<16x32xf32>, vector<36x32xf32> -> vector<36x32xf32>
      %99 = arith.addf %90, %98 : vector<36x32xf32>
      %c18_i32_49 = arith.constant 18 : i32
      %100 = arith.addi %17, %c18_i32_49 : i32
      %c4_i32_50 = arith.constant 4 : i32
      %101 = arith.addi %100, %c4_i32_50 : i32
      %c0_51 = arith.constant 0 : index
      %102 = arith.index_cast %101 : i32 to index
      %c0_52 = arith.constant 0 : index
      %103 = vector.load %arg1[%c0_51, %102, %c0_52] : memref<1x328x16xf32, #tpu.memory_space<vmem>>, vector<1x36x16xf32>
      %104 = vector.shape_cast %103 : vector<1x36x16xf32> to vector<36x16xf32>
      %105 = vector.extract_strided_slice %0 {offsets = [9, 0, 0], sizes = [1, 16, 32], strides = [1, 1, 1]} : vector<25x16x32xf32> to vector<1x16x32xf32>
      %106 = vector.shape_cast %105 : vector<1x16x32xf32> to vector<16x32xf32>
      %cst_53 = arith.constant dense<0.000000e+00> : vector<36x32xf32>
      %107 = tpu.matmul %104, %106, %cst_53 {dimension_numbers = #tpu.dot_dimension_numbers<[1], [0], [0], [1], [0, 0, 1, 1], [], []>} : vector<36x16xf32>, vector<16x32xf32>, vector<36x32xf32> -> vector<36x32xf32>
      %108 = arith.addf %99, %107 : vector<36x32xf32>
      %c36_i32_54 = arith.constant 36 : i32
      %109 = arith.addi %17, %c36_i32_54 : i32
      %c0_i32_55 = arith.constant 0 : i32
      %110 = arith.addi %109, %c0_i32_55 : i32
      %c0_56 = arith.constant 0 : index
      %111 = arith.index_cast %110 : i32 to index
      %c0_57 = arith.constant 0 : index
      %112 = vector.load %arg1[%c0_56, %111, %c0_57] : memref<1x328x16xf32, #tpu.memory_space<vmem>>, vector<1x36x16xf32>
      %113 = vector.shape_cast %112 : vector<1x36x16xf32> to vector<36x16xf32>
      %114 = vector.extract_strided_slice %0 {offsets = [10, 0, 0], sizes = [1, 16, 32], strides = [1, 1, 1]} : vector<25x16x32xf32> to vector<1x16x32xf32>
      %115 = vector.shape_cast %114 : vector<1x16x32xf32> to vector<16x32xf32>
      %cst_58 = arith.constant dense<0.000000e+00> : vector<36x32xf32>
      %116 = tpu.matmul %113, %115, %cst_58 {dimension_numbers = #tpu.dot_dimension_numbers<[1], [0], [0], [1], [0, 0, 1, 1], [], []>} : vector<36x16xf32>, vector<16x32xf32>, vector<36x32xf32> -> vector<36x32xf32>
      %117 = arith.addf %108, %116 : vector<36x32xf32>
      %c36_i32_59 = arith.constant 36 : i32
      %118 = arith.addi %17, %c36_i32_59 : i32
      %c1_i32_60 = arith.constant 1 : i32
      %119 = arith.addi %118, %c1_i32_60 : i32
      %c0_61 = arith.constant 0 : index
      %120 = arith.index_cast %119 : i32 to index
      %c0_62 = arith.constant 0 : index
      %121 = vector.load %arg1[%c0_61, %120, %c0_62] : memref<1x328x16xf32, #tpu.memory_space<vmem>>, vector<1x36x16xf32>
      %122 = vector.shape_cast %121 : vector<1x36x16xf32> to vector<36x16xf32>
      %123 = vector.extract_strided_slice %0 {offsets = [11, 0, 0], sizes = [1, 16, 32], strides = [1, 1, 1]} : vector<25x16x32xf32> to vector<1x16x32xf32>
      %124 = vector.shape_cast %123 : vector<1x16x32xf32> to vector<16x32xf32>
      %cst_63 = arith.constant dense<0.000000e+00> : vector<36x32xf32>
      %125 = tpu.matmul %122, %124, %cst_63 {dimension_numbers = #tpu.dot_dimension_numbers<[1], [0], [0], [1], [0, 0, 1, 1], [], []>} : vector<36x16xf32>, vector<16x32xf32>, vector<36x32xf32> -> vector<36x32xf32>
      %126 = arith.addf %117, %125 : vector<36x32xf32>
      %c36_i32_64 = arith.constant 36 : i32
      %127 = arith.addi %17, %c36_i32_64 : i32
      %c2_i32_65 = arith.constant 2 : i32
      %128 = arith.addi %127, %c2_i32_65 : i32
      %c0_66 = arith.constant 0 : index
      %129 = arith.index_cast %128 : i32 to index
      %c0_67 = arith.constant 0 : index
      %130 = vector.load %arg1[%c0_66, %129, %c0_67] : memref<1x328x16xf32, #tpu.memory_space<vmem>>, vector<1x36x16xf32>
      %131 = vector.shape_cast %130 : vector<1x36x16xf32> to vector<36x16xf32>
      %132 = vector.extract_strided_slice %0 {offsets = [12, 0, 0], sizes = [1, 16, 32], strides = [1, 1, 1]} : vector<25x16x32xf32> to vector<1x16x32xf32>
      %133 = vector.shape_cast %132 : vector<1x16x32xf32> to vector<16x32xf32>
      %cst_68 = arith.constant dense<0.000000e+00> : vector<36x32xf32>
      %134 = tpu.matmul %131, %133, %cst_68 {dimension_numbers = #tpu.dot_dimension_numbers<[1], [0], [0], [1], [0, 0, 1, 1], [], []>} : vector<36x16xf32>, vector<16x32xf32>, vector<36x32xf32> -> vector<36x32xf32>
      %135 = arith.addf %126, %134 : vector<36x32xf32>
      %c36_i32_69 = arith.constant 36 : i32
      %136 = arith.addi %17, %c36_i32_69 : i32
      %c3_i32_70 = arith.constant 3 : i32
      %137 = arith.addi %136, %c3_i32_70 : i32
      %c0_71 = arith.constant 0 : index
      %138 = arith.index_cast %137 : i32 to index
      %c0_72 = arith.constant 0 : index
      %139 = vector.load %arg1[%c0_71, %138, %c0_72] : memref<1x328x16xf32, #tpu.memory_space<vmem>>, vector<1x36x16xf32>
      %140 = vector.shape_cast %139 : vector<1x36x16xf32> to vector<36x16xf32>
      %141 = vector.extract_strided_slice %0 {offsets = [13, 0, 0], sizes = [1, 16, 32], strides = [1, 1, 1]} : vector<25x16x32xf32> to vector<1x16x32xf32>
      %142 = vector.shape_cast %141 : vector<1x16x32xf32> to vector<16x32xf32>
      %cst_73 = arith.constant dense<0.000000e+00> : vector<36x32xf32>
      %143 = tpu.matmul %140, %142, %cst_73 {dimension_numbers = #tpu.dot_dimension_numbers<[1], [0], [0], [1], [0, 0, 1, 1], [], []>} : vector<36x16xf32>, vector<16x32xf32>, vector<36x32xf32> -> vector<36x32xf32>
      %144 = arith.addf %135, %143 : vector<36x32xf32>
      %c36_i32_74 = arith.constant 36 : i32
      %145 = arith.addi %17, %c36_i32_74 : i32
      %c4_i32_75 = arith.constant 4 : i32
      %146 = arith.addi %145, %c4_i32_75 : i32
      %c0_76 = arith.constant 0 : index
      %147 = arith.index_cast %146 : i32 to index
      %c0_77 = arith.constant 0 : index
      %148 = vector.load %arg1[%c0_76, %147, %c0_77] : memref<1x328x16xf32, #tpu.memory_space<vmem>>, vector<1x36x16xf32>
      %149 = vector.shape_cast %148 : vector<1x36x16xf32> to vector<36x16xf32>
      %150 = vector.extract_strided_slice %0 {offsets = [14, 0, 0], sizes = [1, 16, 32], strides = [1, 1, 1]} : vector<25x16x32xf32> to vector<1x16x32xf32>
      %151 = vector.shape_cast %150 : vector<1x16x32xf32> to vector<16x32xf32>
      %cst_78 = arith.constant dense<0.000000e+00> : vector<36x32xf32>
      %152 = tpu.matmul %149, %151, %cst_78 {dimension_numbers = #tpu.dot_dimension_numbers<[1], [0], [0], [1], [0, 0, 1, 1], [], []>} : vector<36x16xf32>, vector<16x32xf32>, vector<36x32xf32> -> vector<36x32xf32>
      %153 = arith.addf %144, %152 : vector<36x32xf32>
      %c54_i32 = arith.constant 54 : i32
      %154 = arith.addi %17, %c54_i32 : i32
      %c0_i32_79 = arith.constant 0 : i32
      %155 = arith.addi %154, %c0_i32_79 : i32
      %c0_80 = arith.constant 0 : index
      %156 = arith.index_cast %155 : i32 to index
      %c0_81 = arith.constant 0 : index
      %157 = vector.load %arg1[%c0_80, %156, %c0_81] : memref<1x328x16xf32, #tpu.memory_space<vmem>>, vector<1x36x16xf32>
      %158 = vector.shape_cast %157 : vector<1x36x16xf32> to vector<36x16xf32>
      %159 = vector.extract_strided_slice %0 {offsets = [15, 0, 0], sizes = [1, 16, 32], strides = [1, 1, 1]} : vector<25x16x32xf32> to vector<1x16x32xf32>
      %160 = vector.shape_cast %159 : vector<1x16x32xf32> to vector<16x32xf32>
      %cst_82 = arith.constant dense<0.000000e+00> : vector<36x32xf32>
      %161 = tpu.matmul %158, %160, %cst_82 {dimension_numbers = #tpu.dot_dimension_numbers<[1], [0], [0], [1], [0, 0, 1, 1], [], []>} : vector<36x16xf32>, vector<16x32xf32>, vector<36x32xf32> -> vector<36x32xf32>
      %162 = arith.addf %153, %161 : vector<36x32xf32>
      %c54_i32_83 = arith.constant 54 : i32
      %163 = arith.addi %17, %c54_i32_83 : i32
      %c1_i32_84 = arith.constant 1 : i32
      %164 = arith.addi %163, %c1_i32_84 : i32
      %c0_85 = arith.constant 0 : index
      %165 = arith.index_cast %164 : i32 to index
      %c0_86 = arith.constant 0 : index
      %166 = vector.load %arg1[%c0_85, %165, %c0_86] : memref<1x328x16xf32, #tpu.memory_space<vmem>>, vector<1x36x16xf32>
      %167 = vector.shape_cast %166 : vector<1x36x16xf32> to vector<36x16xf32>
      %168 = vector.extract_strided_slice %0 {offsets = [16, 0, 0], sizes = [1, 16, 32], strides = [1, 1, 1]} : vector<25x16x32xf32> to vector<1x16x32xf32>
      %169 = vector.shape_cast %168 : vector<1x16x32xf32> to vector<16x32xf32>
      %cst_87 = arith.constant dense<0.000000e+00> : vector<36x32xf32>
      %170 = tpu.matmul %167, %169, %cst_87 {dimension_numbers = #tpu.dot_dimension_numbers<[1], [0], [0], [1], [0, 0, 1, 1], [], []>} : vector<36x16xf32>, vector<16x32xf32>, vector<36x32xf32> -> vector<36x32xf32>
      %171 = arith.addf %162, %170 : vector<36x32xf32>
      %c54_i32_88 = arith.constant 54 : i32
      %172 = arith.addi %17, %c54_i32_88 : i32
      %c2_i32_89 = arith.constant 2 : i32
      %173 = arith.addi %172, %c2_i32_89 : i32
      %c0_90 = arith.constant 0 : index
      %174 = arith.index_cast %173 : i32 to index
      %c0_91 = arith.constant 0 : index
      %175 = vector.load %arg1[%c0_90, %174, %c0_91] : memref<1x328x16xf32, #tpu.memory_space<vmem>>, vector<1x36x16xf32>
      %176 = vector.shape_cast %175 : vector<1x36x16xf32> to vector<36x16xf32>
      %177 = vector.extract_strided_slice %0 {offsets = [17, 0, 0], sizes = [1, 16, 32], strides = [1, 1, 1]} : vector<25x16x32xf32> to vector<1x16x32xf32>
      %178 = vector.shape_cast %177 : vector<1x16x32xf32> to vector<16x32xf32>
      %cst_92 = arith.constant dense<0.000000e+00> : vector<36x32xf32>
      %179 = tpu.matmul %176, %178, %cst_92 {dimension_numbers = #tpu.dot_dimension_numbers<[1], [0], [0], [1], [0, 0, 1, 1], [], []>} : vector<36x16xf32>, vector<16x32xf32>, vector<36x32xf32> -> vector<36x32xf32>
      %180 = arith.addf %171, %179 : vector<36x32xf32>
      %c54_i32_93 = arith.constant 54 : i32
      %181 = arith.addi %17, %c54_i32_93 : i32
      %c3_i32_94 = arith.constant 3 : i32
      %182 = arith.addi %181, %c3_i32_94 : i32
      %c0_95 = arith.constant 0 : index
      %183 = arith.index_cast %182 : i32 to index
      %c0_96 = arith.constant 0 : index
      %184 = vector.load %arg1[%c0_95, %183, %c0_96] : memref<1x328x16xf32, #tpu.memory_space<vmem>>, vector<1x36x16xf32>
      %185 = vector.shape_cast %184 : vector<1x36x16xf32> to vector<36x16xf32>
      %186 = vector.extract_strided_slice %0 {offsets = [18, 0, 0], sizes = [1, 16, 32], strides = [1, 1, 1]} : vector<25x16x32xf32> to vector<1x16x32xf32>
      %187 = vector.shape_cast %186 : vector<1x16x32xf32> to vector<16x32xf32>
      %cst_97 = arith.constant dense<0.000000e+00> : vector<36x32xf32>
      %188 = tpu.matmul %185, %187, %cst_97 {dimension_numbers = #tpu.dot_dimension_numbers<[1], [0], [0], [1], [0, 0, 1, 1], [], []>} : vector<36x16xf32>, vector<16x32xf32>, vector<36x32xf32> -> vector<36x32xf32>
      %189 = arith.addf %180, %188 : vector<36x32xf32>
      %c54_i32_98 = arith.constant 54 : i32
      %190 = arith.addi %17, %c54_i32_98 : i32
      %c4_i32_99 = arith.constant 4 : i32
      %191 = arith.addi %190, %c4_i32_99 : i32
      %c0_100 = arith.constant 0 : index
      %192 = arith.index_cast %191 : i32 to index
      %c0_101 = arith.constant 0 : index
      %193 = vector.load %arg1[%c0_100, %192, %c0_101] : memref<1x328x16xf32, #tpu.memory_space<vmem>>, vector<1x36x16xf32>
      %194 = vector.shape_cast %193 : vector<1x36x16xf32> to vector<36x16xf32>
      %195 = vector.extract_strided_slice %0 {offsets = [19, 0, 0], sizes = [1, 16, 32], strides = [1, 1, 1]} : vector<25x16x32xf32> to vector<1x16x32xf32>
      %196 = vector.shape_cast %195 : vector<1x16x32xf32> to vector<16x32xf32>
      %cst_102 = arith.constant dense<0.000000e+00> : vector<36x32xf32>
      %197 = tpu.matmul %194, %196, %cst_102 {dimension_numbers = #tpu.dot_dimension_numbers<[1], [0], [0], [1], [0, 0, 1, 1], [], []>} : vector<36x16xf32>, vector<16x32xf32>, vector<36x32xf32> -> vector<36x32xf32>
      %198 = arith.addf %189, %197 : vector<36x32xf32>
      %c72_i32 = arith.constant 72 : i32
      %199 = arith.addi %17, %c72_i32 : i32
      %c0_i32_103 = arith.constant 0 : i32
      %200 = arith.addi %199, %c0_i32_103 : i32
      %c0_104 = arith.constant 0 : index
      %201 = arith.index_cast %200 : i32 to index
      %c0_105 = arith.constant 0 : index
      %202 = vector.load %arg1[%c0_104, %201, %c0_105] : memref<1x328x16xf32, #tpu.memory_space<vmem>>, vector<1x36x16xf32>
      %203 = vector.shape_cast %202 : vector<1x36x16xf32> to vector<36x16xf32>
      %204 = vector.extract_strided_slice %0 {offsets = [20, 0, 0], sizes = [1, 16, 32], strides = [1, 1, 1]} : vector<25x16x32xf32> to vector<1x16x32xf32>
      %205 = vector.shape_cast %204 : vector<1x16x32xf32> to vector<16x32xf32>
      %cst_106 = arith.constant dense<0.000000e+00> : vector<36x32xf32>
      %206 = tpu.matmul %203, %205, %cst_106 {dimension_numbers = #tpu.dot_dimension_numbers<[1], [0], [0], [1], [0, 0, 1, 1], [], []>} : vector<36x16xf32>, vector<16x32xf32>, vector<36x32xf32> -> vector<36x32xf32>
      %207 = arith.addf %198, %206 : vector<36x32xf32>
      %c72_i32_107 = arith.constant 72 : i32
      %208 = arith.addi %17, %c72_i32_107 : i32
      %c1_i32_108 = arith.constant 1 : i32
      %209 = arith.addi %208, %c1_i32_108 : i32
      %c0_109 = arith.constant 0 : index
      %210 = arith.index_cast %209 : i32 to index
      %c0_110 = arith.constant 0 : index
      %211 = vector.load %arg1[%c0_109, %210, %c0_110] : memref<1x328x16xf32, #tpu.memory_space<vmem>>, vector<1x36x16xf32>
      %212 = vector.shape_cast %211 : vector<1x36x16xf32> to vector<36x16xf32>
      %213 = vector.extract_strided_slice %0 {offsets = [21, 0, 0], sizes = [1, 16, 32], strides = [1, 1, 1]} : vector<25x16x32xf32> to vector<1x16x32xf32>
      %214 = vector.shape_cast %213 : vector<1x16x32xf32> to vector<16x32xf32>
      %cst_111 = arith.constant dense<0.000000e+00> : vector<36x32xf32>
      %215 = tpu.matmul %212, %214, %cst_111 {dimension_numbers = #tpu.dot_dimension_numbers<[1], [0], [0], [1], [0, 0, 1, 1], [], []>} : vector<36x16xf32>, vector<16x32xf32>, vector<36x32xf32> -> vector<36x32xf32>
      %216 = arith.addf %207, %215 : vector<36x32xf32>
      %c72_i32_112 = arith.constant 72 : i32
      %217 = arith.addi %17, %c72_i32_112 : i32
      %c2_i32_113 = arith.constant 2 : i32
      %218 = arith.addi %217, %c2_i32_113 : i32
      %c0_114 = arith.constant 0 : index
      %219 = arith.index_cast %218 : i32 to index
      %c0_115 = arith.constant 0 : index
      %220 = vector.load %arg1[%c0_114, %219, %c0_115] : memref<1x328x16xf32, #tpu.memory_space<vmem>>, vector<1x36x16xf32>
      %221 = vector.shape_cast %220 : vector<1x36x16xf32> to vector<36x16xf32>
      %222 = vector.extract_strided_slice %0 {offsets = [22, 0, 0], sizes = [1, 16, 32], strides = [1, 1, 1]} : vector<25x16x32xf32> to vector<1x16x32xf32>
      %223 = vector.shape_cast %222 : vector<1x16x32xf32> to vector<16x32xf32>
      %cst_116 = arith.constant dense<0.000000e+00> : vector<36x32xf32>
      %224 = tpu.matmul %221, %223, %cst_116 {dimension_numbers = #tpu.dot_dimension_numbers<[1], [0], [0], [1], [0, 0, 1, 1], [], []>} : vector<36x16xf32>, vector<16x32xf32>, vector<36x32xf32> -> vector<36x32xf32>
      %225 = arith.addf %216, %224 : vector<36x32xf32>
      %c72_i32_117 = arith.constant 72 : i32
      %226 = arith.addi %17, %c72_i32_117 : i32
      %c3_i32_118 = arith.constant 3 : i32
      %227 = arith.addi %226, %c3_i32_118 : i32
      %c0_119 = arith.constant 0 : index
      %228 = arith.index_cast %227 : i32 to index
      %c0_120 = arith.constant 0 : index
      %229 = vector.load %arg1[%c0_119, %228, %c0_120] : memref<1x328x16xf32, #tpu.memory_space<vmem>>, vector<1x36x16xf32>
      %230 = vector.shape_cast %229 : vector<1x36x16xf32> to vector<36x16xf32>
      %231 = vector.extract_strided_slice %0 {offsets = [23, 0, 0], sizes = [1, 16, 32], strides = [1, 1, 1]} : vector<25x16x32xf32> to vector<1x16x32xf32>
      %232 = vector.shape_cast %231 : vector<1x16x32xf32> to vector<16x32xf32>
      %cst_121 = arith.constant dense<0.000000e+00> : vector<36x32xf32>
      %233 = tpu.matmul %230, %232, %cst_121 {dimension_numbers = #tpu.dot_dimension_numbers<[1], [0], [0], [1], [0, 0, 1, 1], [], []>} : vector<36x16xf32>, vector<16x32xf32>, vector<36x32xf32> -> vector<36x32xf32>
      %234 = arith.addf %225, %233 : vector<36x32xf32>
      %c72_i32_122 = arith.constant 72 : i32
      %235 = arith.addi %17, %c72_i32_122 : i32
      %c4_i32_123 = arith.constant 4 : i32
      %236 = arith.addi %235, %c4_i32_123 : i32
      %c0_124 = arith.constant 0 : index
      %237 = arith.index_cast %236 : i32 to index
      %c0_125 = arith.constant 0 : index
      %238 = vector.load %arg1[%c0_124, %237, %c0_125] : memref<1x328x16xf32, #tpu.memory_space<vmem>>, vector<1x36x16xf32>
      %239 = vector.shape_cast %238 : vector<1x36x16xf32> to vector<36x16xf32>
      %240 = vector.extract_strided_slice %0 {offsets = [24, 0, 0], sizes = [1, 16, 32], strides = [1, 1, 1]} : vector<25x16x32xf32> to vector<1x16x32xf32>
      %241 = vector.shape_cast %240 : vector<1x16x32xf32> to vector<16x32xf32>
      %cst_126 = arith.constant dense<0.000000e+00> : vector<36x32xf32>
      %242 = tpu.matmul %239, %241, %cst_126 {dimension_numbers = #tpu.dot_dimension_numbers<[1], [0], [0], [1], [0, 0, 1, 1], [], []>} : vector<36x16xf32>, vector<16x32xf32>, vector<36x32xf32> -> vector<36x32xf32>
      %243 = arith.addf %234, %242 : vector<36x32xf32>
      %244 = vector.extract_strided_slice %243 {offsets = [0, 0], sizes = [18, 32], strides = [1, 1]} : vector<36x32xf32> to vector<18x32xf32>
      %245 = vector.extract_strided_slice %243 {offsets = [18, 0], sizes = [18, 32], strides = [1, 1]} : vector<36x32xf32> to vector<18x32xf32>
      %246 = arith.maximumf %244, %245 : vector<18x32xf32>
      %cst_127 = arith.constant dense<0.000000e+00> : vector<7x32xf32>
      %247 = tpu.matmul %8, %246, %cst_127 {dimension_numbers = #tpu.dot_dimension_numbers<[1], [0], [0], [1], [0, 0, 1, 1], [], []>} : vector<7x18xf32>, vector<18x32xf32>, vector<7x32xf32> -> vector<7x32xf32>
      %cst_128 = arith.constant dense<0.000000e+00> : vector<7x32xf32>
      %248 = tpu.matmul %15, %246, %cst_128 {dimension_numbers = #tpu.dot_dimension_numbers<[1], [0], [0], [1], [0, 0, 1, 1], [], []>} : vector<7x18xf32>, vector<18x32xf32>, vector<7x32xf32> -> vector<7x32xf32>
      %249 = arith.maximumf %247, %248 : vector<7x32xf32>
      %250 = vector.broadcast %1 : vector<1x32xf32> to vector<7x32xf32>
      %251 = arith.addf %249, %250 : vector<7x32xf32>
      %cst_129 = arith.constant 0.000000e+00 : f32
      %252 = vector.broadcast %cst_129 : f32 to vector<7x32xf32>
      %253 = arith.maximumf %251, %252 : vector<7x32xf32>
      %c7_i32_130 = arith.constant 7 : i32
      %254 = arith.muli %arg5, %c7_i32_130 : i32
      %c0_131 = arith.constant 0 : index
      %255 = arith.index_cast %254 : i32 to index
      %c0_132 = arith.constant 0 : index
      %256 = vector.load %arg4[%c0_131, %255, %c0_132] : memref<1x49x32xf32, #tpu.memory_space<vmem>>, vector<1x7x32xf32>
      %257 = vector.shape_cast %256 : vector<1x7x32xf32> to vector<7x32xf32>
      %258 = vector.shape_cast %253 : vector<7x32xf32> to vector<1x7x32xf32>
      tpu.vector_store %arg4[%c0_131, %255, %c0_132], %258 {strides = array<i32>} : memref<1x49x32xf32, #tpu.memory_space<vmem>>, vector<1x7x32xf32>,
    }
    %c7_i32_6 = arith.constant 7 : i32
    return
  }
  func.func @transform_0(%arg0: i32) -> (i32, i32, i32) {
    %c0_i32 = arith.constant 0 : i32
    %c0_i32_0 = arith.constant 0 : i32
    %c0_i32_1 = arith.constant 0 : i32
    return %arg0, %c0_i32, %c0_i32_0 : i32, i32, i32
  }
  func.func @transform_1(%arg0: i32) -> (i32, i32, i32) {
    %c0_i32 = arith.constant 0 : i32
    %c0_i32_0 = arith.constant 0 : i32
    %c0_i32_1 = arith.constant 0 : i32
    %c0_i32_2 = arith.constant 0 : i32
    return %c0_i32, %c0_i32_0, %c0_i32_1 : i32, i32, i32
  }
  func.func @transform_2(%arg0: i32) -> (i32, i32) {
    %c0_i32 = arith.constant 0 : i32
    %c0_i32_0 = arith.constant 0 : i32
    %c0_i32_1 = arith.constant 0 : i32
    return %c0_i32, %c0_i32_0 : i32, i32
  }
  func.func @transform_3(%arg0: i32) -> (i32, i32, i32) {
    %c0_i32 = arith.constant 0 : i32
    %c0_i32_0 = arith.constant 0 : i32
    %c0_i32_1 = arith.constant 0 : i32
    return %arg0, %c0_i32, %c0_i32_0 : i32, i32, i32
  }
}

module attributes {stable_mosaic.version = 11 : i64} {
  func.func @_fc_kernel(%arg0: i32, %arg1: memref<2x1568xf32, #tpu.memory_space<vmem>>, %arg2: memref<1568x512xbf16, #tpu.memory_space<vmem>>, %arg3: memref<1x512xf32, #tpu.memory_space<vmem>>, %arg4: memref<512x10xbf16, #tpu.memory_space<vmem>>, %arg5: memref<1x10xf32, #tpu.memory_space<vmem>>, %arg6: memref<2x10xf32, #tpu.memory_space<vmem>>) attributes {dimension_semantics = [#tpu.dimension_semantics<parallel>], iteration_bounds = array<i64: 1>, scalar_prefetch = 0 : i64, scratch_operands = 0 : i64, tpu.core_type = #tpu.core_type<tc>, window_params = [{transform_indices = @transform_0, window_bounds = array<i64: 2, 1568>}, {pipeline_mode = #tpu.pipeline_mode<synchronous>, transform_indices = @transform_1, window_bounds = array<i64: 1568, 512>}, {pipeline_mode = #tpu.pipeline_mode<synchronous>, transform_indices = @transform_2, window_bounds = array<i64: 1, 512>}, {pipeline_mode = #tpu.pipeline_mode<synchronous>, transform_indices = @transform_3, window_bounds = array<i64: 512, 10>}, {pipeline_mode = #tpu.pipeline_mode<synchronous>, transform_indices = @transform_4, window_bounds = array<i64: 1, 10>}, {transform_indices = @transform_5, window_bounds = array<i64: 2, 10>}]} {
    %c0 = arith.constant 0 : index
    %c0_0 = arith.constant 0 : index
    %0 = vector.load %arg1[%c0, %c0_0] : memref<2x1568xf32, #tpu.memory_space<vmem>>, vector<2x1568xf32>
    %1 = arith.truncf %0 : vector<2x1568xf32> to vector<2x1568xbf16>
    %c0_1 = arith.constant 0 : index
    %c0_2 = arith.constant 0 : index
    %2 = vector.load %arg2[%c0_1, %c0_2] : memref<1568x512xbf16, #tpu.memory_space<vmem>>, vector<1568x512xbf16>
    %cst = arith.constant dense<0.000000e+00> : vector<2x512xf32>
    %3 = tpu.matmul %1, %2, %cst {dimension_numbers = #tpu.dot_dimension_numbers<[1], [0], [0], [1], [0, 0, 1, 1], [], []>} : vector<2x1568xbf16>, vector<1568x512xbf16>, vector<2x512xf32> -> vector<2x512xf32>
    %c0_3 = arith.constant 0 : index
    %c0_4 = arith.constant 0 : index
    %4 = vector.load %arg3[%c0_3, %c0_4] : memref<1x512xf32, #tpu.memory_space<vmem>>, vector<1x512xf32>
    %5 = vector.broadcast %4 : vector<1x512xf32> to vector<2x512xf32>
    %6 = arith.addf %3, %5 : vector<2x512xf32>
    %cst_5 = arith.constant 0.000000e+00 : f32
    %7 = vector.broadcast %cst_5 : f32 to vector<2x512xf32>
    %8 = arith.maximumf %6, %7 : vector<2x512xf32>
    %9 = arith.truncf %8 : vector<2x512xf32> to vector<2x512xbf16>
    %c0_6 = arith.constant 0 : index
    %c0_7 = arith.constant 0 : index
    %10 = vector.load %arg4[%c0_6, %c0_7] : memref<512x10xbf16, #tpu.memory_space<vmem>>, vector<512x10xbf16>
    %cst_8 = arith.constant dense<0.000000e+00> : vector<2x10xf32>
    %11 = tpu.matmul %9, %10, %cst_8 {dimension_numbers = #tpu.dot_dimension_numbers<[1], [0], [0], [1], [0, 0, 1, 1], [], []>} : vector<2x512xbf16>, vector<512x10xbf16>, vector<2x10xf32> -> vector<2x10xf32>
    %c0_9 = arith.constant 0 : index
    %c0_10 = arith.constant 0 : index
    %12 = vector.load %arg5[%c0_9, %c0_10] : memref<1x10xf32, #tpu.memory_space<vmem>>, vector<1x10xf32>
    %13 = vector.broadcast %12 : vector<1x10xf32> to vector<2x10xf32>
    %14 = arith.addf %11, %13 : vector<2x10xf32>
    %c0_11 = arith.constant 0 : index
    %c0_12 = arith.constant 0 : index
    %15 = vector.load %arg6[%c0_11, %c0_12] : memref<2x10xf32, #tpu.memory_space<vmem>>, vector<2x10xf32>
    tpu.vector_store %arg6[%c0_11, %c0_12], %14 {strides = array<i32>} : memref<2x10xf32, #tpu.memory_space<vmem>>, vector<2x10xf32>,
    return
  }
  func.func @transform_0(%arg0: i32) -> (i32, i32) {
    %c0_i32 = arith.constant 0 : i32
    %c0_i32_0 = arith.constant 0 : i32
    return %arg0, %c0_i32 : i32, i32
  }
  func.func @transform_1(%arg0: i32) -> (i32, i32) {
    %c0_i32 = arith.constant 0 : i32
    %c0_i32_0 = arith.constant 0 : i32
    %c0_i32_1 = arith.constant 0 : i32
    return %c0_i32, %c0_i32_0 : i32, i32
  }
  func.func @transform_2(%arg0: i32) -> (i32, i32) {
    %c0_i32 = arith.constant 0 : i32
    %c0_i32_0 = arith.constant 0 : i32
    %c0_i32_1 = arith.constant 0 : i32
    return %c0_i32, %c0_i32_0 : i32, i32
  }
  func.func @transform_3(%arg0: i32) -> (i32, i32) {
    %c0_i32 = arith.constant 0 : i32
    %c0_i32_0 = arith.constant 0 : i32
    %c0_i32_1 = arith.constant 0 : i32
    return %c0_i32, %c0_i32_0 : i32, i32
  }
  func.func @transform_4(%arg0: i32) -> (i32, i32) {
    %c0_i32 = arith.constant 0 : i32
    %c0_i32_0 = arith.constant 0 : i32
    %c0_i32_1 = arith.constant 0 : i32
    return %c0_i32, %c0_i32_0 : i32, i32
  }
  func.func @transform_5(%arg0: i32) -> (i32, i32) {
    %c0_i32 = arith.constant 0 : i32
    %c0_i32_0 = arith.constant 0 : i32
    return %arg0, %c0_i32 : i32, i32
  }
}

</mosaic_0001>

<bundles_post_ra>
// kernel: forward.3
= control target key start
LH: loop header
LB: loop body
LE: loop exit
PB: predicated region body
PF: predicated region fallthrough
CT: control target
= control target key end

     0   :  { %s2744_s12 = smov 0   ;;  %s4024_s0 = inlined_call_operand.vmem [shape: f32[2,1032,1], index: 0, kind: input, shape index: {}]   ;;  %s4025_s1 = inlined_call_operand.vmem [shape: f32[25,1,16], index: 1, kind: input, shape index: {}]   ;;  %s4026_s2 = inlined_call_operand.vmem [shape: f32[1,16], index: 2, kind: input, shape index: {}]   ;;  %s4027_s3 = inlined_call_operand.vmem [shape: f32[2,328,16], index: 3, kind: output, shape index: {}]  }
   0x1 LB: > { %s2388_s13 = sadd.s32 4294967295, %s2716_s12   ;;  %p2392_p0 = scmp.ge.s32.totalorder %s2716_s12, 1  ;;  %s2716_s12 = sphi %s2744_s12, %s13_s12  }
   0x2   : > { %p137_p1 = scmp.lt.s32.totalorder %s2716_s12, 3 }
   0x4   : > { %p138_p2 = pnand %p2392_p0, %p137_p1 }
   0x5   : > { %p161_p3 = scmp.lt.s32.totalorder (!%p138_p2), %s2388_s13, 1  ;;  %s2995_s23 = smov (!%p138_p2), 0  }
   0x6   : > { %141 = sbr.rel (%p138_p2) target bundleno = 782 (0x30e), region = 32 }
   0xb   : > { %vm171_vm0 = vcmask 130048   ;;  %v2755_v0 = vld [vmem:[%s4025_s1] ss:$0 sm:$0xff]  ;;  %v239_v1 = vlaneseq  ;;  %v2760_v2 = vld [vmem:[%s4025_s1 + $0x1] ss:$0 sm:$0xff]  ;;  %s4248_s13 = smov (!%p161_p3, %s2388_s13), 1 }
   0xc   : > { %4073 = vst [vmem:[#allocation2_spill] sm:$0xff] %v2755_v0  ;;  %4074 = vst [vmem:[#allocation3_spill] sm:$0xff] %v2760_v2  ;;  %v2765_v3 = vld [vmem:[%s4025_s1 + $0x2] ss:$0 sm:$0xff]  ;;  %v2770_v4 = vld [vmem:[%s4025_s1 + $0x3] ss:$0 sm:$0xff] }
   0xd   : > { %4075 = vst [vmem:[#allocation4_spill] sm:$0xff] %v2765_v3  ;;  %4076 = vst [vmem:[#allocation5_spill] sm:$0xff] %v2770_v4  ;;  %v2775_v5 = vld [vmem:[%s4025_s1 + $0x4] ss:$0 sm:$0xff]  ;;  %v2780_v6 = vld [vmem:[%s4025_s1 + $0x5] ss:$0 sm:$0xff] }
   0xe   : > { %4077 = vst [vmem:[#allocation6_spill] sm:$0xff] %v2775_v5  ;;  %4078 = vst [vmem:[#allocation7_spill] sm:$0xff] %v2780_v6  ;;  %v2782_v7 = vshrl.u32 %v239_v1, 7  ;;  %v2787_v8 = vld [vmem:[%s4025_s1 + $0x6] ss:$0 sm:$0xff]  ;;  %s2684_s5 = smul.u32 1032, %s4248_s13 }
   0xf   : > { %4079 = vst [vmem:[#allocation8_spill] sm:$0xff] %v2787_v8  ;;  %v2792_v9 = vld [vmem:[%s4025_s1 + $0x7] ss:$0 sm:$0xff]  ;;  %v2797_v10 = vld [vmem:[%s4025_s1 + $0x8] ss:$0 sm:$0xff]  ;;  %s2685_s10 = smul.u32 328, %s4248_s13 }
  0x10   : > { %4080 = vst [vmem:[#allocation9_spill] sm:$0xff] %v2792_v9  ;;  %4081 = vst [vmem:[#allocation10_spill] sm:$0xff] %v2797_v10  ;;  %v2802_v11 = vld [vmem:[%s4025_s1 + $0x9] ss:$0 sm:$0xff]  ;;  %v2807_v12 = vld [vmem:[%s4025_s1 + $0xa] ss:$0 sm:$0xff]  ;;  %s2827_s19 = scalar_lea.vmem %s4024_s0, %s2684_s5 }
  0x11   : > { %4082 = vst [vmem:[#allocation11_spill] sm:$0xff] %v2802_v11  ;;  %4083 = vst [vmem:[#allocation12_spill] sm:$0xff] %v2807_v12  ;;  %v2810_v13 = vadd.s32 8, %v2782_v7  ;;  %v2815_v14 = vld [vmem:[%s4025_s1 + $0xb] ss:$0 sm:$0xff]  ;;  %v2822_v16 = vand.u32 127, %v239_v1  ;;  %s2847_s27 = scalar_lea.vmem %s4027_s3, %s2685_s10 }
  0x12   : > { %4084 = vst [vmem:[#allocation13_spill] sm:$0xff] %v2815_v14  ;;  %v2820_v15 = vld [vmem:[%s4025_s1 + $0xc] ss:$0 sm:$0xff]  ;;  %v2832_v17 = vld [vmem:[%s4025_s1 + $0xd] ss:$0 sm:$0xff]  ;;  %v2722_v23 = vmov 0.0  }
  0x13   : > { %4085 = vst [vmem:[#allocation14_spill] sm:$0xff] %v2820_v15  ;;  %4086 = vst [vmem:[#allocation15_spill] sm:$0xff] %v2832_v17  ;;  %v2837_v18 = vld [vmem:[%s4025_s1 + $0xe] ss:$0 sm:$0xff]  ;;  %v2842_v19 = vld [vmem:[%s4025_s1 + $0xf] ss:$0 sm:$0xff] }
  0x14   : > { %4087 = vst [vmem:[#allocation16_spill] sm:$0xff] %v2837_v18  ;;  %4088 = vst [vmem:[#allocation17_spill] sm:$0xff] %v2842_v19  ;;  %v2852_v20 = vld [vmem:[%s4025_s1 + $0x10] ss:$0 sm:$0xff]  ;;  %v2857_v21 = vld [vmem:[%s4025_s1 + $0x11] ss:$0 sm:$0xff] }
  0x15   : > { %4089 = vst [vmem:[#allocation18_spill] sm:$0xff] %v2852_v20  ;;  %4090 = vst [vmem:[#allocation19_spill] sm:$0xff] %v2857_v21  ;;  %v2862_v22 = vld [vmem:[%s4025_s1 + $0x12] ss:$0 sm:$0xff]  ;;  %v2949_v24 = vld [vmem:[%s4025_s1 + $0x13] ss:$0 sm:$0xff] }
  0x16   : > { %4091 = vst [vmem:[#allocation20_spill] sm:$0xff] %v2862_v22  ;;  %172 = vst.msk [vmem:[%s2847_s27] sm:$0xff] %vm171_vm0, %v2722_v23  ;;  %v2954_v25 = vld [vmem:[%s4025_s1 + $0x14] ss:$0 sm:$0xff]  ;;  %v2959_v26 = vld [vmem:[%s4025_s1 + $0x15] ss:$0 sm:$0xff] }
  0x17   : > { %173 = vst.msk [vmem:[%s2847_s27 + $0x8] sm:$0xff] %vm171_vm0, %v2722_v23  ;;  %174 = vst.msk [vmem:[%s2847_s27 + $0x10] sm:$0xff] %vm171_vm0, %v2722_v23  ;;  %v2964_v27 = vld [vmem:[%s4025_s1 + $0x16] ss:$0 sm:$0xff]  ;;  %v2969_v28 = vld [vmem:[%s4025_s1 + $0x17] ss:$0 sm:$0xff] }
  0x18   : > { %175 = vst.msk [vmem:[%s2847_s27 + $0x18] sm:$0xff] %vm171_vm0, %v2722_v23  ;;  %176 = vst.msk [vmem:[%s2847_s27 + $0x20] sm:$0xff] %vm171_vm0, %v2722_v23  ;;  %v2974_v29 = vld [vmem:[%s4025_s1 + $0x18] ss:$0 sm:$0xff]  ;;  %v2979_v30 = vld [vmem:[%s4026_s2] ss:$0 sm:$0xff] }
  0x19   : > { %177 = vst.msk [vmem:[%s2847_s27 + $0x28] sm:$0xff] %vm171_vm0, %v2722_v23  ;;  %178 = vst.msk [vmem:[%s2847_s27 + $0x30] sm:$0xff] %vm171_vm0, %v2722_v23  ;;  %v244_v31 = vmul.u32 2, %v2782_v7  ;;  %v245_v32 = vmul.u32 2, %v2810_v13 }
  0x1a   : > { %179 = vst.msk [vmem:[%s2847_s27 + $0x38] sm:$0xff] %vm171_vm0, %v2722_v23  ;;  %180 = vst.msk [vmem:[%s2847_s27 + $0x40] sm:$0xff] %vm171_vm0, %v2722_v23 }
  0x1b   : > { %181 = vst.msk [vmem:[%s2847_s27 + $0x48] sm:$0xff] %vm171_vm0, %v2722_v23  ;;  %182 = vst.msk [vmem:[%s2847_s27 + $0x50] sm:$0xff] %vm171_vm0, %v2722_v23  ;;  %vm246_vm1 = vcmp.eq.s32.totalorder %v2822_v16, %v244_v31  ;;  %vm247_vm2 = vcmp.eq.s32.totalorder %v2822_v16, %v245_v32  ;;  %v252_v33 = vadd.s32 1, %v244_v31  ;;  %v253_v34 = vadd.s32 1, %v245_v32 }
  0x1c   : > { %183 = vst.msk [vmem:[%s2847_s27 + $0x58] sm:$0xff] %vm171_vm0, %v2722_v23  ;;  %184 = vst.msk [vmem:[%s2847_s27 + $0x60] sm:$0xff] %vm171_vm0, %v2722_v23  ;;  %v2985_v35 = vsel %vm246_vm1, 1.0, %v2722_v23  ;;  %v2987_v36 = vsel %vm247_vm2, 1.0, %v2722_v23 }
  0x1d   : > { %185 = vst.msk [vmem:[%s2847_s27 + $0x68] sm:$0xff] %vm171_vm0, %v2722_v23  ;;  %186 = vst.msk [vmem:[%s2847_s27 + $0x70] sm:$0xff] %vm171_vm0, %v2722_v23  ;;  %vm254_vm3 = vcmp.eq.s32.totalorder %v2822_v16, %v252_v33  ;;  %vm255_vm4 = vcmp.eq.s32.totalorder %v2822_v16, %v253_v34 }
  0x1e   : > { %187 = vst.msk [vmem:[%s2847_s27 + $0x78] sm:$0xff] %vm171_vm0, %v2722_v23  ;;  %188 = vst.msk [vmem:[%s2847_s27 + $0x80] sm:$0xff] %vm171_vm0, %v2722_v23  ;;  %v2991_v37 = vsel %vm254_vm3, 1.0, %v2722_v23  ;;  %v2993_v38 = vsel %vm255_vm4, 1.0, %v2722_v23 }
  0x1f   : > { %189 = vst.msk [vmem:[%s2847_s27 + $0x88] sm:$0xff] %vm171_vm0, %v2722_v23  ;;  %190 = vst.msk [vmem:[%s2847_s27 + $0x90] sm:$0xff] %vm171_vm0, %v2722_v23 }
  0x20   : > { %191 = vst.msk [vmem:[%s2847_s27 + $0x98] sm:$0xff] %vm171_vm0, %v2722_v23  ;;  %192 = vst.msk [vmem:[%s2847_s27 + $0xa0] sm:$0xff] %vm171_vm0, %v2722_v23 }
  0x21   : > { %193 = vst.msk [vmem:[%s2847_s27 + $0xa8] sm:$0xff] %vm171_vm0, %v2722_v23  ;;  %194 = vst.msk [vmem:[%s2847_s27 + $0xb0] sm:$0xff] %vm171_vm0, %v2722_v23 }
  0x22   : > { %195 = vst.msk [vmem:[%s2847_s27 + $0xb8] sm:$0xff] %vm171_vm0, %v2722_v23  ;;  %196 = vst.msk [vmem:[%s2847_s27 + $0xc0] sm:$0xff] %vm171_vm0, %v2722_v23 }
  0x23   : > { %197 = vst.msk [vmem:[%s2847_s27 + $0xc8] sm:$0xff] %vm171_vm0, %v2722_v23  ;;  %198 = vst.msk [vmem:[%s2847_s27 + $0xd0] sm:$0xff] %vm171_vm0, %v2722_v23 }
  0x24   : > { %199 = vst.msk [vmem:[%s2847_s27 + $0xd8] sm:$0xff] %vm171_vm0, %v2722_v23  ;;  %200 = vst.msk [vmem:[%s2847_s27 + $0xe0] sm:$0xff] %vm171_vm0, %v2722_v23 }
  0x25   : > { %201 = vst.msk [vmem:[%s2847_s27 + $0xe8] sm:$0xff] %vm171_vm0, %v2722_v23  ;;  %202 = vst.msk [vmem:[%s2847_s27 + $0xf0] sm:$0xff] %vm171_vm0, %v2722_v23 }
  0x26   : > { %203 = vst.msk [vmem:[%s2847_s27 + $0xf8] sm:$0xff] %vm171_vm0, %v2722_v23  ;;  %204 = vst.msk [vmem:[%s2847_s27 + $0x100] sm:$0xff] %vm171_vm0, %v2722_v23 }
  0x27   : > { %205 = vst.msk [vmem:[%s2847_s27 + $0x108] sm:$0xff] %vm171_vm0, %v2722_v23  ;;  %206 = vst.msk [vmem:[%s2847_s27 + $0x110] sm:$0xff] %vm171_vm0, %v2722_v23 }
  0x28   : > { %207 = vst.msk [vmem:[%s2847_s27 + $0x118] sm:$0xff] %vm171_vm0, %v2722_v23  ;;  %208 = vst.msk [vmem:[%s2847_s27 + $0x120] sm:$0xff] %vm171_vm0, %v2722_v23 }
  0x29   : > { %209 = vst.msk [vmem:[%s2847_s27 + $0x128] sm:$0xff] %vm171_vm0, %v2722_v23  ;;  %210 = vst.msk [vmem:[%s2847_s27 + $0x130] sm:$0xff] %vm171_vm0, %v2722_v23 }
  0x2a   : > { %211 = vst.msk [vmem:[%s2847_s27 + $0x138] sm:$0xff] %vm171_vm0, %v2722_v23  ;;  %212 = vst.msk [vmem:[%s2847_s27 + $0x140] sm:$0xff] %vm171_vm0, %v2722_v23 }
  0x2b   : > { %4092 = vst [vmem:[#allocation21_spill] sm:$0xff] %v2949_v24  ;;  %4093 = vst [vmem:[#allocation22_spill] sm:$0xff] %v2954_v25 }
  0x2c   : > { %4094 = vst [vmem:[#allocation23_spill] sm:$0xff] %v2959_v26  ;;  %4095 = vst [vmem:[#allocation24_spill] sm:$0xff] %v2964_v27 }
  0x2d   : > { %4096 = vst [vmem:[#allocation25_spill] sm:$0xff] %v2969_v28  ;;  %4097 = vst [vmem:[#allocation26_spill] sm:$0xff] %v2974_v29 }
  0x2e   : > { %4098 = vst [vmem:[#allocation27_spill] sm:$0xff] %v2979_v30  ;;  %4099 = vst [vmem:[#allocation28_spill] sm:$0xff] %v2985_v35 }
  0x2f   : > { %4100 = vst [vmem:[#allocation29_spill] sm:$0xff] %v2987_v36  ;;  %4101 = vst [vmem:[#allocation30_spill] sm:$0xff] %v2991_v37 }
  0x30   : > { %4102 = vst [vmem:[#allocation31_spill] sm:$0xff] %v2993_v38 }
  0x31 LB: >> { %v4103_v4 = vld [vmem:[#allocation5_spill] sm:$0xff]  ;;  %v4104_v3 = vld [vmem:[#allocation4_spill] sm:$0xff]  ;;  %v4105_v2 = vld [vmem:[#allocation3_spill] sm:$0xff]  ;;  %v2723_v39 = vmov 0   ;;  %s2399_s24 = sshll.u32 %s2720_s23, 6  ;;  %vm2070_vm5 = vcmask 261120   ;;  %s2720_s23 = sphi %s2995_s23, %s265_s23  }
  0x32   : >> { %v4106_v0 = vld [vmem:[#allocation2_spill] sm:$0xff]  ;;  %2705 = vset.pattern.permute.xlu1 %v2723_v39  ;;  %2704 = vset.pattern.permute.xlu0 %v2723_v39  ;;  %s3002_s25 = scalar_lea.vmem %s2827_s19, %s2399_s24  ;;  %s2356_s26 = smul.u32 18, %s2720_s23  ;;  %vm2249_vm6 = vcmask 128000  }
  0x33   : >> { %v270_v40 = vld [vmem:[%s3002_s25 + $0x10] sm:$0xff]  ;;  %v268_v41 = vld [vmem:[%s3002_s25] sm:$0xff]  ;;  %v271_v42 = vld [vmem:[%s3002_s25 + $0x18] sm:$0xff]  ;;  %s265_s23 = sadd.s32 1, %s2720_s23  }
  0x34   : >> { %288 = vperm.xlu1 %2705, %v270_v40   ;;  %278 = vperm.xlu0 %2704, %v268_v41   ;;  %v269_v43 = vld [vmem:[%s3002_s25 + $0x8] sm:$0xff]  ;;  %v3012_v45 = vld [vmem:[%s3002_s25 + $0x20] sm:$0xff]  ;;  %v3017_v46 = vld [vmem:[%s3002_s25 + $0x38] sm:$0xff]  ;;  %s2357_s28 = scalar_lea.vmem %s2847_s27, %s2356_s26  ;;  %p262_p4 = scmp.ge.s32.totalorder %s265_s23, 14  }
  0x35   : >> { %v3009_v44 = vld [vmem:[%s3002_s25 + $0x28] sm:$0xff]  ;;  %v3020_v47 = vld [vmem:[%s3002_s25 + $0x30] sm:$0xff]  ;;  %v2405_v50 = vld [vmem:[%s3002_s25 + $0x19] sm:$0xff] }
  0x36   : >> { %v2403_v48 = vld [vmem:[%s3002_s25 + $0x9] sm:$0xff]  ;;  %v2402_v49 = vld [vmem:[%s3002_s25 + $0x1] sm:$0xff]  ;;  %v2404_v51 = vld [vmem:[%s3002_s25 + $0x11] sm:$0xff] }
  0x37   : >> { %v3029_v52 = vld [vmem:[%s3002_s25 + $0x29] sm:$0xff]  ;;  %v3032_v53 = vld [vmem:[%s3002_s25 + $0x21] sm:$0xff]  ;;  %v3037_v54 = vld [vmem:[%s3002_s25 + $0x39] sm:$0xff] }
  0x38   : >> { %293 = vperm.xlu1 %2705, %v271_v42   ;;  %283 = vperm.xlu0 %2704, %v269_v43   ;;  %v3040_v55 = vld [vmem:[%s3002_s25 + $0x31] sm:$0xff]  ;;  %v2412_v57 = vld [vmem:[%s3002_s25 + $0x2] sm:$0xff]  ;;  %v2415_v58 = vld [vmem:[%s3002_s25 + $0x1a] sm:$0xff] }
  0x39   : >> { %v2413_v56 = vld [vmem:[%s3002_s25 + $0xa] sm:$0xff]  ;;  %v2414_v59 = vld [vmem:[%s3002_s25 + $0x12] sm:$0xff]  ;;  %v3052_v61 = vld [vmem:[%s3002_s25 + $0x22] sm:$0xff] }
  0x3a   : >> { %v3049_v60 = vld [vmem:[%s3002_s25 + $0x2a] sm:$0xff]  ;;  %v2419_v62 = vld [vmem:[%s3002_s25 + $0x3a] sm:$0xff]  ;;  %v2418_v63 = vld [vmem:[%s3002_s25 + $0x32] sm:$0xff] }
  0x3b   : >> { %v2423_v1 = vld [vmem:[%s3002_s25 + $0xb] sm:$0xff]  ;;  %v2422_v7 = vld [vmem:[%s3002_s25 + $0x3] sm:$0xff]  ;;  %v2425_v13 = vld [vmem:[%s3002_s25 + $0x1b] sm:$0xff] }
  0x3c   : >> { %303 = vperm.xlu1 %2705, %v3009_v44   ;;  %298 = vperm.xlu0 %2704, %v3012_v45   ;;  %v2424_v16 = vld [vmem:[%s3002_s25 + $0x13] sm:$0xff]  ;;  %v3063_v23 = vld [vmem:[%s3002_s25 + $0x2b] sm:$0xff]  ;;  %v3066_v31 = vld [vmem:[%s3002_s25 + $0x23] sm:$0xff] }
  0x3d   : >> { %v3071_v32 = vld [vmem:[%s3002_s25 + $0x3b] sm:$0xff]  ;;  %v3074_v33 = vld [vmem:[%s3002_s25 + $0x33] sm:$0xff]  ;;  %v2432_v39 = vld [vmem:[%s3002_s25 + $0x4] sm:$0xff] }
  0x3e   : >> { %v2433_v34 = vld [vmem:[%s3002_s25 + $0xc] sm:$0xff]  ;;  %v2435_v40 = vld [vmem:[%s3002_s25 + $0x1c] sm:$0xff]  ;;  %v2434_v41 = vld [vmem:[%s3002_s25 + $0x14] sm:$0xff] }
  0x3f   : >> { %v3083_v42 = vld [vmem:[%s3002_s25 + $0x2c] sm:$0xff]  ;;  %v3086_v43 = vld [vmem:[%s3002_s25 + $0x24] sm:$0xff] }
  0x40   : >> { %313 = vperm.xlu1 %2705, %v3017_v46   ;;  %308 = vperm.xlu0 %2704, %v3020_v47   ;;  %v3209_v30 = vld [vmem:[%s3002_s25 + $0x4c] sm:$0xff]  ;;  %v3212_v38 = vld [vmem:[%s3002_s25 + $0x44] sm:$0xff] }
  0x41   : >> { %v3245_v24 = vld [vmem:[%s3002_s25 + $0x68] sm:$0xff]  ;;  %v3248_v22 = vld [vmem:[%s3002_s25 + $0x60] sm:$0xff] }
  0x42   : >> { %v3281_v17 = vld [vmem:[%s3002_s25 + $0x69] sm:$0xff]  ;;  %v3284_v15 = vld [vmem:[%s3002_s25 + $0x61] sm:$0xff] }
  0x43   : >> { %v3317_v6 = vld [vmem:[%s3002_s25 + $0x6a] sm:$0xff] }
  0x44   : >> { %355 = vperm.xlu1 %2705, %v2403_v48   ;;  %350 = vperm.xlu0 %2704, %v2402_v49   ;;  %v3091_v48 = vld [vmem:[%s3002_s25 + $0x3c] sm:$0xff]  ;;  %v3094_v49 = vld [vmem:[%s3002_s25 + $0x34] sm:$0xff] }
  0x48   : >> { %365 = vperm.xlu1 %2705, %v2405_v50   ;;  %360 = vperm.xlu0 %2704, %v2404_v51   ;;  %v3103_v50 = vld [vmem:[%s3002_s25 + $0x48] sm:$0xff]  ;;  %v3106_v51 = vld [vmem:[%s3002_s25 + $0x40] sm:$0xff] }
  0x4c   : >> { %375 = vperm.xlu1 %2705, %v3029_v52   ;;  %370 = vperm.xlu0 %2704, %v3032_v53  }
  0x50   : >> { %385 = vperm.xlu1 %2705, %v3037_v54   ;;  %380 = vperm.xlu0 %2704, %v3040_v55  }
  0x54   : >> { %427 = vperm.xlu1 %2705, %v2413_v56   ;;  %422 = vperm.xlu0 %2704, %v2412_v57   ;;  %v3111_v56 = vld [vmem:[%s3002_s25 + $0x58] sm:$0xff] }
  0x55   : >> { %v3152_v57 = vld [vmem:[%s3002_s25 + $0x52] sm:$0xff] }
  0x58   : >> { %437 = vperm.xlu1 %2705, %v2415_v58   ;;  %432 = vperm.xlu0 %2704, %v2414_v59  }
  0x5c   : >> { %447 = vperm.xlu1 %2705, %v3049_v60   ;;  %442 = vperm.xlu0 %2704, %v3052_v61  }
  0x60   : >> { %457 = vperm.xlu1 %2705, %v2419_v62   ;;  %452 = vperm.xlu0 %2704, %v2418_v63  }
  0x64   : >> { %499 = vperm.xlu1 %2705, %v2423_v1   ;;  %494 = vperm.xlu0 %2704, %v2422_v7   ;;  %v3173_v1 = vld [vmem:[%s3002_s25 + $0x4b] sm:$0xff]  ;;  %v3176_v7 = vld [vmem:[%s3002_s25 + $0x43] sm:$0xff] }
  0x68   : >> { %509 = vperm.xlu1 %2705, %v2425_v13   ;;  %504 = vperm.xlu0 %2704, %v2424_v16  }
  0x6c   : >> { %519 = vperm.xlu1 %2705, %v3063_v23   ;;  %514 = vperm.xlu0 %2704, %v3066_v31  }
  0x70   : >> { %529 = vperm.xlu1 %2705, %v3071_v32   ;;  %524 = vperm.xlu0 %2704, %v3074_v33  }
  0x74   : >> { %571 = vperm.xlu1 %2705, %v2433_v34   ;;  %566 = vperm.xlu0 %2704, %v2432_v39  }
  0x78   : >> { %581 = vperm.xlu1 %2705, %v2435_v40   ;;  %576 = vperm.xlu0 %2704, %v2434_v41  }
  0x7c   : >> { %591 = vperm.xlu1 %2705, %v3083_v42   ;;  %586 = vperm.xlu0 %2704, %v3086_v43  }
  0x80   : >> { %601 = vperm.xlu1 %2705, %v3091_v48   ;;  %596 = vperm.xlu0 %2704, %v3094_v49  }
  0x84   : >> { %643 = vperm.xlu1 %2705, %v3009_v44   ;;  %638 = vperm.xlu0 %2704, %v3012_v45   ;;  %v3114_v44 = vld [vmem:[%s3002_s25 + $0x50] sm:$0xff] }
  0x85   : >> { %v3123_v45 = vld [vmem:[%s3002_s25 + $0x49] sm:$0xff] }
  0x88   : >> { %653 = vperm.xlu1 %2705, %v3017_v46   ;;  %648 = vperm.xlu0 %2704, %v3020_v47   ;;  %v3126_v46 = vld [vmem:[%s3002_s25 + $0x41] sm:$0xff]  ;;  %v3131_v47 = vld [vmem:[%s3002_s25 + $0x59] sm:$0xff] }
  0x8c   : >> { %663 = vperm.xlu1 %2705, %v3103_v50   ;;  %658 = vperm.xlu0 %2704, %v3106_v51  }
  0x90   : >> { %673 = vperm.xlu1 %2705, %v3111_v56   ;;  %668 = vperm.xlu0 %2704, %v3114_v44  }
  0x94   : >> { %715 = vperm.xlu1 %2705, %v3029_v52   ;;  %710 = vperm.xlu0 %2704, %v3032_v53   ;;  %v3134_v52 = vld [vmem:[%s3002_s25 + $0x51] sm:$0xff] }
  0x95   : >> { %v3141_v53 = vld [vmem:[%s3002_s25 + $0x4a] sm:$0xff] }
  0x98   : >> { %725 = vperm.xlu1 %2705, %v3037_v54   ;;  %720 = vperm.xlu0 %2704, %v3040_v55   ;;  %v3144_v54 = vld [vmem:[%s3002_s25 + $0x42] sm:$0xff]  ;;  %v3149_v55 = vld [vmem:[%s3002_s25 + $0x5a] sm:$0xff] }
  0x9c   : >> { %735 = vperm.xlu1 %2705, %v3123_v45   ;;  %730 = vperm.xlu0 %2704, %v3126_v46  }
  0xa0   : >> { %745 = vperm.xlu1 %2705, %v3131_v47   ;;  %740 = vperm.xlu0 %2704, %v3134_v52  }
  0xa4   : >> { %787 = vperm.xlu1 %2705, %v3049_v60   ;;  %782 = vperm.xlu0 %2704, %v3052_v61  }
  0xa8   : >> { %797 = vperm.xlu1 %2705, %v2419_v62   ;;  %792 = vperm.xlu0 %2704, %v2418_v63  }
  0xac   : >> { %807 = vperm.xlu1 %2705, %v3141_v53   ;;  %802 = vperm.xlu0 %2704, %v3144_v54  }
  0xaf   : >> { %v3154_v58 = vpop.permute.xlu1 %288  ;;  %v3156_v59 = vpop.permute.xlu0 %278 }
  0xb0   : >> { %817 = vperm.xlu1 %2705, %v3149_v55   ;;  %812 = vperm.xlu0 %2704, %v3152_v57  }
  0xb3   : >> { %v3160_v60 = vpop.permute.xlu1 %293  ;;  %v3162_v61 = vpop.permute.xlu0 %283 }
  0xb4   : >> { %859 = vperm.xlu1 %2705, %v3063_v23   ;;  %854 = vperm.xlu0 %2704, %v3066_v31   ;;  %v3185_v23 = vld [vmem:[%s3002_s25 + $0x5b] sm:$0xff]  ;;  %v3188_v31 = vld [vmem:[%s3002_s25 + $0x53] sm:$0xff] }
  0xb7   : >> { %v3166_v62 = vpop.permute.xlu1 %303  ;;  %v3168_v63 = vpop.permute.xlu0 %298 }
  0xb8   : >> { %869 = vperm.xlu1 %2705, %v3071_v32   ;;  %864 = vperm.xlu0 %2704, %v3074_v33  }
  0xbb   : >> { %v3178_v13 = vpop.permute.xlu1 %313  ;;  %v3180_v16 = vpop.permute.xlu0 %308 }
  0xbc   : >> { %879 = vperm.xlu1 %2705, %v3173_v1   ;;  %874 = vperm.xlu0 %2704, %v3176_v7  }
  0xbf   : >> { %v3190_v32 = vpop.permute.xlu1 %355  ;;  %v3192_v33 = vpop.permute.xlu0 %350 }
  0xc0   : >> { %889 = vperm.xlu1 %2705, %v3185_v23   ;;  %884 = vperm.xlu0 %2704, %v3188_v31  }
  0xc3   : >> { %v3196_v34 = vpop.permute.xlu1 %365  ;;  %v3198_v39 = vpop.permute.xlu0 %360 }
  0xc4   : >> { %931 = vperm.xlu1 %2705, %v3083_v42   ;;  %926 = vperm.xlu0 %2704, %v3086_v43   ;;  %v3221_v42 = vld [vmem:[%s3002_s25 + $0x5c] sm:$0xff]  ;;  %v3224_v43 = vld [vmem:[%s3002_s25 + $0x54] sm:$0xff] }
  0xc7   : >> { %v3202_v40 = vpop.permute.xlu1 %375  ;;  %v3204_v41 = vpop.permute.xlu0 %370 }
  0xc8   : >> { %941 = vperm.xlu1 %2705, %v3091_v48   ;;  %936 = vperm.xlu0 %2704, %v3094_v49  }
  0xcb   : >> { %v3214_v36 = vpop.permute.xlu1 %385  ;;  %v3216_v29 = vpop.permute.xlu0 %380 }
  0xcc   : >> { %951 = vperm.xlu1 %2705, %v3209_v30   ;;  %946 = vperm.xlu0 %2704, %v3212_v38  }
  0xcf   : >> { %v3226_v48 = vpop.permute.xlu1 %427  ;;  %v3228_v49 = vpop.permute.xlu0 %422 }
  0xd0   : >> { %961 = vperm.xlu1 %2705, %v3221_v42   ;;  %956 = vperm.xlu0 %2704, %v3224_v43  }
  0xd3   : >> { %v3232_v28 = vpop.permute.xlu1 %437  ;;  %v3234_v27 = vpop.permute.xlu0 %432 }
  0xd4   : >> { %1003 = vperm.xlu1 %2705, %v3103_v50   ;;  %998 = vperm.xlu0 %2704, %v3106_v51   ;;  %v3257_v50 = vld [vmem:[%s3002_s25 + $0x78] sm:$0xff]  ;;  %v3260_v51 = vld [vmem:[%s3002_s25 + $0x70] sm:$0xff] }
  0xd7   : >> { %v3238_v26 = vpop.permute.xlu1 %447  ;;  %v3240_v25 = vpop.permute.xlu0 %442 }
  0xd8   : >> { %1013 = vperm.xlu1 %2705, %v3111_v56   ;;  %1008 = vperm.xlu0 %2704, %v3114_v44  }
  0xdb   : >> { %v3250_v37 = vpop.permute.xlu1 %457  ;;  %v3252_v35 = vpop.permute.xlu0 %452 }
  0xdc   : >> { %1023 = vperm.xlu1 %2705, %v3245_v24   ;;  %1018 = vperm.xlu0 %2704, %v3248_v22  }
  0xdf   : >> { %v3262_v56 = vpop.permute.xlu1 %499  ;;  %v3264_v44 = vpop.permute.xlu0 %494 }
  0xe0   : >> { %1033 = vperm.xlu1 %2705, %v3257_v50   ;;  %1028 = vperm.xlu0 %2704, %v3260_v51  }
  0xe3   : >> { %v3268_v21 = vpop.permute.xlu1 %509  ;;  %v3270_v20 = vpop.permute.xlu0 %504 }
  0xe4   : >> { %1075 = vperm.xlu1 %2705, %v3123_v45   ;;  %1070 = vperm.xlu0 %2704, %v3126_v46   ;;  %v3293_v45 = vld [vmem:[%s3002_s25 + $0x79] sm:$0xff]  ;;  %v3296_v46 = vld [vmem:[%s3002_s25 + $0x71] sm:$0xff] }
  0xe7   : >> { %v3274_v19 = vpop.permute.xlu1 %519  ;;  %v3276_v18 = vpop.permute.xlu0 %514 }
  0xe8   : >> { %1085 = vperm.xlu1 %2705, %v3131_v47   ;;  %1080 = vperm.xlu0 %2704, %v3134_v52  }
  0xeb   : >> { %v3286_v14 = vpop.permute.xlu1 %529  ;;  %v3288_v12 = vpop.permute.xlu0 %524 }
  0xec   : >> { %1095 = vperm.xlu1 %2705, %v3281_v17   ;;  %1090 = vperm.xlu0 %2704, %v3284_v15  }
  0xef   : >> { %v3298_v47 = vpop.permute.xlu1 %571  ;;  %v3300_v52 = vpop.permute.xlu0 %566 }
  0xf0   : >> { %4107 = vst [vmem:[#allocation32_spill] sm:$0xff] %v3300_v52  ;;  %1105 = vperm.xlu1 %2705, %v3293_v45   ;;  %1100 = vperm.xlu0 %2704, %v3296_v46   ;;  %v3320_v52 = vld [vmem:[%s3002_s25 + $0x62] sm:$0xff] }
  0xf3   : >> { %v3304_v11 = vpop.permute.xlu1 %581  ;;  %v3306_v10 = vpop.permute.xlu0 %576 }
  0xf4   : >> { %4108 = vst [vmem:[#allocation33_spill] sm:$0xff] %v3304_v11  ;;  %4109 = vst [vmem:[#allocation34_spill] sm:$0xff] %v3306_v10  ;;  %1147 = vperm.xlu1 %2705, %v3141_v53   ;;  %1142 = vperm.xlu0 %2704, %v3144_v54   ;;  %v3329_v53 = vld [vmem:[%s3002_s25 + $0x7a] sm:$0xff]  ;;  %v3332_v54 = vld [vmem:[%s3002_s25 + $0x72] sm:$0xff] }
  0xf7   : >> { %v3310_v9 = vpop.permute.xlu1 %591  ;;  %v3312_v8 = vpop.permute.xlu0 %586 }
  0xf8   : >> { %4110 = vst [vmem:[#allocation35_spill] sm:$0xff] %v3310_v9  ;;  %4111 = vst [vmem:[#allocation36_spill] sm:$0xff] %v3312_v8  ;;  %1157 = vperm.xlu1 %2705, %v3149_v55   ;;  %1152 = vperm.xlu0 %2704, %v3152_v57  }
  0xfb   : >> { %v3322_v5 = vpop.permute.xlu1 %601  ;;  %v3324_v11 = vpop.permute.xlu0 %596 }
  0xfc   : >> { %4112 = vst [vmem:[#allocation37_spill] sm:$0xff] %v3322_v5  ;;  %4113 = vst [vmem:[#allocation38_spill] sm:$0xff] %v3324_v11  ;;  %1167 = vperm.xlu1 %2705, %v3317_v6   ;;  %1162 = vperm.xlu0 %2704, %v3320_v52  }
  0xff   : >> { %v3334_v55 = vpop.permute.xlu1 %643  ;;  %v3336_v57 = vpop.permute.xlu0 %638 }
 0x100   : >> { %4114 = vst [vmem:[#allocation39_spill] sm:$0xff] %v3334_v55  ;;  %4115 = vst [vmem:[#allocation40_spill] sm:$0xff] %v3336_v57  ;;  %1177 = vperm.xlu1 %2705, %v3329_v53   ;;  %1172 = vperm.xlu0 %2704, %v3332_v54   ;;  %v3353_v57 = vld [vmem:[%s3002_s25 + $0x6b] sm:$0xff]  ;;  %v3356_v55 = vld [vmem:[%s3002_s25 + $0x63] sm:$0xff] }
 0x103   : >> { %v3340_v11 = vpop.permute.xlu1 %653  ;;  %v3342_v5 = vpop.permute.xlu0 %648 }
 0x104   : >> { %4116 = vst [vmem:[#allocation41_spill] sm:$0xff] %v3340_v11  ;;  %4117 = vst [vmem:[#allocation42_spill] sm:$0xff] %v3342_v5  ;;  %1219 = vperm.xlu1 %2705, %v3173_v1   ;;  %1214 = vperm.xlu0 %2704, %v3176_v7   ;;  %v3365_v1 = vld [vmem:[%s3002_s25 + $0x7b] sm:$0xff]  ;;  %v3368_v7 = vld [vmem:[%s3002_s25 + $0x73] sm:$0xff] }
 0x107   : >> { %v3346_v8 = vpop.permute.xlu1 %663  ;;  %v3348_v9 = vpop.permute.xlu0 %658 }
 0x108   : >> { %4118 = vst [vmem:[#allocation43_spill] sm:$0xff] %v3346_v8  ;;  %4119 = vst [vmem:[#allocation44_spill] sm:$0xff] %v3348_v9  ;;  %1229 = vperm.xlu1 %2705, %v3185_v23   ;;  %1224 = vperm.xlu0 %2704, %v3188_v31  }
 0x10b   : >> { %v3358_v10 = vpop.permute.xlu1 %673  ;;  %v3360_v11 = vpop.permute.xlu0 %668 }
 0x10c   : >> { %4120 = vst [vmem:[#allocation45_spill] sm:$0xff] %v3358_v10  ;;  %4121 = vst [vmem:[#allocation46_spill] sm:$0xff] %v3360_v11  ;;  %1239 = vperm.xlu1 %2705, %v3353_v57   ;;  %1234 = vperm.xlu0 %2704, %v3356_v55  }
 0x10f   : >> { %v3370_v23 = vpop.permute.xlu1 %715  ;;  %v3372_v31 = vpop.permute.xlu0 %710 }
 0x110   : >> { %4122 = vst [vmem:[#allocation47_spill] sm:$0xff] %v3370_v23  ;;  %4123 = vst [vmem:[#allocation48_spill] sm:$0xff] %v3372_v31  ;;  %1249 = vperm.xlu1 %2705, %v3365_v1   ;;  %1244 = vperm.xlu0 %2704, %v3368_v7   ;;  %v3389_v31 = vld [vmem:[%s3002_s25 + $0x6c] sm:$0xff]  ;;  %v3392_v23 = vld [vmem:[%s3002_s25 + $0x64] sm:$0xff] }
 0x111   : >> { %4126 = vst [vmem:[#allocation51_spill] sm:$0xff] %v3392_v23 }
 0x113   : >> { %v3376_v11 = vpop.permute.xlu1 %725  ;;  %v3378_v10 = vpop.permute.xlu0 %720 }
 0x114   : >> { %4124 = vst [vmem:[#allocation49_spill] sm:$0xff] %v3376_v11  ;;  %1291 = vperm.xlu1 %2705, %v3209_v30   ;;  %1286 = vperm.xlu0 %2704, %v3212_v38   ;;  %v3401_v30 = vld [vmem:[%s3002_s25 + $0x7c] sm:$0xff]  ;;  %v3404_v38 = vld [vmem:[%s3002_s25 + $0x74] sm:$0xff] }
 0x117   : >> { %v3382_v9 = vpop.permute.xlu1 %735  ;;  %v3384_v8 = vpop.permute.xlu0 %730 }
 0x118   : >> { %4125 = vst [vmem:[#allocation50_spill] sm:$0xff] %v3384_v8  ;;  %1301 = vperm.xlu1 %2705, %v3221_v42   ;;  %1296 = vperm.xlu0 %2704, %v3224_v43   ;;  %v3428_v8 = vld [vmem:[%s3002_s25 + $0x80] sm:$0xff] }
 0x119   : >> { %4135 = vst [vmem:[#allocation60_spill] sm:$0xff] %v3428_v8 }
 0x11b   : >> { %v3394_v5 = vpop.permute.xlu1 %745  ;;  %v3396_v11 = vpop.permute.xlu0 %740 }
 0x11c   : >> { %4127 = vst [vmem:[#allocation52_spill] sm:$0xff] %v3394_v5  ;;  %4128 = vst [vmem:[#allocation53_spill] sm:$0xff] %v3396_v11  ;;  %1311 = vperm.xlu1 %2705, %v3389_v31   ;;  %1306 = vperm.xlu0 %2704, %v3392_v23  }
 0x11f   : >> { %v3406_v42 = vpop.permute.xlu1 %787  ;;  %v3408_v43 = vpop.permute.xlu0 %782 }
 0x120   : >> { %4129 = vst [vmem:[#allocation54_spill] sm:$0xff] %v3406_v42  ;;  %4130 = vst [vmem:[#allocation55_spill] sm:$0xff] %v3408_v43  ;;  %1321 = vperm.xlu1 %2705, %v3401_v30   ;;  %1316 = vperm.xlu0 %2704, %v3404_v38   ;;  %v3425_v43 = vld [vmem:[%s3002_s25 + $0x88] sm:$0xff] }
 0x121   : >> { %4134 = vst [vmem:[#allocation59_spill] sm:$0xff] %v3425_v43 }
 0x123   : >> { %v3412_v11 = vpop.permute.xlu1 %797  ;;  %v3414_v5 = vpop.permute.xlu0 %792 }
 0x124   : >> { %4131 = vst [vmem:[#allocation56_spill] sm:$0xff] %v3412_v11  ;;  %4132 = vst [vmem:[#allocation57_spill] sm:$0xff] %v3414_v5  ;;  %1363 = vperm.xlu1 %2705, %v3245_v24   ;;  %1358 = vperm.xlu0 %2704, %v3248_v22   ;;  %v3437_v22 = vld [vmem:[%s3002_s25 + $0x90] sm:$0xff]  ;;  %v3440_v24 = vld [vmem:[%s3002_s25 + $0x98] sm:$0xff] }
 0x127   : >> { %v3418_v23 = vpop.permute.xlu1 %807  ;;  %v3420_v42 = vpop.permute.xlu0 %802 }
 0x128   : >> { %4133 = vst [vmem:[#allocation58_spill] sm:$0xff] %v3420_v42  ;;  %1373 = vperm.xlu1 %2705, %v3257_v50   ;;  %1368 = vperm.xlu0 %2704, %v3260_v51   ;;  %v3467_v42 = vld [vmem:[%s3002_s25 + $0x9a] sm:$0xff] }
 0x129   : >> { %4145 = vst [vmem:[#allocation70_spill] sm:$0xff] %v3467_v42 }
 0x12b   : >> { %v3430_v11 = vpop.permute.xlu1 %817  ;;  %v3432_v5 = vpop.permute.xlu0 %812 }
 0x12c   : >> { %4136 = vst [vmem:[#allocation61_spill] sm:$0xff] %v3430_v11  ;;  %4137 = vst [vmem:[#allocation62_spill] sm:$0xff] %v3432_v5  ;;  %1383 = vperm.xlu1 %2705, %v3425_v43   ;;  %1378 = vperm.xlu0 %2704, %v3428_v8   ;;  %v3449_v11 = vld [vmem:[%s3002_s25 + $0x99] sm:$0xff]  ;;  %v3458_v8 = vld [vmem:[%s3002_s25 + $0x91] sm:$0xff] }
 0x12d   : >> { %4142 = vst [vmem:[#allocation67_spill] sm:$0xff] %v3458_v8 }
 0x12f   : >> { %v3442_v50 = vpop.permute.xlu1 %859  ;;  %v3444_v51 = vpop.permute.xlu0 %854 }
 0x130   : >> { %4138 = vst [vmem:[#allocation63_spill] sm:$0xff] %v3442_v50  ;;  %4139 = vst [vmem:[#allocation64_spill] sm:$0xff] %v3444_v51  ;;  %1388 = vperm.xlu1 %2705, %v3437_v22   ;;  %1393 = vperm.xlu0 %2704, %v3440_v24  }
 0x133   : >> { %v3451_v5 = vpop.permute.xlu1 %869  ;;  %v3453_v43 = vpop.permute.xlu0 %864 }
 0x134   : >> { %4140 = vst [vmem:[#allocation65_spill] sm:$0xff] %v3451_v5  ;;  %4141 = vst [vmem:[#allocation66_spill] sm:$0xff] %v3453_v43  ;;  %1465 = vperm.xlu1 %2705, %v3449_v11   ;;  %1445 = vperm.xlu0 %2704, %v3293_v45   ;;  %v3476_v45 = vld [vmem:[%s3002_s25 + $0x89] sm:$0xff] }
 0x135   : >> { %4147 = vst [vmem:[#allocation72_spill] sm:$0xff] %v3476_v45 }
 0x137   : >> { %v3460_v50 = vpop.permute.xlu1 %879  ;;  %v3462_v51 = vpop.permute.xlu0 %874 }
 0x138   : >> { %4143 = vst [vmem:[#allocation68_spill] sm:$0xff] %v3460_v50  ;;  %4144 = vst [vmem:[#allocation69_spill] sm:$0xff] %v3462_v51  ;;  %1460 = vperm.xlu1 %2705, %v3458_v8   ;;  %1440 = vperm.xlu0 %2704, %v3296_v46   ;;  %v3485_v46 = vld [vmem:[%s3002_s25 + $0x92] sm:$0xff] }
 0x139   : >> { %4149 = vst [vmem:[#allocation74_spill] sm:$0xff] %v3485_v46 }
 0x13b   : >> { %v3469_v5 = vpop.permute.xlu1 %889  ;;  %v3471_v43 = vpop.permute.xlu0 %884 }
 0x13c   : >> { %4146 = vst [vmem:[#allocation71_spill] sm:$0xff] %v3471_v43  ;;  %1537 = vperm.xlu1 %2705, %v3467_v42   ;;  %1517 = vperm.xlu0 %2704, %v3329_v53   ;;  %v3494_v53 = vld [vmem:[%s3002_s25 + $0x9b] sm:$0xff] }
 0x13d   : >> { %4151 = vst [vmem:[#allocation76_spill] sm:$0xff] %v3494_v53 }
 0x13f   : >> { %v3478_v50 = vpop.permute.xlu1 %931  ;;  %v3480_v51 = vpop.permute.xlu0 %926 }
 0x140   : >> { %4148 = vst [vmem:[#allocation73_spill] sm:$0xff] %v3480_v51  ;;  %1455 = vperm.xlu1 %2705, %v3476_v45   ;;  %1435 = vperm.xlu0 %2704, %v3281_v17   ;;  %v3503_v17 = vld [vmem:[%s3002_s25 + $0x81] sm:$0xff] }
 0x141   : >> { %4153 = vst [vmem:[#allocation78_spill] sm:$0xff] %v3503_v17 }
 0x143   : >> { %v3487_v8 = vpop.permute.xlu1 %941  ;;  %v3489_v43 = vpop.permute.xlu0 %936 }
 0x144   : >> { %4150 = vst [vmem:[#allocation75_spill] sm:$0xff] %v3489_v43  ;;  %1532 = vperm.xlu1 %2705, %v3485_v46   ;;  %1512 = vperm.xlu0 %2704, %v3332_v54   ;;  %v3512_v54 = vld [vmem:[%s3002_s25 + $0x8a] sm:$0xff] }
 0x145   : >> { %4155 = vst [vmem:[#allocation80_spill] sm:$0xff] %v3512_v54 }
 0x147   : >> { %v3496_v42 = vpop.permute.xlu1 %951  ;;  %v3498_v51 = vpop.permute.xlu0 %946 }
 0x148   : >> { %4152 = vst [vmem:[#allocation77_spill] sm:$0xff] %v3498_v51  ;;  %1609 = vperm.xlu1 %2705, %v3494_v53   ;;  %1589 = vperm.xlu0 %2704, %v3365_v1   ;;  %v3521_v1 = vld [vmem:[%s3002_s25 + $0x93] sm:$0xff] }
 0x149   : >> { %4157 = vst [vmem:[#allocation82_spill] sm:$0xff] %v3521_v1 }
 0x14b   : >> { %v3505_v45 = vpop.permute.xlu1 %961  ;;  %v3507_v43 = vpop.permute.xlu0 %956 }
 0x14c   : >> { %4154 = vst [vmem:[#allocation79_spill] sm:$0xff] %v3507_v43  ;;  %1450 = vperm.xlu1 %2705, %v3503_v17   ;;  %1430 = vperm.xlu0 %2704, %v3284_v15   ;;  %v3530_v15 = vld [vmem:[%s3002_s25 + $0x9c] sm:$0xff] }
 0x14d   : >> { %4160 = vst [vmem:[#allocation85_spill] sm:$0xff] %v3530_v15 }
 0x14f   : >> { %v3514_v46 = vpop.permute.xlu1 %1003  ;;  %v3516_v51 = vpop.permute.xlu0 %998 }
 0x150   : >> { %4156 = vst [vmem:[#allocation81_spill] sm:$0xff] %v3514_v46  ;;  %1527 = vperm.xlu1 %2705, %v3512_v54   ;;  %1507 = vperm.xlu0 %2704, %v3317_v6   ;;  %v3539_v6 = vld [vmem:[%s3002_s25 + $0x82] sm:$0xff]  ;;  %v324_v54 = vmul.f32 %v4106_v0, %v3154_v58  ;;  %v327_v58 = vmul.f32 %v4106_v0, %v3166_v62 }
 0x151   : >> { %4163 = vst [vmem:[#allocation88_spill] sm:$0xff] %v3539_v6  ;;  %v399_v62 = vmul.f32 %v4105_v2, %v3202_v40  ;;  %v466_v40 = vmul.f32 %v4104_v3, %v3228_v49  ;;  %v471_v49 = vmul.f32 %v4104_v3, %v3238_v26 }
 0x153   : >> { %v3523_v53 = vpop.permute.xlu1 %1013  ;;  %v3525_v43 = vpop.permute.xlu0 %1008 }
 0x154   : >> { %4158 = vst [vmem:[#allocation83_spill] sm:$0xff] %v3523_v53  ;;  %4159 = vst [vmem:[#allocation84_spill] sm:$0xff] %v3525_v43  ;;  %1604 = vperm.xlu1 %2705, %v3521_v1   ;;  %1584 = vperm.xlu0 %2704, %v3368_v7   ;;  %v322_v1 = vmul.f32 %v4106_v0, %v3156_v59  ;;  %v325_v7 = vmul.f32 %v4106_v0, %v3160_v60 }
 0x155   : >> { %v394_v43 = vmul.f32 %v4105_v2, %v3192_v33  ;;  %v397_v59 = vmul.f32 %v4105_v2, %v3196_v34  ;;  %v326_v60 = vmul.f32 %v4106_v0, %v3168_v63  ;;  %v3572_v33 = vld [vmem:[%s3002_s25 + $0x8b] sm:$0xff]  ;;  %v328_v34 = vmul.f32 %v4106_v0, %v3180_v16 }
 0x156   : >> { %v401_v63 = vmul.f32 %v4105_v2, %v3214_v36  ;;  %v469_v16 = vmul.f32 %v4104_v3, %v3232_v28  ;;  %v470_v28 = vmul.f32 %v4104_v3, %v3240_v25 }
 0x157   : >> { %v3532_v17 = vpop.permute.xlu1 %1023  ;;  %v3534_v46 = vpop.permute.xlu0 %1018  ;;  %v402_v53 = vadd.f32 %v394_v43, %v322_v1  ;;  %v405_v36 = vadd.f32 %v397_v59, %v325_v7 }
 0x158   : >> { %4161 = vst [vmem:[#allocation86_spill] sm:$0xff] %v3532_v17  ;;  %4162 = vst [vmem:[#allocation87_spill] sm:$0xff] %v3534_v46  ;;  %1681 = vperm.xlu1 %2705, %v3530_v15   ;;  %1661 = vperm.xlu0 %2704, %v3401_v30   ;;  %v323_v17 = vmul.f32 %v4106_v0, %v3162_v61  ;;  %v395_v15 = vmul.f32 %v4105_v2, %v3190_v32 }
 0x159   : >> { %v329_v61 = vmul.f32 %v4106_v0, %v3178_v13  ;;  %v396_v32 = vmul.f32 %v4105_v2, %v3198_v39  ;;  %v400_v13 = vmul.f32 %v4105_v2, %v3216_v29  ;;  %v467_v39 = vmul.f32 %v4104_v3, %v3226_v48 }
 0x15a   : >> { %v468_v29 = vmul.f32 %v4104_v3, %v3234_v27  ;;  %v473_v27 = vmul.f32 %v4104_v3, %v3250_v37  ;;  %v474_v59 = vadd.f32 %v466_v40, %v402_v53  ;;  %v4166_v40 = vld [vmem:[#allocation33_spill] sm:$0xff] }
 0x15b   : >> { %v3551_v46 = vpop.permute.xlu1 %1033  ;;  %v3553_v30 = vpop.permute.xlu0 %1028  ;;  %v404_v48 = vadd.f32 %v396_v32, %v324_v54  ;;  %v409_v43 = vadd.f32 %v401_v63, %v329_v61  ;;  %v408_v1 = vadd.f32 %v400_v13, %v328_v34  ;;  %v472_v54 = vmul.f32 %v4104_v3, %v3252_v35  ;;  %v2599_v32 = vld [vmem:[%s3002_s25 + $0xb8] sm:$0xff] }
 0x15c   : >> { %1522 = vperm.xlu1 %2705, %v3539_v6   ;;  %1502 = vperm.xlu0 %2704, %v3320_v52   ;;  %v398_v52 = vmul.f32 %v4105_v2, %v3204_v41  ;;  %v403_v6 = vadd.f32 %v395_v15, %v323_v17  ;;  %v407_v17 = vadd.f32 %v399_v62, %v327_v58  ;;  %v3601_v15 = vld [vmem:[%s3002_s25 + $0x94] sm:$0xff] }
 0x15d   : >> { %v476_v25 = vadd.f32 %v468_v29, %v404_v48  ;;  %v538_v61 = vmul.f32 %v4103_v4, %v3264_v44  ;;  %v541_v35 = vmul.f32 %v4103_v4, %v3268_v21  ;;  %v481_v62 = vadd.f32 %v473_v27, %v409_v43  ;;  %v4164_v21 = vld [vmem:[#allocation6_spill] sm:$0xff]  ;;  %v4168_v29 = vld [vmem:[#allocation35_spill] sm:$0xff] }
 0x15e   : >> { %v406_v2 = vadd.f32 %v398_v52, %v326_v60  ;;  %v475_v7 = vadd.f32 %v467_v39, %v403_v6  ;;  %v539_v60 = vmul.f32 %v4103_v4, %v3262_v56  ;;  %v479_v37 = vadd.f32 %v471_v49, %v407_v17  ;;  %v3646_v17 = vld [vmem:[%s3002_s25 + $0x83] sm:$0xff] }
 0x15f   : >> { %v3588_v0 = vpop.permute.xlu1 %1075  ;;  %v3590_v41 = vpop.permute.xlu0 %1070  ;;  %v540_v6 = vmul.f32 %v4103_v4, %v3270_v20  ;;  %v543_v56 = vmul.f32 %v4103_v4, %v3274_v19  ;;  %v542_v44 = vmul.f32 %v4103_v4, %v3276_v18  ;;  %v545_v34 = vmul.f32 %v4103_v4, %v3286_v14  ;;  %v4165_v20 = vld [vmem:[#allocation32_spill] sm:$0xff] }
 0x160   : >> { %1599 = vperm.xlu1 %2705, %v3572_v33   ;;  %1579 = vperm.xlu0 %2704, %v3353_v57   ;;  %v477_v57 = vadd.f32 %v469_v16, %v405_v36  ;;  %v478_v53 = vadd.f32 %v470_v28, %v406_v2  ;;  %v544_v2 = vmul.f32 %v4103_v4, %v3288_v12  ;;  %v4167_v36 = vld [vmem:[#allocation34_spill] sm:$0xff] }
 0x161   : >> { %v611_v52 = vmul.f32 %v4164_v21, %v3298_v47  ;;  %v610_v63 = vmul.f32 %v4164_v21, %v4165_v20  ;;  %v547_v39 = vadd.f32 %v539_v60, %v475_v7  ;;  %v546_v18 = vadd.f32 %v538_v61, %v474_v59 }
 0x162   : >> { %v613_v14 = vmul.f32 %v4164_v21, %v4166_v40  ;;  %v549_v16 = vadd.f32 %v541_v35, %v477_v57  ;;  %v548_v12 = vadd.f32 %v540_v6, %v476_v25  ;;  %v612_v47 = vmul.f32 %v4164_v21, %v4167_v36  ;;  %v4170_v57 = vld [vmem:[#allocation37_spill] sm:$0xff]  ;;  %v4171_v35 = vld [vmem:[#allocation38_spill] sm:$0xff]  ;;  %v4173_v6 = vld [vmem:[#allocation7_spill] sm:$0xff] }
 0x163   : >> { %v3607_v58 = vpop.permute.xlu1 %1085  ;;  %v3609_v26 = vpop.permute.xlu0 %1080  ;;  %v615_v48 = vmul.f32 %v4164_v21, %v4168_v29  ;;  %v551_v49 = vadd.f32 %v543_v56, %v479_v37  ;;  %v550_v28 = vadd.f32 %v542_v44, %v478_v53  ;;  %v553_v43 = vadd.f32 %v545_v34, %v481_v62  ;;  %v4172_v53 = vld [vmem:[#allocation39_spill] sm:$0xff]  ;;  %v4174_v44 = vld [vmem:[#allocation40_spill] sm:$0xff] }
 0x164   : >> { %1676 = vperm.xlu1 %2705, %v3601_v15   ;;  %1656 = vperm.xlu0 %2704, %v3404_v38   ;;  %v480_v38 = vadd.f32 %v472_v54, %v408_v1  ;;  %v4169_v1 = vld [vmem:[#allocation36_spill] sm:$0xff]  ;;  %v619_v59 = vadd.f32 %v611_v52, %v547_v39  ;;  %v617_v54 = vmul.f32 %v4164_v21, %v4170_v57 }
 0x165   : >> { %v614_v27 = vmul.f32 %v4164_v21, %v4169_v1  ;;  %v621_v61 = vadd.f32 %v613_v14, %v549_v16  ;;  %v616_v37 = vmul.f32 %v4164_v21, %v4171_v35  ;;  %v620_v62 = vadd.f32 %v612_v47, %v548_v12  ;;  %v3667_v52 = vld [vmem:[%s3002_s25 + $0x8c] sm:$0xff]  ;;  %v4179_v12 = vld [vmem:[#allocation45_spill] sm:$0xff]  ;;  %v4180_v47 = vld [vmem:[#allocation46_spill] sm:$0xff] }
 0x166   : >> { %v552_v7 = vadd.f32 %v544_v2, %v480_v38  ;;  %v623_v56 = vadd.f32 %v615_v48, %v551_v49  ;;  %v682_v34 = vmul.f32 %v4173_v6, %v4174_v44  ;;  %v4175_v38 = vld [vmem:[#allocation41_spill] sm:$0xff]  ;;  %v4178_v14 = vld [vmem:[#allocation44_spill] sm:$0xff]  ;;  %v625_v16 = vadd.f32 %v617_v54, %v553_v43  ;;  %v4181_v48 = vld [vmem:[#allocation47_spill] sm:$0xff] }
 0x167   : >> { %v3634_v13 = vpop.permute.xlu1 %1095  ;;  %v3636_v19 = vpop.permute.xlu0 %1090  ;;  %v685_v2 = vmul.f32 %v4173_v6, %v4175_v38  ;;  %v622_v20 = vadd.f32 %v614_v27, %v550_v28  ;;  %v689_v36 = vmul.f32 %v4173_v6, %v4179_v12  ;;  %v688_v29 = vmul.f32 %v4173_v6, %v4180_v47  ;;  %v4182_v49 = vld [vmem:[#allocation8_spill] sm:$0xff]  ;;  %v4184_v38 = vld [vmem:[#allocation49_spill] sm:$0xff] }
 0x168   : >> { %1753 = vperm.xlu1 %2705, %v2599_v32   ;;  %1733 = vperm.xlu0 %2704, %v3440_v24   ;;  %v618_v24 = vadd.f32 %v610_v63, %v546_v18  ;;  %v683_v32 = vmul.f32 %v4173_v6, %v4172_v53  ;;  %v4176_v63 = vld [vmem:[#allocation42_spill] sm:$0xff]  ;;  %v4177_v18 = vld [vmem:[#allocation43_spill] sm:$0xff]  ;;  %v755_v28 = vmul.f32 %v4182_v49, %v4181_v48  ;;  %v4183_v53 = vld [vmem:[#allocation48_spill] sm:$0xff] }
 0x169   : >> { %v684_v39 = vmul.f32 %v4173_v6, %v4176_v63  ;;  %v687_v40 = vmul.f32 %v4173_v6, %v4177_v18  ;;  %v624_v57 = vadd.f32 %v616_v37, %v552_v7  ;;  %v754_v44 = vmul.f32 %v4182_v49, %v4183_v53 }
 0x16a   : >> { %v691_v35 = vadd.f32 %v683_v32, %v619_v59  ;;  %v690_v43 = vadd.f32 %v682_v34, %v618_v24  ;;  %v693_v54 = vadd.f32 %v685_v2, %v621_v61  ;;  %v757_v63 = vmul.f32 %v4182_v49, %v4184_v38 }
 0x16b   : >> { %v3652_v25 = vpop.permute.xlu1 %1105  ;;  %v3654_v60 = vpop.permute.xlu0 %1100  ;;  %v756_v18 = vmul.f32 %v4182_v49, %v3378_v10  ;;  %v692_v12 = vadd.f32 %v684_v39, %v620_v62  ;;  %v695_v47 = vadd.f32 %v687_v40, %v623_v56  ;;  %v759_v59 = vmul.f32 %v4182_v49, %v3382_v9  ;;  %v4186_v10 = vld [vmem:[#allocation52_spill] sm:$0xff]  ;;  %v4187_v56 = vld [vmem:[#allocation53_spill] sm:$0xff]  ;;  %v4188_v40 = vld [vmem:[#allocation54_spill] sm:$0xff] }
 0x16c   : >> { %1594 = vperm.xlu1 %2705, %v3646_v17   ;;  %1574 = vperm.xlu0 %2704, %v3356_v55   ;;  %v686_v55 = vmul.f32 %v4173_v6, %v4178_v14  ;;  %v2598_v14 = vld [vmem:[%s3002_s25 + $0xb0] sm:$0xff]  ;;  %v697_v37 = vadd.f32 %v689_v36, %v625_v16  ;;  %v696_v32 = vadd.f32 %v688_v29, %v624_v57  ;;  %v4190_v36 = vld [vmem:[#allocation55_spill] sm:$0xff] }
 0x16d   : >> { %v763_v48 = vadd.f32 %v755_v28, %v691_v35  ;;  %v762_v2 = vadd.f32 %v754_v44, %v690_v43  ;;  %v761_v62 = vmul.f32 %v4182_v49, %v4186_v10  ;;  %v765_v9 = vadd.f32 %v757_v63, %v693_v54  ;;  %v2609_v28 = vld [vmem:[%s3002_s25 + $0xb9] sm:$0xff]  ;;  %v4191_v35 = vld [vmem:[#allocation56_spill] sm:$0xff] }
 0x16e   : >> { %v694_v7 = vadd.f32 %v686_v55, %v622_v20  ;;  %v760_v20 = vmul.f32 %v4182_v49, %v4187_v56  ;;  %v764_v39 = vadd.f32 %v756_v18, %v692_v12  ;;  %v4189_v55 = vld [vmem:[#allocation9_spill] sm:$0xff]  ;;  %v767_v57 = vadd.f32 %v759_v59, %v695_v47  ;;  %v4193_v54 = vld [vmem:[#allocation58_spill] sm:$0xff] }
 0x16f   : >> { %v3681_v1 = vpop.permute.xlu1 %1147  ;;  %v3683_v27 = vpop.permute.xlu0 %1142  ;;  %v827_v16 = vmul.f32 %v4189_v55, %v4188_v40  ;;  %v826_v29 = vmul.f32 %v4189_v55, %v4190_v36  ;;  %v829_v53 = vmul.f32 %v4189_v55, %v4191_v35  ;;  %v4192_v44 = vld [vmem:[#allocation57_spill] sm:$0xff]  ;;  %v831_v38 = vmul.f32 %v4189_v55, %v3418_v23  ;;  %v4195_v12 = vld [vmem:[#allocation62_spill] sm:$0xff]  ;;  %v4196_v40 = vld [vmem:[#allocation63_spill] sm:$0xff] }
 0x170   : >> { %1671 = vperm.xlu1 %2705, %v3667_v52   ;;  %1651 = vperm.xlu0 %2704, %v3389_v31   ;;  %v4185_v31 = vld [vmem:[#allocation50_spill] sm:$0xff]  ;;  %v828_v43 = vmul.f32 %v4189_v55, %v4192_v44  ;;  %v830_v63 = vmul.f32 %v4189_v55, %v4193_v54  ;;  %v4194_v18 = vld [vmem:[#allocation61_spill] sm:$0xff]  ;;  %v832_v47 = vmul.f32 %v4189_v55, %v4195_v12  ;;  %v4198_v35 = vld [vmem:[#allocation64_spill] sm:$0xff] }
 0x171   : >> { %v758_v24 = vmul.f32 %v4182_v49, %v4185_v31  ;;  %v769_v10 = vadd.f32 %v761_v62, %v697_v37  ;;  %v768_v56 = vadd.f32 %v760_v20, %v696_v32  ;;  %v4197_v36 = vld [vmem:[#allocation10_spill] sm:$0xff]  ;;  %v4199_v54 = vld [vmem:[#allocation65_spill] sm:$0xff]  ;;  %v837_v3 = vadd.f32 %v829_v53, %v765_v9 }
 0x172   : >> { %v899_v23 = vmul.f32 %v4197_v36, %v4196_v40  ;;  %v898_v44 = vmul.f32 %v4197_v36, %v4198_v35  ;;  %v3736_v12 = vld [vmem:[%s3002_s25 + $0x84] sm:$0xff]  ;;  %v836_v4 = vadd.f32 %v828_v43, %v764_v39  ;;  %v839_v37 = vadd.f32 %v831_v38, %v767_v57  ;;  %v4202_v35 = vld [vmem:[#allocation69_spill] sm:$0xff] }
 0x173   : >> { %v3698_v61 = vpop.permute.xlu1 %1157  ;;  %v3700_v34 = vpop.permute.xlu0 %1152  ;;  %v4200_v32 = vld [vmem:[#allocation66_spill] sm:$0xff]  ;;  %v905_v9 = vmul.f32 %v4197_v36, %v3469_v5  ;;  %v4203_v39 = vld [vmem:[#allocation51_spill] sm:$0xff] }
 0x174   : >> { %1748 = vperm.xlu1 %2705, %v2598_v14   ;;  %1728 = vperm.xlu0 %2704, %v3437_v22   ;;  %v766_v22 = vadd.f32 %v758_v24, %v694_v7  ;;  %v833_v14 = vmul.f32 %v4189_v55, %v4194_v18  ;;  %v835_v7 = vadd.f32 %v827_v16, %v763_v48  ;;  %v4201_v48 = vld [vmem:[#allocation68_spill] sm:$0xff]  ;;  %v4204_v43 = vld [vmem:[#allocation71_spill] sm:$0xff] }
 0x175   : >> { %v834_v24 = vadd.f32 %v826_v29, %v762_v2  ;;  %v901_v18 = vmul.f32 %v4197_v36, %v4199_v54  ;;  %v900_v62 = vmul.f32 %v4197_v36, %v4200_v32  ;;  %v903_v2 = vmul.f32 %v4197_v36, %v4201_v48 }
 0x176   : >> { %v838_v20 = vadd.f32 %v830_v63, %v766_v22  ;;  %v907_v40 = vadd.f32 %v899_v23, %v835_v7  ;;  %v902_v54 = vmul.f32 %v4197_v36, %v4202_v35  ;;  %v904_v38 = vmul.f32 %v4197_v36, %v4204_v43  ;;  %v4205_v22 = vld [vmem:[#allocation11_spill] sm:$0xff]  ;;  %v4211_v43 = vld [vmem:[#allocation81_spill] sm:$0xff] }
 0x177   : >> { %v3724_v59 = vpop.permute.xlu1 %1167  ;;  %v3726_v31 = vpop.permute.xlu0 %1162  ;;  %v906_v57 = vadd.f32 %v898_v44, %v834_v24  ;;  %v909_v53 = vadd.f32 %v901_v18, %v837_v3  ;;  %v971_v63 = vmul.f32 %v4205_v22, %v3478_v50  ;;  %v973_v5 = vmul.f32 %v4205_v22, %v3487_v8  ;;  %v4207_v23 = vld [vmem:[#allocation75_spill] sm:$0xff]  ;;  %v4208_v44 = vld [vmem:[#allocation77_spill] sm:$0xff] }
 0x178   : >> { %1825 = vperm.xlu1 %2705, %v2609_v28   ;;  %1805 = vperm.xlu0 %2704, %v3449_v11   ;;  %v841_v28 = vadd.f32 %v833_v14, %v769_v10  ;;  %v840_v11 = vadd.f32 %v832_v47, %v768_v56  ;;  %v2597_v14 = vld [vmem:[%s3002_s25 + $0xa8] sm:$0xff]  ;;  %v908_v47 = vadd.f32 %v900_v62, %v836_v4  ;;  %v4206_v10 = vld [vmem:[#allocation73_spill] sm:$0xff] }
 0x179   : >> { %v970_v56 = vmul.f32 %v4205_v22, %v4206_v10  ;;  %v972_v7 = vmul.f32 %v4205_v22, %v4207_v23  ;;  %v911_v24 = vadd.f32 %v903_v2, %v839_v37  ;;  %v975_v3 = vmul.f32 %v4205_v22, %v3496_v42  ;;  %v4209_v35 = vld [vmem:[#allocation79_spill] sm:$0xff]  ;;  %v4212_v42 = vld [vmem:[#allocation12_spill] sm:$0xff] }
 0x17a   : >> { %v974_v18 = vmul.f32 %v4205_v22, %v4208_v44  ;;  %v977_v4 = vmul.f32 %v4205_v22, %v3505_v45  ;;  %v910_v62 = vadd.f32 %v902_v54, %v838_v20  ;;  %v913_v48 = vadd.f32 %v905_v9, %v841_v28  ;;  %v2608_v44 = vld [vmem:[%s3002_s25 + $0xb1] sm:$0xff] }
 0x17b   : >> { %v1178_v16 = vpop.permute.xlu1 %1177  ;;  %v1173_v29 = vpop.permute.xlu0 %1172  ;;  %v976_v8 = vmul.f32 %v4205_v22, %v4209_v35  ;;  %v912_v37 = vadd.f32 %v904_v38, %v840_v11  ;;  %v979_v2 = vadd.f32 %v971_v63, %v907_v40  ;;  %v1043_v10 = vmul.f32 %v4212_v42, %v4211_v43 }
 0x17c   : >> { %1666 = vperm.xlu1 %2705, %v3736_v12   ;;  %1646 = vperm.xlu0 %2704, %v4203_v39   ;;  %v4210_v39 = vld [vmem:[#allocation59_spill] sm:$0xff]  ;;  %v1042_v23 = vmul.f32 %v4212_v42, %v3516_v51  ;;  %v978_v45 = vadd.f32 %v970_v56, %v906_v57  ;;  %v981_v6 = vadd.f32 %v973_v5, %v909_v53  ;;  %v4214_v57 = vld [vmem:[#allocation84_spill] sm:$0xff]  ;;  %v4216_v5 = vld [vmem:[#allocation13_spill] sm:$0xff] }
 0x17d   : >> { %v980_v21 = vadd.f32 %v972_v7, %v908_v47  ;;  %v1049_v20 = vmul.f32 %v4212_v42, %v3551_v46  ;;  %v983_v28 = vadd.f32 %v975_v3, %v911_v24  ;;  %v3775_v54 = vadd.f32 %v974_v18, %v910_v62  ;;  %v4215_v47 = vld [vmem:[#allocation67_spill] sm:$0xff]  ;;  %v2619_v24 = vld [vmem:[%s3002_s25 + $0xba] sm:$0xff] }
 0x17e   : >> { %v985_v9 = vadd.f32 %v977_v4, %v913_v48  ;;  %v1048_v11 = vmul.f32 %v4212_v42, %v3553_v30  ;;  %v984_v63 = vadd.f32 %v976_v8, %v912_v37  ;;  %v1044_v53 = vmul.f32 %v4212_v42, %v4214_v57  ;;  %v4217_v3 = vld [vmem:[#allocation86_spill] sm:$0xff] }
 0x17f   : >> { %v1220_v50 = vpop.permute.xlu1 %1219  ;;  %v1215_v32 = vpop.permute.xlu0 %1214  ;;  %v1051_v46 = vadd.f32 %v1043_v10, %v979_v2  ;;  %v1050_v56 = vadd.f32 %v1042_v23, %v978_v45  ;;  %v1121_v7 = vmul.f32 %v4216_v5, %v3652_v25  ;;  %v1120_v30 = vmul.f32 %v4216_v5, %v3654_v60  ;;  %v4218_v25 = vld [vmem:[#allocation14_spill] sm:$0xff]  ;;  %v4219_v23 = vld [vmem:[#allocation87_spill] sm:$0xff] }
 0x180   : >> { %1743 = vperm.xlu1 %2705, %v2597_v14   ;;  %1723 = vperm.xlu0 %2704, %v4210_v39   ;;  %v4213_v14 = vld [vmem:[#allocation83_spill] sm:$0xff]  ;;  %v1047_v18 = vmul.f32 %v4212_v42, %v4217_v3  ;;  %v1057_v4 = vadd.f32 %v1049_v20, %v985_v9  ;;  %v1115_v62 = vmul.f32 %v4216_v5, %v3588_v0  ;;  %v4220_v0 = vld [vmem:[#allocation70_spill] sm:$0xff] }
 0x181   : >> { %v1045_v51 = vmul.f32 %v4212_v42, %v4213_v14  ;;  %v1114_v48 = vmul.f32 %v4216_v5, %v3590_v41  ;;  %v1056_v35 = vadd.f32 %v1048_v11, %v984_v63  ;;  %v1117_v8 = vmul.f32 %v4216_v5, %v3607_v58 }
 0x182   : >> { %v1193_v39 = vmul.f32 %v4218_v25, %v1178_v16  ;;  %v1192_v60 = vmul.f32 %v4218_v25, %v1173_v29  ;;  %v1052_v10 = vadd.f32 %v1044_v53, %v980_v21  ;;  %v1116_v41 = vmul.f32 %v4216_v5, %v3609_v26  ;;  %v2596_v16 = vld [vmem:[%s3002_s25 + $0xa0] sm:$0xff] }
 0x183   : >> { %v1230_v40 = vpop.permute.xlu1 %1229  ;;  %v1225_v38 = vpop.permute.xlu0 %1224  ;;  %v1053_v43 = vadd.f32 %v1045_v51, %v981_v6  ;;  %v1129_v45 = vadd.f32 %v1121_v7, %v1057_v4  ;;  %v1128_v20 = vadd.f32 %v1120_v30, %v1056_v35  ;;  %v1187_v58 = vmul.f32 %v4218_v25, %v3681_v1  ;;  %v4221_v51 = vld [vmem:[#allocation15_spill] sm:$0xff] }
 0x184   : >> { %1820 = vperm.xlu1 %2705, %v2608_v44   ;;  %1800 = vperm.xlu0 %2704, %v4215_v47   ;;  %v1046_v44 = vmul.f32 %v4212_v42, %v4219_v23  ;;  %v1055_v29 = vadd.f32 %v1047_v18, %v983_v28  ;;  %v1123_v9 = vadd.f32 %v1115_v62, %v1051_v46  ;;  %v4222_v28 = vld [vmem:[#allocation60_spill] sm:$0xff] }
 0x185   : >> { %v1122_v11 = vadd.f32 %v1114_v48, %v1050_v56  ;;  %v1186_v21 = vmul.f32 %v4218_v25, %v3683_v27  ;;  %v1125_v6 = vadd.f32 %v1117_v8, %v1053_v43  ;;  %v1201_v63 = vadd.f32 %v1193_v39, %v1129_v45 }
 0x186   : >> { %v1200_v14 = vadd.f32 %v1192_v60, %v1128_v20  ;;  %v1259_v57 = vmul.f32 %v4221_v51, %v1220_v50  ;;  %v1258_v47 = vmul.f32 %v4221_v51, %v1215_v32  ;;  %v1124_v46 = vadd.f32 %v1116_v41, %v1052_v10  ;;  %v2607_v50 = vld [vmem:[%s3002_s25 + $0xa9] sm:$0xff] }
 0x187   : >> { %v1240_v37 = vpop.permute.xlu1 %1239  ;;  %v1235_v2 = vpop.permute.xlu0 %1234  ;;  %v1195_v56 = vadd.f32 %v1187_v58, %v1123_v9  ;;  %v1189_v27 = vmul.f32 %v4218_v25, %v3698_v61  ;;  %v1188_v30 = vmul.f32 %v4218_v25, %v3700_v34  ;;  %v1194_v32 = vadd.f32 %v1186_v21, %v1122_v11  ;;  %v4223_v34 = vld [vmem:[#allocation16_spill] sm:$0xff] }
 0x188   : >> { %1897 = vperm.xlu1 %2705, %v2619_v24   ;;  %1877 = vperm.xlu0 %2704, %v4220_v0   ;;  %v1119_v24 = vmul.f32 %v4216_v5, %v3634_v13  ;;  %v1118_v4 = vmul.f32 %v4216_v5, %v3636_v19  ;;  %v1261_v48 = vmul.f32 %v4221_v51, %v1230_v40  ;;  %v4224_v13 = vld [vmem:[#allocation72_spill] sm:$0xff] }
 0x189   : >> { %v1267_v62 = vadd.f32 %v1259_v57, %v1195_v56  ;;  %v1260_v35 = vmul.f32 %v4221_v51, %v1225_v38  ;;  %v1266_v39 = vadd.f32 %v1258_v47, %v1194_v32  ;;  %v1054_v10 = vadd.f32 %v1046_v44, %v3775_v54  ;;  %v2618_v40 = vld [vmem:[%s3002_s25 + $0xb2] sm:$0xff] }
 0x18a   : >> { %v1197_v23 = vadd.f32 %v1189_v27, %v1125_v6  ;;  %v1196_v0 = vadd.f32 %v1188_v30, %v1124_v46  ;;  %v1191_v19 = vmul.f32 %v4218_v25, %v3724_v59  ;;  %v1127_v41 = vadd.f32 %v1119_v24, %v1055_v29  ;;  %v4225_v29 = vld [vmem:[#allocation74_spill] sm:$0xff] }
 0x18b   : >> { %v1250_v53 = vpop.permute.xlu1 %1249  ;;  %v1245_v26 = vpop.permute.xlu0 %1244  ;;  %v1190_v38 = vmul.f32 %v4218_v25, %v3726_v31  ;;  %v1126_v58 = vadd.f32 %v1118_v4, %v1054_v10  ;;  %v1263_v11 = vmul.f32 %v4221_v51, %v1240_v37  ;;  %v1262_v44 = vmul.f32 %v4221_v51, %v1235_v2  ;;  %v2606_v46 = vld [vmem:[%s3002_s25 + $0xa1] sm:$0xff]  ;;  %v2628_v10 = vld [vmem:[%s3002_s25 + $0xb3] sm:$0xff] }
 0x18c   : >> { %v1265_v7 = vmul.f32 %v4221_v51, %v1250_v53  ;;  %v1264_v1 = vmul.f32 %v4221_v51, %v1245_v26  ;;  %1738 = vperm.xlu1 %2705, %v2596_v16   ;;  %1718 = vperm.xlu0 %2704, %v4222_v28   ;;  %v1269_v16 = vadd.f32 %v1261_v48, %v1197_v23  ;;  %v4226_v28 = vld [vmem:[#allocation76_spill] sm:$0xff]  ;;  %v4227_v4 = vld [vmem:[#allocation78_spill] sm:$0xff] }
 0x18d   : >> { %v1268_v9 = vadd.f32 %v1260_v35, %v1196_v0  ;;  %v1199_v31 = vadd.f32 %v1191_v19, %v1127_v41  ;;  %v4230_v41 = vld [vmem:[#allocation82_spill] sm:$0xff] }
 0x18e   : >> { %v1273_v3 = vadd.f32 %v1265_v7, %v1201_v63  ;;  %v1272_v18 = vadd.f32 %v1264_v1, %v1200_v14  ;;  %v2629_v63 = vld [vmem:[%s3002_s25 + $0xbb] sm:$0xff]  ;;  %v1198_v14 = vadd.f32 %v1190_v38, %v1126_v58 }
 0x18f   : >> { %v1292_v61 = vpop.permute.xlu1 %1291  ;;  %v1287_v8 = vpop.permute.xlu0 %1286  ;;  %v1271_v26 = vadd.f32 %v1263_v11, %v1199_v31  ;;  %v2639_v38 = vld [vmem:[%s3002_s25 + $0xbc] sm:$0xff] }
 0x190   : >> { %v1331_v60 = vmul.f32 %v4223_v34, %v1292_v61  ;;  %v1330_v43 = vmul.f32 %v4223_v34, %v1287_v8  ;;  %1815 = vperm.xlu1 %2705, %v2607_v50   ;;  %1795 = vperm.xlu0 %2704, %v4224_v13   ;;  %v1270_v7 = vadd.f32 %v1262_v44, %v1198_v14  ;;  %v4229_v13 = vld [vmem:[#allocation80_spill] sm:$0xff] }
 0x191   : >> { %v4232_v14 = vld [vmem:[#allocation88_spill] sm:$0xff] }
 0x192   : >> { %v1339_v45 = vadd.f32 %v1331_v60, %v1267_v62  ;;  %v1338_v20 = vadd.f32 %v1330_v43, %v1266_v39  ;;  %v2617_v62 = vld [vmem:[%s3002_s25 + $0xaa] sm:$0xff]  ;;  %v4228_v39 = vld [vmem:[#allocation17_spill] sm:$0xff] }
 0x193   : >> { %v1302_v21 = vpop.permute.xlu1 %1301  ;;  %v1297_v54 = vpop.permute.xlu0 %1296 }
 0x194   : >> { %v1333_v6 = vmul.f32 %v4223_v34, %v1302_v21  ;;  %v1332_v59 = vmul.f32 %v4223_v34, %v1297_v54  ;;  %1892 = vperm.xlu1 %2705, %v2618_v40   ;;  %1872 = vperm.xlu0 %2704, %v4225_v29   ;;  %v4231_v21 = vld [vmem:[#allocation85_spill] sm:$0xff]  ;;  %v2616_v54 = vld [vmem:[%s3002_s25 + $0xa2] sm:$0xff] }
 0x196   : >> { %v1341_v57 = vadd.f32 %v1333_v6, %v1269_v16  ;;  %v1340_v53 = vadd.f32 %v1332_v59, %v1268_v9 }
 0x197   : >> { %v1312_v47 = vpop.permute.xlu1 %1311  ;;  %v1307_v37 = vpop.permute.xlu0 %1306 }
 0x198   : >> { %v1335_v2 = vmul.f32 %v4223_v34, %v1312_v47  ;;  %v1334_v1 = vmul.f32 %v4223_v34, %v1307_v37  ;;  %1969 = vperm.xlu1 %2705, %v2629_v63   ;;  %1949 = vperm.xlu0 %2704, %v4226_v28   ;;  %v2638_v28 = vld [vmem:[%s3002_s25 + $0xb4] sm:$0xff] }
 0x19a   : >> { %v1343_v56 = vadd.f32 %v1335_v2, %v1271_v26  ;;  %v1342_v27 = vadd.f32 %v1334_v1, %v1270_v7  ;;  %v4233_v7 = vld [vmem:[#allocation18_spill] sm:$0xff] }
 0x19b   : >> { %v1322_v30 = vpop.permute.xlu1 %1321  ;;  %v1317_v50 = vpop.permute.xlu0 %1316 }
 0x19c   : >> { %v1337_v24 = vmul.f32 %v4223_v34, %v1322_v30  ;;  %v1336_v32 = vmul.f32 %v4223_v34, %v1317_v50  ;;  %1810 = vperm.xlu1 %2705, %v2606_v46   ;;  %1790 = vperm.xlu0 %2704, %v4227_v4  }
 0x19e   : >> { %v1345_v48 = vadd.f32 %v1337_v24, %v1273_v3  ;;  %v1344_v35 = vadd.f32 %v1336_v32, %v1272_v18  ;;  %v2626_v32 = vld [vmem:[%s3002_s25 + $0xa3] sm:$0xff] }
 0x19f   : >> { %v1364_v61 = vpop.permute.xlu1 %1363  ;;  %v1359_v8 = vpop.permute.xlu0 %1358 }
 0x1a0   : >> { %v1403_v60 = vmul.f32 %v4228_v39, %v1364_v61  ;;  %v1402_v43 = vmul.f32 %v4228_v39, %v1359_v8  ;;  %1887 = vperm.xlu1 %2705, %v2617_v62   ;;  %1867 = vperm.xlu0 %2704, %v4229_v13  }
 0x1a2   : >> { %v3852_v23 = vadd.f32 %v1403_v60, %v1339_v45  ;;  %v3854_v0 = vadd.f32 %v1402_v43, %v1338_v20  ;;  %v2637_v60 = vld [vmem:[%s3002_s25 + $0xac] sm:$0xff] }
 0x1a3   : >> { %v1374_v19 = vpop.permute.xlu1 %1373  ;;  %v1369_v40 = vpop.permute.xlu0 %1368 }
 0x1a4   : >> { %v1405_v3 = vmul.f32 %v4228_v39, %v1374_v19  ;;  %v1404_v18 = vmul.f32 %v4228_v39, %v1369_v40  ;;  %1964 = vperm.xlu1 %2705, %v2628_v10   ;;  %1944 = vperm.xlu0 %2704, %v4230_v41  }
 0x1a6   : >> { %v1413_v58 = vadd.f32 %v1405_v3, %v1341_v57  ;;  %v1412_v16 = vadd.f32 %v1404_v18, %v1340_v53  ;;  %v2627_v57 = vld [vmem:[%s3002_s25 + $0xab] sm:$0xff] }
 0x1a7   : >> { %v1384_v9 = vpop.permute.xlu1 %1383  ;;  %v1379_v11 = vpop.permute.xlu0 %1378  ;;  %v2636_v3 = vld [vmem:[%s3002_s25 + $0xa4] sm:$0xff] }
 0x1a8   : >> { %v1407_v45 = vmul.f32 %v4228_v39, %v1384_v9  ;;  %v1406_v20 = vmul.f32 %v4228_v39, %v1379_v11  ;;  %2041 = vperm.xlu1 %2705, %v2639_v38   ;;  %2021 = vperm.xlu0 %2704, %v4231_v21   ;;  %v4235_v21 = vld [vmem:[#allocation28_spill] sm:$0xff] }
 0x1a9   : >> { %2670 = vmatprep.mubr.msk.f32.mxu0 %vm2070_vm5, %v4235_v21 }
 0x1aa   : >> { %v1415_v44 = vadd.f32 %v1407_v45, %v1343_v56  ;;  %v3864_v6 = vadd.f32 %v1406_v20, %v1342_v27 }
 0x1ab   : >> { %v1389_v59 = vpop.permute.xlu1 %1388  ;;  %v1394_v29 = vpop.permute.xlu0 %1393 }
 0x1ac   : >> { %v1408_v31 = vmul.f32 %v4228_v39, %v1389_v59  ;;  %v1409_v63 = vmul.f32 %v4228_v39, %v1394_v29  ;;  %1882 = vperm.xlu1 %2705, %v2616_v54   ;;  %1862 = vperm.xlu0 %2704, %v4232_v14  }
 0x1ae   : >> { %v1416_v53 = vadd.f32 %v1408_v31, %v1344_v35  ;;  %v1417_v26 = vadd.f32 %v1409_v63, %v1345_v48 }
 0x1af   : >> { %v1466_v47 = vpop.permute.xlu1 %1465  ;;  %v1446_v37 = vpop.permute.xlu0 %1445 }
 0x1b0   : >> { %v1481_v2 = vmul.f32 %v4233_v7, %v1466_v47  ;;  %v1477_v1 = vmul.f32 %v4233_v7, %v1446_v37  ;;  %1959 = vperm.xlu1 %2705, %v2627_v57   ;;  %1939 = vperm.xlu0 %2704, %v3572_v33   ;;  %v4234_v33 = vld [vmem:[#allocation19_spill] sm:$0xff] }
 0x1b2   : >> { %v1489_v46 = vadd.f32 %v1481_v2, %v1417_v26  ;;  %v1485_v56 = vadd.f32 %v1477_v1, %v1413_v58 }
 0x1b3   : >> { %v1461_v27 = vpop.permute.xlu1 %1460  ;;  %v1441_v30 = vpop.permute.xlu0 %1440 }
 0x1b4   : >> { %v1480_v50 = vmul.f32 %v4233_v7, %v1461_v27  ;;  %v1476_v24 = vmul.f32 %v4233_v7, %v1441_v30  ;;  %2036 = vperm.xlu1 %2705, %v2638_v28   ;;  %2016 = vperm.xlu0 %2704, %v3601_v15  }
 0x1b6   : >> { %v1488_v4 = vadd.f32 %v1480_v50, %v1416_v53  ;;  %v1484_v62 = vadd.f32 %v1476_v24, %v1412_v16 }
 0x1b7   : >> { %v1538_v48 = vpop.permute.xlu1 %1537  ;;  %v1518_v35 = vpop.permute.xlu0 %1517 }
 0x1b8   : >> { %v1553_v61 = vmul.f32 %v4234_v33, %v1538_v48  ;;  %v1549_v8 = vmul.f32 %v4234_v33, %v1518_v35  ;;  %1954 = vperm.xlu1 %2705, %v2626_v32   ;;  %1934 = vperm.xlu0 %2704, %v3646_v17  }
 0x1ba   : >> { %v1561_v43 = vadd.f32 %v1553_v61, %v1489_v46  ;;  %v1557_v13 = vadd.f32 %v1549_v8, %v1485_v56 }
 0x1bb   : >> { %v1456_v10 = vpop.permute.xlu1 %1455  ;;  %v1436_v19 = vpop.permute.xlu0 %1435 }
 0x1bc   : >> { %v1479_v15 = vmul.f32 %v4233_v7, %v1456_v10  ;;  %v1475_v40 = vmul.f32 %v4233_v7, %v1436_v19  ;;  %2031 = vperm.xlu1 %2705, %v2637_v60   ;;  %2011 = vperm.xlu0 %2704, %v3667_v52   ;;  %v4236_v52 = vld [vmem:[#allocation30_spill] sm:$0xff] }
 0x1bd   : >> { %2681 = vmatprep.mubr.msk.f32.mxu1 %vm2070_vm5, %v4236_v52 }
 0x1be   : >> { %v1487_v18 = vadd.f32 %v1479_v15, %v1415_v44  ;;  %v1483_v41 = vadd.f32 %v1475_v40, %v3852_v23  ;;  %v4237_v23 = vld [vmem:[#allocation20_spill] sm:$0xff] }
 0x1bf   : >> { %v1533_v38 = vpop.permute.xlu1 %1532  ;;  %v1513_v58 = vpop.permute.xlu0 %1512 }
 0x1c0   : >> { %v1552_v17 = vmul.f32 %v4234_v33, %v1533_v38  ;;  %v1548_v16 = vmul.f32 %v4234_v33, %v1513_v58  ;;  %2026 = vperm.xlu1 %2705, %v2636_v3   ;;  %2006 = vperm.xlu0 %2704, %v3736_v12  }
 0x1c2   : >> { %v1560_v9 = vadd.f32 %v1552_v17, %v1488_v4  ;;  %v1556_v11 = vadd.f32 %v1548_v16, %v1484_v62  ;;  %v4238_v4 = vld [vmem:[#allocation21_spill] sm:$0xff] }
 0x1c3   : >> { %v1610_v45 = vpop.permute.xlu1 %1609  ;;  %v1590_v20 = vpop.permute.xlu0 %1589 }
 0x1c4   : >> { %v1625_v54 = vmul.f32 %v4237_v23, %v1610_v45  ;;  %v1621_v44 = vmul.f32 %v4237_v23, %v1590_v20 }
 0x1c6   : >> { %v1633_v59 = vadd.f32 %v1625_v54, %v1561_v43  ;;  %v1629_v29 = vadd.f32 %v1621_v44, %v1557_v13 }
 0x1c7   : >> { %v1451_v31 = vpop.permute.xlu1 %1450  ;;  %v1431_v63 = vpop.permute.xlu0 %1430 }
 0x1c8   : >> { %v1478_v12 = vmul.f32 %v4233_v7, %v1451_v31  ;;  %v1474_v14 = vmul.f32 %v4233_v7, %v1431_v63 }
 0x1ca   : >> { %v1486_v57 = vadd.f32 %v1478_v12, %v3864_v6  ;;  %v1482_v53 = vadd.f32 %v1474_v14, %v3854_v0 }
 0x1cb   : >> { %v1528_v26 = vpop.permute.xlu1 %1527  ;;  %v1508_v47 = vpop.permute.xlu0 %1507 }
 0x1cc   : >> { %v1551_v37 = vmul.f32 %v4234_v33, %v1528_v26  ;;  %v1547_v2 = vmul.f32 %v4234_v33, %v1508_v47 }
 0x1ce   : >> { %v1559_v1 = vadd.f32 %v1551_v37, %v1487_v18  ;;  %v1555_v28 = vadd.f32 %v1547_v2, %v1483_v41 }
 0x1cf   : >> { %v1605_v46 = vpop.permute.xlu1 %1604  ;;  %v1585_v56 = vpop.permute.xlu0 %1584 }
 0x1d0   : >> { %v1624_v27 = vmul.f32 %v4237_v23, %v1605_v46  ;;  %v1620_v30 = vmul.f32 %v4237_v23, %v1585_v56 }
 0x1d2   : >> { %v1632_v50 = vadd.f32 %v1624_v27, %v1560_v9  ;;  %v1628_v24 = vadd.f32 %v1620_v30, %v1556_v11 }
 0x1d3   : >> { %v1682_v32 = vpop.permute.xlu1 %1681  ;;  %v1662_v6 = vpop.permute.xlu0 %1661 }
 0x1d4   : >> { %v1697_v0 = vmul.f32 %v4238_v4, %v1682_v32  ;;  %v1693_v62 = vmul.f32 %v4238_v4, %v1662_v6 }
 0x1d6   : >> { %v1705_v48 = vadd.f32 %v1697_v0, %v1633_v59  ;;  %v1701_v35 = vadd.f32 %v1693_v62, %v1629_v29 }
 0x1d7   : >> { %v1523_v61 = vpop.permute.xlu1 %1522  ;;  %v1503_v8 = vpop.permute.xlu0 %1502 }
 0x1d8   : >> { %v1550_v60 = vmul.f32 %v4234_v33, %v1523_v61  ;;  %v1546_v43 = vmul.f32 %v4234_v33, %v1503_v8 }
 0x1da   : >> { %v1558_v13 = vadd.f32 %v1550_v60, %v1486_v57  ;;  %v1554_v10 = vadd.f32 %v1546_v43, %v1482_v53 }
 0x1db   : >> { %v1600_v19 = vpop.permute.xlu1 %1599  ;;  %v1580_v15 = vpop.permute.xlu0 %1579 }
 0x1dc   : >> { %v1623_v40 = vmul.f32 %v4237_v23, %v1600_v19  ;;  %v1619_v3 = vmul.f32 %v4237_v23, %v1580_v15  ;;  %v4239_v19 = vld [vmem:[#allocation22_spill] sm:$0xff] }
 0x1de   : >> { %v1631_v18 = vadd.f32 %v1623_v40, %v1559_v1  ;;  %v1627_v41 = vadd.f32 %v1619_v3, %v1555_v28 }
 0x1df   : >> { %v1677_v38 = vpop.permute.xlu1 %1676  ;;  %v1657_v58 = vpop.permute.xlu0 %1656 }
 0x1e0   : >> { %v1696_v17 = vmul.f32 %v4238_v4, %v1677_v38  ;;  %v1692_v16 = vmul.f32 %v4238_v4, %v1657_v58 }
 0x1e2   : >> { %v3912_v9 = vadd.f32 %v1696_v17, %v1632_v50  ;;  %v3914_v11 = vadd.f32 %v1692_v16, %v1628_v24 }
 0x1e3   : >> { %v1754_v45 = vpop.permute.xlu1 %1753  ;;  %v1734_v20 = vpop.permute.xlu0 %1733 }
 0x1e4   : >> { %v1769_v15 = vmul.f32 %v4239_v19, %v1754_v45  ;;  %v1765_v40 = vmul.f32 %v4239_v19, %v1734_v20 }
 0x1e6   : >> { %v1777_v17 = vadd.f32 %v1769_v15, %v1705_v48  ;;  %v1773_v16 = vadd.f32 %v1765_v40, %v1701_v35  ;;  %v4243_v48 = vld [vmem:[#allocation26_spill] sm:$0xff] }
 0x1e7   : >> { %v1595_v21 = vpop.permute.xlu1 %1594  ;;  %v1575_v52 = vpop.permute.xlu0 %1574 }
 0x1e8   : >> { %v1622_v54 = vmul.f32 %v4237_v23, %v1595_v21  ;;  %v1618_v44 = vmul.f32 %v4237_v23, %v1575_v52  ;;  %v4241_v21 = vld [vmem:[#allocation24_spill] sm:$0xff] }
 0x1ea   : >> { %v3918_v59 = vadd.f32 %v1622_v54, %v1558_v13  ;;  %v3920_v29 = vadd.f32 %v1618_v44, %v1554_v10 }
 0x1eb   : >> { %v1672_v31 = vpop.permute.xlu1 %1671  ;;  %v1652_v63 = vpop.permute.xlu0 %1651 }
 0x1ec   : >> { %v1695_v12 = vmul.f32 %v4238_v4, %v1672_v31  ;;  %v1691_v14 = vmul.f32 %v4238_v4, %v1652_v63 }
 0x1ee   : >> { %v3924_v57 = vadd.f32 %v1695_v12, %v1631_v18  ;;  %v3926_v53 = vadd.f32 %v1691_v14, %v1627_v41  ;;  %v4240_v41 = vld [vmem:[#allocation23_spill] sm:$0xff]  ;;  %v4242_v12 = vld [vmem:[#allocation25_spill] sm:$0xff] }
 0x1ef   : >> { %v1749_v26 = vpop.permute.xlu1 %1748  ;;  %v1729_v47 = vpop.permute.xlu0 %1728 }
 0x1f0   : >> { %v1764_v15 = vmul.f32 %v4239_v19, %v1729_v47 }
 0x1f3   : >> { %v1826_v37 = vpop.permute.xlu1 %1825  ;;  %v1806_v2 = vpop.permute.xlu0 %1805 }
 0x1f4   : >> { %v1841_v38 = vmul.f32 %v4240_v41, %v1826_v37  ;;  %v1837_v58 = vmul.f32 %v4240_v41, %v1806_v2 }
 0x1f6   : >> { %v1849_v63 = vadd.f32 %v1841_v38, %v1777_v17  ;;  %v1845_v45 = vadd.f32 %v1837_v58, %v1773_v16 }
 0x1f7   : >> { %v1667_v1 = vpop.permute.xlu1 %1666  ;;  %v3928_v28 = vpop.permute.xlu0 %1646 }
 0x1fb   : >> { %v3930_v46 = vpop.permute.xlu1 %1743  ;;  %v3932_v56 = vpop.permute.xlu0 %1723 }
 0x1ff   : >> { %v1821_v27 = vpop.permute.xlu1 %1820  ;;  %v1801_v30 = vpop.permute.xlu0 %1800 }
 0x200   : >> { %v1836_v17 = vmul.f32 %v4240_v41, %v1801_v30 }
 0x203   : >> { %v1898_v50 = vpop.permute.xlu1 %1897  ;;  %v1878_v24 = vpop.permute.xlu0 %1877 }
 0x204   : >> { %v1913_v52 = vmul.f32 %v4241_v21, %v1898_v50  ;;  %v1909_v54 = vmul.f32 %v4241_v21, %v1878_v24  ;;  %v1768_v24 = vmul.f32 %v4239_v19, %v1749_v26 }
 0x206   : >> { %v1921_v5 = vadd.f32 %v1913_v52, %v1849_v63  ;;  %v1917_v7 = vadd.f32 %v1909_v54, %v1845_v45 }
 0x207   : >> { %v3934_v32 = vpop.permute.xlu1 %1738  ;;  %v3936_v6 = vpop.permute.xlu0 %1718 }
 0x20b   : >> { %v3938_v0 = vpop.permute.xlu1 %1815  ;;  %v3940_v62 = vpop.permute.xlu0 %1795 }
 0x20f   : >> { %v1893_v61 = vpop.permute.xlu1 %1892  ;;  %v1873_v8 = vpop.permute.xlu0 %1872 }
 0x210   : >> { %v1908_v52 = vmul.f32 %v4241_v21, %v1873_v8  ;;  %v1690_v8 = vmul.f32 %v4238_v4, %v3928_v28 }
 0x213   : >> { %v1970_v60 = vpop.permute.xlu1 %1969  ;;  %v1950_v43 = vpop.permute.xlu0 %1949 }
 0x214   : >> { %v1985_v20 = vmul.f32 %v4242_v12, %v1970_v60  ;;  %v1981_v14 = vmul.f32 %v4242_v12, %v1950_v43  ;;  %v1840_v43 = vmul.f32 %v4240_v41, %v1821_v27 }
 0x216   : >> { %v1993_v23 = vadd.f32 %v1985_v20, %v1921_v5  ;;  %v1989_v2 = vadd.f32 %v1981_v14, %v1917_v7  ;;  %v1776_v5 = vadd.f32 %v1768_v24, %v3912_v9  ;;  %v1772_v7 = vadd.f32 %v1764_v15, %v3914_v11 }
 0x217   : >> { %v3942_v13 = vpop.permute.xlu1 %1810  ;;  %v3944_v10 = vpop.permute.xlu0 %1790  ;;  %v1767_v11 = vmul.f32 %v4239_v19, %v3930_v46  ;;  %v1766_v20 = vmul.f32 %v4239_v19, %v3934_v32  ;;  %v1762_v32 = vmul.f32 %v4239_v19, %v3936_v6 }
 0x218   : >> { %v1848_v27 = vadd.f32 %v1840_v43, %v1776_v5  ;;  %v1844_v54 = vadd.f32 %v1836_v17, %v1772_v7 }
 0x21a   : >> { %v1916_v63 = vadd.f32 %v1908_v52, %v1844_v54 }
 0x21b   : >> { %v3948_v3 = vpop.permute.xlu1 %1887  ;;  %v3950_v18 = vpop.permute.xlu0 %1867 }
 0x21f   : >> { %v1965_v44 = vpop.permute.xlu1 %1964  ;;  %v1945_v31 = vpop.permute.xlu0 %1944 }
 0x220   : >> { %v1984_v30 = vmul.f32 %v4242_v12, %v1965_v44  ;;  %v1980_v9 = vmul.f32 %v4242_v12, %v1945_v31  ;;  %v1839_v44 = vmul.f32 %v4240_v41, %v3938_v0  ;;  %v1835_v31 = vmul.f32 %v4240_v41, %v3940_v62 }
 0x221   : >> { %v1911_v0 = vmul.f32 %v4241_v21, %v3948_v3  ;;  %v1838_v62 = vmul.f32 %v4240_v41, %v3942_v13 }
 0x223   : >> { %v2042_v22 = vpop.permute.xlu1 %2041  ;;  %v2022_v37 = vpop.permute.xlu0 %2021 }
 0x224   : >> { %v2057_v35 = vmul.f32 %v4243_v48, %v2042_v22  ;;  %v2053_v50 = vmul.f32 %v4243_v48, %v2022_v37  ;;  %v1912_v22 = vmul.f32 %v4241_v21, %v1893_v61  ;;  %v1763_v61 = vmul.f32 %v4239_v19, %v3932_v56 }
 0x225   : >> { %v1988_v56 = vadd.f32 %v1980_v9, %v1916_v63 }
 0x226   : >> { %v2065_v40 = vadd.f32 %v2057_v35, %v1993_v23  ;;  %v2061_v38 = vadd.f32 %v2053_v50, %v1989_v2  ;;  %v1694_v23 = vmul.f32 %v4238_v4, %v1667_v1  ;;  %v1920_v1 = vadd.f32 %v1912_v22, %v1848_v27 }
 0x227   : >> { %v1883_v58 = vpop.permute.xlu1 %1882  ;;  %v1863_v60 = vpop.permute.xlu0 %1862  ;;  %v1775_v35 = vadd.f32 %v1767_v11, %v3924_v57  ;;  %v1907_v50 = vmul.f32 %v4241_v21, %v3950_v18  ;;  %v1834_v57 = vmul.f32 %v4240_v41, %v3944_v10 }
 0x228   : >> { %v2069_v16 = vmax.f32 %v2061_v38, %v2065_v40  ;;  %v1702_v45 = vadd.f32 %v1694_v23, %v3918_v59  ;;  %v1992_v37 = vadd.f32 %v1984_v30, %v1920_v1  ;;  %v1771_v59 = vadd.f32 %v1763_v61, %v3926_v53 }
 0x229   : >> { %v1698_v40 = vadd.f32 %v1690_v8, %v3920_v29  ;;  %v1847_v38 = vadd.f32 %v1839_v44, %v1775_v35  ;;  %v1910_v18 = vmul.f32 %v4241_v21, %v1883_v58  ;;  %v1906_v29 = vmul.f32 %v4241_v21, %v1863_v60 }
 0x22a   : >> { %2662 = vmatprep.subr.mxu0 %v2069_v16  ;;  %2673 = vmatprep.subr.mxu1 %v2069_v16  ;;  %v1774_v17 = vadd.f32 %v1766_v20, %v1702_v45  ;;  %v1843_v3 = vadd.f32 %v1835_v31, %v1771_v59 }
 0x22b   : >> { %v1960_v26 = vpop.permute.xlu1 %1959  ;;  %2663 = vmatpush3.msra.mxu0 %v2069_v16  ;;  %2674 = vmatpush3.msra.mxu1 %v2069_v16  ;;  %v1940_v47 = vpop.permute.xlu0 %1939  ;;  %v1770_v5 = vadd.f32 %v1762_v32, %v1698_v40  ;;  %v1919_v7 = vadd.f32 %v1911_v0, %v1847_v38 }
 0x22c   : >> { %v1983_v53 = vmul.f32 %v4242_v12, %v1960_v26  ;;  %v1979_v16 = vmul.f32 %v4242_v12, %v1940_v47  ;;  %v1846_v22 = vadd.f32 %v1838_v62, %v1774_v17  ;;  %v1915_v52 = vadd.f32 %v1907_v50, %v1843_v3  ;;  %v4246_v50 = vld [vmem:[#allocation27_spill] sm:$0xff] }
 0x22d   : >> { %v1842_v10 = vadd.f32 %v1834_v57, %v1770_v5 }
 0x22e   : >> { %v1991_v23 = vadd.f32 %v1983_v53, %v1919_v7  ;;  %v1987_v47 = vadd.f32 %v1979_v16, %v1915_v52  ;;  %v1918_v11 = vadd.f32 %v1910_v18, %v1846_v22 }
 0x22f   : >> { %v2037_v46 = vpop.permute.xlu1 %2036  ;;  %v2017_v14 = vpop.permute.xlu0 %2016  ;;  %v1914_v61 = vadd.f32 %v1906_v29, %v1842_v10 }
 0x230   : >> { %v2056_v2 = vmul.f32 %v4243_v48, %v2037_v46  ;;  %v2052_v28 = vmul.f32 %v4243_v48, %v2017_v14 }
 0x232   : >> { %v2064_v24 = vadd.f32 %v2056_v2, %v1992_v37  ;;  %v2060_v15 = vadd.f32 %v2052_v28, %v1988_v56  ;;  %v4244_v2 = vld [vmem:[#allocation29_spill] sm:$0xff]  ;;  %v4245_v28 = vld [vmem:[#allocation31_spill] sm:$0xff] }
 0x233   : >> { %v1955_v6 = vpop.permute.xlu1 %1954  ;;  %v1935_v43 = vpop.permute.xlu0 %1934 }
 0x234   : >> { %v2068_v13 = vmax.f32 %v2060_v15, %v2064_v24  ;;  %v1982_v26 = vmul.f32 %v4242_v12, %v1955_v6  ;;  %v1978_v30 = vmul.f32 %v4242_v12, %v1935_v43 }
 0x236   : >> { %2664 = vmatprep.subr.mxu0 %v2068_v13  ;;  %2675 = vmatprep.subr.mxu1 %v2068_v13  ;;  %v1990_v1 = vadd.f32 %v1982_v26, %v1918_v11  ;;  %v1986_v20 = vadd.f32 %v1978_v30, %v1914_v61 }
 0x237   : >> { %v2032_v27 = vpop.permute.xlu1 %2031  ;;  %2665 = vmatpush3.msra.mxu0 %v2068_v13  ;;  %2676 = vmatpush3.msra.mxu1 %v2068_v13  ;;  %v2012_v54 = vpop.permute.xlu0 %2011 }
 0x238   : >> { %v2055_v9 = vmul.f32 %v4243_v48, %v2032_v27  ;;  %v2051_v58 = vmul.f32 %v4243_v48, %v2012_v54 }
 0x23a   : >> { %v2063_v60 = vadd.f32 %v2055_v9, %v1991_v23  ;;  %v2059_v8 = vadd.f32 %v2051_v58, %v1987_v47 }
 0x23b   : >> { %v2027_v63 = vpop.permute.xlu1 %2026  ;;  %v2007_v45 = vpop.permute.xlu0 %2006 }
 0x23c   : >> { %v2067_v44 = vmax.f32 %v2059_v8, %v2063_v60  ;;  %v2054_v31 = vmul.f32 %v4243_v48, %v2027_v63  ;;  %v2050_v46 = vmul.f32 %v4243_v48, %v2007_v45 }
 0x23e   : >> { %v2062_v14 = vadd.f32 %v2054_v31, %v1990_v1  ;;  %v2058_v37 = vadd.f32 %v2050_v46, %v1986_v20  ;;  %2666 = vmatprep.subr.mxu0 %v2067_v44  ;;  %2677 = vmatprep.subr.mxu1 %v2067_v44 }
 0x23f   : >> { %2667 = vmatpush3.msra.mxu0 %v2067_v44  ;;  %2678 = vmatpush3.msra.mxu1 %v2067_v44 }
 0x240   : >> { %v2066_v56 = vmax.f32 %v2058_v37, %v2062_v14 }
 0x242   : >> { %2668 = vmatprep.subr.mxu0 %v2066_v56  ;;  %2679 = vmatprep.subr.mxu1 %v2066_v56 }
 0x243   : >> { %2669 = vmatpush3.msra.mxu0 %v2066_v56  ;;  %2680 = vmatpush3.msra.mxu1 %v2066_v56 }
 0x244   : >> { %2671 = vmatmul.mubr.msk.f32.vlgmr.msra.gmra.mxu0 %vm2070_vm5, %v4244_v2  ;;  %2682 = vmatmul.mubr.msk.f32.vlgmr.msra.gmra.mxu1 %vm2070_vm5, %v4245_v28 }
 0x304   : >> { %v2672_v35 = vpop.f32.mrf.mxu0  ;;  %v2683_v59 = vpop.f32.mrf.mxu1 }
 0x305   : >> { %v2234_v32 = vmax.f32 %v2672_v35, %v2683_v59 }
 0x306   : >> { %v2143_v0 = vpop.f32.mrf.mxu0  ;;  %v2224_v62 = vpop.f32.mrf.mxu1 }
 0x307   : >> { %v2242_v24 = vadd.f32 %v4246_v50, %v2234_v32  ;;  %v2233_v15 = vmax.f32 %v2143_v0, %v2224_v62 }
 0x309   : >> { %v2244_v40 = vmax.f32 %v2242_v24, 0.0  ;;  %v2241_v38 = vadd.f32 %v4246_v50, %v2233_v15  ;;  %264 = sbr.rel (!%p262_p4) target bundleno = 49 (0x31), region = 95 }
 0x30b   : >> { %v2243_v57 = vmax.f32 %v2241_v38, 0.0  ;;  %2647 = vst.msk [vmem:[%s2357_s28 + $0x2e] sm:$0x3f] %vm2249_vm6, %v2244_v40 }
 0x30d   : >> { %2646 = vst.msk [vmem:[%s2357_s28 + $0x26] sm:$0xff] %vm171_vm0, %v2243_v57 }
 0x30e PF: > { %s13_s12 = sadd.s32 1, %s2716_s12  }
 0x30f   : > { %p10_p5 = scmp.ge.s32.totalorder %s13_s12, 4  }
 0x311   :  { %12 = sbr.rel (!%p10_p5) target bundleno = 1 (0x1), region = 106 }

// kernel: forward.4
= control target key start
LH: loop header
LB: loop body
LE: loop exit
PB: predicated region body
PF: predicated region fallthrough
CT: control target
= control target key end

     0   :  { %s4472_s12 = smov 0   ;;  %s5406_s0 = inlined_call_operand.vmem [shape: f32[2,328,16], index: 0, kind: input, shape index: {}]   ;;  %s5407_s1 = inlined_call_operand.vmem [shape: f32[25,16,32], index: 1, kind: input, shape index: {}]   ;;  %s5408_s2 = inlined_call_operand.vmem [shape: f32[1,32], index: 2, kind: input, shape index: {}]   ;;  %s5409_s3 = inlined_call_operand.vmem [shape: f32[2,49,32], index: 3, kind: output, shape index: {}]  }
   0x1 LB: > { %s3471_s13 = sadd.s32 4294967295, %s4443_s12   ;;  %p3475_p0 = scmp.ge.s32.totalorder %s4443_s12, 1  ;;  %s4443_s12 = sphi %s4472_s12, %s13_s12  }
   0x2   : > { %p137_p1 = scmp.lt.s32.totalorder %s4443_s12, 3 }
   0x4   : > { %p138_p2 = pnand %p3475_p0, %p137_p1 }
   0x5   : > { %p161_p3 = scmp.lt.s32.totalorder (!%p138_p2), %s3471_s13, 1  ;;  %s4749_s25 = smov (!%p138_p2), 0  }
   0x6   : > { %141 = sbr.rel (%p138_p2) target bundleno = 703 (0x2bf), region = 32 }
   0xb   : > { %v4483_v0 = vld [vmem:[%s5407_s1] sm:$0xff]  ;;  %v4488_v1 = vld [vmem:[%s5407_s1 + $0x8] sm:$0xff]  ;;  %v4493_v2 = vld [vmem:[%s5407_s1 + $0x10] sm:$0xff]  ;;  %v222_v3 = vlaneseq  ;;  %s5494_s13 = smov (!%p161_p3, %s3471_s13), 1  ;;  %v4449_v29 = vmov 0.0  }
   0xc   : > { %5414 = vst [vmem:[#allocation2_spill] sm:$0xff] %v4483_v0  ;;  %5415 = vst [vmem:[#allocation3_spill] sm:$0xff] %v4488_v1  ;;  %v4498_v4 = vld [vmem:[%s5407_s1 + $0x18] sm:$0xff]  ;;  %v4503_v5 = vld [vmem:[%s5407_s1 + $0x20] sm:$0xff]  ;;  %s4412_s11 = smul.u32 328, %s5494_s13 }
   0xd   : > { %5416 = vst [vmem:[#allocation4_spill] sm:$0xff] %v4493_v2  ;;  %5417 = vst [vmem:[#allocation5_spill] sm:$0xff] %v4498_v4  ;;  %v4508_v6 = vld [vmem:[%s5407_s1 + $0x28] sm:$0xff]  ;;  %v4513_v7 = vld [vmem:[%s5407_s1 + $0x30] sm:$0xff]  ;;  %v223_v10 = vshrl.u32 %v222_v3, 7  ;;  %v225_v11 = vand.u32 127, %v222_v3 }
   0xe   : > { %5418 = vst [vmem:[#allocation6_spill] sm:$0xff] %v4503_v5  ;;  %5419 = vst [vmem:[#allocation7_spill] sm:$0xff] %v4508_v6  ;;  %v4518_v8 = vld [vmem:[%s5407_s1 + $0x38] sm:$0xff]  ;;  %v4523_v9 = vld [vmem:[%s5407_s1 + $0x40] sm:$0xff]  ;;  %s4413_s20 = smul.u32 56, %s5494_s13  ;;  %s4573_s29 = scalar_lea.vmem %s5406_s0, %s4412_s11 }
   0xf   : > { %5420 = vst [vmem:[#allocation8_spill] sm:$0xff] %v4513_v7  ;;  %5421 = vst [vmem:[#allocation9_spill] sm:$0xff] %v4518_v8  ;;  %v4528_v12 = vld [vmem:[%s5407_s1 + $0x48] sm:$0xff]  ;;  %v4533_v13 = vld [vmem:[%s5407_s1 + $0x50] sm:$0xff]  ;;  %v226_v18 = vmul.u32 2, %v223_v10 }
  0x10   : > { %5422 = vst [vmem:[#allocation10_spill] sm:$0xff] %v4523_v9  ;;  %5423 = vst [vmem:[#allocation11_spill] sm:$0xff] %v4528_v12  ;;  %v4538_v14 = vld [vmem:[%s5407_s1 + $0x58] sm:$0xff]  ;;  %v4543_v15 = vld [vmem:[%s5407_s1 + $0x60] sm:$0xff]  ;;  %s4593_s10 = scalar_lea.vmem %s5409_s3, %s4413_s20 }
  0x11   : > { %5424 = vst [vmem:[#allocation12_spill] sm:$0xff] %v4533_v13  ;;  %5425 = vst [vmem:[#allocation13_spill] sm:$0xff] %v4538_v14  ;;  %v4548_v16 = vld [vmem:[%s5407_s1 + $0x68] sm:$0xff]  ;;  %v4553_v17 = vld [vmem:[%s5407_s1 + $0x70] sm:$0xff]  ;;  %vm227_vm0 = vcmp.eq.s32.totalorder %v225_v11, %v226_v18  ;;  %v230_v25 = vadd.s32 1, %v226_v18 }
  0x12   : > { %5426 = vst [vmem:[#allocation14_spill] sm:$0xff] %v4543_v15  ;;  %5427 = vst [vmem:[#allocation15_spill] sm:$0xff] %v4548_v16  ;;  %v4558_v19 = vld [vmem:[%s5407_s1 + $0x78] sm:$0xff]  ;;  %v4563_v20 = vld [vmem:[%s5407_s1 + $0x80] sm:$0xff]  ;;  %v4610_v30 = vsel %vm227_vm0, 1.0, %v4449_v29 }
  0x13   : > { %5428 = vst [vmem:[#allocation16_spill] sm:$0xff] %v4553_v17  ;;  %5429 = vst [vmem:[#allocation17_spill] sm:$0xff] %v4558_v19  ;;  %v4568_v21 = vld [vmem:[%s5407_s1 + $0x88] sm:$0xff]  ;;  %v4578_v22 = vld [vmem:[%s5407_s1 + $0x90] sm:$0xff]  ;;  %vm231_vm1 = vcmp.eq.s32.totalorder %v225_v11, %v230_v25 }
  0x14   : > { %5430 = vst [vmem:[#allocation18_spill] sm:$0xff] %v4563_v20  ;;  %5431 = vst [vmem:[#allocation19_spill] sm:$0xff] %v4568_v21  ;;  %v4583_v23 = vld [vmem:[%s5407_s1 + $0x98] sm:$0xff]  ;;  %v4588_v24 = vld [vmem:[%s5407_s1 + $0xa0] sm:$0xff]  ;;  %v4642_v37 = vsel %vm231_vm1, 1.0, %v4449_v29 }
  0x15   : > { %5432 = vst [vmem:[#allocation20_spill] sm:$0xff] %v4578_v22  ;;  %5433 = vst [vmem:[#allocation21_spill] sm:$0xff] %v4583_v23  ;;  %v4598_v26 = vld [vmem:[%s5407_s1 + $0xa8] sm:$0xff]  ;;  %v4603_v27 = vld [vmem:[%s5407_s1 + $0xb0] sm:$0xff] }
  0x16   : > { %5434 = vst [vmem:[#allocation22_spill] sm:$0xff] %v4588_v24  ;;  %5435 = vst [vmem:[#allocation23_spill] sm:$0xff] %v4598_v26  ;;  %v4608_v28 = vld [vmem:[%s5407_s1 + $0xb8] sm:$0xff]  ;;  %v4615_v31 = vld [vmem:[%s5407_s1 + $0xc0] sm:$0xff] }
  0x17   : > { %5436 = vst [vmem:[#allocation24_spill] sm:$0xff] %v4603_v27  ;;  %5437 = vst [vmem:[#allocation25_spill] sm:$0xff] %v4608_v28  ;;  %v4620_v32 = vld [vmem:[%s5407_s1 + $0xc8] sm:$0xff]  ;;  %v4625_v33 = vld [vmem:[%s5407_s1 + $0xd0] sm:$0xff] }
  0x18   : > { %5438 = vst [vmem:[#allocation26_spill] sm:$0xff] %v4615_v31  ;;  %5439 = vst [vmem:[#allocation27_spill] sm:$0xff] %v4620_v32  ;;  %v4630_v34 = vld [vmem:[%s5407_s1 + $0xd8] sm:$0xff]  ;;  %v4635_v35 = vld [vmem:[%s5407_s1 + $0xe0] sm:$0xff] }
  0x19   : > { %5440 = vst [vmem:[#allocation28_spill] sm:$0xff] %v4625_v33  ;;  %5441 = vst [vmem:[#allocation29_spill] sm:$0xff] %v4630_v34  ;;  %v4640_v36 = vld [vmem:[%s5407_s1 + $0xe8] sm:$0xff]  ;;  %v4647_v38 = vld [vmem:[%s5407_s1 + $0xf0] sm:$0xff] }
  0x1a   : > { %5442 = vst [vmem:[#allocation30_spill] sm:$0xff] %v4635_v35  ;;  %5443 = vst [vmem:[#allocation31_spill] sm:$0xff] %v4640_v36  ;;  %v4652_v39 = vld [vmem:[%s5407_s1 + $0xf8] sm:$0xff]  ;;  %v4657_v40 = vld [vmem:[%s5407_s1 + $0x100] sm:$0xff] }
  0x1b   : > { %5444 = vst [vmem:[#allocation32_spill] sm:$0xff] %v4647_v38  ;;  %5445 = vst [vmem:[#allocation33_spill] sm:$0xff] %v4652_v39  ;;  %v4662_v41 = vld [vmem:[%s5407_s1 + $0x108] sm:$0xff]  ;;  %v4667_v42 = vld [vmem:[%s5407_s1 + $0x110] sm:$0xff] }
  0x1c   : > { %5446 = vst [vmem:[#allocation34_spill] sm:$0xff] %v4657_v40  ;;  %5447 = vst [vmem:[#allocation35_spill] sm:$0xff] %v4662_v41  ;;  %v4672_v43 = vld [vmem:[%s5407_s1 + $0x118] sm:$0xff]  ;;  %v4677_v44 = vld [vmem:[%s5407_s1 + $0x120] sm:$0xff] }
  0x1d   : > { %5448 = vst [vmem:[#allocation36_spill] sm:$0xff] %v4667_v42  ;;  %5449 = vst [vmem:[#allocation37_spill] sm:$0xff] %v4672_v43  ;;  %v4682_v45 = vld [vmem:[%s5407_s1 + $0x128] sm:$0xff]  ;;  %v4687_v46 = vld [vmem:[%s5407_s1 + $0x130] sm:$0xff] }
  0x1e   : > { %5450 = vst [vmem:[#allocation38_spill] sm:$0xff] %v4677_v44  ;;  %5451 = vst [vmem:[#allocation39_spill] sm:$0xff] %v4682_v45  ;;  %v4692_v47 = vld [vmem:[%s5407_s1 + $0x138] sm:$0xff]  ;;  %v4697_v48 = vld [vmem:[%s5407_s1 + $0x140] sm:$0xff] }
  0x1f   : > { %5452 = vst [vmem:[#allocation40_spill] sm:$0xff] %v4687_v46  ;;  %v4702_v49 = vld [vmem:[%s5407_s1 + $0x148] sm:$0xff]  ;;  %v4707_v50 = vld [vmem:[%s5407_s1 + $0x150] sm:$0xff]  ;;  %v4712_v51 = vld [vmem:[%s5407_s1 + $0x158] sm:$0xff] }
  0x20   : > { %v4717_v52 = vld [vmem:[%s5407_s1 + $0x160] sm:$0xff]  ;;  %v4722_v53 = vld [vmem:[%s5407_s1 + $0x168] sm:$0xff]  ;;  %v4727_v54 = vld [vmem:[%s5407_s1 + $0x170] sm:$0xff] }
  0x21   : > { %v4732_v55 = vld [vmem:[%s5407_s1 + $0x178] sm:$0xff]  ;;  %v4737_v56 = vld [vmem:[%s5407_s1 + $0x180] sm:$0xff]  ;;  %v4742_v57 = vld [vmem:[%s5407_s1 + $0x188] sm:$0xff] }
  0x22   : > { %v4747_v58 = vld [vmem:[%s5408_s2] ss:$0 sm:$0xff] }
  0x23 LB: >> { %v5453_v4 = vld [vmem:[#allocation5_spill] sm:$0xff]  ;;  %v5454_v2 = vld [vmem:[#allocation4_spill] sm:$0xff]  ;;  %v5412_v59 = vmov 0.0   ;;  %s240_s26 = smul.u32 36, %s4447_s25  ;;  %vm254_vm2 = vcmask 130048   ;;  %vm4451_vm3 = vmmov 0   ;;  %s4447_s25 = sphi %s4749_s25, %s239_s25  }
  0x24   : >> { %3915 = vmatprep.subr.mxu0 %v5412_v59  ;;  %4408 = vmatprep.subr.mxu1 %v5412_v59  ;;  %v5455_v1 = vld [vmem:[#allocation3_spill] sm:$0xff]  ;;  %v5456_v0 = vld [vmem:[#allocation2_spill] sm:$0xff]  ;;  %v5458_v8 = vld [vmem:[#allocation9_spill] sm:$0xff]  ;;  %vm3159_vm4 = vcmask 1045504   ;;  %vm3175_vm5 = vcmask 1041408   ;;  %vm3171_vm6 = vcmask 146432  }
  0x25   : >> { %3916 = vmatpush3.msra.mxu0 %v5453_v4  ;;  %4410 = vmatpush3.msra.mxu1 %v5453_v4  ;;  %s4764_s27 = scalar_lea.vmem %s4573_s29, %s240_s26  ;;  %v5457_v6 = vld [vmem:[#allocation7_spill] sm:$0xff]  ;;  %v5459_v5 = vld [vmem:[#allocation6_spill] sm:$0xff]  ;;  %v5460_v7 = vld [vmem:[#allocation8_spill] sm:$0xff]  ;;  %s3331_s28 = smul.u32 7, %s4447_s25  ;;  %vm3333_vm7 = vcmask 260096  }
  0x26   : >> { %3917 = vmatprep.subr.mxu0 %v5412_v59  ;;  %4409 = vmatprep.subr.mxu1 %v5412_v59  ;;  %v3480_v60 = vld [vmem:[%s4764_s27 + $0x1] sm:$0xff]  ;;  %v3481_v62 = vld [vmem:[%s4764_s27 + $0x9] sm:$0xff]  ;;  %v3482_v3 = vld [vmem:[%s4764_s27 + $0x11] sm:$0xff]  ;;  %s239_s25 = sadd.s32 1, %s4447_s25  }
  0x27   : >> { %3918 = vmatpush3.msra.mxu0 %v5454_v2  ;;  %4411 = vmatpush3.msra.mxu1 %v5454_v2  ;;  %v3484_v61 = vld [vmem:[%s4764_s27 + $0x21] sm:$0xf]  ;;  %v243_v10 = vld [vmem:[%s4764_s27 + $0x8] sm:$0xff]  ;;  %v3483_v11 = vld [vmem:[%s4764_s27 + $0x19] sm:$0xff]  ;;  %s3332_s13 = scalar_lea.vmem %s4593_s10, %s3331_s28  ;;  %p236_p4 = scmp.ge.s32.totalorder %s239_s25, 7  }
  0x28   : >> { %3919 = vmatprep.mubr.msk.f32.mxu0 %vm4451_vm3, %v5412_v59  ;;  %3931 = vmatprep.mubr.msk.f32.mxu1 %vm4451_vm3, %v5412_v59  ;;  %v242_v63 = vld [vmem:[%s4764_s27] sm:$0xff]  ;;  %v244_v18 = vld [vmem:[%s4764_s27 + $0x10] sm:$0xff]  ;;  %v245_v29 = vld [vmem:[%s4764_s27 + $0x18] sm:$0xff] }
  0x29   : >> { %3920 = vmatmul.mubr.msk.f32.vlgmr.msra.gmra.mxu0 %vm254_vm2, %v3480_v60  ;;  %3932 = vmatmul.mubr.msk.f32.vlgmr.msra.gmra.mxu1 %vm254_vm2, %v3484_v61  ;;  %v3495_v25 = vld [vmem:[%s4764_s27 + $0x2] sm:$0xff]  ;;  %v3496_v60 = vld [vmem:[%s4764_s27 + $0xa] sm:$0xff]  ;;  %v5463_v14 = vld [vmem:[#allocation13_spill] sm:$0xff] }
  0x2a   : >> { %3934 = vmatprep.subr.mxu1 %v5412_v59  ;;  %3922 = vmatprep.mubr.msk.f32.mxu0 %vm4451_vm3, %v5412_v59  ;;  %v246_v61 = vld [vmem:[%s4764_s27 + $0x20] sm:$0xf]  ;;  %v5461_v12 = vld [vmem:[#allocation11_spill] sm:$0xff]  ;;  %v5464_v13 = vld [vmem:[#allocation12_spill] sm:$0xff] }
  0x2b   : >> { %3935 = vmatpush3.msra.mxu1 %v5455_v1  ;;  %3938 = vmatprep.mubr.msk.f32.mxu1 %vm4451_vm3, %v5412_v59  ;;  %v5462_v9 = vld [vmem:[#allocation10_spill] sm:$0xff]  ;;  %v5465_v16 = vld [vmem:[#allocation15_spill] sm:$0xff]  ;;  %v5467_v19 = vld [vmem:[#allocation17_spill] sm:$0xff] }
  0x2c   : >> { %3936 = vmatprep.subr.mxu1 %v5412_v59  ;;  %3953 = vmatprep.subr.mxu0 %v5412_v59  ;;  %v5466_v15 = vld [vmem:[#allocation14_spill] sm:$0xff]  ;;  %v5468_v17 = vld [vmem:[#allocation16_spill] sm:$0xff]  ;;  %v5469_v21 = vld [vmem:[#allocation19_spill] sm:$0xff] }
  0x2d   : >> { %3937 = vmatpush3.msra.mxu1 %v5456_v0  ;;  %3923 = vmatmul.mubr.msk.f32.gmra.mxu0 %vm254_vm2, %v3481_v62  ;;  %v3497_v62 = vld [vmem:[%s4764_s27 + $0x12] sm:$0xff]  ;;  %v5470_v20 = vld [vmem:[#allocation18_spill] sm:$0xff]  ;;  %v5473_v26 = vld [vmem:[#allocation23_spill] sm:$0xff] }
  0x2e   : >> { %3939 = vmatmul.mubr.msk.f32.vlgmr.msra.gmra.mxu1 %vm254_vm2, %v242_v63  ;;  %3925 = vmatprep.mubr.msk.f32.mxu0 %vm4451_vm3, %v5412_v59  ;;  %v3505_v63 = vld [vmem:[%s4764_s27 + $0x3] sm:$0xff]  ;;  %v5471_v23 = vld [vmem:[#allocation21_spill] sm:$0xff]  ;;  %v5472_v22 = vld [vmem:[#allocation20_spill] sm:$0xff] }
  0x2f   : >> { %3941 = vmatprep.mubr.msk.f32.mxu1 %vm4451_vm3, %v5412_v59  ;;  %3954 = vmatpush3.msra.mxu0 %v5457_v6  ;;  %v5474_v24 = vld [vmem:[#allocation22_spill] sm:$0xff]  ;;  %v5475_v28 = vld [vmem:[#allocation25_spill] sm:$0xff]  ;;  %v5476_v27 = vld [vmem:[#allocation24_spill] sm:$0xff] }
  0x30   : >> { %3955 = vmatprep.subr.mxu0 %v5412_v59  ;;  %3972 = vmatprep.subr.mxu1 %v5412_v59  ;;  %v5477_v32 = vld [vmem:[#allocation27_spill] sm:$0xff]  ;;  %v5478_v31 = vld [vmem:[#allocation26_spill] sm:$0xff]  ;;  %v5479_v34 = vld [vmem:[#allocation29_spill] sm:$0xff] }
  0x31   : >> { %3926 = vmatmul.mubr.msk.f32.gmra.mxu0 %vm254_vm2, %v3482_v3  ;;  %3973 = vmatpush3.msra.mxu1 %v5458_v8  ;;  %v3498_v3 = vld [vmem:[%s4764_s27 + $0x1a] sm:$0xff]  ;;  %v5480_v33 = vld [vmem:[#allocation28_spill] sm:$0xff]  ;;  %v5481_v36 = vld [vmem:[#allocation31_spill] sm:$0xff] }
  0x32   : >> { %3942 = vmatmul.mubr.msk.f32.gmra.mxu1 %vm254_vm2, %v243_v10  ;;  %3928 = vmatprep.mubr.msk.f32.mxu0 %vm4451_vm3, %v5412_v59  ;;  %v3506_v10 = vld [vmem:[%s4764_s27 + $0xb] sm:$0xff]  ;;  %v5482_v35 = vld [vmem:[#allocation30_spill] sm:$0xff]  ;;  %v5483_v39 = vld [vmem:[#allocation33_spill] sm:$0xff] }
  0x33   : >> { %3944 = vmatprep.mubr.msk.f32.mxu1 %vm4451_vm3, %v5412_v59  ;;  %3956 = vmatpush3.msra.mxu0 %v5459_v5  ;;  %v5484_v38 = vld [vmem:[#allocation32_spill] sm:$0xff]  ;;  %v5485_v41 = vld [vmem:[#allocation35_spill] sm:$0xff]  ;;  %v5486_v40 = vld [vmem:[#allocation34_spill] sm:$0xff] }
  0x34   : >> { %3974 = vmatprep.subr.mxu1 %v5412_v59  ;;  %3991 = vmatprep.subr.mxu0 %v5412_v59  ;;  %v5487_v43 = vld [vmem:[#allocation37_spill] sm:$0xff]  ;;  %v5488_v42 = vld [vmem:[#allocation36_spill] sm:$0xff]  ;;  %v5489_v45 = vld [vmem:[#allocation39_spill] sm:$0xff] }
  0x35   : >> { %3929 = vmatmul.mubr.msk.f32.gmra.mxu0 %vm254_vm2, %v3483_v11  ;;  %3975 = vmatpush3.msra.mxu1 %v5460_v7  ;;  %v3499_v11 = vld [vmem:[%s4764_s27 + $0x22] sm:$0xf]  ;;  %v5491_v46 = vld [vmem:[#allocation40_spill] sm:$0xff] }
  0x36   : >> { %3945 = vmatmul.mubr.msk.f32.gmra.mxu1 %vm254_vm2, %v244_v18  ;;  %3957 = vmatprep.mubr.msk.f32.mxu0 %vm4451_vm3, %v5412_v59  ;;  %v3507_v18 = vld [vmem:[%s4764_s27 + $0x13] sm:$0xff]  ;;  %v5490_v44 = vld [vmem:[#allocation38_spill] sm:$0xff] }
  0x37   : >> { %3947 = vmatprep.mubr.msk.f32.mxu1 %vm4451_vm3, %v5412_v59  ;;  %4010 = vmatprep.subr.mxu1 %v5412_v59  ;;  %v5239_v0 = vld [vmem:[%s4764_s27 + $0x52] sm:$0xff] }
  0x39   : >> { %3958 = vmatmul.mubr.msk.f32.vlgmr.msra.gmra.mxu0 %vm254_vm2, %v3495_v25  ;;  %v3515_v25 = vld [vmem:[%s4764_s27 + $0x4] sm:$0xff] }
  0x3a   : >> { %3948 = vmatmul.mubr.msk.f32.gmra.mxu1 %vm254_vm2, %v245_v29  ;;  %3960 = vmatprep.mubr.msk.f32.mxu0 %vm4451_vm3, %v5412_v59  ;;  %v3508_v29 = vld [vmem:[%s4764_s27 + $0x1b] sm:$0xff] }
  0x3b   : >> { %3950 = vmatprep.mubr.msk.f32.mxu1 %vm4451_vm3, %v5412_v59  ;;  %3992 = vmatpush3.msra.mxu0 %v5461_v12 }
  0x3c   : >> { %3993 = vmatprep.subr.mxu0 %v5412_v59 }
  0x3d   : >> { %3961 = vmatmul.mubr.msk.f32.gmra.mxu0 %vm254_vm2, %v3496_v60  ;;  %v3516_v60 = vld [vmem:[%s4764_s27 + $0xc] sm:$0xff] }
  0x3e   : >> { %3951 = vmatmul.mubr.msk.f32.gmra.mxu1 %vm254_vm2, %v246_v61  ;;  %3963 = vmatprep.mubr.msk.f32.mxu0 %vm4451_vm3, %v5412_v59  ;;  %v3509_v61 = vld [vmem:[%s4764_s27 + $0x23] sm:$0xf] }
  0x3f   : >> { %3976 = vmatprep.mubr.msk.f32.mxu1 %vm4451_vm3, %v5412_v59  ;;  %3994 = vmatpush3.msra.mxu0 %v5462_v9 }
  0x40   : >> { %4029 = vmatprep.subr.mxu0 %v5412_v59 }
  0x41   : >> { %3964 = vmatmul.mubr.msk.f32.gmra.mxu0 %vm254_vm2, %v3497_v62 }
  0x42   : >> { %3977 = vmatmul.mubr.msk.f32.vlgmr.msra.gmra.mxu1 %vm254_vm2, %v3505_v63  ;;  %3966 = vmatprep.mubr.msk.f32.mxu0 %vm4451_vm3, %v5412_v59  ;;  %v3517_v63 = vld [vmem:[%s4764_s27 + $0x14] sm:$0xff] }
  0x43   : >> { %3979 = vmatprep.mubr.msk.f32.mxu1 %vm4451_vm3, %v5412_v59  ;;  %4011 = vmatpush3.msra.mxu1 %v5463_v14 }
  0x44   : >> { %4012 = vmatprep.subr.mxu1 %v5412_v59 }
  0x45   : >> { %3967 = vmatmul.mubr.msk.f32.gmra.mxu0 %vm254_vm2, %v3498_v3  ;;  %4013 = vmatpush3.msra.mxu1 %v5464_v13 }
  0x46   : >> { %3980 = vmatmul.mubr.msk.f32.gmra.mxu1 %vm254_vm2, %v3506_v10  ;;  %3969 = vmatprep.mubr.msk.f32.mxu0 %vm4451_vm3, %v5412_v59  ;;  %v3518_v10 = vld [vmem:[%s4764_s27 + $0x1c] sm:$0xff] }
  0x47   : >> { %3982 = vmatprep.mubr.msk.f32.mxu1 %vm4451_vm3, %v5412_v59  ;;  %4048 = vmatprep.subr.mxu1 %v5412_v59 }
  0x49   : >> { %3970 = vmatmul.mubr.msk.f32.gmra.mxu0 %vm254_vm2, %v3499_v11  ;;  %v3527_v11 = vld [vmem:[%s4764_s27 + $0x22] sm:$0xff] }
  0x4a   : >> { %3983 = vmatmul.mubr.msk.f32.gmra.mxu1 %vm254_vm2, %v3507_v18  ;;  %3995 = vmatprep.mubr.msk.f32.mxu0 %vm4451_vm3, %v5412_v59 }
  0x4b   : >> { %3985 = vmatprep.mubr.msk.f32.mxu1 %vm4451_vm3, %v5412_v59 }
  0x4d   : >> { %3996 = vmatmul.mubr.msk.f32.vlgmr.msra.gmra.mxu0 %vm254_vm2, %v3515_v25  ;;  %v3529_v25 = vld [vmem:[%s4764_s27 + $0x32] sm:$0xf] }
  0x4e   : >> { %3986 = vmatmul.mubr.msk.f32.gmra.mxu1 %vm254_vm2, %v3508_v29  ;;  %3998 = vmatprep.mubr.msk.f32.mxu0 %vm4451_vm3, %v5412_v59 }
  0x4f   : >> { %3988 = vmatprep.mubr.msk.f32.mxu1 %vm4451_vm3, %v5412_v59  ;;  %4030 = vmatpush3.msra.mxu0 %v5465_v16 }
  0x50   : >> { %4031 = vmatprep.subr.mxu0 %v5412_v59 }
  0x51   : >> { %3999 = vmatmul.mubr.msk.f32.gmra.mxu0 %vm254_vm2, %v3516_v60  ;;  %v3539_v60 = vld [vmem:[%s4764_s27 + $0x33] sm:$0xf] }
  0x52   : >> { %3989 = vmatmul.mubr.msk.f32.gmra.mxu1 %vm254_vm2, %v3509_v61  ;;  %4001 = vmatprep.mubr.msk.f32.mxu0 %vm4451_vm3, %v5412_v59  ;;  %v3547_v61 = vld [vmem:[%s4764_s27 + $0x24] sm:$0xff] }
  0x53   : >> { %4014 = vmatprep.mubr.msk.f32.mxu1 %vm4451_vm3, %v5412_v59  ;;  %4032 = vmatpush3.msra.mxu0 %v5466_v15 }
  0x54   : >> { %4067 = vmatprep.subr.mxu0 %v5412_v59 }
  0x55   : >> { %4002 = vmatmul.mubr.msk.f32.gmra.mxu0 %vm254_vm2, %v3517_v63 }
  0x56   : >> { %4015 = vmatmul.mubr.msk.f32.vlgmr.msra.gmra.mxu1 %vm254_vm2, %v3497_v62  ;;  %4004 = vmatprep.mubr.msk.f32.mxu0 %vm4451_vm3, %v5412_v59  ;;  %v3519_v62 = vld [vmem:[%s4764_s27 + $0x24] sm:$0xf] }
  0x57   : >> { %4017 = vmatprep.mubr.msk.f32.mxu1 %vm4451_vm3, %v5412_v59  ;;  %4049 = vmatpush3.msra.mxu1 %v5467_v19 }
  0x58   : >> { %4050 = vmatprep.subr.mxu1 %v5412_v59 }
  0x59   : >> { %4005 = vmatmul.mubr.msk.f32.gmra.mxu0 %vm254_vm2, %v3518_v10  ;;  %4051 = vmatpush3.msra.mxu1 %v5468_v17 }
  0x5a   : >> { %4018 = vmatmul.mubr.msk.f32.gmra.mxu1 %vm254_vm2, %v3498_v3  ;;  %4007 = vmatprep.mubr.msk.f32.mxu0 %vm4451_vm3, %v5412_v59  ;;  %v3528_v3 = vld [vmem:[%s4764_s27 + $0x2a] sm:$0xff] }
  0x5b   : >> { %4020 = vmatprep.mubr.msk.f32.mxu1 %vm4451_vm3, %v5412_v59  ;;  %4086 = vmatprep.subr.mxu1 %v5412_v59 }
  0x5d   : >> { %4008 = vmatmul.mubr.msk.f32.gmra.mxu0 %vm254_vm2, %v3519_v62  ;;  %v3556_v62 = vld [vmem:[%s4764_s27 + $0x1d] sm:$0xff] }
  0x5e   : >> { %4021 = vmatmul.mubr.msk.f32.gmra.mxu1 %vm254_vm2, %v3527_v11  ;;  %4033 = vmatprep.mubr.msk.f32.mxu0 %vm4451_vm3, %v5412_v59  ;;  %v3549_v11 = vld [vmem:[%s4764_s27 + $0x34] sm:$0xf] }
  0x5f   : >> { %4023 = vmatprep.mubr.msk.f32.mxu1 %vm4451_vm3, %v5412_v59 }
  0x61   : >> { %4034 = vmatmul.mubr.msk.f32.vlgmr.msra.gmra.mxu0 %vm254_vm2, %v3507_v18  ;;  %v3537_v18 = vld [vmem:[%s4764_s27 + $0x23] sm:$0xff] }
  0x62   : >> { %4024 = vmatmul.mubr.msk.f32.gmra.mxu1 %vm254_vm2, %v3528_v3  ;;  %4036 = vmatprep.mubr.msk.f32.mxu0 %vm4451_vm3, %v5412_v59  ;;  %v3557_v3 = vld [vmem:[%s4764_s27 + $0x25] sm:$0xff] }
  0x63   : >> { %4026 = vmatprep.mubr.msk.f32.mxu1 %vm4451_vm3, %v5412_v59  ;;  %4068 = vmatpush3.msra.mxu0 %v5469_v21 }
  0x64   : >> { %4069 = vmatprep.subr.mxu0 %v5412_v59 }
  0x65   : >> { %4037 = vmatmul.mubr.msk.f32.gmra.mxu0 %vm254_vm2, %v3508_v29  ;;  %v3538_v29 = vld [vmem:[%s4764_s27 + $0x2b] sm:$0xff] }
  0x66   : >> { %4027 = vmatmul.mubr.msk.f32.gmra.mxu1 %vm254_vm2, %v3529_v25  ;;  %4039 = vmatprep.mubr.msk.f32.mxu0 %vm4451_vm3, %v5412_v59  ;;  %v3565_v25 = vld [vmem:[%s4764_s27 + $0x16] sm:$0xff] }
  0x67   : >> { %4052 = vmatprep.mubr.msk.f32.mxu1 %vm4451_vm3, %v5412_v59  ;;  %4070 = vmatpush3.msra.mxu0 %v5470_v20 }
  0x68   : >> { %4105 = vmatprep.subr.mxu0 %v5412_v59 }
  0x69   : >> { %4040 = vmatmul.mubr.msk.f32.gmra.mxu0 %vm254_vm2, %v3537_v18  ;;  %v3558_v18 = vld [vmem:[%s4764_s27 + $0x2d] sm:$0xff] }
  0x6a   : >> { %4053 = vmatmul.mubr.msk.f32.vlgmr.msra.gmra.mxu1 %vm254_vm2, %v3517_v63  ;;  %4042 = vmatprep.mubr.msk.f32.mxu0 %vm4451_vm3, %v5412_v59  ;;  %v3555_v63 = vld [vmem:[%s4764_s27 + $0x15] sm:$0xff] }
  0x6b   : >> { %4055 = vmatprep.mubr.msk.f32.mxu1 %vm4451_vm3, %v5412_v59  ;;  %4087 = vmatpush3.msra.mxu1 %v5471_v23 }
  0x6c   : >> { %4088 = vmatprep.subr.mxu1 %v5412_v59 }
  0x6d   : >> { %4043 = vmatmul.mubr.msk.f32.gmra.mxu0 %vm254_vm2, %v3538_v29  ;;  %4089 = vmatpush3.msra.mxu1 %v5472_v22  ;;  %v3566_v29 = vld [vmem:[%s4764_s27 + $0x1e] sm:$0xff] }
  0x6e   : >> { %4056 = vmatmul.mubr.msk.f32.gmra.mxu1 %vm254_vm2, %v3518_v10  ;;  %4045 = vmatprep.mubr.msk.f32.mxu0 %vm4451_vm3, %v5412_v59  ;;  %v3548_v10 = vld [vmem:[%s4764_s27 + $0x2c] sm:$0xff] }
  0x6f   : >> { %4058 = vmatprep.mubr.msk.f32.mxu1 %vm4451_vm3, %v5412_v59  ;;  %4124 = vmatprep.subr.mxu1 %v5412_v59 }
  0x71   : >> { %4046 = vmatmul.mubr.msk.f32.gmra.mxu0 %vm254_vm2, %v3539_v60  ;;  %v3559_v60 = vld [vmem:[%s4764_s27 + $0x35] sm:$0xf] }
  0x72   : >> { %4059 = vmatmul.mubr.msk.f32.gmra.mxu1 %vm254_vm2, %v3547_v61  ;;  %4071 = vmatprep.mubr.msk.f32.mxu0 %vm4451_vm3, %v5412_v59 }
  0x73   : >> { %4061 = vmatprep.mubr.msk.f32.mxu1 %vm4451_vm3, %v5412_v59 }
  0x75   : >> { %4072 = vmatmul.mubr.msk.f32.vlgmr.msra.gmra.mxu0 %vm254_vm2, %v3555_v63  ;;  %v3567_v63 = vld [vmem:[%s4764_s27 + $0x26] sm:$0xff] }
  0x76   : >> { %4062 = vmatmul.mubr.msk.f32.gmra.mxu1 %vm254_vm2, %v3548_v10  ;;  %4074 = vmatprep.mubr.msk.f32.mxu0 %vm4451_vm3, %v5412_v59 }
  0x77   : >> { %4064 = vmatprep.mubr.msk.f32.mxu1 %vm4451_vm3, %v5412_v59  ;;  %4106 = vmatpush3.msra.mxu0 %v5473_v26 }
  0x78   : >> { %4107 = vmatprep.subr.mxu0 %v5412_v59 }
  0x79   : >> { %4075 = vmatmul.mubr.msk.f32.gmra.mxu0 %vm254_vm2, %v3556_v62  ;;  %v3568_v62 = vld [vmem:[%s4764_s27 + $0x2e] sm:$0xff] }
  0x7a   : >> { %4065 = vmatmul.mubr.msk.f32.gmra.mxu1 %vm254_vm2, %v3549_v11  ;;  %4077 = vmatprep.mubr.msk.f32.mxu0 %vm4451_vm3, %v5412_v59  ;;  %v3569_v11 = vld [vmem:[%s4764_s27 + $0x36] sm:$0xf] }
  0x7b   : >> { %4090 = vmatprep.mubr.msk.f32.mxu1 %vm4451_vm3, %v5412_v59  ;;  %4108 = vmatpush3.msra.mxu0 %v5474_v24 }
  0x7c   : >> { %4143 = vmatprep.subr.mxu0 %v5412_v59 }
  0x7d   : >> { %4078 = vmatmul.mubr.msk.f32.gmra.mxu0 %vm254_vm2, %v3557_v3 }
  0x7e   : >> { %4091 = vmatmul.mubr.msk.f32.vlgmr.msra.gmra.mxu1 %vm254_vm2, %v3565_v25  ;;  %4080 = vmatprep.mubr.msk.f32.mxu0 %vm4451_vm3, %v5412_v59  ;;  %v3587_v25 = vld [vmem:[%s4764_s27 + $0x35] sm:$0xff] }
  0x7f   : >> { %4093 = vmatprep.mubr.msk.f32.mxu1 %vm4451_vm3, %v5412_v59  ;;  %4125 = vmatpush3.msra.mxu1 %v5475_v28 }
  0x80   : >> { %4126 = vmatprep.subr.mxu1 %v5412_v59 }
  0x81   : >> { %4081 = vmatmul.mubr.msk.f32.gmra.mxu0 %vm254_vm2, %v3558_v18  ;;  %4127 = vmatpush3.msra.mxu1 %v5476_v27 }
  0x82   : >> { %4094 = vmatmul.mubr.msk.f32.gmra.mxu1 %vm254_vm2, %v3566_v29  ;;  %4083 = vmatprep.mubr.msk.f32.mxu0 %vm4451_vm3, %v5412_v59  ;;  %v3589_v29 = vld [vmem:[%s4764_s27 + $0x45] sm:$0xf] }
  0x83   : >> { %4096 = vmatprep.mubr.msk.f32.mxu1 %vm4451_vm3, %v5412_v59  ;;  %4162 = vmatprep.subr.mxu1 %v5412_v59 }
  0x85   : >> { %4084 = vmatmul.mubr.msk.f32.gmra.mxu0 %vm254_vm2, %v3559_v60  ;;  %v3597_v60 = vld [vmem:[%s4764_s27 + $0x36] sm:$0xff] }
  0x86   : >> { %4097 = vmatmul.mubr.msk.f32.gmra.mxu1 %vm254_vm2, %v3567_v63  ;;  %4109 = vmatprep.mubr.msk.f32.mxu0 %vm4451_vm3, %v5412_v59 }
  0x87   : >> { %4099 = vmatprep.mubr.msk.f32.mxu1 %vm4451_vm3, %v5412_v59 }
  0x89   : >> { %4110 = vmatmul.mubr.msk.f32.vlgmr.msra.gmra.mxu0 %vm254_vm2, %v3547_v61  ;;  %v3577_v61 = vld [vmem:[%s4764_s27 + $0x34] sm:$0xff] }
  0x8a   : >> { %4100 = vmatmul.mubr.msk.f32.gmra.mxu1 %vm254_vm2, %v3568_v62  ;;  %4112 = vmatprep.mubr.msk.f32.mxu0 %vm4451_vm3, %v5412_v59 }
  0x8b   : >> { %4102 = vmatprep.mubr.msk.f32.mxu1 %vm4451_vm3, %v5412_v59  ;;  %4144 = vmatpush3.msra.mxu0 %v5477_v32 }
  0x8c   : >> { %4145 = vmatprep.subr.mxu0 %v5412_v59 }
  0x8d   : >> { %4113 = vmatmul.mubr.msk.f32.gmra.mxu0 %vm254_vm2, %v3548_v10  ;;  %v3578_v10 = vld [vmem:[%s4764_s27 + $0x3c] sm:$0xff] }
  0x8e   : >> { %4103 = vmatmul.mubr.msk.f32.gmra.mxu1 %vm254_vm2, %v3569_v11  ;;  %4115 = vmatprep.mubr.msk.f32.mxu0 %vm4451_vm3, %v5412_v59  ;;  %v3606_v11 = vld [vmem:[%s4764_s27 + $0x2f] sm:$0xff] }
  0x8f   : >> { %4128 = vmatprep.mubr.msk.f32.mxu1 %vm4451_vm3, %v5412_v59  ;;  %4146 = vmatpush3.msra.mxu0 %v5478_v31 }
  0x90   : >> { %4181 = vmatprep.subr.mxu0 %v5412_v59 }
  0x91   : >> { %4116 = vmatmul.mubr.msk.f32.gmra.mxu0 %vm254_vm2, %v3577_v61  ;;  %v3599_v61 = vld [vmem:[%s4764_s27 + $0x46] sm:$0xf] }
  0x92   : >> { %4129 = vmatmul.mubr.msk.f32.vlgmr.msra.gmra.mxu1 %vm254_vm2, %v3557_v3  ;;  %4118 = vmatprep.mubr.msk.f32.mxu0 %vm4451_vm3, %v5412_v59  ;;  %v3579_v3 = vld [vmem:[%s4764_s27 + $0x44] sm:$0xf] }
  0x93   : >> { %4131 = vmatprep.mubr.msk.f32.mxu1 %vm4451_vm3, %v5412_v59  ;;  %4163 = vmatpush3.msra.mxu1 %v5479_v34 }
  0x94   : >> { %4164 = vmatprep.subr.mxu1 %v5412_v59 }
  0x95   : >> { %4119 = vmatmul.mubr.msk.f32.gmra.mxu0 %vm254_vm2, %v3578_v10  ;;  %4165 = vmatpush3.msra.mxu1 %v5480_v33  ;;  %v3607_v10 = vld [vmem:[%s4764_s27 + $0x37] sm:$0xff] }
  0x96   : >> { %4132 = vmatmul.mubr.msk.f32.gmra.mxu1 %vm254_vm2, %v3558_v18  ;;  %4121 = vmatprep.mubr.msk.f32.mxu0 %vm4451_vm3, %v5412_v59  ;;  %v3588_v18 = vld [vmem:[%s4764_s27 + $0x3d] sm:$0xff] }
  0x97   : >> { %4134 = vmatprep.mubr.msk.f32.mxu1 %vm4451_vm3, %v5412_v59  ;;  %4200 = vmatprep.subr.mxu1 %v5412_v59 }
  0x99   : >> { %4122 = vmatmul.mubr.msk.f32.gmra.mxu0 %vm254_vm2, %v3579_v3  ;;  %v3615_v3 = vld [vmem:[%s4764_s27 + $0x28] sm:$0xff] }
  0x9a   : >> { %4135 = vmatmul.mubr.msk.f32.gmra.mxu1 %vm254_vm2, %v3587_v25  ;;  %4147 = vmatprep.mubr.msk.f32.mxu0 %vm4451_vm3, %v5412_v59  ;;  %v3608_v25 = vld [vmem:[%s4764_s27 + $0x3f] sm:$0xff] }
  0x9b   : >> { %4137 = vmatprep.mubr.msk.f32.mxu1 %vm4451_vm3, %v5412_v59 }
  0x9d   : >> { %4148 = vmatmul.mubr.msk.f32.vlgmr.msra.gmra.mxu0 %vm254_vm2, %v3567_v63  ;;  %v3605_v63 = vld [vmem:[%s4764_s27 + $0x27] sm:$0xff] }
  0x9e   : >> { %4138 = vmatmul.mubr.msk.f32.gmra.mxu1 %vm254_vm2, %v3588_v18  ;;  %4150 = vmatprep.mubr.msk.f32.mxu0 %vm4451_vm3, %v5412_v59  ;;  %v3616_v18 = vld [vmem:[%s4764_s27 + $0x30] sm:$0xff] }
  0x9f   : >> { %4140 = vmatprep.mubr.msk.f32.mxu1 %vm4451_vm3, %v5412_v59  ;;  %4182 = vmatpush3.msra.mxu0 %v5481_v36 }
  0xa0   : >> { %4183 = vmatprep.subr.mxu0 %v5412_v59 }
  0xa1   : >> { %4151 = vmatmul.mubr.msk.f32.gmra.mxu0 %vm254_vm2, %v3568_v62  ;;  %v3598_v62 = vld [vmem:[%s4764_s27 + $0x3e] sm:$0xff] }
  0xa2   : >> { %4141 = vmatmul.mubr.msk.f32.gmra.mxu1 %vm254_vm2, %v3589_v29  ;;  %4153 = vmatprep.mubr.msk.f32.mxu0 %vm4451_vm3, %v5412_v59  ;;  %v3609_v29 = vld [vmem:[%s4764_s27 + $0x47] sm:$0xf] }
  0xa3   : >> { %4166 = vmatprep.mubr.msk.f32.mxu1 %vm4451_vm3, %v5412_v59  ;;  %4184 = vmatpush3.msra.mxu0 %v5482_v35 }
  0xa4   : >> { %4219 = vmatprep.subr.mxu0 %v5412_v59 }
  0xa5   : >> { %4154 = vmatmul.mubr.msk.f32.gmra.mxu0 %vm254_vm2, %v3597_v60 }
  0xa6   : >> { %4167 = vmatmul.mubr.msk.f32.vlgmr.msra.gmra.mxu1 %vm254_vm2, %v3605_v63  ;;  %4156 = vmatprep.mubr.msk.f32.mxu0 %vm4451_vm3, %v5412_v59  ;;  %v3617_v63 = vld [vmem:[%s4764_s27 + $0x38] sm:$0xff] }
  0xa7   : >> { %4169 = vmatprep.mubr.msk.f32.mxu1 %vm4451_vm3, %v5412_v59  ;;  %4201 = vmatpush3.msra.mxu1 %v5483_v39 }
  0xa8   : >> { %4202 = vmatprep.subr.mxu1 %v5412_v59 }
  0xa9   : >> { %4157 = vmatmul.mubr.msk.f32.gmra.mxu0 %vm254_vm2, %v3598_v62  ;;  %4203 = vmatpush3.msra.mxu1 %v5484_v38 }
  0xaa   : >> { %4170 = vmatmul.mubr.msk.f32.gmra.mxu1 %vm254_vm2, %v3606_v11  ;;  %4159 = vmatprep.mubr.msk.f32.mxu0 %vm4451_vm3, %v5412_v59  ;;  %v3618_v11 = vld [vmem:[%s4764_s27 + $0x40] sm:$0xff] }
  0xab   : >> { %4172 = vmatprep.mubr.msk.f32.mxu1 %vm4451_vm3, %v5412_v59  ;;  %4238 = vmatprep.subr.mxu1 %v5412_v59 }
  0xad   : >> { %4160 = vmatmul.mubr.msk.f32.gmra.mxu0 %vm254_vm2, %v3599_v61  ;;  %v3627_v61 = vld [vmem:[%s4764_s27 + $0x46] sm:$0xff] }
  0xae   : >> { %4173 = vmatmul.mubr.msk.f32.gmra.mxu1 %vm254_vm2, %v3607_v10  ;;  %4185 = vmatprep.mubr.msk.f32.mxu0 %vm4451_vm3, %v5412_v59 }
  0xaf   : >> { %4175 = vmatprep.mubr.msk.f32.mxu1 %vm4451_vm3, %v5412_v59 }
  0xb1   : >> { %4186 = vmatmul.mubr.msk.f32.vlgmr.msra.gmra.mxu0 %vm254_vm2, %v3615_v3  ;;  %v3629_v3 = vld [vmem:[%s4764_s27 + $0x56] sm:$0xf] }
  0xb2   : >> { %4176 = vmatmul.mubr.msk.f32.gmra.mxu1 %vm254_vm2, %v3608_v25  ;;  %4188 = vmatprep.mubr.msk.f32.mxu0 %vm4451_vm3, %v5412_v59 }
  0xb3   : >> { %4178 = vmatprep.mubr.msk.f32.mxu1 %vm4451_vm3, %v5412_v59  ;;  %4220 = vmatpush3.msra.mxu0 %v5485_v41 }
  0xb4   : >> { %4221 = vmatprep.subr.mxu0 %v5412_v59 }
  0xb5   : >> { %4189 = vmatmul.mubr.msk.f32.gmra.mxu0 %vm254_vm2, %v3616_v18  ;;  %v3639_v18 = vld [vmem:[%s4764_s27 + $0x57] sm:$0xf] }
  0xb6   : >> { %4179 = vmatmul.mubr.msk.f32.gmra.mxu1 %vm254_vm2, %v3609_v29  ;;  %4191 = vmatprep.mubr.msk.f32.mxu0 %vm4451_vm3, %v5412_v59  ;;  %v3647_v29 = vld [vmem:[%s4764_s27 + $0x48] sm:$0xff] }
  0xb7   : >> { %4204 = vmatprep.mubr.msk.f32.mxu1 %vm4451_vm3, %v5412_v59  ;;  %4222 = vmatpush3.msra.mxu0 %v5486_v40 }
  0xb8   : >> { %4257 = vmatprep.subr.mxu0 %v5412_v59 }
  0xb9   : >> { %4192 = vmatmul.mubr.msk.f32.gmra.mxu0 %vm254_vm2, %v3617_v63 }
  0xba   : >> { %4205 = vmatmul.mubr.msk.f32.vlgmr.msra.gmra.mxu1 %vm254_vm2, %v3597_v60  ;;  %4194 = vmatprep.mubr.msk.f32.mxu0 %vm4451_vm3, %v5412_v59  ;;  %v3619_v60 = vld [vmem:[%s4764_s27 + $0x48] sm:$0xf] }
  0xbb   : >> { %4207 = vmatprep.mubr.msk.f32.mxu1 %vm4451_vm3, %v5412_v59  ;;  %4239 = vmatpush3.msra.mxu1 %v5487_v43 }
  0xbc   : >> { %4240 = vmatprep.subr.mxu1 %v5412_v59 }
  0xbd   : >> { %4195 = vmatmul.mubr.msk.f32.gmra.mxu0 %vm254_vm2, %v3618_v11  ;;  %4241 = vmatpush3.msra.mxu1 %v5488_v42 }
  0xbe   : >> { %4208 = vmatmul.mubr.msk.f32.gmra.mxu1 %vm254_vm2, %v3598_v62  ;;  %4197 = vmatprep.mubr.msk.f32.mxu0 %vm4451_vm3, %v5412_v59  ;;  %v3628_v62 = vld [vmem:[%s4764_s27 + $0x4e] sm:$0xff] }
  0xbf   : >> { %4210 = vmatprep.mubr.msk.f32.mxu1 %vm4451_vm3, %v5412_v59  ;;  %4276 = vmatprep.subr.mxu1 %v5412_v59 }
  0xc1   : >> { %4198 = vmatmul.mubr.msk.f32.gmra.mxu0 %vm254_vm2, %v3619_v60  ;;  %v3656_v60 = vld [vmem:[%s4764_s27 + $0x41] sm:$0xff] }
  0xc2   : >> { %4211 = vmatmul.mubr.msk.f32.gmra.mxu1 %vm254_vm2, %v3627_v61  ;;  %4223 = vmatprep.mubr.msk.f32.mxu0 %vm4451_vm3, %v5412_v59  ;;  %v3649_v61 = vld [vmem:[%s4764_s27 + $0x58] sm:$0xf] }
  0xc3   : >> { %4213 = vmatprep.mubr.msk.f32.mxu1 %vm4451_vm3, %v5412_v59 }
  0xc5   : >> { %4224 = vmatmul.mubr.msk.f32.vlgmr.msra.gmra.mxu0 %vm254_vm2, %v3607_v10  ;;  %v3637_v10 = vld [vmem:[%s4764_s27 + $0x47] sm:$0xff] }
  0xc6   : >> { %4214 = vmatmul.mubr.msk.f32.gmra.mxu1 %vm254_vm2, %v3628_v62  ;;  %4226 = vmatprep.mubr.msk.f32.mxu0 %vm4451_vm3, %v5412_v59  ;;  %v3657_v62 = vld [vmem:[%s4764_s27 + $0x49] sm:$0xff] }
  0xc7   : >> { %4216 = vmatprep.mubr.msk.f32.mxu1 %vm4451_vm3, %v5412_v59  ;;  %4258 = vmatpush3.msra.mxu0 %v5489_v45 }
  0xc8   : >> { %4259 = vmatprep.subr.mxu0 %v5412_v59 }
  0xc9   : >> { %4227 = vmatmul.mubr.msk.f32.gmra.mxu0 %vm254_vm2, %v3608_v25  ;;  %v3638_v25 = vld [vmem:[%s4764_s27 + $0x4f] sm:$0xff] }
  0xca   : >> { %4217 = vmatmul.mubr.msk.f32.gmra.mxu1 %vm254_vm2, %v3629_v3  ;;  %4229 = vmatprep.mubr.msk.f32.mxu0 %vm4451_vm3, %v5412_v59  ;;  %v3665_v3 = vld [vmem:[%s4764_s27 + $0x3a] sm:$0xff] }
  0xcb   : >> { %4242 = vmatprep.mubr.msk.f32.mxu1 %vm4451_vm3, %v5412_v59  ;;  %4260 = vmatpush3.msra.mxu0 %v5490_v44 }
  0xcc   : >> { %4295 = vmatprep.subr.mxu0 %v5412_v59 }
  0xcd   : >> { %4230 = vmatmul.mubr.msk.f32.gmra.mxu0 %vm254_vm2, %v3637_v10  ;;  %v5209_v10 = vld [vmem:[%s4764_s27 + $0x51] sm:$0xff] }
  0xce   : >> { %4243 = vmatmul.mubr.msk.f32.vlgmr.msra.gmra.mxu1 %vm254_vm2, %v3617_v63  ;;  %4232 = vmatprep.mubr.msk.f32.mxu0 %vm4451_vm3, %v5412_v59  ;;  %v3655_v63 = vld [vmem:[%s4764_s27 + $0x39] sm:$0xff] }
  0xcf   : >> { %4245 = vmatprep.mubr.msk.f32.mxu1 %vm4451_vm3, %v5412_v59  ;;  %4277 = vmatpush3.msra.mxu1 %v4692_v47 }
  0xd0   : >> { %4278 = vmatprep.subr.mxu1 %v5412_v59 }
  0xd1   : >> { %4233 = vmatmul.mubr.msk.f32.gmra.mxu0 %vm254_vm2, %v3638_v25  ;;  %4279 = vmatpush3.msra.mxu1 %v5491_v46  ;;  %v3666_v25 = vld [vmem:[%s4764_s27 + $0x42] sm:$0xff] }
  0xd2   : >> { %4246 = vmatmul.mubr.msk.f32.gmra.mxu1 %vm254_vm2, %v3618_v11  ;;  %4235 = vmatprep.mubr.msk.f32.mxu0 %vm4451_vm3, %v5412_v59  ;;  %v3648_v11 = vld [vmem:[%s4764_s27 + $0x50] sm:$0xff] }
  0xd3   : >> { %4248 = vmatprep.mubr.msk.f32.mxu1 %vm4451_vm3, %v5412_v59  ;;  %4314 = vmatprep.subr.mxu1 %v5412_v59 }
  0xd5   : >> { %4236 = vmatmul.mubr.msk.f32.gmra.mxu0 %vm254_vm2, %v3639_v18  ;;  %v3659_v18 = vld [vmem:[%s4764_s27 + $0x59] sm:$0xf] }
  0xd6   : >> { %4249 = vmatmul.mubr.msk.f32.gmra.mxu1 %vm254_vm2, %v3647_v29  ;;  %4261 = vmatprep.mubr.msk.f32.mxu0 %vm4451_vm3, %v5412_v59 }
  0xd7   : >> { %4251 = vmatprep.mubr.msk.f32.mxu1 %vm4451_vm3, %v5412_v59 }
  0xd9   : >> { %4262 = vmatmul.mubr.msk.f32.vlgmr.msra.gmra.mxu0 %vm254_vm2, %v3655_v63  ;;  %v5226_v63 = vld [vmem:[%s4764_s27 + $0x4a] sm:$0xff] }
  0xda   : >> { %4252 = vmatmul.mubr.msk.f32.gmra.mxu1 %vm254_vm2, %v3648_v11  ;;  %4264 = vmatprep.mubr.msk.f32.mxu0 %vm4451_vm3, %v5412_v59 }
  0xdb   : >> { %4254 = vmatprep.mubr.msk.f32.mxu1 %vm4451_vm3, %v5412_v59  ;;  %4296 = vmatpush3.msra.mxu0 %v4702_v49 }
  0xdc   : >> { %4297 = vmatprep.subr.mxu0 %v5412_v59 }
  0xdd   : >> { %4265 = vmatmul.mubr.msk.f32.gmra.mxu0 %vm254_vm2, %v3656_v60 }
  0xde   : >> { %4255 = vmatmul.mubr.msk.f32.gmra.mxu1 %vm254_vm2, %v3649_v61  ;;  %4267 = vmatprep.mubr.msk.f32.mxu0 %vm4451_vm3, %v5412_v59 }
  0xdf   : >> { %4280 = vmatprep.mubr.msk.f32.mxu1 %vm4451_vm3, %v5412_v59  ;;  %4298 = vmatpush3.msra.mxu0 %v4697_v48 }
  0xe0   : >> { %4333 = vmatprep.subr.mxu0 %v5412_v59 }
  0xe1   : >> { %4268 = vmatmul.mubr.msk.f32.gmra.mxu0 %vm254_vm2, %v3657_v62 }
  0xe2   : >> { %4281 = vmatmul.mubr.msk.f32.vlgmr.msra.gmra.mxu1 %vm254_vm2, %v3665_v3  ;;  %4270 = vmatprep.mubr.msk.f32.mxu0 %vm4451_vm3, %v5412_v59 }
  0xe3   : >> { %4283 = vmatprep.mubr.msk.f32.mxu1 %vm4451_vm3, %v5412_v59  ;;  %4315 = vmatpush3.msra.mxu1 %v4712_v51 }
  0xe4   : >> { %4316 = vmatprep.subr.mxu1 %v5412_v59 }
  0xe5   : >> { %4271 = vmatmul.mubr.msk.f32.gmra.mxu0 %vm254_vm2, %v5209_v10  ;;  %4317 = vmatpush3.msra.mxu1 %v4707_v50 }
  0xe6   : >> { %4284 = vmatmul.mubr.msk.f32.gmra.mxu1 %vm254_vm2, %v3666_v25  ;;  %4273 = vmatprep.mubr.msk.f32.mxu0 %vm4451_vm3, %v5412_v59 }
  0xe7   : >> { %4286 = vmatprep.mubr.msk.f32.mxu1 %vm4451_vm3, %v5412_v59  ;;  %4352 = vmatprep.subr.mxu1 %v5412_v59 }
  0xe9   : >> { %v336_v60 = vpop.f32.mrf.mxu0  ;;  %v5229_v61 = vpop.f32.mrf.mxu1  ;;  %4274 = vmatmul.mubr.msk.f32.gmra.mxu0 %vm254_vm2, %v3659_v18 }
  0xea   : >> { %4287 = vmatmul.mubr.msk.f32.gmra.mxu1 %vm254_vm2, %v5226_v63  ;;  %4299 = vmatprep.mubr.msk.f32.mxu0 %vm4451_vm3, %v5412_v59 }
  0xeb   : >> { %v3921_v3 = vpop.f32.mrf.mxu0  ;;  %v3933_v25 = vpop.f32.mrf.mxu1  ;;  %4289 = vmatprep.mubr.msk.f32.mxu1 %vm4451_vm3, %v5412_v59 }
  0xec   : >> { %v3669_v3 = vld [vmem:[%s4764_s27 + $0x5a] sm:$0xf] }
  0xed   : >> { %v341_v1 = vpop.f32.mrf.mxu0  ;;  %4300 = vmatmul.mubr.msk.f32.vlgmr.msra.gmra.mxu0 %vm254_vm2, %v3647_v29 }
  0xee   : >> { %v441_v2 = vpop.f32.mrf.mxu1  ;;  %4290 = vmatmul.mubr.msk.f32.gmra.mxu1 %vm254_vm2, %v5239_v0  ;;  %4302 = vmatprep.mubr.msk.f32.mxu0 %vm4451_vm3, %v5412_v59 }
  0xef   : >> { %v442_v18 = vadd.f32 %v441_v2, %v336_v60  ;;  %v3924_v4 = vpop.f32.mrf.mxu0  ;;  %4292 = vmatprep.mubr.msk.f32.mxu1 %vm4451_vm3, %v5412_v59  ;;  %4334 = vmatpush3.msra.mxu0 %v4722_v53  ;;  %v3677_v2 = vld [vmem:[%s4764_s27 + $0x58] sm:$0xff] }
  0xf0   : >> { %v3940_v25 = vpop.f32.mrf.mxu1  ;;  %4335 = vmatprep.subr.mxu0 %v5412_v59 }
  0xf1   : >> { %v346_v29 = vpop.f32.mrf.mxu0  ;;  %4303 = vmatmul.mubr.msk.f32.gmra.mxu0 %vm254_vm2, %v3648_v11 }
  0xf2   : >> { %v446_v5 = vpop.f32.mrf.mxu1  ;;  %4293 = vmatmul.mubr.msk.f32.gmra.mxu1 %vm254_vm2, %v3669_v3  ;;  %4305 = vmatprep.mubr.msk.f32.mxu0 %vm4451_vm3, %v5412_v59 }
  0xf3   : >> { %v447_v4 = vadd.f32 %v446_v5, %v341_v1  ;;  %v3927_v60 = vpop.f32.mrf.mxu0  ;;  %4318 = vmatprep.mubr.msk.f32.mxu1 %vm4451_vm3, %v5412_v59  ;;  %4336 = vmatpush3.msra.mxu0 %v4717_v52  ;;  %v3678_v1 = vld [vmem:[%s4764_s27 + $0x60] sm:$0xff] }
  0xf4   : >> { %v3943_v25 = vpop.f32.mrf.mxu1  ;;  %4371 = vmatprep.subr.mxu0 %v5412_v59 }
  0xf5   : >> { %v351_v6 = vpop.f32.mrf.mxu0  ;;  %4306 = vmatmul.mubr.msk.f32.gmra.mxu0 %vm254_vm2, %v3677_v2 }
  0xf6   : >> { %v451_v11 = vpop.f32.mrf.mxu1  ;;  %4319 = vmatmul.mubr.msk.f32.vlgmr.msra.gmra.mxu1 %vm254_vm2, %v3657_v62  ;;  %4308 = vmatprep.mubr.msk.f32.mxu0 %vm4451_vm3, %v5412_v59 }
  0xf7   : >> { %v452_v5 = vadd.f32 %v451_v11, %v346_v29  ;;  %v3930_v3 = vpop.f32.mrf.mxu0  ;;  %4321 = vmatprep.mubr.msk.f32.mxu1 %vm4451_vm3, %v5412_v59  ;;  %4353 = vmatpush3.msra.mxu1 %v4732_v55  ;;  %v3679_v29 = vld [vmem:[%s4764_s27 + $0x68] sm:$0xf] }
  0xf8   : >> { %v3946_v60 = vpop.f32.mrf.mxu1  ;;  %4354 = vmatprep.subr.mxu1 %v5412_v59 }
  0xf9   : >> { %v553_v2 = vpop.f32.mrf.mxu0  ;;  %4309 = vmatmul.mubr.msk.f32.gmra.mxu0 %vm254_vm2, %v3678_v1  ;;  %4355 = vmatpush3.msra.mxu1 %v4727_v54  ;;  %v3687_v60 = vld [vmem:[%s4764_s27 + $0x59] sm:$0xff] }
  0xfa   : >> { %v456_v62 = vpop.f32.mrf.mxu1  ;;  %v577_v25 = vadd.f32 %v553_v2, %v442_v18  ;;  %4322 = vmatmul.mubr.msk.f32.gmra.mxu1 %vm254_vm2, %v5209_v10  ;;  %4311 = vmatprep.mubr.msk.f32.mxu0 %vm4451_vm3, %v5412_v59 }
  0xfb   : >> { %v457_v11 = vadd.f32 %v456_v62, %v351_v6  ;;  %v3959_v3 = vpop.f32.mrf.mxu0  ;;  %4324 = vmatprep.mubr.msk.f32.mxu1 %vm4451_vm3, %v5412_v59  ;;  %4390 = vmatprep.subr.mxu1 %v5412_v59  ;;  %v3688_v62 = vld [vmem:[%s4764_s27 + $0x61] sm:$0xff] }
  0xfc   : >> { %v3949_v1 = vpop.f32.mrf.mxu1 }
  0xfd   : >> { %v558_v7 = vpop.f32.mrf.mxu0  ;;  %4312 = vmatmul.mubr.msk.f32.gmra.mxu0 %vm254_vm2, %v3679_v29 }
  0xfe   : >> { %v461_v18 = vpop.f32.mrf.mxu1  ;;  %v578_v2 = vadd.f32 %v558_v7, %v447_v4  ;;  %4325 = vmatmul.mubr.msk.f32.gmra.mxu1 %vm254_vm2, %v3687_v60  ;;  %4337 = vmatprep.mubr.msk.f32.mxu0 %vm4451_vm3, %v5412_v59  ;;  %v3689_v60 = vld [vmem:[%s4764_s27 + $0x69] sm:$0xf] }
  0xff   : >> { %v462_v6 = vadd.f32 %v461_v18, %v5229_v61  ;;  %v3962_v10 = vpop.f32.mrf.mxu0  ;;  %4327 = vmatprep.mubr.msk.f32.mxu1 %vm4451_vm3, %v5412_v59 }
 0x100   : >> { %v3952_v3 = vpop.f32.mrf.mxu1 }
 0x101   : >> { %v563_v1 = vpop.f32.mrf.mxu0  ;;  %4338 = vmatmul.mubr.msk.f32.vlgmr.msra.gmra.mxu0 %vm254_vm2, %v5226_v63 }
 0x102   : >> { %v579_v29 = vadd.f32 %v563_v1, %v452_v5  ;;  %v670_v7 = vpop.f32.mrf.mxu1  ;;  %4328 = vmatmul.mubr.msk.f32.gmra.mxu1 %vm254_vm2, %v3688_v62  ;;  %4340 = vmatprep.mubr.msk.f32.mxu0 %vm4451_vm3, %v5412_v59  ;;  %v3705_v1 = vld [vmem:[%s4764_s27 + $0x4b] sm:$0xff] }
 0x103   : >> { %v694_v4 = vadd.f32 %v670_v7, %v577_v25  ;;  %v3965_v61 = vpop.f32.mrf.mxu0  ;;  %4330 = vmatprep.mubr.msk.f32.mxu1 %vm4451_vm3, %v5412_v59  ;;  %4372 = vmatpush3.msra.mxu0 %v4742_v57  ;;  %v3697_v25 = vld [vmem:[%s4764_s27 + $0x5a] sm:$0xff] }
 0x104   : >> { %v3978_v18 = vpop.f32.mrf.mxu1  ;;  %4373 = vmatprep.subr.mxu0 %v5412_v59 }
 0x105   : >> { %v568_v63 = vpop.f32.mrf.mxu0  ;;  %4341 = vmatmul.mubr.msk.f32.gmra.mxu0 %vm254_vm2, %v5239_v0 }
 0x106   : >> { %v580_v5 = vadd.f32 %v568_v63, %v457_v11  ;;  %v675_v10 = vpop.f32.mrf.mxu1  ;;  %4331 = vmatmul.mubr.msk.f32.gmra.mxu1 %vm254_vm2, %v3689_v60  ;;  %4343 = vmatprep.mubr.msk.f32.mxu0 %vm4451_vm3, %v5412_v59  ;;  %v3706_v63 = vld [vmem:[%s4764_s27 + $0x53] sm:$0xff] }
 0x107   : >> { %v695_v62 = vadd.f32 %v675_v10, %v578_v2  ;;  %v3968_v3 = vpop.f32.mrf.mxu0  ;;  %4356 = vmatprep.mubr.msk.f32.mxu1 %vm4451_vm3, %v5412_v59  ;;  %4374 = vmatpush3.msra.mxu0 %v4737_v56  ;;  %v3698_v2 = vld [vmem:[%s4764_s27 + $0x62] sm:$0xff] }
 0x108   : >> { %v3981_v7 = vpop.f32.mrf.mxu1 }
 0x109   : >> { %v573_v0 = vpop.f32.mrf.mxu0  ;;  %4344 = vmatmul.mubr.msk.f32.gmra.mxu0 %vm254_vm2, %v3697_v25 }
 0x10a   : >> { %v581_v11 = vadd.f32 %v573_v0, %v462_v6  ;;  %v680_v61 = vpop.f32.mrf.mxu1  ;;  %4357 = vmatmul.mubr.msk.f32.vlgmr.msra.gmra.mxu1 %vm254_vm2, %v3705_v1  ;;  %4346 = vmatprep.mubr.msk.f32.mxu0 %vm4451_vm3, %v5412_v59  ;;  %v3699_v1 = vld [vmem:[%s4764_s27 + $0x6a] sm:$0xf]  ;;  %v3707_v0 = vld [vmem:[%s4764_s27 + $0x5b] sm:$0xff] }
 0x10b   : >> { %v696_v60 = vadd.f32 %v680_v61, %v579_v29  ;;  %v3971_v18 = vpop.f32.mrf.mxu0  ;;  %4359 = vmatprep.mubr.msk.f32.mxu1 %vm4451_vm3, %v5412_v59 }
 0x10c   : >> { %v3984_v10 = vpop.f32.mrf.mxu1 }
 0x10d   : >> { %v787_v3 = vpop.f32.mrf.mxu0  ;;  %4347 = vmatmul.mubr.msk.f32.gmra.mxu0 %vm254_vm2, %v3698_v2 }
 0x10e   : >> { %v685_v6 = vpop.f32.mrf.mxu1  ;;  %v811_v25 = vadd.f32 %v787_v3, %v694_v4  ;;  %4360 = vmatmul.mubr.msk.f32.gmra.mxu1 %vm254_vm2, %v3706_v63  ;;  %4349 = vmatprep.mubr.msk.f32.mxu0 %vm4451_vm3, %v5412_v59  ;;  %v3715_v63 = vld [vmem:[%s4764_s27 + $0x4c] sm:$0xff]  ;;  %v3708_v3 = vld [vmem:[%s4764_s27 + $0x63] sm:$0xff] }
 0x10f   : >> { %v697_v29 = vadd.f32 %v685_v6, %v580_v5  ;;  %v3997_v7 = vpop.f32.mrf.mxu0  ;;  %4362 = vmatprep.mubr.msk.f32.mxu1 %vm4451_vm3, %v5412_v59 }
 0x110   : >> { %v3987_v61 = vpop.f32.mrf.mxu1 }
 0x111   : >> { %v792_v18 = vpop.f32.mrf.mxu0  ;;  %4350 = vmatmul.mubr.msk.f32.gmra.mxu0 %vm254_vm2, %v3699_v1 }
 0x112   : >> { %v690_v2 = vpop.f32.mrf.mxu1  ;;  %v812_v4 = vadd.f32 %v792_v18, %v695_v62  ;;  %4363 = vmatmul.mubr.msk.f32.gmra.mxu1 %vm254_vm2, %v3707_v0  ;;  %4375 = vmatprep.mubr.msk.f32.mxu0 %vm4451_vm3, %v5412_v59  ;;  %v3716_v0 = vld [vmem:[%s4764_s27 + $0x54] sm:$0xff]  ;;  %v3709_v18 = vld [vmem:[%s4764_s27 + $0x6b] sm:$0xf] }
 0x113   : >> { %v698_v5 = vadd.f32 %v690_v2, %v581_v11  ;;  %v4000_v10 = vpop.f32.mrf.mxu0  ;;  %4365 = vmatprep.mubr.msk.f32.mxu1 %vm4451_vm3, %v5412_v59 }
 0x114   : >> { %v3990_v6 = vpop.f32.mrf.mxu1 }
 0x115   : >> { %v797_v7 = vpop.f32.mrf.mxu0  ;;  %4376 = vmatmul.mubr.msk.f32.vlgmr.msra.gmra.mxu0 %vm254_vm2, %v3715_v63 }
 0x116   : >> { %v813_v1 = vadd.f32 %v797_v7, %v696_v60  ;;  %v904_v62 = vpop.f32.mrf.mxu1  ;;  %4366 = vmatmul.mubr.msk.f32.gmra.mxu1 %vm254_vm2, %v3708_v3  ;;  %4378 = vmatprep.mubr.msk.f32.mxu0 %vm4451_vm3, %v5412_v59  ;;  %v3717_v3 = vld [vmem:[%s4764_s27 + $0x5c] sm:$0xff] }
 0x117   : >> { %v928_v61 = vadd.f32 %v904_v62, %v811_v25  ;;  %v4003_v11 = vpop.f32.mrf.mxu0  ;;  %4368 = vmatprep.mubr.msk.f32.mxu1 %vm4451_vm3, %v5412_v59 }
 0x118   : >> { %v4016_v2 = vpop.f32.mrf.mxu1 }
 0x119   : >> { %v802_v10 = vpop.f32.mrf.mxu0  ;;  %4379 = vmatmul.mubr.msk.f32.gmra.mxu0 %vm254_vm2, %v3716_v0 }
 0x11a   : >> { %v814_v60 = vadd.f32 %v802_v10, %v697_v29  ;;  %v909_v63 = vpop.f32.mrf.mxu1  ;;  %4369 = vmatmul.mubr.msk.f32.gmra.mxu1 %vm254_vm2, %v3709_v18  ;;  %4381 = vmatprep.mubr.msk.f32.mxu0 %vm4451_vm3, %v5412_v59  ;;  %v3718_v29 = vld [vmem:[%s4764_s27 + $0x64] sm:$0xff] }
 0x11b   : >> { %v929_v6 = vadd.f32 %v909_v63, %v812_v4  ;;  %v4006_v25 = vpop.f32.mrf.mxu0  ;;  %4396 = vmatprep.mubr.msk.f32.mxu1 %vm4451_vm3, %v5412_v59 }
 0x11c   : >> { %v4019_v7 = vpop.f32.mrf.mxu1  ;;  %v3719_v25 = vld [vmem:[%s4764_s27 + $0x6c] sm:$0xf] }
 0x11d   : >> { %v807_v62 = vpop.f32.mrf.mxu0  ;;  %4382 = vmatmul.mubr.msk.f32.gmra.mxu0 %vm254_vm2, %v3717_v3 }
 0x11e   : >> { %v815_v11 = vadd.f32 %v807_v62, %v698_v5  ;;  %v914_v0 = vpop.f32.mrf.mxu1  ;;  %4384 = vmatprep.mubr.msk.f32.mxu0 %vm4451_vm3, %v5412_v59 }
 0x11f   : >> { %v930_v18 = vadd.f32 %v914_v0, %v813_v1  ;;  %v4009_v2 = vpop.f32.mrf.mxu0 }
 0x120   : >> { %v4022_v10 = vpop.f32.mrf.mxu1 }
 0x121   : >> { %v1021_v8 = vpop.f32.mrf.mxu0  ;;  %4385 = vmatmul.mubr.msk.f32.gmra.mxu0 %vm254_vm2, %v3718_v29 }
 0x122   : >> { %v919_v4 = vpop.f32.mrf.mxu1  ;;  %v1045_v63 = vadd.f32 %v1021_v8, %v928_v61  ;;  %4387 = vmatprep.mubr.msk.f32.mxu0 %vm4451_vm3, %v5412_v59 }
 0x123   : >> { %v931_v7 = vadd.f32 %v919_v4, %v814_v60  ;;  %v4035_v3 = vpop.f32.mrf.mxu0 }
 0x124   : >> { %v4025_v5 = vpop.f32.mrf.mxu1 }
 0x125   : >> { %v1026_v62 = vpop.f32.mrf.mxu0  ;;  %4388 = vmatmul.mubr.msk.f32.gmra.mxu0 %vm254_vm2, %v3719_v25 }
 0x126   : >> { %v924_v9 = vpop.f32.mrf.mxu1  ;;  %v1046_v12 = vadd.f32 %v1026_v62, %v929_v6 }
 0x127   : >> { %v932_v1 = vadd.f32 %v924_v9, %v815_v11  ;;  %v4038_v0 = vpop.f32.mrf.mxu0 }
 0x128   : >> { %v4028_v2 = vpop.f32.mrf.mxu1 }
 0x129   : >> { %v1031_v10 = vpop.f32.mrf.mxu0 }
 0x12a   : >> { %v1047_v13 = vadd.f32 %v1031_v10, %v930_v18  ;;  %v1138_v29 = vpop.f32.mrf.mxu1 }
 0x12b   : >> { %v1162_v14 = vadd.f32 %v1138_v29, %v1045_v63  ;;  %v4041_v8 = vpop.f32.mrf.mxu0 }
 0x12c   : >> { %v4054_v61 = vpop.f32.mrf.mxu1 }
 0x12d   : >> { %v1036_v15 = vpop.f32.mrf.mxu0 }
 0x12e   : >> { %v1048_v59 = vadd.f32 %v1036_v15, %v931_v7  ;;  %v1143_v16 = vpop.f32.mrf.mxu1 }
 0x12f   : >> { %v1163_v60 = vadd.f32 %v1143_v16, %v1046_v12  ;;  %v4044_v4 = vpop.f32.mrf.mxu0 }
 0x130   : >> { %v4057_v3 = vpop.f32.mrf.mxu1 }
 0x131   : >> { %v1041_v5 = vpop.f32.mrf.mxu0 }
 0x132   : >> { %v1049_v17 = vadd.f32 %v1041_v5, %v932_v1  ;;  %v1148_v25 = vpop.f32.mrf.mxu1 }
 0x133   : >> { %v1164_v19 = vadd.f32 %v1148_v25, %v1047_v13  ;;  %v4047_v6 = vpop.f32.mrf.mxu0 }
 0x134   : >> { %v4060_v9 = vpop.f32.mrf.mxu1 }
 0x135   : >> { %v1255_v11 = vpop.f32.mrf.mxu0 }
 0x136   : >> { %v1153_v62 = vpop.f32.mrf.mxu1  ;;  %v1279_v0 = vadd.f32 %v1255_v11, %v1162_v14 }
 0x137   : >> { %v1165_v18 = vadd.f32 %v1153_v62, %v1048_v59  ;;  %v4073_v2 = vpop.f32.mrf.mxu0 }
 0x138   : >> { %v4063_v63 = vpop.f32.mrf.mxu1 }
 0x139   : >> { %v1260_v10 = vpop.f32.mrf.mxu0 }
 0x13a   : >> { %v1158_v29 = vpop.f32.mrf.mxu1  ;;  %v1280_v8 = vadd.f32 %v1260_v10, %v1163_v60 }
 0x13b   : >> { %v1166_v15 = vadd.f32 %v1158_v29, %v1049_v17  ;;  %v4076_v7 = vpop.f32.mrf.mxu0 }
 0x13c   : >> { %v4066_v12 = vpop.f32.mrf.mxu1 }
 0x13d   : >> { %v1265_v16 = vpop.f32.mrf.mxu0 }
 0x13e   : >> { %v1281_v61 = vadd.f32 %v1265_v16, %v1164_v19  ;;  %v1372_v4 = vpop.f32.mrf.mxu1 }
 0x13f   : >> { %v1396_v1 = vadd.f32 %v1372_v4, %v1279_v0  ;;  %v4079_v3 = vpop.f32.mrf.mxu0 }
 0x140   : >> { %v4092_v13 = vpop.f32.mrf.mxu1 }
 0x141   : >> { %v1270_v5 = vpop.f32.mrf.mxu0 }
 0x142   : >> { %v1282_v25 = vadd.f32 %v1270_v5, %v1165_v18  ;;  %v1377_v6 = vpop.f32.mrf.mxu1 }
 0x143   : >> { %v1397_v9 = vadd.f32 %v1377_v6, %v1280_v8  ;;  %v4082_v14 = vpop.f32.mrf.mxu0 }
 0x144   : >> { %v4095_v59 = vpop.f32.mrf.mxu1 }
 0x145   : >> { %v1275_v11 = vpop.f32.mrf.mxu0 }
 0x146   : >> { %v1283_v62 = vadd.f32 %v1275_v11, %v1166_v15  ;;  %v1382_v2 = vpop.f32.mrf.mxu1 }
 0x147   : >> { %v1398_v63 = vadd.f32 %v1382_v2, %v1281_v61  ;;  %v4085_v60 = vpop.f32.mrf.mxu0 }
 0x148   : >> { %v4098_v17 = vpop.f32.mrf.mxu1 }
 0x149   : >> { %v1489_v10 = vpop.f32.mrf.mxu0 }
 0x14a   : >> { %v1387_v29 = vpop.f32.mrf.mxu1  ;;  %v1513_v7 = vadd.f32 %v1489_v10, %v1396_v1 }
 0x14b   : >> { %v1399_v19 = vadd.f32 %v1387_v29, %v1282_v25  ;;  %v4111_v12 = vpop.f32.mrf.mxu0 }
 0x14c   : >> { %v4101_v0 = vpop.f32.mrf.mxu1 }
 0x14d   : >> { %v1494_v16 = vpop.f32.mrf.mxu0 }
 0x14e   : >> { %v1392_v4 = vpop.f32.mrf.mxu1  ;;  %v1514_v3 = vadd.f32 %v1494_v16, %v1397_v9 }
 0x14f   : >> { %v1400_v18 = vadd.f32 %v1392_v4, %v1283_v62  ;;  %v4114_v13 = vpop.f32.mrf.mxu0 }
 0x150   : >> { %v4104_v8 = vpop.f32.mrf.mxu1 }
 0x151   : >> { %v1499_v5 = vpop.f32.mrf.mxu0 }
 0x152   : >> { %v1515_v6 = vadd.f32 %v1499_v5, %v1398_v63  ;;  %v1606_v14 = vpop.f32.mrf.mxu1 }
 0x153   : >> { %v1630_v15 = vadd.f32 %v1606_v14, %v1513_v7  ;;  %v4117_v59 = vpop.f32.mrf.mxu0 }
 0x154   : >> { %v4130_v61 = vpop.f32.mrf.mxu1 }
 0x155   : >> { %v1504_v11 = vpop.f32.mrf.mxu0 }
 0x156   : >> { %v1516_v2 = vadd.f32 %v1504_v11, %v1399_v19  ;;  %v1611_v60 = vpop.f32.mrf.mxu1 }
 0x157   : >> { %v1631_v17 = vadd.f32 %v1611_v60, %v1514_v3  ;;  %v4120_v1 = vpop.f32.mrf.mxu0 }
 0x158   : >> { %v4133_v25 = vpop.f32.mrf.mxu1 }
 0x159   : >> { %v1509_v10 = vpop.f32.mrf.mxu0 }
 0x15a   : >> { %v1517_v29 = vadd.f32 %v1509_v10, %v1400_v18  ;;  %v1616_v12 = vpop.f32.mrf.mxu1 }
 0x15b   : >> { %v1632_v0 = vadd.f32 %v1616_v12, %v1515_v6  ;;  %v4123_v9 = vpop.f32.mrf.mxu0 }
 0x15c   : >> { %v4136_v62 = vpop.f32.mrf.mxu1 }
 0x15d   : >> { %v1723_v16 = vpop.f32.mrf.mxu0 }
 0x15e   : >> { %v1621_v4 = vpop.f32.mrf.mxu1  ;;  %v1747_v13 = vadd.f32 %v1723_v16, %v1630_v15 }
 0x15f   : >> { %v1633_v63 = vadd.f32 %v1621_v4, %v1516_v2  ;;  %v4149_v8 = vpop.f32.mrf.mxu0 }
 0x160   : >> { %v4139_v7 = vpop.f32.mrf.mxu1 }
 0x161   : >> { %v1728_v5 = vpop.f32.mrf.mxu0 }
 0x162   : >> { %v1626_v14 = vpop.f32.mrf.mxu1  ;;  %v1748_v59 = vadd.f32 %v1728_v5, %v1631_v17 }
 0x163   : >> { %v1634_v19 = vadd.f32 %v1626_v14, %v1517_v29  ;;  %v4152_v61 = vpop.f32.mrf.mxu0 }
 0x164   : >> { %v4142_v3 = vpop.f32.mrf.mxu1 }
 0x165   : >> { %v1733_v11 = vpop.f32.mrf.mxu0 }
 0x166   : >> { %v1749_v60 = vadd.f32 %v1733_v11, %v1632_v0  ;;  %v1840_v1 = vpop.f32.mrf.mxu1 }
 0x167   : >> { %v1864_v18 = vadd.f32 %v1840_v1, %v1747_v13  ;;  %v4155_v25 = vpop.f32.mrf.mxu0 }
 0x168   : >> { %v4168_v6 = vpop.f32.mrf.mxu1 }
 0x169   : >> { %v1738_v10 = vpop.f32.mrf.mxu0 }
 0x16a   : >> { %v1750_v12 = vadd.f32 %v1738_v10, %v1633_v63  ;;  %v1845_v9 = vpop.f32.mrf.mxu1 }
 0x16b   : >> { %v1865_v62 = vadd.f32 %v1845_v9, %v1748_v59  ;;  %v4158_v15 = vpop.f32.mrf.mxu0 }
 0x16c   : >> { %v4171_v2 = vpop.f32.mrf.mxu1 }
 0x16d   : >> { %v1743_v16 = vpop.f32.mrf.mxu0 }
 0x16e   : >> { %v1751_v4 = vadd.f32 %v1743_v16, %v1634_v19  ;;  %v1850_v8 = vpop.f32.mrf.mxu1 }
 0x16f   : >> { %v1866_v7 = vadd.f32 %v1850_v8, %v1749_v60  ;;  %v4161_v17 = vpop.f32.mrf.mxu0 }
 0x170   : >> { %v4174_v29 = vpop.f32.mrf.mxu1 }
 0x171   : >> { %v1957_v5 = vpop.f32.mrf.mxu0 }
 0x172   : >> { %v1855_v14 = vpop.f32.mrf.mxu1  ;;  %v1981_v61 = vadd.f32 %v1957_v5, %v1864_v18 }
 0x173   : >> { %v1867_v0 = vadd.f32 %v1855_v14, %v1750_v12  ;;  %v4187_v3 = vpop.f32.mrf.mxu0 }
 0x174   : >> { %v4177_v13 = vpop.f32.mrf.mxu1 }
 0x175   : >> { %v1962_v11 = vpop.f32.mrf.mxu0 }
 0x176   : >> { %v1860_v1 = vpop.f32.mrf.mxu1  ;;  %v1982_v25 = vadd.f32 %v1962_v11, %v1865_v62 }
 0x177   : >> { %v1868_v63 = vadd.f32 %v1860_v1, %v1751_v4  ;;  %v4190_v6 = vpop.f32.mrf.mxu0 }
 0x178   : >> { %v4180_v59 = vpop.f32.mrf.mxu1 }
 0x179   : >> { %v1967_v10 = vpop.f32.mrf.mxu0 }
 0x17a   : >> { %v1983_v9 = vadd.f32 %v1967_v10, %v1866_v7  ;;  %v2074_v15 = vpop.f32.mrf.mxu1 }
 0x17b   : >> { %v2098_v19 = vadd.f32 %v2074_v15, %v1981_v61  ;;  %v4193_v2 = vpop.f32.mrf.mxu0 }
 0x17c   : >> { %v4206_v60 = vpop.f32.mrf.mxu1 }
 0x17d   : >> { %v1972_v16 = vpop.f32.mrf.mxu0 }
 0x17e   : >> { %v1984_v8 = vadd.f32 %v1972_v16, %v1867_v0  ;;  %v2079_v17 = vpop.f32.mrf.mxu1 }
 0x17f   : >> { %v2099_v29 = vadd.f32 %v2079_v17, %v1982_v25  ;;  %v4196_v18 = vpop.f32.mrf.mxu0 }
 0x180   : >> { %v4209_v12 = vpop.f32.mrf.mxu1 }
 0x181   : >> { %v1977_v5 = vpop.f32.mrf.mxu0 }
 0x182   : >> { %v1985_v14 = vadd.f32 %v1977_v5, %v1868_v63  ;;  %v2084_v3 = vpop.f32.mrf.mxu1 }
 0x183   : >> { %v2100_v13 = vadd.f32 %v2084_v3, %v1983_v9  ;;  %v4199_v62 = vpop.f32.mrf.mxu0 }
 0x184   : >> { %v4212_v4 = vpop.f32.mrf.mxu1 }
 0x185   : >> { %v2191_v11 = vpop.f32.mrf.mxu0 }
 0x186   : >> { %v2089_v1 = vpop.f32.mrf.mxu1  ;;  %v2215_v6 = vadd.f32 %v2191_v11, %v2098_v19 }
 0x187   : >> { %v2101_v7 = vadd.f32 %v2089_v1, %v1984_v8  ;;  %v4225_v59 = vpop.f32.mrf.mxu0 }
 0x188   : >> { %v4215_v61 = vpop.f32.mrf.mxu1 }
 0x189   : >> { %v2196_v10 = vpop.f32.mrf.mxu0 }
 0x18a   : >> { %v2094_v15 = vpop.f32.mrf.mxu1  ;;  %v2216_v2 = vadd.f32 %v2196_v10, %v2099_v29 }
 0x18b   : >> { %v2102_v0 = vadd.f32 %v2094_v15, %v1985_v14  ;;  %v4228_v60 = vpop.f32.mrf.mxu0 }
 0x18c   : >> { %v4218_v25 = vpop.f32.mrf.mxu1 }
 0x18d   : >> { %v2201_v16 = vpop.f32.mrf.mxu0 }
 0x18e   : >> { %v2217_v17 = vadd.f32 %v2201_v16, %v2100_v13  ;;  %v2308_v18 = vpop.f32.mrf.mxu1 }
 0x18f   : >> { %v2332_v63 = vadd.f32 %v2308_v18, %v2215_v6  ;;  %v4231_v12 = vpop.f32.mrf.mxu0 }
 0x190   : >> { %v4244_v9 = vpop.f32.mrf.mxu1 }
 0x191   : >> { %v2206_v5 = vpop.f32.mrf.mxu0 }
 0x192   : >> { %v5356_v3 = vadd.f32 %v2206_v5, %v2101_v7  ;;  %v2313_v62 = vpop.f32.mrf.mxu1 }
 0x193   : >> { %v2333_v19 = vadd.f32 %v2313_v62, %v2216_v2  ;;  %v4234_v8 = vpop.f32.mrf.mxu0 }
 0x194   : >> { %v4247_v4 = vpop.f32.mrf.mxu1 }
 0x195   : >> { %v2211_v11 = vpop.f32.mrf.mxu0 }
 0x196   : >> { %v5358_v1 = vadd.f32 %v2211_v11, %v2102_v0  ;;  %v2318_v29 = vpop.f32.mrf.mxu1 }
 0x197   : >> { %v5360_v14 = vadd.f32 %v2318_v29, %v2217_v17  ;;  %v4237_v59 = vpop.f32.mrf.mxu0 }
 0x198   : >> { %v4250_v61 = vpop.f32.mrf.mxu1 }
 0x199   : >> { %v2425_v13 = vpop.f32.mrf.mxu0 }
 0x19a   : >> { %v2323_v10 = vpop.f32.mrf.mxu1  ;;  %v5362_v6 = vadd.f32 %v2425_v13, %v2332_v63 }
 0x19b   : >> { %v4263_v15 = vpop.f32.mrf.mxu0 }
 0x19c   : >> { %v4253_v60 = vpop.f32.mrf.mxu1 }
 0x19d   : >> { %v2430_v7 = vpop.f32.mrf.mxu0 }
 0x19e   : >> { %v5364_v25 = vpop.f32.mrf.mxu1  ;;  %v5366_v2 = vadd.f32 %v2430_v7, %v2333_v19 }
 0x19f   : >> { %v4266_v16 = vpop.f32.mrf.mxu0 }
 0x1a0   : >> { %v4256_v18 = vpop.f32.mrf.mxu1 }
 0x1a1   : >> { %v2435_v0 = vpop.f32.mrf.mxu0 }
 0x1a2   : >> { %v5368_v12 = vpop.f32.mrf.mxu1 }
 0x1a3   : >> { %v4269_v17 = vpop.f32.mrf.mxu0 }
 0x1a4   : >> { %v4282_v9 = vpop.f32.mrf.mxu1 }
 0x1a5   : >> { %v2440_v5 = vpop.f32.mrf.mxu0 }
 0x1a6   : >> { %v5370_v62 = vpop.f32.mrf.mxu1 }
 0x1a7   : >> { %v4272_v8 = vpop.f32.mrf.mxu0 }
 0x1a8   : >> { %v4285_v63 = vpop.f32.mrf.mxu1 }
 0x1a9   : >> { %v2445_v4 = vpop.f32.mrf.mxu0 }
 0x1aa   : >> { %v2552_v11 = vpop.f32.mrf.mxu1 }
 0x1ab   : >> { %v4275_v29 = vpop.f32.mrf.mxu0 }
 0x1ac   : >> { %v4288_v59 = vpop.f32.mrf.mxu1 }
 0x1ad   : >> { %v2659_v61 = vpop.f32.mrf.mxu0 }
 0x1ae   : >> { %v2557_v13 = vpop.f32.mrf.mxu1 }
 0x1af   : >> { %v4301_v19 = vpop.f32.mrf.mxu0 }
 0x1b0   : >> { %v4291_v15 = vpop.f32.mrf.mxu1 }
 0x1b1   : >> { %v5372_v60 = vpop.f32.mrf.mxu0 }
 0x1b2   : >> { %v2562_v7 = vpop.f32.mrf.mxu1 }
 0x1b3   : >> { %v4304_v16 = vpop.f32.mrf.mxu0 }
 0x1b4   : >> { %v4294_v18 = vpop.f32.mrf.mxu1 }
 0x1b5   : >> { %v2669_v17 = vpop.f32.mrf.mxu0 }
 0x1b6   : >> { %v2776_v9 = vpop.f32.mrf.mxu1 }
 0x1b7   : >> { %v4307_v20 = vpop.f32.mrf.mxu0 }
 0x1b8   : >> { %v4320_v21 = vpop.f32.mrf.mxu1 }
 0x1b9   : >> { %v2674_v22 = vpop.f32.mrf.mxu0 }
 0x1ba   : >> { %v5374_v8 = vpop.f32.mrf.mxu1 }
 0x1bb   : >> { %v4310_v63 = vpop.f32.mrf.mxu0 }
 0x1bc   : >> { %v4323_v23 = vpop.f32.mrf.mxu1 }
 0x1bd   : >> { %v2679_v29 = vpop.f32.mrf.mxu0 }
 0x1be   : >> { %v2786_v59 = vpop.f32.mrf.mxu1 }
 0x1bf   : >> { %v4313_v24 = vpop.f32.mrf.mxu0 }
 0x1c0   : >> { %v4326_v26 = vpop.f32.mrf.mxu1 }
 0x1c1   : >> { %v2893_v19 = vpop.f32.mrf.mxu0  ;;  %v2335_v26 = vadd.f32 %v2323_v10, %v5356_v3  ;;  %v2566_v3 = vadd.f32 %v5368_v12, %v5362_v6 }
 0x1c2   : >> { %v2791_v15 = vpop.f32.mrf.mxu1 }
 0x1c3   : >> { %v4339_v27 = vpop.f32.mrf.mxu0  ;;  %v2452_v41 = vadd.f32 %v2440_v5, %v2335_v26 }
 0x1c4   : >> { %v4329_v28 = vpop.f32.mrf.mxu1  ;;  %v2451_v27 = vadd.f32 %v2435_v0, %v5360_v14 }
 0x1c5   : >> { %v2898_v31 = vpop.f32.mrf.mxu0 }
 0x1c6   : >> { %v2796_v16 = vpop.f32.mrf.mxu1 }
 0x1c7   : >> { %v4342_v18 = vpop.f32.mrf.mxu0 }
 0x1c8   : >> { %v4332_v32 = vpop.f32.mrf.mxu1  ;;  %v2568_v18 = vadd.f32 %v2552_v11, %v2451_v27 }
 0x1c9   : >> { %v2903_v33 = vpop.f32.mrf.mxu0 }
 0x1ca   : >> { %v3010_v20 = vpop.f32.mrf.mxu1  ;;  %v2685_v43 = vadd.f32 %v2669_v17, %v2568_v18 }
 0x1cb   : >> { %v4345_v21 = vpop.f32.mrf.mxu0 }
 0x1cc   : >> { %v4358_v34 = vpop.f32.mrf.mxu1  ;;  %v2569_v21 = vadd.f32 %v2557_v13, %v2452_v41 }
 0x1cd   : >> { %v2908_v35 = vpop.f32.mrf.mxu0  ;;  %v2336_v34 = vadd.f32 %v5364_v25, %v5358_v1  ;;  %v2567_v25 = vadd.f32 %v5370_v62, %v5366_v2 }
 0x1ce   : >> { %v3015_v36 = vpop.f32.mrf.mxu1  ;;  %v2686_v45 = vadd.f32 %v2674_v22, %v2569_v21 }
 0x1cf   : >> { %v4348_v63 = vpop.f32.mrf.mxu0  ;;  %v2453_v44 = vadd.f32 %v2445_v4, %v2336_v34  ;;  %v2684_v6 = vadd.f32 %v5372_v60, %v2567_v25 }
 0x1d0   : >> { %v4361_v23 = vpop.f32.mrf.mxu1  ;;  %v2803_v0 = vadd.f32 %v2791_v15, %v2686_v45 }
 0x1d1   : >> { %v2913_v38 = vpop.f32.mrf.mxu0  ;;  %v2570_v10 = vadd.f32 %v2562_v7, %v2453_v44 }
 0x1d2   : >> { %v3020_v39 = vpop.f32.mrf.mxu1  ;;  %v2920_v1 = vadd.f32 %v2908_v35, %v2803_v0 }
 0x1d3   : >> { %v4351_v24 = vpop.f32.mrf.mxu0  ;;  %v2687_v27 = vadd.f32 %v2679_v29, %v2570_v10 }
 0x1d4   : >> { %v4364_v28 = vpop.f32.mrf.mxu1  ;;  %v2802_v24 = vadd.f32 %v2786_v59, %v2685_v43 }
 0x1d5   : >> { %v3127_v40 = vpop.f32.mrf.mxu0  ;;  %v2804_v43 = vadd.f32 %v2796_v16, %v2687_v27 }
 0x1d6   : >> { %v3025_v32 = vpop.f32.mrf.mxu1  ;;  %v2919_v5 = vadd.f32 %v2903_v33, %v2802_v24 }
 0x1d7   : >> { %v4377_v42 = vpop.f32.mrf.mxu0  ;;  %v3037_v13 = vadd.f32 %v3025_v32, %v2920_v1  ;;  %v2921_v45 = vadd.f32 %v2913_v38, %v2804_v43 }
 0x1d8   : >> { %v4367_v63 = vpop.f32.mrf.mxu1  ;;  %v2683_v42 = vadd.f32 %v2659_v61, %v2566_v3  ;;  %v3036_v41 = vadd.f32 %v3020_v39, %v2919_v5  ;;  %v2801_v61 = vadd.f32 %v5374_v8, %v2684_v6 }
 0x1d9   : >> { %v3132_v23 = vpop.f32.mrf.mxu0 }
 0x1da   : >> { %v3030_v46 = vpop.f32.mrf.mxu1  ;;  %v2800_v4 = vadd.f32 %v2776_v9, %v2683_v42  ;;  %v2918_v2 = vadd.f32 %v2898_v31, %v2801_v61 }
 0x1db   : >> { %v4380_v14 = vpop.f32.mrf.mxu0  ;;  %v3038_v39 = vadd.f32 %v3030_v46, %v2921_v45  ;;  %v5492_v46 = vmov 0.0  }
 0x1dc   : >> { %v4370_v11 = vpop.f32.mrf.mxu1  ;;  %v2917_v12 = vadd.f32 %v2893_v19, %v2800_v4  ;;  %v3035_v28 = vadd.f32 %v3015_v36, %v2918_v2 }
 0x1dd   : >> { %v3137_v26 = vpop.f32.mrf.mxu0 }
 0x1de   : >> { %v3153_v17 = vadd.f32 %v3137_v26, %v3036_v41  ;;  %v3034_v7 = vadd.f32 %v3010_v20, %v2917_v12  ;;  %v3152_v38 = vadd.f32 %v3132_v23, %v3035_v28 }
 0x1df   : >> { %v4383_v22 = vpop.f32.mrf.mxu0 }
 0x1e0   : >> { %v3160_v29 = vrot.slane %v3153_v17, 2  ;;  %v3151_v62 = vadd.f32 %v3127_v40, %v3034_v7 }
 0x1e1   : >> { %v3142_v44 = vpop.f32.mrf.mxu0 }
 0x1e2   : >> { %v3154_v33 = vadd.f32 %v3142_v44, %v3037_v13 }
 0x1e3   : >> { %v4386_v35 = vpop.f32.mrf.mxu0 }
 0x1e4   : >> { %v3161_v59 = vrot.slane %v3154_v33, 2 }
 0x1e5   : >> { %v3147_v9 = vpop.f32.mrf.mxu0 }
 0x1e6   : >> { %v3162_v15 = vsel %vm3159_vm4, %v3160_v29, %v3161_v59  ;;  %v3155_v16 = vadd.f32 %v3147_v9, %v3038_v39 }
 0x1e7   : >> { %v3168_v60 = vmax.f32 %v3151_v62, %v3162_v15  ;;  %v4389_v19 = vpop.f32.mrf.mxu0 }
 0x1e8   : >> { %v3163_v18 = vrot.slane %v3155_v16, 2 }
 0x1ea   : >> { %v3164_v8 = vsel %vm3159_vm4, %v3161_v59, %v3163_v18  ;;  %v3170_v20 = vmax.f32 %v3153_v17, %v3163_v18 }
 0x1eb   : >> { %v3169_v32 = vmax.f32 %v3152_v38, %v3164_v8 }
 0x1ec   : >> { %4391 = vmatpush3.msk.msra.mxu1 %vm3175_vm5, %v3170_v20 }
 0x1ed   : >> { %4392 = vmatprep.subr.mxu1 %v5492_v46 }
 0x1ee   : >> { %4393 = vmatpush3.msra.mxu1 %v3169_v32 }
 0x1ef   : >> { %4394 = vmatprep.subr.mxu1 %v5492_v46 }
 0x1f0   : >> { %4395 = vmatpush3.msra.mxu1 %v3168_v60 }
 0x1f1   : >> { %4399 = vmatprep.subr.mxu1 %v5492_v46  ;;  %4397 = vmatmul.mubr.msk.f32.vlgmr.msra.gmra.mxu1 %vm3171_vm6, %v4610_v30 }
 0x1f2   : >> { %4400 = vmatpush3.msk.msra.mxu1 %vm3175_vm5, %v3170_v20  ;;  %4405 = vmatprep.mubr.msk.f32.mxu1 %vm4451_vm3, %v5492_v46 }
 0x1f3   : >> { %4401 = vmatprep.subr.mxu1 %v5492_v46 }
 0x1f4   : >> { %4402 = vmatpush3.msra.mxu1 %v3169_v32 }
 0x1f5   : >> { %4403 = vmatprep.subr.mxu1 %v5492_v46 }
 0x1f6   : >> { %4404 = vmatpush3.msra.mxu1 %v3168_v60 }
 0x1f7   : >> { %4406 = vmatmul.mubr.msk.f32.vlgmr.msra.gmra.mxu1 %vm3171_vm6, %v4642_v37 }
 0x2b1   : >> { %v3245_v31 = vpop.f32.mrf.mxu1 }
 0x2b3   : >> { %v4398_v36 = vpop.f32.mrf.mxu1 }
 0x2b7   : >> { %v3318_v40 = vpop.f32.mrf.mxu1 }
 0x2b8   : >> { %v3322_v34 = vmax.f32 %v3245_v31, %v3318_v40 }
 0x2b9   : >> { %v4407_v21 = vpop.f32.mrf.mxu1 }
 0x2ba   : >> { %v3329_v63 = vadd.f32 %v4747_v58, %v3322_v34  ;;  %238 = sbr.rel (!%p236_p4) target bundleno = 35 (0x23), region = 95 }
 0x2bc   : >> { %v3330_v23 = vmax.f32 %v3329_v63, 0.0 }
 0x2be   : >> { %3334 = vst.msk [vmem:[%s3332_s13] sm:$0x7f] %vm3333_vm7, %v3330_v23 }
 0x2bf PF: > { %s13_s12 = sadd.s32 1, %s4443_s12  }
 0x2c0   : > { %p10_p5 = scmp.ge.s32.totalorder %s13_s12, 4  }
 0x2c2   :  { %12 = sbr.rel (!%p10_p5) target bundleno = 1 (0x1), region = 106 }

// kernel: forward.5
= control target key start
LH: loop header
LB: loop body
LE: loop exit
PB: predicated region body
PF: predicated region fallthrough
CT: control target
= control target key end

     0   :  { %v4553_v36 = vmov 1983009808   ;;  %v34_v38 = vlaneseq  ;;  %vm2488_vm0 = vcmask 261120   ;;  %s5995_s0 = inlined_call_operand.vmem [shape: f32[2,1568], index: 0, kind: input, shape index: {}]   ;;  %s5996_s1 = inlined_call_operand.vmem [shape: bf16[1568,512], index: 1, kind: input, shape index: {}]   ;;  %s5997_s2 = inlined_call_operand.vmem [shape: f32[1,512], index: 2, kind: input, shape index: {}]   ;;  %s5998_s3 = inlined_call_operand.vmem [shape: bf16[512,10], index: 3, kind: input, shape index: {}]   ;;  %s5999_s4 = inlined_call_operand.vmem [shape: f32[1,10], index: 4, kind: input, shape index: {}]   ;;  %s6000_s5 = inlined_call_operand.hbm [shape: f32[2,10], index: 5, kind: output, shape index: {}]  }
   0x1   :  { %v3908_v0 = vld [vmem:[%s5996_s1 + $0xe4] ss:$16 sps:$4 sm:$0xff]   ;;  %v3912_v2 = vld [vmem:[%s5996_s1 + $0xe0] ss:$16 sps:$4 sm:$0xff]   ;;  %v32_v37 = vunpack.c.l.s4 %v4553_v36 }
   0x2   :  { %v3910_v1 = vld [vmem:[%s5996_s1 + $0x2e4] ss:$16 sps:$4 sm:$0xff]   ;;  %2492 = vmatprep.subr.bf16.mxu0 %v3908_v0  ;;  %v3913_v3 = vld [vmem:[%s5996_s1 + $0x2e0] ss:$16 sps:$4 sm:$0xff]   ;;  %v4703_v43 = vshrl.u32 %v34_v38, 7 }
   0x3   :  { %2533 = vmatprep.subr.bf16.mxu1 %v3910_v1  ;;  %v3914_v4 = vld [vmem:[%s5996_s1 + $0xc4] ss:$16 sps:$4 sm:$0xff]   ;;  %2493 = vmatpush1.bf16.msra.mxu0 %v3912_v2  ;;  %v3918_v6 = vld [vmem:[%s5996_s1 + $0xc0] ss:$16 sps:$4 sm:$0xff]   ;;  %v33_v42 = vunpack.c.0.s8 %v32_v37 }
   0x4   :  { %2534 = vmatpush1.bf16.msra.mxu1 %v3913_v3  ;;  %v3916_v5 = vld [vmem:[%s5996_s1 + $0x2c4] ss:$16 sps:$4 sm:$0xff]   ;;  %2494 = vmatprep.subr.bf16.mxu0 %v3914_v4  ;;  %v3919_v7 = vld [vmem:[%s5996_s1 + $0x2c0] ss:$16 sps:$4 sm:$0xff]  }
   0x5   :  { %2535 = vmatprep.subr.bf16.mxu1 %v3916_v5  ;;  %v3920_v8 = vld [vmem:[%s5996_s1 + $0xa4] ss:$16 sps:$4 sm:$0xff]   ;;  %v3924_v10 = vld [vmem:[%s5996_s1 + $0xa0] ss:$16 sps:$4 sm:$0xff]   ;;  %v4721_v49 = vsub.s32 %v33_v42, %v4703_v43  ;;  %v23_v42 = vld [vmem:[%s5995_s0 + $0x8] sm:$0xff] }
   0x6   :  { %v3922_v9 = vld [vmem:[%s5996_s1 + $0x2a4] ss:$16 sps:$4 sm:$0xff]   ;;  %v3925_v11 = vld [vmem:[%s5996_s1 + $0x2a0] ss:$16 sps:$4 sm:$0xff]  }
   0x7   :  { %2495 = vmatpush1.bf16.msra.mxu0 %v3918_v6  ;;  %v3926_v12 = vld [vmem:[%s5996_s1 + $0x84] ss:$16 sps:$4 sm:$0xff]   ;;  %v3930_v14 = vld [vmem:[%s5996_s1 + $0x80] ss:$16 sps:$4 sm:$0xff]  }
   0x8   :  { %2536 = vmatpush1.bf16.msra.mxu1 %v3919_v7  ;;  %2496 = vmatprep.subr.bf16.mxu0 %v3920_v8  ;;  %v3928_v13 = vld [vmem:[%s5996_s1 + $0x284] ss:$16 sps:$4 sm:$0xff]   ;;  %v3931_v15 = vld [vmem:[%s5996_s1 + $0x280] ss:$16 sps:$4 sm:$0xff]  }
   0x9   :  { %2537 = vmatprep.subr.bf16.mxu1 %v3922_v9  ;;  %v3932_v16 = vld [vmem:[%s5996_s1 + $0x64] ss:$16 sps:$4 sm:$0xff]   ;;  %v3936_v18 = vld [vmem:[%s5996_s1 + $0x60] ss:$16 sps:$4 sm:$0xff]  }
   0xa   :  { %v3934_v17 = vld [vmem:[%s5996_s1 + $0x264] ss:$16 sps:$4 sm:$0xff]   ;;  %v3937_v19 = vld [vmem:[%s5996_s1 + $0x260] ss:$16 sps:$4 sm:$0xff]  }
   0xb   :  { %2497 = vmatpush1.bf16.msra.mxu0 %v3924_v10  ;;  %v3938_v20 = vld [vmem:[%s5996_s1 + $0x44] ss:$16 sps:$4 sm:$0xff]   ;;  %v3942_v22 = vld [vmem:[%s5996_s1 + $0x40] ss:$16 sps:$4 sm:$0xff]  }
   0xc   :  { %2538 = vmatpush1.bf16.msra.mxu1 %v3925_v11  ;;  %2498 = vmatprep.subr.bf16.mxu0 %v3926_v12  ;;  %v3940_v21 = vld [vmem:[%s5996_s1 + $0x244] ss:$16 sps:$4 sm:$0xff]   ;;  %v3943_v23 = vld [vmem:[%s5996_s1 + $0x240] ss:$16 sps:$4 sm:$0xff]  }
   0xd   :  { %2539 = vmatprep.subr.bf16.mxu1 %v3928_v13  ;;  %v3944_v24 = vld [vmem:[%s5996_s1 + $0x24] ss:$16 sps:$4 sm:$0xff]   ;;  %v3948_v26 = vld [vmem:[%s5996_s1 + $0x20] ss:$16 sps:$4 sm:$0xff]  }
   0xe   :  { %v3946_v25 = vld [vmem:[%s5996_s1 + $0x224] ss:$16 sps:$4 sm:$0xff]   ;;  %v3949_v27 = vld [vmem:[%s5996_s1 + $0x220] ss:$16 sps:$4 sm:$0xff]  }
   0xf   :  { %2499 = vmatpush1.bf16.msra.mxu0 %v3930_v14  ;;  %v3950_v28 = vld [vmem:[%s5996_s1 + $0x4] ss:$16 sps:$4 sm:$0xff]   ;;  %v3954_v30 = vld [vmem:[%s5996_s1] ss:$16 sps:$4 sm:$0xff]  }
  0x10   :  { %2540 = vmatpush1.bf16.msra.mxu1 %v3931_v15  ;;  %2500 = vmatprep.subr.bf16.mxu0 %v3932_v16  ;;  %v3952_v29 = vld [vmem:[%s5996_s1 + $0x204] ss:$16 sps:$4 sm:$0xff]   ;;  %v3955_v31 = vld [vmem:[%s5996_s1 + $0x200] ss:$16 sps:$4 sm:$0xff]  }
  0x11   :  { %2541 = vmatprep.subr.bf16.mxu1 %v3934_v17  ;;  %v3956_v32 = vld [vmem:[%s5996_s1 + $0x1e4] ss:$16 sps:$4 sm:$0xff]   ;;  %v3960_v34 = vld [vmem:[%s5996_s1 + $0x1e0] ss:$16 sps:$4 sm:$0xff]  }
  0x12   :  { %v3958_v33 = vld [vmem:[%s5996_s1 + $0x3e4] ss:$16 sps:$4 sm:$0xff]   ;;  %v3961_v35 = vld [vmem:[%s5996_s1 + $0x3e0] ss:$16 sps:$4 sm:$0xff]  }
  0x13   :  { %2501 = vmatpush1.bf16.msra.mxu0 %v3936_v18  ;;  %v3962_v39 = vld [vmem:[%s5996_s1 + $0x1c4] ss:$16 sps:$4 sm:$0xff]   ;;  %v3966_v41 = vld [vmem:[%s5996_s1 + $0x1c0] ss:$16 sps:$4 sm:$0xff]  }
  0x14   :  { %2542 = vmatpush1.bf16.msra.mxu1 %v3937_v19  ;;  %2502 = vmatprep.subr.bf16.mxu0 %v3938_v20  ;;  %v3964_v40 = vld [vmem:[%s5996_s1 + $0x3c4] ss:$16 sps:$4 sm:$0xff]   ;;  %v3967_v44 = vld [vmem:[%s5996_s1 + $0x3c0] ss:$16 sps:$4 sm:$0xff]  }
  0x15   :  { %2543 = vmatprep.subr.bf16.mxu1 %v3940_v21  ;;  %v3968_v45 = vld [vmem:[%s5996_s1 + $0x1a4] ss:$16 sps:$4 sm:$0xff]   ;;  %v3972_v47 = vld [vmem:[%s5996_s1 + $0x1a0] ss:$16 sps:$4 sm:$0xff]  }
  0x16   :  { %v3970_v46 = vld [vmem:[%s5996_s1 + $0x3a4] ss:$16 sps:$4 sm:$0xff]   ;;  %v3973_v48 = vld [vmem:[%s5996_s1 + $0x3a0] ss:$16 sps:$4 sm:$0xff]  }
  0x17   :  { %2503 = vmatpush1.bf16.msra.mxu0 %v3942_v22  ;;  %v3974_v50 = vld [vmem:[%s5996_s1 + $0x184] ss:$16 sps:$4 sm:$0xff]   ;;  %v3978_v53 = vld [vmem:[%s5996_s1 + $0x180] ss:$16 sps:$4 sm:$0xff]  }
  0x18   :  { %2544 = vmatpush1.bf16.msra.mxu1 %v3943_v23  ;;  %2504 = vmatprep.subr.bf16.mxu0 %v3944_v24  ;;  %v3976_v51 = vld [vmem:[%s5996_s1 + $0x384] ss:$16 sps:$4 sm:$0xff]   ;;  %v3979_v56 = vld [vmem:[%s5996_s1 + $0x380] ss:$16 sps:$4 sm:$0xff]  }
  0x19   :  { %2545 = vmatprep.subr.bf16.mxu1 %v3946_v25  ;;  %v22_v52 = vld [vmem:[%s5995_s0] sm:$0xff] }
  0x1a   :  { %v37_v54 = vrot.slane %v22_v52, %v4721_v49  ;;  %v30_v55 = vcombine.high %v22_v52, %v22_v52  ;;  %v3980_v57 = vld [vmem:[%s5996_s1 + $0x164] ss:$16 sps:$4 sm:$0xff]   ;;  %v3984_v61 = vld [vmem:[%s5996_s1 + $0x160] ss:$16 sps:$4 sm:$0xff]  }
  0x1b   :  { %2505 = vmatpush1.bf16.msra.mxu0 %v3948_v26  ;;  %v3982_v58 = vld [vmem:[%s5996_s1 + $0x364] ss:$16 sps:$4 sm:$0xff]   ;;  %v3985_v0 = vld [vmem:[%s5996_s1 + $0x360] ss:$16 sps:$4 sm:$0xff]  }
  0x1c   :  { %2546 = vmatpush1.bf16.msra.mxu1 %v3949_v27  ;;  %2506 = vmatprep.subr.bf16.mxu0 %v3950_v28  ;;  %v45_v59 = vcombine.high %v37_v54, %v37_v54  ;;  %v44_v60 = vrot.slane %v30_v55, %v4721_v49  ;;  %v3986_v1 = vld [vmem:[%s5996_s1 + $0x144] ss:$16 sps:$4 sm:$0xff]   ;;  %v3990_v4 = vld [vmem:[%s5996_s1 + $0x140] ss:$16 sps:$4 sm:$0xff]   ;;  %v4800_v16 = vpack.c.bf16 %v37_v54, %v37_v54 }
  0x1d   :  { %2547 = vmatprep.subr.bf16.mxu1 %v3952_v29  ;;  %v3988_v2 = vld [vmem:[%s5996_s1 + $0x344] ss:$16 sps:$4 sm:$0xff]   ;;  %v3991_v5 = vld [vmem:[%s5996_s1 + $0x340] ss:$16 sps:$4 sm:$0xff]  }
  0x1e   :  { %v4749_v62 = vpack.c.bf16 %v45_v59, %v45_v59  ;;  %v46_v63 = vcombine.high %v44_v60, %v44_v60  ;;  %v3992_v6 = vld [vmem:[%s5996_s1 + $0x124] ss:$16 sps:$4 sm:$0xff]   ;;  %v3996_v8 = vld [vmem:[%s5996_s1 + $0x120] ss:$16 sps:$4 sm:$0xff]   ;;  %v4802_v17 = vpack.c.bf16 %v44_v60, %v44_v60 }
  0x1f   :  { %2507 = vmatpush1.bf16.msra.mxu0 %v3954_v30  ;;  %v3994_v7 = vld [vmem:[%s5996_s1 + $0x324] ss:$16 sps:$4 sm:$0xff]   ;;  %v3997_v9 = vld [vmem:[%s5996_s1 + $0x320] ss:$16 sps:$4 sm:$0xff]  }
  0x20   :  { %2548 = vmatpush1.bf16.msra.mxu1 %v3955_v31  ;;  %2508 = vmatprep.subr.bf16.mxu0 %v3956_v32  ;;  %v4760_v3 = vpack.c.bf16 %v46_v63, %v46_v63  ;;  %v3998_v10 = vld [vmem:[%s5996_s1 + $0x104] ss:$16 sps:$4 sm:$0xff]   ;;  %v4002_v12 = vld [vmem:[%s5996_s1 + $0x100] ss:$16 sps:$4 sm:$0xff]  }
  0x21   :  { %2549 = vmatprep.subr.bf16.mxu1 %v3958_v33  ;;  %2524 = vmatprep.mubr.bf16.mxu0 %v4749_v62  ;;  %v4000_v11 = vld [vmem:[%s5996_s1 + $0x304] ss:$16 sps:$4 sm:$0xff]   ;;  %v4003_v13 = vld [vmem:[%s5996_s1 + $0x300] ss:$16 sps:$4 sm:$0xff]  }
  0x22   :  { %2565 = vmatprep.mubr.bf16.mxu1 %v4760_v3  ;;  %v4007_v14 = vld [vmem:[%s5996_s1 + $0x4e4] ss:$16 sps:$4 sm:$0xff]   ;;  %v4005_v18 = vld [vmem:[%s5996_s1 + $0x4e0] ss:$16 sps:$4 sm:$0xff]  }
  0x23   :  { %2509 = vmatpush2.bf16.msra.mxu0 %v3960_v34  ;;  %v4010_v15 = vld [vmem:[%s5996_s1 + $0x6e4] ss:$16 sps:$4 sm:$0xff]   ;;  %v4008_v19 = vld [vmem:[%s5996_s1 + $0x6e0] ss:$16 sps:$4 sm:$0xff]  }
  0x24   :  { %2550 = vmatpush2.bf16.msra.mxu1 %v3961_v35  ;;  %2510 = vmatprep.subr.bf16.mxu0 %v3962_v39  ;;  %v4013_v20 = vld [vmem:[%s5996_s1 + $0x4c4] ss:$16 sps:$4 sm:$0xff]   ;;  %v4011_v22 = vld [vmem:[%s5996_s1 + $0x4c0] ss:$16 sps:$4 sm:$0xff]  }
  0x25   :  { %2551 = vmatprep.subr.bf16.mxu1 %v3964_v40  ;;  %v4016_v21 = vld [vmem:[%s5996_s1 + $0x6c4] ss:$16 sps:$4 sm:$0xff]   ;;  %v4014_v23 = vld [vmem:[%s5996_s1 + $0x6c0] ss:$16 sps:$4 sm:$0xff]  }
  0x26   :  { %v4019_v24 = vld [vmem:[%s5996_s1 + $0x4a4] ss:$16 sps:$4 sm:$0xff]   ;;  %v4017_v26 = vld [vmem:[%s5996_s1 + $0x4a0] ss:$16 sps:$4 sm:$0xff]  }
  0x27   :  { %2511 = vmatpush2.bf16.msra.mxu0 %v3966_v41  ;;  %v4022_v25 = vld [vmem:[%s5996_s1 + $0x6a4] ss:$16 sps:$4 sm:$0xff]   ;;  %v4020_v27 = vld [vmem:[%s5996_s1 + $0x6a0] ss:$16 sps:$4 sm:$0xff]  }
  0x28   :  { %2552 = vmatpush2.bf16.msra.mxu1 %v3967_v44  ;;  %2512 = vmatprep.subr.bf16.mxu0 %v3968_v45  ;;  %v4025_v28 = vld [vmem:[%s5996_s1 + $0x484] ss:$16 sps:$4 sm:$0xff]   ;;  %v4023_v30 = vld [vmem:[%s5996_s1 + $0x480] ss:$16 sps:$4 sm:$0xff]   ;;  %v4882_v44 = vrot.slane %v23_v42, %v4721_v49  ;;  %v47_v45 = vcombine.high %v23_v42, %v23_v42 }
  0x29   :  { %2553 = vmatprep.subr.bf16.mxu1 %v3970_v46  ;;  %v4028_v29 = vld [vmem:[%s5996_s1 + $0x684] ss:$16 sps:$4 sm:$0xff]   ;;  %v4026_v31 = vld [vmem:[%s5996_s1 + $0x680] ss:$16 sps:$4 sm:$0xff]  }
  0x2a   :  { %v4031_v32 = vld [vmem:[%s5996_s1 + $0x464] ss:$16 sps:$4 sm:$0xff]   ;;  %v4029_v34 = vld [vmem:[%s5996_s1 + $0x460] ss:$16 sps:$4 sm:$0xff]  }
  0x2b   :  { %2513 = vmatpush2.bf16.msra.mxu0 %v3972_v47  ;;  %v4034_v33 = vld [vmem:[%s5996_s1 + $0x664] ss:$16 sps:$4 sm:$0xff]   ;;  %v4032_v35 = vld [vmem:[%s5996_s1 + $0x660] ss:$16 sps:$4 sm:$0xff]  }
  0x2c   :  { %2554 = vmatpush2.bf16.msra.mxu1 %v3973_v48  ;;  %2514 = vmatprep.subr.bf16.mxu0 %v3974_v50  ;;  %v4037_v36 = vld [vmem:[%s5996_s1 + $0x444] ss:$16 sps:$4 sm:$0xff]   ;;  %v4035_v38 = vld [vmem:[%s5996_s1 + $0x440] ss:$16 sps:$4 sm:$0xff]   ;;  %v62_v48 = vcombine.high %v4882_v44, %v4882_v44  ;;  %v4893_v50 = vrot.slane %v47_v45, %v4721_v49 }
  0x2d   :  { %2555 = vmatprep.subr.bf16.mxu1 %v3976_v51  ;;  %v4040_v37 = vld [vmem:[%s5996_s1 + $0x644] ss:$16 sps:$4 sm:$0xff]   ;;  %v4038_v39 = vld [vmem:[%s5996_s1 + $0x640] ss:$16 sps:$4 sm:$0xff]  }
  0x2e   :  { %v4043_v40 = vld [vmem:[%s5996_s1 + $0x424] ss:$16 sps:$4 sm:$0xff]   ;;  %v4041_v46 = vld [vmem:[%s5996_s1 + $0x420] ss:$16 sps:$4 sm:$0xff]   ;;  %v63_v54 = vcombine.high %v4893_v50, %v4893_v50 }
  0x2f   :  { %2515 = vmatpush2.bf16.msra.mxu0 %v3978_v53  ;;  %v4046_v41 = vld [vmem:[%s5996_s1 + $0x624] ss:$16 sps:$4 sm:$0xff]   ;;  %v4044_v47 = vld [vmem:[%s5996_s1 + $0x620] ss:$16 sps:$4 sm:$0xff]   ;;  %v4901_v53 = vpack.c.bf16 %v62_v48, %v62_v48 }
  0x30   :  { %2556 = vmatpush2.bf16.msra.mxu1 %v3979_v56  ;;  %2516 = vmatprep.subr.bf16.mxu0 %v3980_v57  ;;  %v4049_v51 = vld [vmem:[%s5996_s1 + $0x404] ss:$16 sps:$4 sm:$0xff]   ;;  %v4047_v55 = vld [vmem:[%s5996_s1 + $0x400] ss:$16 sps:$4 sm:$0xff]   ;;  %v4911_v57 = vpack.c.bf16 %v63_v54, %v63_v54 }
  0x31   :  { %2557 = vmatprep.subr.bf16.mxu1 %v3982_v58  ;;  %v4052_v52 = vld [vmem:[%s5996_s1 + $0x604] ss:$16 sps:$4 sm:$0xff]   ;;  %v4050_v56 = vld [vmem:[%s5996_s1 + $0x600] ss:$16 sps:$4 sm:$0xff]  }
  0x32   :  { %v4055_v58 = vld [vmem:[%s5996_s1 + $0x5e4] ss:$16 sps:$4 sm:$0xff]   ;;  %v4053_v60 = vld [vmem:[%s5996_s1 + $0x5e0] ss:$16 sps:$4 sm:$0xff]  }
  0x33   :  { %2517 = vmatpush2.bf16.msra.mxu0 %v3984_v61  ;;  %v4058_v59 = vld [vmem:[%s5996_s1 + $0x7e4] ss:$16 sps:$4 sm:$0xff]   ;;  %v4056_v61 = vld [vmem:[%s5996_s1 + $0x7e0] ss:$16 sps:$4 sm:$0xff]  }
  0x34   :  { %2558 = vmatpush2.bf16.msra.mxu1 %v3985_v0  ;;  %2518 = vmatprep.subr.bf16.mxu0 %v3986_v1  ;;  %v4061_v63 = vld [vmem:[%s5996_s1 + $0x5c4] ss:$16 sps:$4 sm:$0xff]   ;;  %v4059_v1 = vld [vmem:[%s5996_s1 + $0x5c0] ss:$16 sps:$4 sm:$0xff]  }
  0x35   :  { %2559 = vmatprep.subr.bf16.mxu1 %v3988_v2  ;;  %v4064_v0 = vld [vmem:[%s5996_s1 + $0x7c4] ss:$16 sps:$4 sm:$0xff]   ;;  %v4062_v2 = vld [vmem:[%s5996_s1 + $0x7c0] ss:$16 sps:$4 sm:$0xff]  }
  0x36   :  { %v4111_v45 = vld [vmem:[%s5996_s1 + $0xac0] ss:$16 sps:$4 sm:$0xff]   ;;  %v4122_v54 = vld [vmem:[%s5996_s1 + $0x884] ss:$16 sps:$4 sm:$0xff]  }
  0x37   :  { %2519 = vmatpush2.bf16.msra.mxu0 %v3990_v4  ;;  %v4067_v4 = vld [vmem:[%s5996_s1 + $0x5a4] ss:$16 sps:$4 sm:$0xff]  }
  0x38   :  { %2560 = vmatpush2.bf16.msra.mxu1 %v3991_v5  ;;  %2520 = vmatprep.subr.bf16.mxu0 %v3992_v6  ;;  %v4070_v5 = vld [vmem:[%s5996_s1 + $0x7a4] ss:$16 sps:$4 sm:$0xff]   ;;  %v4065_v6 = vld [vmem:[%s5996_s1 + $0x5a0] ss:$16 sps:$4 sm:$0xff]  }
  0x39   :  { %2561 = vmatprep.subr.bf16.mxu1 %v3994_v7  ;;  %v4068_v7 = vld [vmem:[%s5996_s1 + $0x7a0] ss:$16 sps:$4 sm:$0xff]  }
  0x3b   :  { %2521 = vmatpush2.bf16.msra.mxu0 %v3996_v8  ;;  %v4073_v8 = vld [vmem:[%s5996_s1 + $0x584] ss:$16 sps:$4 sm:$0xff]  }
  0x3c   :  { %2562 = vmatpush2.bf16.msra.mxu1 %v3997_v9  ;;  %2522 = vmatprep.subr.bf16.mxu0 %v3998_v10  ;;  %v4076_v9 = vld [vmem:[%s5996_s1 + $0x784] ss:$16 sps:$4 sm:$0xff]   ;;  %v4071_v10 = vld [vmem:[%s5996_s1 + $0x580] ss:$16 sps:$4 sm:$0xff]  }
  0x3d   :  { %2563 = vmatprep.subr.bf16.mxu1 %v4000_v11  ;;  %v4074_v11 = vld [vmem:[%s5996_s1 + $0x780] ss:$16 sps:$4 sm:$0xff]  }
  0x3f   :  { %2523 = vmatpush2.bf16.msra.mxu0 %v4002_v12  ;;  %v4079_v12 = vld [vmem:[%s5996_s1 + $0x564] ss:$16 sps:$4 sm:$0xff]  }
  0x40   :  { %2564 = vmatpush2.bf16.msra.mxu1 %v4003_v13  ;;  %2574 = vmatprep.subr.bf16.mxu0 %v4007_v14  ;;  %v4082_v13 = vld [vmem:[%s5996_s1 + $0x764] ss:$16 sps:$4 sm:$0xff]   ;;  %v4077_v14 = vld [vmem:[%s5996_s1 + $0x560] ss:$16 sps:$4 sm:$0xff]  }
  0x41   :  { %2615 = vmatprep.subr.bf16.mxu1 %v4010_v15  ;;  %v4080_v15 = vld [vmem:[%s5996_s1 + $0x760] ss:$16 sps:$4 sm:$0xff]  }
  0x42   :  { %2525 = vmatmul.mubr.bf16.vlgmr.msra.gmra.mxu0 %v4800_v16 }
  0x43   :  { %2566 = vmatmul.mubr.bf16.vlgmr.msra.gmra.mxu1 %v4802_v17  ;;  %2575 = vmatpush1.bf16.msra.mxu0 %v4005_v18  ;;  %v4085_v18 = vld [vmem:[%s5996_s1 + $0x544] ss:$16 sps:$4 sm:$0xff]  }
  0x44   :  { %2616 = vmatpush1.bf16.msra.mxu1 %v4008_v19  ;;  %2576 = vmatprep.subr.bf16.mxu0 %v4013_v20  ;;  %v4088_v19 = vld [vmem:[%s5996_s1 + $0x744] ss:$16 sps:$4 sm:$0xff]   ;;  %v4083_v20 = vld [vmem:[%s5996_s1 + $0x540] ss:$16 sps:$4 sm:$0xff]  }
  0x45   :  { %2617 = vmatprep.subr.bf16.mxu1 %v4016_v21  ;;  %2606 = vmatprep.mubr.bf16.mxu0 %v4901_v53  ;;  %v4086_v21 = vld [vmem:[%s5996_s1 + $0x740] ss:$16 sps:$4 sm:$0xff]  }
  0x46   :  { %2647 = vmatprep.mubr.bf16.mxu1 %v4911_v57 }
  0x47   :  { %2577 = vmatpush1.bf16.msra.mxu0 %v4011_v22  ;;  %v4091_v22 = vld [vmem:[%s5996_s1 + $0x524] ss:$16 sps:$4 sm:$0xff]  }
  0x48   :  { %2618 = vmatpush1.bf16.msra.mxu1 %v4014_v23  ;;  %2578 = vmatprep.subr.bf16.mxu0 %v4019_v24  ;;  %v4094_v23 = vld [vmem:[%s5996_s1 + $0x724] ss:$16 sps:$4 sm:$0xff]   ;;  %v4089_v24 = vld [vmem:[%s5996_s1 + $0x520] ss:$16 sps:$4 sm:$0xff]  }
  0x49   :  { %2619 = vmatprep.subr.bf16.mxu1 %v4022_v25  ;;  %v4092_v25 = vld [vmem:[%s5996_s1 + $0x720] ss:$16 sps:$4 sm:$0xff]  }
  0x4b   :  { %2579 = vmatpush1.bf16.msra.mxu0 %v4017_v26  ;;  %v4097_v26 = vld [vmem:[%s5996_s1 + $0x504] ss:$16 sps:$4 sm:$0xff]  }
  0x4c   :  { %2620 = vmatpush1.bf16.msra.mxu1 %v4020_v27  ;;  %2580 = vmatprep.subr.bf16.mxu0 %v4025_v28  ;;  %v4100_v27 = vld [vmem:[%s5996_s1 + $0x704] ss:$16 sps:$4 sm:$0xff]   ;;  %v4095_v28 = vld [vmem:[%s5996_s1 + $0x500] ss:$16 sps:$4 sm:$0xff]  }
  0x4d   :  { %2621 = vmatprep.subr.bf16.mxu1 %v4028_v29  ;;  %v4098_v29 = vld [vmem:[%s5996_s1 + $0x700] ss:$16 sps:$4 sm:$0xff]  }
  0x4f   :  { %2581 = vmatpush1.bf16.msra.mxu0 %v4023_v30  ;;  %v4104_v30 = vld [vmem:[%s5996_s1 + $0x8e4] ss:$16 sps:$4 sm:$0xff]  }
  0x50   :  { %2622 = vmatpush1.bf16.msra.mxu1 %v4026_v31  ;;  %2582 = vmatprep.subr.bf16.mxu0 %v4031_v32  ;;  %v4107_v31 = vld [vmem:[%s5996_s1 + $0xae4] ss:$16 sps:$4 sm:$0xff]   ;;  %v5019_v32 = vpack.c.bf16 %v4882_v44, %v4882_v44 }
  0x51   :  { %2623 = vmatprep.subr.bf16.mxu1 %v4034_v33  ;;  %v5023_v33 = vpack.c.bf16 %v4893_v50, %v4893_v50  ;;  %v4114_v50 = vld [vmem:[%s5996_s1 + $0x8a0] ss:$16 sps:$4 sm:$0xff]  }
  0x53   :  { %2583 = vmatpush1.bf16.msra.mxu0 %v4029_v34  ;;  %v4102_v34 = vld [vmem:[%s5996_s1 + $0x8e0] ss:$16 sps:$4 sm:$0xff]  }
  0x54   :  { %2624 = vmatpush1.bf16.msra.mxu1 %v4032_v35  ;;  %2584 = vmatprep.subr.bf16.mxu0 %v4037_v36  ;;  %v4105_v35 = vld [vmem:[%s5996_s1 + $0xae0] ss:$16 sps:$4 sm:$0xff]   ;;  %v4110_v36 = vld [vmem:[%s5996_s1 + $0x8c4] ss:$16 sps:$4 sm:$0xff]  }
  0x55   :  { %2625 = vmatprep.subr.bf16.mxu1 %v4040_v37  ;;  %v24_v37 = vld [vmem:[%s5995_s0 + $0x10] sm:$0xff] }
  0x57   :  { %2585 = vmatpush1.bf16.msra.mxu0 %v4035_v38  ;;  %v4113_v38 = vld [vmem:[%s5996_s1 + $0xac4] ss:$16 sps:$4 sm:$0xff]  }
  0x58   :  { %2626 = vmatpush1.bf16.msra.mxu1 %v4038_v39  ;;  %2586 = vmatprep.subr.bf16.mxu0 %v4043_v40  ;;  %v5041_v39 = vrot.slane %v24_v37, %v4721_v49  ;;  %v64_v40 = vcombine.high %v24_v37, %v24_v37  ;;  %v4182_v37 = vld [vmem:[%s5996_s1 + $0x944] ss:$16 sps:$4 sm:$0xff]  }
  0x59   :  { %2627 = vmatprep.subr.bf16.mxu1 %v4046_v41  ;;  %v4108_v41 = vld [vmem:[%s5996_s1 + $0x8c0] ss:$16 sps:$4 sm:$0xff]  }
  0x5a   :  { %v79_v42 = vcombine.high %v5041_v39, %v5041_v39  ;;  %v5051_v44 = vrot.slane %v64_v40, %v4721_v49  ;;  %v4180_v40 = vld [vmem:[%s5996_s1 + $0x940] ss:$16 sps:$4 sm:$0xff]  }
  0x5b   :  { %2587 = vmatpush1.bf16.msra.mxu0 %v4041_v46  ;;  %v4116_v46 = vld [vmem:[%s5996_s1 + $0x8a4] ss:$16 sps:$4 sm:$0xff]  }
  0x5c   :  { %2628 = vmatpush1.bf16.msra.mxu1 %v4044_v47  ;;  %2588 = vmatprep.subr.bf16.mxu0 %v4049_v51  ;;  %v4119_v47 = vld [vmem:[%s5996_s1 + $0xaa4] ss:$16 sps:$4 sm:$0xff]   ;;  %v5062_v48 = vpack.c.bf16 %v79_v42, %v79_v42  ;;  %v80_v49 = vcombine.high %v5051_v44, %v5051_v44 }
  0x5d   :  { %2629 = vmatprep.subr.bf16.mxu1 %v4052_v52  ;;  %v4117_v52 = vld [vmem:[%s5996_s1 + $0xaa0] ss:$16 sps:$4 sm:$0xff]   ;;  %v4188_v42 = vld [vmem:[%s5996_s1 + $0x924] ss:$16 sps:$4 sm:$0xff]  }
  0x5e   :  { %v5070_v51 = vpack.c.bf16 %v80_v49, %v80_v49  ;;  %v4194_v49 = vld [vmem:[%s5996_s1 + $0x904] ss:$16 sps:$4 sm:$0xff]  }
  0x5f   :  { %2589 = vmatpush1.bf16.msra.mxu0 %v4047_v55  ;;  %v4125_v55 = vld [vmem:[%s5996_s1 + $0xa84] ss:$16 sps:$4 sm:$0xff]  }
  0x60   :  { %2630 = vmatpush1.bf16.msra.mxu1 %v4050_v56  ;;  %2590 = vmatprep.subr.bf16.mxu0 %v4055_v58  ;;  %v4120_v56 = vld [vmem:[%s5996_s1 + $0x880] ss:$16 sps:$4 sm:$0xff]  }
  0x61   :  { %2631 = vmatprep.subr.bf16.mxu1 %v4058_v59  ;;  %v4123_v58 = vld [vmem:[%s5996_s1 + $0xa80] ss:$16 sps:$4 sm:$0xff]   ;;  %v4128_v59 = vld [vmem:[%s5996_s1 + $0x864] ss:$16 sps:$4 sm:$0xff]  }
  0x63   :  { %2591 = vmatpush2.bf16.msra.mxu0 %v4053_v60  ;;  %v4131_v60 = vld [vmem:[%s5996_s1 + $0xa64] ss:$16 sps:$4 sm:$0xff]  }
  0x64   :  { %2632 = vmatpush2.bf16.msra.mxu1 %v4056_v61  ;;  %2592 = vmatprep.subr.bf16.mxu0 %v4061_v63  ;;  %v4126_v61 = vld [vmem:[%s5996_s1 + $0x860] ss:$16 sps:$4 sm:$0xff]  }
  0x65   :  { %2633 = vmatprep.subr.bf16.mxu1 %v4064_v0  ;;  %v4129_v63 = vld [vmem:[%s5996_s1 + $0xa60] ss:$16 sps:$4 sm:$0xff]   ;;  %v4134_v0 = vld [vmem:[%s5996_s1 + $0x844] ss:$16 sps:$4 sm:$0xff]  }
  0x67   :  { %2593 = vmatpush2.bf16.msra.mxu0 %v4059_v1  ;;  %v4137_v1 = vld [vmem:[%s5996_s1 + $0xa44] ss:$16 sps:$4 sm:$0xff]  }
  0x68   :  { %2634 = vmatpush2.bf16.msra.mxu1 %v4062_v2  ;;  %2594 = vmatprep.subr.bf16.mxu0 %v4067_v4  ;;  %v4132_v2 = vld [vmem:[%s5996_s1 + $0x840] ss:$16 sps:$4 sm:$0xff]  }
  0x69   :  { %2635 = vmatprep.subr.bf16.mxu1 %v4070_v5  ;;  %v4135_v4 = vld [vmem:[%s5996_s1 + $0xa40] ss:$16 sps:$4 sm:$0xff]   ;;  %v4140_v5 = vld [vmem:[%s5996_s1 + $0x824] ss:$16 sps:$4 sm:$0xff]  }
  0x6b   :  { %2595 = vmatpush2.bf16.msra.mxu0 %v4065_v6  ;;  %v4143_v6 = vld [vmem:[%s5996_s1 + $0xa24] ss:$16 sps:$4 sm:$0xff]  }
  0x6c   :  { %2636 = vmatpush2.bf16.msra.mxu1 %v4068_v7  ;;  %2596 = vmatprep.subr.bf16.mxu0 %v4073_v8  ;;  %v4138_v7 = vld [vmem:[%s5996_s1 + $0x820] ss:$16 sps:$4 sm:$0xff]  }
  0x6d   :  { %2637 = vmatprep.subr.bf16.mxu1 %v4076_v9  ;;  %v4141_v8 = vld [vmem:[%s5996_s1 + $0xa20] ss:$16 sps:$4 sm:$0xff]   ;;  %v4146_v9 = vld [vmem:[%s5996_s1 + $0x804] ss:$16 sps:$4 sm:$0xff]  }
  0x6f   :  { %2597 = vmatpush2.bf16.msra.mxu0 %v4071_v10  ;;  %v4149_v10 = vld [vmem:[%s5996_s1 + $0xa04] ss:$16 sps:$4 sm:$0xff]  }
  0x70   :  { %2638 = vmatpush2.bf16.msra.mxu1 %v4074_v11  ;;  %2598 = vmatprep.subr.bf16.mxu0 %v4079_v12  ;;  %v4144_v11 = vld [vmem:[%s5996_s1 + $0x800] ss:$16 sps:$4 sm:$0xff]  }
  0x71   :  { %2639 = vmatprep.subr.bf16.mxu1 %v4082_v13  ;;  %v4147_v12 = vld [vmem:[%s5996_s1 + $0xa00] ss:$16 sps:$4 sm:$0xff]   ;;  %v4152_v13 = vld [vmem:[%s5996_s1 + $0x9e4] ss:$16 sps:$4 sm:$0xff]  }
  0x73   :  { %2599 = vmatpush2.bf16.msra.mxu0 %v4077_v14  ;;  %v4155_v14 = vld [vmem:[%s5996_s1 + $0xbe4] ss:$16 sps:$4 sm:$0xff]  }
  0x74   :  { %2640 = vmatpush2.bf16.msra.mxu1 %v4080_v15  ;;  %2600 = vmatprep.subr.bf16.mxu0 %v4085_v18  ;;  %v4150_v15 = vld [vmem:[%s5996_s1 + $0x9e0] ss:$16 sps:$4 sm:$0xff]  }
  0x75   :  { %2641 = vmatprep.subr.bf16.mxu1 %v4088_v19  ;;  %v4153_v18 = vld [vmem:[%s5996_s1 + $0xbe0] ss:$16 sps:$4 sm:$0xff]   ;;  %v4158_v19 = vld [vmem:[%s5996_s1 + $0x9c4] ss:$16 sps:$4 sm:$0xff]  }
  0x77   :  { %2601 = vmatpush2.bf16.msra.mxu0 %v4083_v20  ;;  %v4161_v20 = vld [vmem:[%s5996_s1 + $0xbc4] ss:$16 sps:$4 sm:$0xff]  }
  0x78   :  { %2642 = vmatpush2.bf16.msra.mxu1 %v4086_v21  ;;  %2602 = vmatprep.subr.bf16.mxu0 %v4091_v22  ;;  %v4156_v21 = vld [vmem:[%s5996_s1 + $0x9c0] ss:$16 sps:$4 sm:$0xff]  }
  0x79   :  { %2643 = vmatprep.subr.bf16.mxu1 %v4094_v23  ;;  %v4159_v22 = vld [vmem:[%s5996_s1 + $0xbc0] ss:$16 sps:$4 sm:$0xff]   ;;  %v4164_v23 = vld [vmem:[%s5996_s1 + $0x9a4] ss:$16 sps:$4 sm:$0xff]  }
  0x7b   :  { %2603 = vmatpush2.bf16.msra.mxu0 %v4089_v24  ;;  %v4167_v24 = vld [vmem:[%s5996_s1 + $0xba4] ss:$16 sps:$4 sm:$0xff]  }
  0x7c   :  { %2644 = vmatpush2.bf16.msra.mxu1 %v4092_v25  ;;  %2604 = vmatprep.subr.bf16.mxu0 %v4097_v26  ;;  %v4162_v25 = vld [vmem:[%s5996_s1 + $0x9a0] ss:$16 sps:$4 sm:$0xff]  }
  0x7d   :  { %2645 = vmatprep.subr.bf16.mxu1 %v4100_v27  ;;  %v4165_v26 = vld [vmem:[%s5996_s1 + $0xba0] ss:$16 sps:$4 sm:$0xff]   ;;  %v4170_v27 = vld [vmem:[%s5996_s1 + $0x984] ss:$16 sps:$4 sm:$0xff]  }
  0x7f   :  { %2605 = vmatpush2.bf16.msra.mxu0 %v4095_v28  ;;  %v4173_v28 = vld [vmem:[%s5996_s1 + $0xb84] ss:$16 sps:$4 sm:$0xff]  }
  0x80   :  { %2646 = vmatpush2.bf16.msra.mxu1 %v4098_v29  ;;  %2656 = vmatprep.subr.bf16.mxu0 %v4104_v30  ;;  %v4168_v29 = vld [vmem:[%s5996_s1 + $0x980] ss:$16 sps:$4 sm:$0xff]  }
  0x81   :  { %2697 = vmatprep.subr.bf16.mxu1 %v4107_v31  ;;  %v4171_v30 = vld [vmem:[%s5996_s1 + $0xb80] ss:$16 sps:$4 sm:$0xff]   ;;  %v4176_v31 = vld [vmem:[%s5996_s1 + $0x964] ss:$16 sps:$4 sm:$0xff]  }
  0x82   :  { %2607 = vmatmul.mubr.bf16.vlgmr.msra.gmra.mxu0 %v5019_v32 }
  0x83   :  { %2648 = vmatmul.mubr.bf16.vlgmr.msra.gmra.mxu1 %v5023_v33  ;;  %2657 = vmatpush1.bf16.msra.mxu0 %v4102_v34  ;;  %v4179_v34 = vld [vmem:[%s5996_s1 + $0xb64] ss:$16 sps:$4 sm:$0xff]  }
  0x84   :  { %2698 = vmatpush1.bf16.msra.mxu1 %v4105_v35  ;;  %2658 = vmatprep.subr.bf16.mxu0 %v4110_v36  ;;  %v4174_v35 = vld [vmem:[%s5996_s1 + $0x960] ss:$16 sps:$4 sm:$0xff]  }
  0x85   :  { %2699 = vmatprep.subr.bf16.mxu1 %v4113_v38  ;;  %2688 = vmatprep.mubr.bf16.mxu0 %v5062_v48  ;;  %v4177_v36 = vld [vmem:[%s5996_s1 + $0xb60] ss:$16 sps:$4 sm:$0xff]   ;;  %v4185_v38 = vld [vmem:[%s5996_s1 + $0xb44] ss:$16 sps:$4 sm:$0xff]  }
  0x86   :  { %2729 = vmatprep.mubr.bf16.mxu1 %v5070_v51 }
  0x87   :  { %2659 = vmatpush1.bf16.msra.mxu0 %v4108_v41  ;;  %v4183_v41 = vld [vmem:[%s5996_s1 + $0xb40] ss:$16 sps:$4 sm:$0xff]  }
  0x88   :  { %2700 = vmatpush1.bf16.msra.mxu1 %v4111_v45  ;;  %2660 = vmatprep.subr.bf16.mxu0 %v4116_v46  ;;  %v4191_v45 = vld [vmem:[%s5996_s1 + $0xb24] ss:$16 sps:$4 sm:$0xff]   ;;  %v4186_v46 = vld [vmem:[%s5996_s1 + $0x920] ss:$16 sps:$4 sm:$0xff]  }
  0x89   :  { %2701 = vmatprep.subr.bf16.mxu1 %v4119_v47  ;;  %v4189_v47 = vld [vmem:[%s5996_s1 + $0xb20] ss:$16 sps:$4 sm:$0xff]  }
  0x8b   :  { %2661 = vmatpush1.bf16.msra.mxu0 %v4114_v50  ;;  %v4197_v50 = vld [vmem:[%s5996_s1 + $0xb04] ss:$16 sps:$4 sm:$0xff]  }
  0x8c   :  { %2702 = vmatpush1.bf16.msra.mxu1 %v4117_v52  ;;  %2662 = vmatprep.subr.bf16.mxu0 %v4122_v54  ;;  %v4192_v52 = vld [vmem:[%s5996_s1 + $0x900] ss:$16 sps:$4 sm:$0xff]  }
  0x8d   :  { %2703 = vmatprep.subr.bf16.mxu1 %v4125_v55  ;;  %v4195_v54 = vld [vmem:[%s5996_s1 + $0xb00] ss:$16 sps:$4 sm:$0xff]   ;;  %v4201_v55 = vld [vmem:[%s5996_s1 + $0xc24] ss:$16 sps:$4 sm:$0xff]  }
  0x8f   :  { %2663 = vmatpush1.bf16.msra.mxu0 %v4120_v56  ;;  %v4204_v56 = vld [vmem:[%s5996_s1 + $0xec] ss:$16 sps:$4 sm:$0xff]  }
  0x90   :  { %2704 = vmatpush1.bf16.msra.mxu1 %v4123_v58  ;;  %2664 = vmatprep.subr.bf16.mxu0 %v4128_v59  ;;  %v5240_v58 = vpack.c.bf16 %v5041_v39, %v5041_v39  ;;  %v5244_v59 = vpack.c.bf16 %v5051_v44, %v5051_v44  ;;  %v4207_v39 = vld [vmem:[%s5996_s1 + $0xc04] ss:$16 sps:$4 sm:$0xff]   ;;  %v4210_v44 = vld [vmem:[%s5996_s1 + $0xcc] ss:$16 sps:$4 sm:$0xff]  }
  0x91   :  { %2705 = vmatprep.subr.bf16.mxu1 %v4131_v60  ;;  %v4199_v60 = vld [vmem:[%s5996_s1 + $0xc20] ss:$16 sps:$4 sm:$0xff]  }
  0x93   :  { %2665 = vmatpush1.bf16.msra.mxu0 %v4126_v61  ;;  %v4202_v61 = vld [vmem:[%s5996_s1 + $0xe8] ss:$16 sps:$4 sm:$0xff]  }
  0x94   :  { %2706 = vmatpush1.bf16.msra.mxu1 %v4129_v63  ;;  %2666 = vmatprep.subr.bf16.mxu0 %v4134_v0  ;;  %v4205_v63 = vld [vmem:[%s5996_s1 + $0xc00] ss:$16 sps:$4 sm:$0xff]   ;;  %v4208_v0 = vld [vmem:[%s5996_s1 + $0xc8] ss:$16 sps:$4 sm:$0xff]  }
  0x95   :  { %2707 = vmatprep.subr.bf16.mxu1 %v4137_v1  ;;  %v3433_v1 = vld.sshfl [vmem:[%s5995_s0 + $0x18] sm:$0x3 pattern:$0x76325410] }
  0x97   :  { %2667 = vmatpush1.bf16.msra.mxu0 %v4132_v2  ;;  %v4213_v2 = vld [vmem:[%s5996_s1 + $0xac] ss:$16 sps:$4 sm:$0xff]  }
  0x98   :  { %2708 = vmatpush1.bf16.msra.mxu1 %v4135_v4  ;;  %2668 = vmatprep.subr.bf16.mxu0 %v4140_v5  ;;  %v4216_v4 = vld [vmem:[%s5996_s1 + $0x2ec] ss:$16 sps:$4 sm:$0xff]   ;;  %v4554_v5 = vmov 0  }
  0x99   :  { %2709 = vmatprep.subr.bf16.mxu1 %v4143_v6  ;;  %v5277_v6 = vpack.c.bf16 %v3433_v1, %v3433_v1  ;;  %v4283_v1 = vld [vmem:[%s5996_s1 + $0x128] ss:$16 sps:$4 sm:$0xff]  }
  0x9b   :  { %2669 = vmatpush1.bf16.msra.mxu0 %v4138_v7  ;;  %v4211_v7 = vld [vmem:[%s5996_s1 + $0xa8] ss:$16 sps:$4 sm:$0xff]  }
  0x9c   :  { %2710 = vmatpush1.bf16.msra.mxu1 %v4141_v8  ;;  %2670 = vmatprep.subr.bf16.mxu0 %v4146_v9  ;;  %v4214_v8 = vld [vmem:[%s5996_s1 + $0x2e8] ss:$16 sps:$4 sm:$0xff]   ;;  %v4219_v9 = vld [vmem:[%s5996_s1 + $0x8c] ss:$16 sps:$4 sm:$0xff]  }
  0x9d   :  { %2711 = vmatprep.subr.bf16.mxu1 %v4149_v10  ;;  %v4217_v10 = vld [vmem:[%s5996_s1 + $0x88] ss:$16 sps:$4 sm:$0xff]  }
  0x9f   :  { %2671 = vmatpush1.bf16.msra.mxu0 %v4144_v11  ;;  %v4220_v11 = vld [vmem:[%s5996_s1 + $0x2c8] ss:$16 sps:$4 sm:$0xff]  }
  0xa0   :  { %2712 = vmatpush1.bf16.msra.mxu1 %v4147_v12  ;;  %2672 = vmatprep.subr.bf16.mxu0 %v4152_v13  ;;  %v4225_v12 = vld [vmem:[%s5996_s1 + $0x6c] ss:$16 sps:$4 sm:$0xff]  }
  0xa1   :  { %2713 = vmatprep.subr.bf16.mxu1 %v4155_v14  ;;  %v4228_v13 = vld [vmem:[%s5996_s1 + $0x2ac] ss:$16 sps:$4 sm:$0xff]   ;;  %v4223_v14 = vld [vmem:[%s5996_s1 + $0x68] ss:$16 sps:$4 sm:$0xff]  }
  0xa3   :  { %2673 = vmatpush2.bf16.msra.mxu0 %v4150_v15  ;;  %v4226_v15 = vld [vmem:[%s5996_s1 + $0x2a8] ss:$16 sps:$4 sm:$0xff]  }
  0xa4   :  { %2714 = vmatpush2.bf16.msra.mxu1 %v4153_v18  ;;  %2674 = vmatprep.subr.bf16.mxu0 %v4158_v19  ;;  %v4231_v18 = vld [vmem:[%s5996_s1 + $0x4c] ss:$16 sps:$4 sm:$0xff]   ;;  %v4229_v19 = vld [vmem:[%s5996_s1 + $0x48] ss:$16 sps:$4 sm:$0xff]  }
  0xa5   :  { %2715 = vmatprep.subr.bf16.mxu1 %v4161_v20  ;;  %v4232_v20 = vld [vmem:[%s5996_s1 + $0x288] ss:$16 sps:$4 sm:$0xff]  }
  0xa7   :  { %2675 = vmatpush2.bf16.msra.mxu0 %v4156_v21  ;;  %v4237_v21 = vld [vmem:[%s5996_s1 + $0x2c] ss:$16 sps:$4 sm:$0xff]  }
  0xa8   :  { %2716 = vmatpush2.bf16.msra.mxu1 %v4159_v22  ;;  %2676 = vmatprep.subr.bf16.mxu0 %v4164_v23  ;;  %v4240_v22 = vld [vmem:[%s5996_s1 + $0x26c] ss:$16 sps:$4 sm:$0xff]   ;;  %v4235_v23 = vld [vmem:[%s5996_s1 + $0x28] ss:$16 sps:$4 sm:$0xff]  }
  0xa9   :  { %2717 = vmatprep.subr.bf16.mxu1 %v4167_v24  ;;  %v4238_v24 = vld [vmem:[%s5996_s1 + $0x268] ss:$16 sps:$4 sm:$0xff]  }
  0xab   :  { %2677 = vmatpush2.bf16.msra.mxu0 %v4162_v25  ;;  %v4243_v25 = vld [vmem:[%s5996_s1 + $0xc] ss:$16 sps:$4 sm:$0xff]  }
  0xac   :  { %2718 = vmatpush2.bf16.msra.mxu1 %v4165_v26  ;;  %2678 = vmatprep.subr.bf16.mxu0 %v4170_v27  ;;  %v4246_v26 = vld [vmem:[%s5996_s1 + $0x24c] ss:$16 sps:$4 sm:$0xff]   ;;  %v4241_v27 = vld [vmem:[%s5996_s1 + $0x8] ss:$16 sps:$4 sm:$0xff]  }
  0xad   :  { %2719 = vmatprep.subr.bf16.mxu1 %v4173_v28  ;;  %v4244_v28 = vld [vmem:[%s5996_s1 + $0x248] ss:$16 sps:$4 sm:$0xff]  }
  0xaf   :  { %2679 = vmatpush2.bf16.msra.mxu0 %v4168_v29  ;;  %v4249_v29 = vld [vmem:[%s5996_s1 + $0x1ec] ss:$16 sps:$4 sm:$0xff]  }
  0xb0   :  { %2720 = vmatpush2.bf16.msra.mxu1 %v4171_v30  ;;  %2680 = vmatprep.subr.bf16.mxu0 %v4176_v31  ;;  %v4252_v30 = vld [vmem:[%s5996_s1 + $0x22c] ss:$16 sps:$4 sm:$0xff]   ;;  %v4247_v31 = vld [vmem:[%s5996_s1 + $0x1e8] ss:$16 sps:$4 sm:$0xff]  }
  0xb1   :  { %2721 = vmatprep.subr.bf16.mxu1 %v4179_v34  ;;  %v4250_v34 = vld [vmem:[%s5996_s1 + $0x228] ss:$16 sps:$4 sm:$0xff]  }
  0xb3   :  { %2681 = vmatpush2.bf16.msra.mxu0 %v4174_v35  ;;  %v4255_v35 = vld [vmem:[%s5996_s1 + $0x1cc] ss:$16 sps:$4 sm:$0xff]  }
  0xb4   :  { %2722 = vmatpush2.bf16.msra.mxu1 %v4177_v36  ;;  %2682 = vmatprep.subr.bf16.mxu0 %v4182_v37  ;;  %v4258_v36 = vld [vmem:[%s5996_s1 + $0x20c] ss:$16 sps:$4 sm:$0xff]   ;;  %v4253_v37 = vld [vmem:[%s5996_s1 + $0x1c8] ss:$16 sps:$4 sm:$0xff]  }
  0xb5   :  { %2723 = vmatprep.subr.bf16.mxu1 %v4185_v38  ;;  %v4256_v38 = vld [vmem:[%s5996_s1 + $0x208] ss:$16 sps:$4 sm:$0xff]  }
  0xb7   :  { %2683 = vmatpush2.bf16.msra.mxu0 %v4180_v40  ;;  %v4261_v40 = vld [vmem:[%s5996_s1 + $0x1ac] ss:$16 sps:$4 sm:$0xff]  }
  0xb8   :  { %2724 = vmatpush2.bf16.msra.mxu1 %v4183_v41  ;;  %2684 = vmatprep.subr.bf16.mxu0 %v4188_v42  ;;  %v4264_v41 = vld [vmem:[%s5996_s1 + $0x3ec] ss:$16 sps:$4 sm:$0xff]   ;;  %v4259_v42 = vld [vmem:[%s5996_s1 + $0x1a8] ss:$16 sps:$4 sm:$0xff]  }
  0xb9   :  { %2725 = vmatprep.subr.bf16.mxu1 %v4191_v45  ;;  %v4262_v45 = vld [vmem:[%s5996_s1 + $0x3e8] ss:$16 sps:$4 sm:$0xff]  }
  0xbb   :  { %2685 = vmatpush2.bf16.msra.mxu0 %v4186_v46  ;;  %v4267_v46 = vld [vmem:[%s5996_s1 + $0x18c] ss:$16 sps:$4 sm:$0xff]  }
  0xbc   :  { %2726 = vmatpush2.bf16.msra.mxu1 %v4189_v47  ;;  %2686 = vmatprep.subr.bf16.mxu0 %v4194_v49  ;;  %v4270_v47 = vld [vmem:[%s5996_s1 + $0x3cc] ss:$16 sps:$4 sm:$0xff]   ;;  %v4265_v49 = vld [vmem:[%s5996_s1 + $0x188] ss:$16 sps:$4 sm:$0xff]  }
  0xbd   :  { %2727 = vmatprep.subr.bf16.mxu1 %v4197_v50  ;;  %v4268_v50 = vld [vmem:[%s5996_s1 + $0x3c8] ss:$16 sps:$4 sm:$0xff]  }
  0xbf   :  { %2687 = vmatpush2.bf16.msra.mxu0 %v4192_v52  ;;  %v4273_v52 = vld [vmem:[%s5996_s1 + $0x16c] ss:$16 sps:$4 sm:$0xff]  }
  0xc0   :  { %2728 = vmatpush2.bf16.msra.mxu1 %v4195_v54  ;;  %2750 = vmatprep.subr.bf16.mxu0 %v4201_v55  ;;  %v4276_v54 = vld [vmem:[%s5996_s1 + $0x3ac] ss:$16 sps:$4 sm:$0xff]   ;;  %v4271_v55 = vld [vmem:[%s5996_s1 + $0x168] ss:$16 sps:$4 sm:$0xff]  }
  0xc1   :  { %2779 = vmatprep.subr.bf16.mxu1 %v4204_v56  ;;  %v4274_v56 = vld [vmem:[%s5996_s1 + $0x3a8] ss:$16 sps:$4 sm:$0xff]  }
  0xc2   :  { %2689 = vmatmul.mubr.bf16.vlgmr.msra.gmra.mxu0 %v5240_v58 }
  0xc3   :  { %2730 = vmatmul.mubr.bf16.vlgmr.msra.gmra.mxu1 %v5244_v59  ;;  %2751 = vmatpush1.bf16.msra.mxu0 %v4199_v60  ;;  %v4279_v60 = vld [vmem:[%s5996_s1 + $0x14c] ss:$16 sps:$4 sm:$0xff]  }
  0xc4   :  { %2780 = vmatpush1.bf16.msra.mxu1 %v4202_v61  ;;  %2752 = vmatprep.subr.bf16.mxu0 %v4207_v39  ;;  %v4282_v61 = vld [vmem:[%s5996_s1 + $0x38c] ss:$16 sps:$4 sm:$0xff]   ;;  %v4277_v39 = vld [vmem:[%s5996_s1 + $0x148] ss:$16 sps:$4 sm:$0xff]  }
  0xc5   :  { %2781 = vmatprep.subr.bf16.mxu1 %v4210_v44  ;;  %2770 = vmatprep.mubr.bf16.mxu0 %v4554_v5  ;;  %v4280_v44 = vld [vmem:[%s5996_s1 + $0x388] ss:$16 sps:$4 sm:$0xff]  }
  0xc6   :  { %2811 = vmatprep.mubr.bf16.mxu1 %v4749_v62  ;;  %v4222_v62 = vld [vmem:[%s5996_s1 + $0x2cc] ss:$16 sps:$4 sm:$0xff]  }
  0xc7   :  { %2753 = vmatpush1.bf16.msra.mxu0 %v4205_v63  ;;  %v4285_v63 = vld [vmem:[%s5996_s1 + $0x12c] ss:$16 sps:$4 sm:$0xff]  }
  0xc8   :  { %2782 = vmatpush1.bf16.msra.mxu1 %v4208_v0  ;;  %2820 = vmatprep.subr.bf16.mxu0 %v4216_v4  ;;  %v4288_v0 = vld [vmem:[%s5996_s1 + $0x36c] ss:$16 sps:$4 sm:$0xff]  }
  0xc9   :  { %2783 = vmatprep.subr.bf16.mxu1 %v4213_v2  ;;  %v4286_v2 = vld [vmem:[%s5996_s1 + $0x368] ss:$16 sps:$4 sm:$0xff]   ;;  %v4291_v4 = vld [vmem:[%s5996_s1 + $0x10c] ss:$16 sps:$4 sm:$0xff]  }
  0xca   :  { %3826 = vmatmul.mubr.msk.bf16.vlgmr.msra.gmra.mxu0 %vm2488_vm0, %v5277_v6 }
  0xcb   :  { %2821 = vmatpush1.bf16.msra.mxu0 %v4214_v8  ;;  %2852 = vmatprep.mubr.bf16.mxu0 %v4760_v3  ;;  %v4234_v3 = vld [vmem:[%s5996_s1 + $0x28c] ss:$16 sps:$4 sm:$0xff]   ;;  %v4289_v8 = vld [vmem:[%s5996_s1 + $0x108] ss:$16 sps:$4 sm:$0xff]  }
  0xcc   :  { %2784 = vmatpush1.bf16.msra.mxu1 %v4211_v7  ;;  %2822 = vmatprep.subr.bf16.mxu0 %v4222_v62  ;;  %v4294_v7 = vld [vmem:[%s5996_s1 + $0x34c] ss:$16 sps:$4 sm:$0xff]   ;;  %v5447_v62 = vld [vmem:[%s5997_s2] sm:$0xf] }
  0xcd   :  { %2785 = vmatprep.subr.bf16.mxu1 %v4219_v9  ;;  %v4292_v9 = vld [vmem:[%s5996_s1 + $0x348] ss:$16 sps:$4 sm:$0xff]  }
  0xcf   :  { %2823 = vmatpush1.bf16.msra.mxu0 %v4220_v11  ;;  %v4297_v11 = vld [vmem:[%s5996_s1 + $0x32c] ss:$16 sps:$4 sm:$0xff]  }
  0xd0   :  { %2786 = vmatpush1.bf16.msra.mxu1 %v4217_v10  ;;  %2824 = vmatprep.subr.bf16.mxu0 %v4228_v13  ;;  %v510_v10 = vsub.s32 0, %v4703_v43  ;;  %v514_v13 = vsub.s32 1, %v4703_v43 }
  0xd1   :  { %2787 = vmatprep.subr.bf16.mxu1 %v4225_v12  ;;  %v4300_v12 = vld [vmem:[%s5996_s1 + $0x4ec] ss:$16 sps:$4 sm:$0xff]  }
  0xd3   :  { %2825 = vmatpush1.bf16.msra.mxu0 %v4226_v15  ;;  %v4295_v15 = vld [vmem:[%s5996_s1 + $0x328] ss:$16 sps:$4 sm:$0xff]  }
  0xd4   :  { %2788 = vmatpush1.bf16.msra.mxu1 %v4223_v14  ;;  %2826 = vmatprep.subr.bf16.mxu0 %v4234_v3  ;;  %v511_v14 = vrot.slane %v5447_v62, %v510_v10  ;;  %v4303_v3 = vld [vmem:[%s5996_s1 + $0x30c] ss:$16 sps:$4 sm:$0xff]  }
  0xd5   :  { %2789 = vmatprep.subr.bf16.mxu1 %v4231_v18  ;;  %v4298_v18 = vld [vmem:[%s5996_s1 + $0x4e8] ss:$16 sps:$4 sm:$0xff]  }
  0xd7   :  { %2827 = vmatpush1.bf16.msra.mxu0 %v4232_v20  ;;  %v515_v20 = vrot.slane %v5447_v62, %v514_v13 }
  0xd8   :  { %2790 = vmatpush1.bf16.msra.mxu1 %v4229_v19  ;;  %2828 = vmatprep.subr.bf16.mxu0 %v4240_v22  ;;  %v4306_v19 = vld [vmem:[%s5996_s1 + $0x4cc] ss:$16 sps:$4 sm:$0xff]  }
  0xd9   :  { %2791 = vmatprep.subr.bf16.mxu1 %v4237_v21 }
  0xdb   :  { %2829 = vmatpush1.bf16.msra.mxu0 %v4238_v24 }
  0xdc   :  { %2792 = vmatpush1.bf16.msra.mxu1 %v4235_v23  ;;  %2830 = vmatprep.subr.bf16.mxu0 %v4246_v26  ;;  %v4301_v23 = vld [vmem:[%s5996_s1 + $0x308] ss:$16 sps:$4 sm:$0xff]   ;;  %v4309_v26 = vld [vmem:[%s5996_s1 + $0x4ac] ss:$16 sps:$4 sm:$0xff]  }
  0xdd   :  { %2793 = vmatprep.subr.bf16.mxu1 %v4243_v25  ;;  %v4304_v25 = vld [vmem:[%s5996_s1 + $0x4c8] ss:$16 sps:$4 sm:$0xff]  }
  0xdf   :  { %2831 = vmatpush1.bf16.msra.mxu0 %v4244_v28 }
  0xe0   :  { %2794 = vmatpush1.bf16.msra.mxu1 %v4241_v27  ;;  %2832 = vmatprep.subr.bf16.mxu0 %v4252_v30 }
  0xe1   :  { %2795 = vmatprep.subr.bf16.mxu1 %v4249_v29 }
  0xe3   :  { %2833 = vmatpush1.bf16.msra.mxu0 %v4250_v34  ;;  %v4310_v34 = vld [vmem:[%s5996_s1 + $0x6e8] ss:$16 sps:$4 sm:$0xff]  }
  0xe4   :  { %2796 = vmatpush2.bf16.msra.mxu1 %v4247_v31  ;;  %2834 = vmatprep.subr.bf16.mxu0 %v4258_v36  ;;  %v4307_v31 = vld [vmem:[%s5996_s1 + $0x4a8] ss:$16 sps:$4 sm:$0xff]  }
  0xe5   :  { %2797 = vmatprep.subr.bf16.mxu1 %v4255_v35 }
  0xe7   :  { %2835 = vmatpush1.bf16.msra.mxu0 %v4256_v38 }
  0xe8   :  { %2798 = vmatpush2.bf16.msra.mxu1 %v4253_v37  ;;  %2836 = vmatprep.subr.bf16.mxu0 %v4264_v41  ;;  %v4315_v37 = vld [vmem:[%s5996_s1 + $0x48c] ss:$16 sps:$4 sm:$0xff]  }
  0xe9   :  { %2799 = vmatprep.subr.bf16.mxu1 %v4261_v40 }
  0xeb   :  { %2837 = vmatpush2.bf16.msra.mxu0 %v4262_v45  ;;  %v4316_v45 = vld [vmem:[%s5996_s1 + $0x6c8] ss:$16 sps:$4 sm:$0xff]  }
  0xec   :  { %2800 = vmatpush2.bf16.msra.mxu1 %v4259_v42  ;;  %2838 = vmatprep.subr.bf16.mxu0 %v4270_v47  ;;  %v4318_v42 = vld [vmem:[%s5996_s1 + $0x6cc] ss:$16 sps:$4 sm:$0xff]  }
  0xed   :  { %2801 = vmatprep.subr.bf16.mxu1 %v4267_v46  ;;  %v4321_v46 = vld [vmem:[%s5996_s1 + $0x46c] ss:$16 sps:$4 sm:$0xff]  }
  0xee   :  { %v4324_v47 = vld [vmem:[%s5996_s1 + $0x6ac] ss:$16 sps:$4 sm:$0xff]  }
  0xef   :  { %2839 = vmatpush2.bf16.msra.mxu0 %v4268_v50  ;;  %v4327_v50 = vld [vmem:[%s5996_s1 + $0x44c] ss:$16 sps:$4 sm:$0xff]  }
  0xf0   :  { %2802 = vmatpush2.bf16.msra.mxu1 %v4265_v49  ;;  %2840 = vmatprep.subr.bf16.mxu0 %v4276_v54  ;;  %v4319_v49 = vld [vmem:[%s5996_s1 + $0x468] ss:$16 sps:$4 sm:$0xff]  }
  0xf1   :  { %2803 = vmatprep.subr.bf16.mxu1 %v4273_v52  ;;  %v4330_v52 = vld [vmem:[%s5996_s1 + $0x68c] ss:$16 sps:$4 sm:$0xff]   ;;  %v4325_v54 = vld [vmem:[%s5996_s1 + $0x448] ss:$16 sps:$4 sm:$0xff]  }
  0xf3   :  { %2841 = vmatpush2.bf16.msra.mxu0 %v4274_v56  ;;  %v4336_v56 = vld [vmem:[%s5996_s1 + $0x66c] ss:$16 sps:$4 sm:$0xff]  }
  0xf4   :  { %2804 = vmatpush2.bf16.msra.mxu1 %v4271_v55  ;;  %2842 = vmatprep.subr.bf16.mxu0 %v4282_v61  ;;  %v4333_v55 = vld [vmem:[%s5996_s1 + $0x42c] ss:$16 sps:$4 sm:$0xff]   ;;  %v4334_v61 = vld [vmem:[%s5996_s1 + $0x668] ss:$16 sps:$4 sm:$0xff]  }
  0xf5   :  { %2805 = vmatprep.subr.bf16.mxu1 %v4279_v60  ;;  %v4331_v60 = vld [vmem:[%s5996_s1 + $0x428] ss:$16 sps:$4 sm:$0xff]  }
  0xf7   :  { %2843 = vmatpush2.bf16.msra.mxu0 %v4280_v44  ;;  %v4342_v44 = vld [vmem:[%s5996_s1 + $0x64c] ss:$16 sps:$4 sm:$0xff]  }
  0xf8   :  { %2806 = vmatpush2.bf16.msra.mxu1 %v4277_v39  ;;  %2844 = vmatprep.subr.bf16.mxu0 %v4288_v0  ;;  %v4339_v39 = vld [vmem:[%s5996_s1 + $0x40c] ss:$16 sps:$4 sm:$0xff]   ;;  %v4340_v0 = vld [vmem:[%s5996_s1 + $0x648] ss:$16 sps:$4 sm:$0xff]  }
  0xf9   :  { %2807 = vmatprep.subr.bf16.mxu1 %v4285_v63  ;;  %v4337_v63 = vld [vmem:[%s5996_s1 + $0x408] ss:$16 sps:$4 sm:$0xff]  }
  0xfb   :  { %2845 = vmatpush2.bf16.msra.mxu0 %v4286_v2  ;;  %v4348_v2 = vld [vmem:[%s5996_s1 + $0x62c] ss:$16 sps:$4 sm:$0xff]  }
  0xfc   :  { %2808 = vmatpush2.bf16.msra.mxu1 %v4283_v1  ;;  %2846 = vmatprep.subr.bf16.mxu0 %v4294_v7  ;;  %v4345_v1 = vld [vmem:[%s5996_s1 + $0x5ec] ss:$16 sps:$4 sm:$0xff]   ;;  %v4346_v7 = vld [vmem:[%s5996_s1 + $0x628] ss:$16 sps:$4 sm:$0xff]  }
  0xfd   :  { %2809 = vmatprep.subr.bf16.mxu1 %v4291_v4  ;;  %v4343_v4 = vld [vmem:[%s5996_s1 + $0x5e8] ss:$16 sps:$4 sm:$0xff]  }
  0xff   :  { %2847 = vmatpush2.bf16.msra.mxu0 %v4292_v9  ;;  %v4354_v9 = vld [vmem:[%s5996_s1 + $0x60c] ss:$16 sps:$4 sm:$0xff]  }
 0x100   :  { %2810 = vmatpush2.bf16.msra.mxu1 %v4289_v8  ;;  %2848 = vmatprep.subr.bf16.mxu0 %v4297_v11  ;;  %v4351_v8 = vld [vmem:[%s5996_s1 + $0x5cc] ss:$16 sps:$4 sm:$0xff]  }
 0x101   :  { %2861 = vmatprep.subr.bf16.mxu1 %v4300_v12 }
 0x102   :  { %v2526_v21 = vpop.f32.mrf.mxu0 }
 0x103   :  { %v2567_v22 = vpop.f32.mrf.mxu1  ;;  %2812 = vmatmul.mubr.bf16.vlgmr.msra.gmra.mxu1 %v4800_v16  ;;  %v2527_v24 = vadd.f32 %v2526_v21, %v511_v14  ;;  %2849 = vmatpush2.bf16.msra.mxu0 %v4295_v15  ;;  %v4312_v16 = vld [vmem:[%s5996_s1 + $0x6ec] ss:$16 sps:$4 sm:$0xff]  }
 0x104   :  { %2862 = vmatpush1.bf16.msra.mxu1 %v4298_v18  ;;  %v2528_v27 = vpop.f32.mrf.mxu0  ;;  %2850 = vmatprep.subr.bf16.mxu0 %v4303_v3 }
 0x105   :  { %v2569_v28 = vpop.f32.mrf.mxu1  ;;  %2863 = vmatprep.subr.bf16.mxu1 %v4306_v19  ;;  %v5484_v29 = vadd.f32 %v2567_v22, %v2527_v24  ;;  %v2529_v30 = vadd.f32 %v2528_v27, %v515_v20  ;;  %2893 = vmatprep.mubr.bf16.mxu1 %v4901_v53  ;;  %v4313_v53 = vld [vmem:[%s5996_s1 + $0x488] ss:$16 sps:$4 sm:$0xff]  }
 0x106   :  { %v2530_v35 = vpop.f32.mrf.mxu0 }
 0x107   :  { %v2571_v36 = vpop.f32.mrf.mxu1  ;;  %v5496_v38 = vadd.f32 %v2569_v28, %v2529_v30  ;;  %2851 = vmatpush2.bf16.msra.mxu0 %v4301_v23 }
 0x108   :  { %2864 = vmatpush1.bf16.msra.mxu1 %v4304_v25  ;;  %v2531_v40 = vpop.f32.mrf.mxu0  ;;  %2902 = vmatprep.subr.bf16.mxu0 %v4312_v16 }
 0x109   :  { %v2572_v41 = vpop.f32.mrf.mxu1  ;;  %2865 = vmatprep.subr.bf16.mxu1 %v4309_v26 }
 0x10a   :  { %2853 = vmatmul.mubr.bf16.vlgmr.msra.gmra.mxu0 %v4802_v17  ;;  %v4322_v17 = vld [vmem:[%s5996_s1 + $0x6a8] ss:$16 sps:$4 sm:$0xff]  }
 0x10b   :  { %2903 = vmatpush1.bf16.msra.mxu0 %v4310_v34  ;;  %2934 = vmatprep.mubr.bf16.mxu0 %v4911_v57  ;;  %v4328_v57 = vld [vmem:[%s5996_s1 + $0x688] ss:$16 sps:$4 sm:$0xff]  }
 0x10c   :  { %2866 = vmatpush1.bf16.msra.mxu1 %v4307_v31  ;;  %2904 = vmatprep.subr.bf16.mxu0 %v4318_v42 }
 0x10d   :  { %2867 = vmatprep.subr.bf16.mxu1 %v4315_v37 }
 0x10f   :  { %2905 = vmatpush1.bf16.msra.mxu0 %v4316_v45 }
 0x110   :  { %2868 = vmatpush1.bf16.msra.mxu1 %v4313_v53  ;;  %2906 = vmatprep.subr.bf16.mxu0 %v4324_v47 }
 0x111   :  { %2869 = vmatprep.subr.bf16.mxu1 %v4321_v46 }
 0x113   :  { %2907 = vmatpush1.bf16.msra.mxu0 %v4322_v17 }
 0x114   :  { %2870 = vmatpush1.bf16.msra.mxu1 %v4319_v49  ;;  %2908 = vmatprep.subr.bf16.mxu0 %v4330_v52 }
 0x115   :  { %2871 = vmatprep.subr.bf16.mxu1 %v4327_v50 }
 0x117   :  { %2909 = vmatpush1.bf16.msra.mxu0 %v4328_v57 }
 0x118   :  { %2872 = vmatpush1.bf16.msra.mxu1 %v4325_v54  ;;  %2910 = vmatprep.subr.bf16.mxu0 %v4336_v56 }
 0x119   :  { %2873 = vmatprep.subr.bf16.mxu1 %v4333_v55 }
 0x11b   :  { %2911 = vmatpush1.bf16.msra.mxu0 %v4334_v61 }
 0x11c   :  { %2874 = vmatpush1.bf16.msra.mxu1 %v4331_v60  ;;  %2912 = vmatprep.subr.bf16.mxu0 %v4342_v44 }
 0x11d   :  { %2875 = vmatprep.subr.bf16.mxu1 %v4339_v39 }
 0x11f   :  { %2913 = vmatpush1.bf16.msra.mxu0 %v4340_v0 }
 0x120   :  { %2876 = vmatpush1.bf16.msra.mxu1 %v4337_v63  ;;  %2914 = vmatprep.subr.bf16.mxu0 %v4348_v2 }
 0x121   :  { %2877 = vmatprep.subr.bf16.mxu1 %v4345_v1 }
 0x122   :  { %10 = vsyncpa [#allocation3], 0  ;;  %v4349_v10 = vld [vmem:[%s5996_s1 + $0x5c8] ss:$16 sps:$4 sm:$0xff]   ;;  %v4357_v12 = vld [vmem:[%s5996_s1 + $0x5ac] ss:$16 sps:$4 sm:$0xff]  }
 0x123   :  { %2915 = vmatpush1.bf16.msra.mxu0 %v4346_v7  ;;  %v4352_v11 = vld [vmem:[%s5996_s1 + $0x608] ss:$16 sps:$4 sm:$0xff]   ;;  %v4360_v13 = vld [vmem:[%s5996_s1 + $0x7ec] ss:$16 sps:$4 sm:$0xff]   ;;  %s4555_s19 = smov [#allocation2]   ;;  %vm3417_vm1 = vcmask 74752  }
 0x124   :  { %2878 = vmatpush2.bf16.msra.mxu1 %v4343_v4  ;;  %2916 = vmatprep.subr.bf16.mxu0 %v4354_v9  ;;  %v4355_v14 = vld [vmem:[%s5996_s1 + $0x5a8] ss:$16 sps:$4 sm:$0xff]   ;;  %v4363_v18 = vld [vmem:[%s5996_s1 + $0x58c] ss:$16 sps:$4 sm:$0xff]   ;;  %s3425_s20 = sshll.u32 %s4555_s19, 4  ;;  %s3426_s20 = int_to_ptr.vmem [resolvable:$true] %s3425_s20 }
 0x125   :  { %2879 = vmatprep.subr.bf16.mxu1 %v4351_v8  ;;  %v4358_v15 = vld [vmem:[%s5996_s1 + $0x7e8] ss:$16 sps:$4 sm:$0xff]   ;;  %v4366_v3 = vld [vmem:[%s5996_s1 + $0x7cc] ss:$16 sps:$4 sm:$0xff]   ;;  %s4531_s21 = scalar_lea.vmem %s3426_s20, 32  ;;  %p4536_p1 = scmp.lt.s32.totalorder %s3426_s20, %s3426_s20 }
 0x126   :  { %v4361_v19 = vld [vmem:[%s5996_s1 + $0x588] ss:$16 sps:$4 sm:$0xff]   ;;  %v4369_v21 = vld [vmem:[%s5996_s1 + $0x56c] ss:$16 sps:$4 sm:$0xff]   ;;  %p4532_p0 = scmp.ne.s32.totalorder %s3426_s20, %s4531_s21  ;;  %p4537_p2 = scmp.lt.s32.totalorder %s4531_s21, %s4531_s21 }
 0x127   :  { %2917 = vmatpush1.bf16.msra.mxu0 %v4352_v11  ;;  %v4364_v20 = vld [vmem:[%s5996_s1 + $0x7c8] ss:$16 sps:$4 sm:$0xff]   ;;  %v4372_v22 = vld [vmem:[%s5996_s1 + $0x7ac] ss:$16 sps:$4 sm:$0xff]  }
 0x128   :  { %2880 = vmatpush2.bf16.msra.mxu1 %v4349_v10  ;;  %2918 = vmatprep.subr.bf16.mxu0 %v4360_v13  ;;  %v4367_v23 = vld [vmem:[%s5996_s1 + $0x568] ss:$16 sps:$4 sm:$0xff]   ;;  %v4375_v25 = vld [vmem:[%s5996_s1 + $0x54c] ss:$16 sps:$4 sm:$0xff]   ;;  %p4538_p3 = por %p4537_p2, %p4536_p1 }
 0x129   :  { %2881 = vmatprep.subr.bf16.mxu1 %v4357_v12  ;;  %v4370_v24 = vld [vmem:[%s5996_s1 + $0x7a8] ss:$16 sps:$4 sm:$0xff]   ;;  %v4378_v26 = vld [vmem:[%s5996_s1 + $0x78c] ss:$16 sps:$4 sm:$0xff]  }
 0x12a   :  { %v4373_v27 = vld [vmem:[%s5996_s1 + $0x548] ss:$16 sps:$4 sm:$0xff]   ;;  %v4381_v16 = vld [vmem:[%s5996_s1 + $0x52c] ss:$16 sps:$4 sm:$0xff]   ;;  %p4539_p4 = pnand %p4538_p3, %p4532_p0 }
 0x12b   :  { %2919 = vmatpush2.bf16.msra.mxu0 %v4358_v15  ;;  %v4376_v28 = vld [vmem:[%s5996_s1 + $0x788] ss:$16 sps:$4 sm:$0xff]   ;;  %v4384_v30 = vld [vmem:[%s5996_s1 + $0x76c] ss:$16 sps:$4 sm:$0xff]  }
 0x12c   :  { %2882 = vmatpush2.bf16.msra.mxu1 %v4355_v14  ;;  %2920 = vmatprep.subr.bf16.mxu0 %v4366_v3  ;;  %v4379_v31 = vld [vmem:[%s5996_s1 + $0x528] ss:$16 sps:$4 sm:$0xff]   ;;  %v4387_v35 = vld [vmem:[%s5996_s1 + $0x50c] ss:$16 sps:$4 sm:$0xff]  }
 0x12d   :  { %2883 = vmatprep.subr.bf16.mxu1 %v4363_v18  ;;  %v4382_v34 = vld [vmem:[%s5996_s1 + $0x768] ss:$16 sps:$4 sm:$0xff]   ;;  %v4390_v36 = vld [vmem:[%s5996_s1 + $0x74c] ss:$16 sps:$4 sm:$0xff]  }
 0x12e   :  { %v4385_v37 = vld [vmem:[%s5996_s1 + $0x508] ss:$16 sps:$4 sm:$0xff]   ;;  %v4393_v41 = vld [vmem:[%s5996_s1 + $0x72c] ss:$16 sps:$4 sm:$0xff]  }
 0x12f   :  { %2921 = vmatpush2.bf16.msra.mxu0 %v4364_v20  ;;  %v4388_v40 = vld [vmem:[%s5996_s1 + $0x748] ss:$16 sps:$4 sm:$0xff]   ;;  %v4396_v42 = vld [vmem:[%s5996_s1 + $0x8ec] ss:$16 sps:$4 sm:$0xff]  }
 0x130   :  { %2884 = vmatpush2.bf16.msra.mxu1 %v4361_v19  ;;  %2922 = vmatprep.subr.bf16.mxu0 %v4372_v22  ;;  %v4391_v53 = vld [vmem:[%s5996_s1 + $0x728] ss:$16 sps:$4 sm:$0xff]   ;;  %v4399_v46 = vld [vmem:[%s5996_s1 + $0x70c] ss:$16 sps:$4 sm:$0xff]  }
 0x131   :  { %2885 = vmatprep.subr.bf16.mxu1 %v4369_v21  ;;  %v4394_v45 = vld [vmem:[%s5996_s1 + $0x8e8] ss:$16 sps:$4 sm:$0xff]   ;;  %v4402_v47 = vld [vmem:[%s5996_s1 + $0x8cc] ss:$16 sps:$4 sm:$0xff]  }
 0x132   :  { %v4397_v52 = vld [vmem:[%s5996_s1 + $0x708] ss:$16 sps:$4 sm:$0xff]   ;;  %v4417_v8 = vld [vmem:[%s5996_s1 + $0x86c] ss:$16 sps:$4 sm:$0xff]  }
 0x133   :  { %2923 = vmatpush2.bf16.msra.mxu0 %v4370_v24  ;;  %v4400_v54 = vld [vmem:[%s5996_s1 + $0x8c8] ss:$16 sps:$4 sm:$0xff]   ;;  %v4423_v11 = vld [vmem:[%s5996_s1 + $0x84c] ss:$16 sps:$4 sm:$0xff]  }
 0x134   :  { %2886 = vmatpush2.bf16.msra.mxu1 %v4367_v23  ;;  %2924 = vmatprep.subr.bf16.mxu0 %v4378_v26  ;;  %v4403_v63 = vld [vmem:[%s5996_s1 + $0x8a8] ss:$16 sps:$4 sm:$0xff]   ;;  %v4429_v14 = vld [vmem:[%s5996_s1 + $0x82c] ss:$16 sps:$4 sm:$0xff]  }
 0x135   :  { %2887 = vmatprep.subr.bf16.mxu1 %v4375_v25  ;;  %v4406_v0 = vld [vmem:[%s5996_s1 + $0xae8] ss:$16 sps:$4 sm:$0xff]   ;;  %v4432_v15 = vld [vmem:[%s5996_s1 + $0xa6c] ss:$16 sps:$4 sm:$0xff]  }
 0x136   :  { %v4409_v4 = vld [vmem:[%s5996_s1 + $0x888] ss:$16 sps:$4 sm:$0xff]   ;;  %v4435_v19 = vld [vmem:[%s5996_s1 + $0x80c] ss:$16 sps:$4 sm:$0xff]  }
 0x137   :  { %2925 = vmatpush2.bf16.msra.mxu0 %v4376_v28  ;;  %v4412_v7 = vld [vmem:[%s5996_s1 + $0xac8] ss:$16 sps:$4 sm:$0xff]   ;;  %v4438_v20 = vld [vmem:[%s5996_s1 + $0xa4c] ss:$16 sps:$4 sm:$0xff]  }
 0x138   :  { %2888 = vmatpush2.bf16.msra.mxu1 %v4373_v27  ;;  %2926 = vmatprep.subr.bf16.mxu0 %v4384_v30  ;;  %v4415_v9 = vld [vmem:[%s5996_s1 + $0x868] ss:$16 sps:$4 sm:$0xff]   ;;  %v4441_v23 = vld [vmem:[%s5996_s1 + $0x9ec] ss:$16 sps:$4 sm:$0xff]  }
 0x139   :  { %2889 = vmatprep.subr.bf16.mxu1 %v4381_v16  ;;  %v4418_v10 = vld [vmem:[%s5996_s1 + $0xaa8] ss:$16 sps:$4 sm:$0xff]   ;;  %v4444_v24 = vld [vmem:[%s5996_s1 + $0xa2c] ss:$16 sps:$4 sm:$0xff]  }
 0x13a   :  { %v4421_v12 = vld [vmem:[%s5996_s1 + $0x848] ss:$16 sps:$4 sm:$0xff]   ;;  %v4447_v27 = vld [vmem:[%s5996_s1 + $0x9cc] ss:$16 sps:$4 sm:$0xff]  }
 0x13b   :  { %2927 = vmatpush2.bf16.msra.mxu0 %v4382_v34  ;;  %v4424_v13 = vld [vmem:[%s5996_s1 + $0xa88] ss:$16 sps:$4 sm:$0xff]   ;;  %v4450_v28 = vld [vmem:[%s5996_s1 + $0xa0c] ss:$16 sps:$4 sm:$0xff]  }
 0x13c   :  { %2890 = vmatpush2.bf16.msra.mxu1 %v4379_v31  ;;  %2928 = vmatprep.subr.bf16.mxu0 %v4390_v36  ;;  %v4427_v18 = vld [vmem:[%s5996_s1 + $0x828] ss:$16 sps:$4 sm:$0xff]   ;;  %v4453_v31 = vld [vmem:[%s5996_s1 + $0x9ac] ss:$16 sps:$4 sm:$0xff]  }
 0x13d   :  { %2891 = vmatprep.subr.bf16.mxu1 %v4387_v35  ;;  %v4430_v3 = vld [vmem:[%s5996_s1 + $0xa68] ss:$16 sps:$4 sm:$0xff]   ;;  %v4456_v34 = vld [vmem:[%s5996_s1 + $0xbec] ss:$16 sps:$4 sm:$0xff]  }
 0x13e   :  { %v4433_v21 = vld [vmem:[%s5996_s1 + $0x808] ss:$16 sps:$4 sm:$0xff]  }
 0x13f   :  { %2929 = vmatpush2.bf16.msra.mxu0 %v4388_v40  ;;  %v4436_v22 = vld [vmem:[%s5996_s1 + $0xa48] ss:$16 sps:$4 sm:$0xff]   ;;  %v4462_v40 = vld [vmem:[%s5996_s1 + $0xbcc] ss:$16 sps:$4 sm:$0xff]  }
 0x140   :  { %2892 = vmatpush2.bf16.msra.mxu1 %v4385_v37  ;;  %2930 = vmatprep.subr.bf16.mxu0 %v4393_v41  ;;  %v4439_v25 = vld [vmem:[%s5996_s1 + $0x9e8] ss:$16 sps:$4 sm:$0xff]   ;;  %v4459_v37 = vld [vmem:[%s5996_s1 + $0x98c] ss:$16 sps:$4 sm:$0xff]  }
 0x141   :  { %2943 = vmatprep.subr.bf16.mxu1 %v4396_v42  ;;  %v4442_v26 = vld [vmem:[%s5996_s1 + $0xa28] ss:$16 sps:$4 sm:$0xff]  }
 0x142   :  { %v2608_v49 = vpop.f32.mrf.mxu0  ;;  %v4445_v16 = vld [vmem:[%s5996_s1 + $0x9c8] ss:$16 sps:$4 sm:$0xff]  }
 0x143   :  { %v2649_v17 = vpop.f32.mrf.mxu1  ;;  %2894 = vmatmul.mubr.bf16.vlgmr.msra.gmra.mxu1 %v5019_v32  ;;  %v2609_v50 = vadd.f32 %v2608_v49, %v5484_v29  ;;  %2931 = vmatpush2.bf16.msra.mxu0 %v4391_v53  ;;  %v4405_v32 = vld [vmem:[%s5996_s1 + $0x8ac] ss:$16 sps:$4 sm:$0xff]   ;;  %v4448_v30 = vld [vmem:[%s5996_s1 + $0xa08] ss:$16 sps:$4 sm:$0xff]  }
 0x144   :  { %2944 = vmatpush1.bf16.msra.mxu1 %v4394_v45  ;;  %v2610_v57 = vpop.f32.mrf.mxu0  ;;  %2932 = vmatprep.subr.bf16.mxu0 %v4399_v46  ;;  %v4408_v29 = vld [vmem:[%s5996_s1 + $0xaec] ss:$16 sps:$4 sm:$0xff]   ;;  %v4451_v35 = vld [vmem:[%s5996_s1 + $0x9a8] ss:$16 sps:$4 sm:$0xff]  }
 0x145   :  { %v2651_v55 = vpop.f32.mrf.mxu1  ;;  %2945 = vmatprep.subr.bf16.mxu1 %v4402_v47  ;;  %v5685_v56 = vadd.f32 %v2649_v17, %v2609_v50  ;;  %v2611_v60 = vadd.f32 %v2610_v57, %v5496_v38  ;;  %2975 = vmatprep.mubr.bf16.mxu1 %v5062_v48  ;;  %v4411_v48 = vld [vmem:[%s5996_s1 + $0x88c] ss:$16 sps:$4 sm:$0xff]   ;;  %v4454_v36 = vld [vmem:[%s5996_s1 + $0xbe8] ss:$16 sps:$4 sm:$0xff]  }
 0x146   :  { %v2612_v61 = vpop.f32.mrf.mxu0  ;;  %v4414_v38 = vld [vmem:[%s5996_s1 + $0xacc] ss:$16 sps:$4 sm:$0xff]   ;;  %v4457_v41 = vld [vmem:[%s5996_s1 + $0x988] ss:$16 sps:$4 sm:$0xff]  }
 0x147   :  { %v2653_v39 = vpop.f32.mrf.mxu1  ;;  %v5689_v44 = vadd.f32 %v2651_v55, %v2611_v60  ;;  %2933 = vmatpush2.bf16.msra.mxu0 %v4397_v52  ;;  %v4460_v42 = vld [vmem:[%s5996_s1 + $0xbc8] ss:$16 sps:$4 sm:$0xff]   ;;  %v4465_v53 = vld [vmem:[%s5996_s1 + $0x96c] ss:$16 sps:$4 sm:$0xff]  }
 0x148   :  { %2946 = vmatpush1.bf16.msra.mxu1 %v4400_v54  ;;  %v2613_v1 = vpop.f32.mrf.mxu0  ;;  %2984 = vmatprep.subr.bf16.mxu0 %v4408_v29  ;;  %v4468_v45 = vld [vmem:[%s5996_s1 + $0xbac] ss:$16 sps:$4 sm:$0xff]   ;;  %v4463_v46 = vld [vmem:[%s5996_s1 + $0x968] ss:$16 sps:$4 sm:$0xff]  }
 0x149   :  { %v2654_v2 = vpop.f32.mrf.mxu1  ;;  %2947 = vmatprep.subr.bf16.mxu1 %v4405_v32  ;;  %v4466_v47 = vld [vmem:[%s5996_s1 + $0xba8] ss:$16 sps:$4 sm:$0xff]   ;;  %v4471_v49 = vld [vmem:[%s5996_s1 + $0x94c] ss:$16 sps:$4 sm:$0xff]  }
 0x14a   :  { %2935 = vmatmul.mubr.bf16.vlgmr.msra.gmra.mxu0 %v5023_v33  ;;  %v4420_v33 = vld [vmem:[%s5996_s1 + $0xaac] ss:$16 sps:$4 sm:$0xff]   ;;  %v4469_v50 = vld [vmem:[%s5996_s1 + $0x948] ss:$16 sps:$4 sm:$0xff]  }
 0x14b   :  { %2985 = vmatpush1.bf16.msra.mxu0 %v4406_v0  ;;  %3016 = vmatprep.mubr.bf16.mxu0 %v5070_v51  ;;  %v4426_v51 = vld [vmem:[%s5996_s1 + $0xa8c] ss:$16 sps:$4 sm:$0xff]   ;;  %v4472_v52 = vld [vmem:[%s5996_s1 + $0xb88] ss:$16 sps:$4 sm:$0xff]  }
 0x14c   :  { %2948 = vmatpush1.bf16.msra.mxu1 %v4403_v63  ;;  %2986 = vmatprep.subr.bf16.mxu0 %v4414_v38  ;;  %v4474_v17 = vld [vmem:[%s5996_s1 + $0xb8c] ss:$16 sps:$4 sm:$0xff]   ;;  %v4475_v55 = vld [vmem:[%s5996_s1 + $0x928] ss:$16 sps:$4 sm:$0xff]  }
 0x14d   :  { %2949 = vmatprep.subr.bf16.mxu1 %v4411_v48  ;;  %v4477_v54 = vld [vmem:[%s5996_s1 + $0x92c] ss:$16 sps:$4 sm:$0xff]   ;;  %v4478_v32 = vld [vmem:[%s5996_s1 + $0xb68] ss:$16 sps:$4 sm:$0xff]  }
 0x14e   :  { %v4480_v57 = vld [vmem:[%s5996_s1 + $0xb6c] ss:$16 sps:$4 sm:$0xff]   ;;  %v4481_v61 = vld [vmem:[%s5996_s1 + $0x908] ss:$16 sps:$4 sm:$0xff]  }
 0x14f   :  { %2987 = vmatpush1.bf16.msra.mxu0 %v4412_v7  ;;  %v4483_v29 = vld [vmem:[%s5996_s1 + $0x90c] ss:$16 sps:$4 sm:$0xff]   ;;  %v4484_v39 = vld [vmem:[%s5996_s1 + $0xb48] ss:$16 sps:$4 sm:$0xff]  }
 0x150   :  { %2950 = vmatpush1.bf16.msra.mxu1 %v4409_v4  ;;  %2988 = vmatprep.subr.bf16.mxu0 %v4420_v33  ;;  %v4486_v60 = vld [vmem:[%s5996_s1 + $0xb4c] ss:$16 sps:$4 sm:$0xff]   ;;  %v4487_v1 = vld [vmem:[%s5996_s1 + $0xb28] ss:$16 sps:$4 sm:$0xff]  }
 0x151   :  { %2951 = vmatprep.subr.bf16.mxu1 %v4417_v8  ;;  %v4489_v63 = vld [vmem:[%s5996_s1 + $0xb2c] ss:$16 sps:$4 sm:$0xff]   ;;  %v4490_v2 = vld [vmem:[%s5996_s1 + $0xc28] ss:$16 sps:$4 sm:$0xff]  }
 0x152   :  { %v4492_v0 = vld [vmem:[%s5996_s1 + $0xc2c] ss:$16 sps:$4 sm:$0xff]   ;;  %v4493_v8 = vld [vmem:[%s5996_s1 + $0xb08] ss:$16 sps:$4 sm:$0xff]  }
 0x153   :  { %2989 = vmatpush1.bf16.msra.mxu0 %v4418_v10  ;;  %v4495_v48 = vld [vmem:[%s5996_s1 + $0xb0c] ss:$16 sps:$4 sm:$0xff]   ;;  %v4496_v33 = vld [vmem:[%s5996_s1 + $0xc08] ss:$16 sps:$4 sm:$0xff]  }
 0x154   :  { %2952 = vmatpush1.bf16.msra.mxu1 %v4415_v9  ;;  %2990 = vmatprep.subr.bf16.mxu0 %v4426_v51  ;;  %v4498_v38 = vld [vmem:[%s5996_s1 + $0xc0c] ss:$16 sps:$4 sm:$0xff]  }
 0x155   :  { %2953 = vmatprep.subr.bf16.mxu1 %v4423_v11  ;;  %v4499_v11 = vld [vmem:[%s5998_s3 + $0x78] sm:$0xff]  }
 0x157   :  { %2991 = vmatpush1.bf16.msra.mxu0 %v4424_v13  ;;  %v4500_v13 = vld [vmem:[%s5998_s3 + $0x38] sm:$0xff]  }
 0x158   :  { %2954 = vmatpush1.bf16.msra.mxu1 %v4421_v12  ;;  %2992 = vmatprep.subr.bf16.mxu0 %v4432_v15 }
 0x159   :  { %2955 = vmatprep.subr.bf16.mxu1 %v4429_v14 }
 0x15b   :  { %2993 = vmatpush1.bf16.msra.mxu0 %v4430_v3 }
 0x15c   :  { %2956 = vmatpush1.bf16.msra.mxu1 %v4427_v18  ;;  %2994 = vmatprep.subr.bf16.mxu0 %v4438_v20  ;;  %v4501_v18 = vld [vmem:[%s5998_s3 + $0x70] sm:$0xff]   ;;  %v4503_v20 = vld [vmem:[%s5998_s3 + $0x68] sm:$0xff]  }
 0x15d   :  { %2957 = vmatprep.subr.bf16.mxu1 %v4435_v19 }
 0x15f   :  { %2995 = vmatpush1.bf16.msra.mxu0 %v4436_v22 }
 0x160   :  { %2958 = vmatpush1.bf16.msra.mxu1 %v4433_v21  ;;  %2996 = vmatprep.subr.bf16.mxu0 %v4444_v24  ;;  %v4505_v24 = vld [vmem:[%s5998_s3 + $0x60] sm:$0xff]  }
 0x161   :  { %2959 = vmatprep.subr.bf16.mxu1 %v4441_v23 }
 0x163   :  { %2997 = vmatpush1.bf16.msra.mxu0 %v4442_v26  ;;  %v4516_v26 = vld [vmem:[%s5998_s3 + $0xb8] sm:$0xff]  }
 0x164   :  { %2960 = vmatpush2.bf16.msra.mxu1 %v4439_v25  ;;  %2998 = vmatprep.subr.bf16.mxu0 %v4450_v28  ;;  %v4515_v25 = vld [vmem:[%s5998_s3 + $0xf8] sm:$0xff]   ;;  %v4517_v28 = vld [vmem:[%s5998_s3 + $0xf0] sm:$0xff]  }
 0x165   :  { %2961 = vmatprep.subr.bf16.mxu1 %v4447_v27 }
 0x167   :  { %2999 = vmatpush1.bf16.msra.mxu0 %v4448_v30  ;;  %v4507_v30 = vld [vmem:[%s5998_s3 + $0x58] sm:$0xff]  }
 0x168   :  { %2962 = vmatpush2.bf16.msra.mxu1 %v4445_v16  ;;  %3000 = vmatprep.subr.bf16.mxu0 %v4456_v34  ;;  %v4506_v16 = vld [vmem:[%s5998_s3 + $0x20] sm:$0xff]   ;;  %v4519_v34 = vld [vmem:[%s5998_s3 + $0xe8] sm:$0xff]  }
 0x169   :  { %2963 = vmatprep.subr.bf16.mxu1 %v4453_v31  ;;  %v4518_v31 = vld [vmem:[%s5998_s3 + $0xb0] sm:$0xff]  }
 0x16b   :  { %3001 = vmatpush2.bf16.msra.mxu0 %v4454_v36  ;;  %v4509_v36 = vld [vmem:[%s5998_s3 + $0x50] sm:$0xff]  }
 0x16c   :  { %2964 = vmatpush2.bf16.msra.mxu1 %v4451_v35  ;;  %3002 = vmatprep.subr.bf16.mxu0 %v4462_v40  ;;  %v4508_v35 = vld [vmem:[%s5998_s3 + $0x18] sm:$0xff]  }
 0x16d   :  { %2965 = vmatprep.subr.bf16.mxu1 %v4459_v37  ;;  %v4520_v37 = vld [vmem:[%s5998_s3 + $0xa8] sm:$0xff]  }
 0x16f   :  { %3003 = vmatpush2.bf16.msra.mxu0 %v4460_v42  ;;  %v4511_v42 = vld [vmem:[%s5998_s3 + $0x48] sm:$0xff]  }
 0x170   :  { %2966 = vmatpush2.bf16.msra.mxu1 %v4457_v41  ;;  %3004 = vmatprep.subr.bf16.mxu0 %v4468_v45  ;;  %v4510_v41 = vld [vmem:[%s5998_s3 + $0x10] sm:$0xff]   ;;  %v4512_v45 = vld [vmem:[%s5998_s3 + $0x8] sm:$0xff]  }
 0x171   :  { %2967 = vmatprep.subr.bf16.mxu1 %v4465_v53 }
 0x173   :  { %3005 = vmatpush2.bf16.msra.mxu0 %v4466_v47  ;;  %v4514_v47 = vld [vmem:[%s5998_s3] sm:$0xff]  }
 0x174   :  { %2968 = vmatpush2.bf16.msra.mxu1 %v4463_v46  ;;  %3006 = vmatprep.subr.bf16.mxu0 %v4474_v17 }
 0x175   :  { %2969 = vmatprep.subr.bf16.mxu1 %v4471_v49 }
 0x177   :  { %3007 = vmatpush2.bf16.msra.mxu0 %v4472_v52  ;;  %v518_v52 = vsub.s32 2, %v4703_v43 }
 0x178   :  { %2970 = vmatpush2.bf16.msra.mxu1 %v4469_v50  ;;  %3008 = vmatprep.subr.bf16.mxu0 %v4480_v57  ;;  %v4521_v50 = vld [vmem:[%s5998_s3 + $0xe0] sm:$0xff]  }
 0x179   :  { %2971 = vmatprep.subr.bf16.mxu1 %v4477_v54  ;;  %v4522_v54 = vld [vmem:[%s5998_s3 + $0xa0] sm:$0xff]  }
 0x17b   :  { %3009 = vmatpush2.bf16.msra.mxu0 %v4478_v32 }
 0x17c   :  { %2972 = vmatpush2.bf16.msra.mxu1 %v4475_v55  ;;  %3010 = vmatprep.subr.bf16.mxu0 %v4486_v60  ;;  %v522_v55 = vsub.s32 3, %v4703_v43  ;;  %v519_v60 = vrot.slane %v5447_v62, %v518_v52  ;;  %v4525_v43 = vld [vmem:[%s5998_s3 + $0xd0] sm:$0xff]   ;;  %v3828_v52 = vld [vmem:[%s5999_s4] ss:$0 sm:$0xff] }
 0x17d   :  { %2973 = vmatprep.subr.bf16.mxu1 %v4483_v29  ;;  %v4523_v29 = vld [vmem:[%s5998_s3 + $0xd8] sm:$0xff]  }
 0x17f   :  { %3011 = vmatpush2.bf16.msra.mxu0 %v4484_v39 }
 0x180   :  { %2974 = vmatpush2.bf16.msra.mxu1 %v4481_v61  ;;  %3012 = vmatprep.subr.bf16.mxu0 %v4489_v63  ;;  %v4524_v61 = vld [vmem:[%s5998_s3 + $0x98] sm:$0xff]   ;;  %v523_v63 = vrot.slane %v5447_v62, %v522_v55  ;;  %v4527_v62 = vld [vmem:[%s5998_s3 + $0xc8] sm:$0xff]  }
 0x181   :  { %3037 = vmatprep.subr.bf16.mxu1 %v4492_v0 }
 0x182   :  { %v2690_v4 = vpop.f32.mrf.mxu0 }
 0x183   :  { %v5873_v7 = vpop.f32.mrf.mxu1  ;;  %2976 = vmatmul.mubr.bf16.vlgmr.msra.gmra.mxu1 %v5240_v58  ;;  %3013 = vmatpush2.bf16.msra.mxu0 %v4487_v1  ;;  %v2691_v40 = vadd.f32 %v2690_v4, %v5685_v56  ;;  %v4513_v56 = vld [vmem:[%s5998_s3 + $0x40] sm:$0xff]  }
 0x184   :  { %3038 = vmatpush1.bf16.msra.mxu1 %v4490_v2  ;;  %v2692_v9 = vpop.f32.mrf.mxu0  ;;  %3014 = vmatprep.subr.bf16.mxu0 %v4495_v48  ;;  %v4526_v2 = vld [vmem:[%s5998_s3 + $0x90] sm:$0xff]  }
 0x185   :  { %v2733_v10 = vpop.f32.mrf.mxu1  ;;  %3039 = vmatprep.subr.bf16.mxu1 %v4498_v38  ;;  %3057 = vmatprep.mubr.bf16.mxu1 %v4554_v5  ;;  %v2693_v12 = vadd.f32 %v2692_v9, %v5689_v44  ;;  %v4502_v44 = vld [vmem:[%s5998_s3 + $0x30] sm:$0xff]   ;;  %v2732_v53 = vadd.f32 %v5873_v7, %v2691_v40 }
 0x186   :  { %v2694_v58 = vpop.f32.mrf.mxu0 }
 0x187   :  { %v2735_v51 = vpop.f32.mrf.mxu1  ;;  %3015 = vmatpush2.bf16.msra.mxu0 %v4493_v8  ;;  %v2734_v5 = vadd.f32 %v2733_v10, %v2693_v12  ;;  %v4530_v58 = vld [vmem:[%s5998_s3 + $0x80] sm:$0xff]  }
 0x188   :  { %3040 = vmatpush1.bf16.msra.mxu1 %v4496_v33  ;;  %v2695_v14 = vpop.f32.mrf.mxu0  ;;  %3861 = vmatprep.subr.bf16.mxu0 %v4499_v11  ;;  %v4528_v33 = vld [vmem:[%s5998_s3 + $0x88] sm:$0xff]   ;;  %v4529_v11 = vld [vmem:[%s5998_s3 + $0xc0] sm:$0xff]  }
 0x189   :  { %v2736_v15 = vpop.f32.mrf.mxu1  ;;  %3883 = vmatprep.subr.bf16.mxu1 %v4515_v25 }
 0x18a   :  { %v2772_v3 = vpop.f32.mrf.mxu0  ;;  %3017 = vmatmul.mubr.bf16.vlgmr.msra.gmra.mxu0 %v5244_v59  ;;  %v4504_v59 = vld [vmem:[%s5998_s3 + $0x28] sm:$0xff]  }
 0x18b   :  { %3827 = vmatmul.mubr.msk.bf16.vlgmr.msra.gmra.mxu1 %vm2488_vm0, %v5277_v6  ;;  %3862 = vmatpush3.bf16.msra.mxu0 %v4500_v13  ;;  %v2773_v46 = vadd.f32 %v2772_v3, %v2732_v53 }
 0x18c   :  { %v2774_v19 = vpop.f32.mrf.mxu0  ;;  %3863 = vmatprep.subr.bf16.mxu0 %v4501_v18  ;;  %3884 = vmatpush3.bf16.msra.mxu1 %v4516_v26 }
 0x18d   :  { %v2775_v21 = vadd.f32 %v2774_v19, %v2734_v5  ;;  %3885 = vmatprep.subr.bf16.mxu1 %v4517_v28  ;;  %v3066_v49 = vmax.f32 %v2773_v46, 0.0 }
 0x18e   :  { %v2776_v22 = vpop.f32.mrf.mxu0 }
 0x18f   :  { %v3067_v23 = vmax.f32 %v2775_v21, 0.0  ;;  %3864 = vmatpush3.bf16.msra.mxu0 %v4502_v44  ;;  %v3070_v17 = vpack.c.bf16 %v3066_v49, %v3066_v49 }
 0x190   :  { %v2777_v6 = vpop.f32.mrf.mxu0  ;;  %3865 = vmatprep.subr.bf16.mxu0 %v4503_v20  ;;  %3886 = vmatpush3.bf16.msra.mxu1 %v4518_v31 }
 0x191   :  { %v3071_v27 = vpack.c.bf16 %v3067_v23, %v3067_v23  ;;  %3887 = vmatprep.subr.bf16.mxu1 %v4519_v34 }
 0x193   :  { %3866 = vmatpush3.bf16.msra.mxu0 %v4504_v59  ;;  %3369 = vmatprep.mubr.bf16.mxu0 %v3071_v27 }
 0x194   :  { %3867 = vmatprep.subr.bf16.mxu0 %v4505_v24  ;;  %3888 = vmatpush3.bf16.msra.mxu1 %v4520_v37 }
 0x195   :  { %3889 = vmatprep.subr.bf16.mxu1 %v4521_v50 }
 0x197   :  { %3868 = vmatpush3.bf16.msra.mxu0 %v4506_v16 }
 0x198   :  { %3869 = vmatprep.subr.bf16.mxu0 %v4507_v30  ;;  %3890 = vmatpush3.bf16.msra.mxu1 %v4522_v54 }
 0x199   :  { %3891 = vmatprep.subr.bf16.mxu1 %v4523_v29 }
 0x19b   :  { %3870 = vmatpush3.bf16.msra.mxu0 %v4508_v35 }
 0x19c   :  { %3871 = vmatprep.subr.bf16.mxu0 %v4509_v36  ;;  %3892 = vmatpush3.bf16.msra.mxu1 %v4524_v61 }
 0x19d   :  { %3893 = vmatprep.subr.bf16.mxu1 %v4525_v43 }
 0x19f   :  { %3872 = vmatpush3.bf16.msra.mxu0 %v4510_v41 }
 0x1a0   :  { %3873 = vmatprep.subr.bf16.mxu0 %v4511_v42  ;;  %3894 = vmatpush3.bf16.msra.mxu1 %v4526_v2 }
 0x1a1   :  { %3895 = vmatprep.subr.bf16.mxu1 %v4527_v62 }
 0x1a3   :  { %3874 = vmatpush3.bf16.msra.mxu0 %v4512_v45 }
 0x1a4   :  { %3875 = vmatprep.subr.bf16.mxu0 %v4513_v56  ;;  %3896 = vmatpush3.bf16.msra.mxu1 %v4528_v33 }
 0x1a5   :  { %3897 = vmatprep.subr.bf16.mxu1 %v4529_v11 }
 0x1a7   :  { %3876 = vmatpush3.bf16.msra.mxu0 %v4514_v47 }
 0x1a8   :  { %3898 = vmatpush3.bf16.msra.mxu1 %v4530_v58 }
 0x1aa   :  { %3370 = vmatmul.mubr.bf16.vlgmr.msra.gmra.mxu0 %v3070_v17 }
 0x1c3   :  { %v2813_v57 = vpop.f32.mrf.mxu1 }
 0x1c4   :  { %v2814_v1 = vadd.f32 %v2813_v57, %v519_v60 }
 0x1c5   :  { %v2815_v32 = vpop.f32.mrf.mxu1 }
 0x1c6   :  { %v2816_v38 = vadd.f32 %v2815_v32, %v523_v63 }
 0x1c7   :  { %v2817_v39 = vpop.f32.mrf.mxu1 }
 0x1c9   :  { %v2818_v0 = vpop.f32.mrf.mxu1 }
 0x1ca   :  { %v2854_v48 = vpop.f32.mrf.mxu0 }
 0x1cb   :  { %v2855_v4 = vadd.f32 %v2854_v48, %v2814_v1 }
 0x1cc   :  { %v2856_v7 = vpop.f32.mrf.mxu0 }
 0x1cd   :  { %v2857_v8 = vadd.f32 %v2856_v7, %v2816_v38 }
 0x1ce   :  { %v2858_v9 = vpop.f32.mrf.mxu0 }
 0x1d0   :  { %v2859_v10 = vpop.f32.mrf.mxu0 }
 0x203   :  { %v2895_v51 = vpop.f32.mrf.mxu1 }
 0x204   :  { %v2896_v12 = vadd.f32 %v2895_v51, %v2855_v4 }
 0x205   :  { %v2897_v13 = vpop.f32.mrf.mxu1 }
 0x206   :  { %v2898_v14 = vadd.f32 %v2897_v13, %v2857_v8 }
 0x207   :  { %v2899_v15 = vpop.f32.mrf.mxu1 }
 0x209   :  { %v2900_v18 = vpop.f32.mrf.mxu1 }
 0x20a   :  { %v2936_v3 = vpop.f32.mrf.mxu0 }
 0x20b   :  { %v2937_v23 = vadd.f32 %v2936_v3, %v2896_v12 }
 0x20c   :  { %v2938_v5 = vpop.f32.mrf.mxu0 }
 0x20d   :  { %v2939_v6 = vadd.f32 %v2938_v5, %v2898_v14 }
 0x20e   :  { %v2940_v44 = vpop.f32.mrf.mxu0 }
 0x210   :  { %v2941_v19 = vpop.f32.mrf.mxu0 }
 0x243   :  { %v2977_v20 = vpop.f32.mrf.mxu1 }
 0x244   :  { %v2978_v24 = vadd.f32 %v2977_v20, %v2937_v23 }
 0x245   :  { %v2979_v21 = vpop.f32.mrf.mxu1 }
 0x246   :  { %v2980_v27 = vadd.f32 %v2979_v21, %v2939_v6 }
 0x247   :  { %v2981_v22 = vpop.f32.mrf.mxu1 }
 0x249   :  { %v2982_v59 = vpop.f32.mrf.mxu1 }
 0x24a   :  { %v3018_v25 = vpop.f32.mrf.mxu0 }
 0x24b   :  { %v3059_v26 = vpop.f32.mrf.mxu1  ;;  %v3019_v28 = vadd.f32 %v3018_v25, %v2978_v24 }
 0x24c   :  { %v3020_v16 = vpop.f32.mrf.mxu0 }
 0x24d   :  { %v3061_v30 = vpop.f32.mrf.mxu1  ;;  %v3060_v31 = vadd.f32 %v3059_v26, %v3019_v28  ;;  %v3021_v34 = vadd.f32 %v3020_v16, %v2980_v27 }
 0x24e   :  { %v3022_v35 = vpop.f32.mrf.mxu0 }
 0x24f   :  { %v3063_v36 = vpop.f32.mrf.mxu1  ;;  %v3062_v37 = vadd.f32 %v3061_v30, %v3021_v34  ;;  %v3068_v40 = vmax.f32 %v3060_v31, 0.0 }
 0x250   :  { %v3023_v41 = vpop.f32.mrf.mxu0 }
 0x251   :  { %v3064_v42 = vpop.f32.mrf.mxu1  ;;  %v3069_v53 = vmax.f32 %v3062_v37, 0.0  ;;  %v3072_v46 = vpack.c.bf16 %v3068_v40, %v3068_v40 }
 0x253   :  { %v3073_v45 = vpack.c.bf16 %v3069_v53, %v3069_v53 }
 0x255   :  { %3409 = vmatprep.mubr.bf16.mxu1 %v3073_v45 }
 0x256   :  { %3410 = vmatmul.mubr.bf16.vlgmr.msra.gmra.mxu1 %v3072_v46 }
 0x26a   :  { %v3877_v56 = vpop.f32.mrf.mxu0 }
 0x26c   :  { %v3878_v47 = vpop.f32.mrf.mxu0 }
 0x26d   :  { %v3879_v49 = vadd.f32 %v3878_v47, %v3877_v56 }
 0x26e   :  { %v3880_v17 = vpop.f32.mrf.mxu0 }
 0x26f   :  { %v3372_v55 = vadd.f32 %v3879_v49, %v3828_v52 }
 0x270   :  { %v3881_v50 = vpop.f32.mrf.mxu0 }
 0x316   :  { %v3899_v54 = vpop.f32.mrf.mxu1 }
 0x318   :  { %v3900_v57 = vpop.f32.mrf.mxu1 }
 0x319   :  { %v3901_v32 = vadd.f32 %v3900_v57, %v3899_v54 }
 0x31a   :  { %v3902_v29 = vpop.f32.mrf.mxu1 }
 0x31b   :  { %v3412_v60 = vadd.f32 %v3901_v32, %v3372_v55 }
 0x31c   :  { %v3903_v61 = vpop.f32.mrf.mxu1 }
 0x31d   :  { %3418 = vst.msk [vmem:[#allocation2] sm:$0x3] %vm3417_vm1, %v3412_v60 }
 0x31e   :  { %4542 = shalt.err (!%p4539_p4)
}
 0x31f   :  { %3428 = dma.vmem_to_hbm [thread:$0]  %s3426_s20, 32, %s6000_s5, [#allocation3]  }
 0x320   :  { %4551 = dma.done.wait [#allocation3], 32  }
 0x321   :  { %4552 = vsyncadd [#allocation3], 4294967264 }
 0x322   :  { %3432 = vsyncpa [#allocation3], 1 }

</bundles_post_ra>
